<compile_context>
chip_gen: v7x
topology: tpu7x:2x2x1
jax: 0.10.0
libtpu: 0.0.40
codegen_flags: <defaults>
</compile_context>

<pallas_src>
import jax
import jax.numpy as jnp
from jax.experimental import pallas as pl
from jax.experimental.pallas import tpu as pltpu

IMG_FEATS = 3 * 64 * 64  # 12288
LAYER_DIMS = [(768, 256), (256, 512), (512, 1024), (1024, IMG_FEATS)]


def _generator_kernel(x_ref, w1_ref, b1_ref, w2_ref, b2_ref, w3_ref, b3_ref,
                      w4_ref, b4_ref, o_ref):
    # Hidden chain 768->256->512->1024: a few MFLOPs at B=2, recomputed per
    # N-tile so every grid step is independent (megacore-safe, no scratch).
    x = x_ref[...].astype(jnp.bfloat16)                                   # (B, 768)
    h = jnp.dot(x, w1_ref[...], preferred_element_type=jnp.float32) + b1_ref[...]
    h = jnp.maximum(h, 0.0).astype(jnp.bfloat16)                          # (B, 256)
    h = jnp.dot(h, w2_ref[...], preferred_element_type=jnp.float32) + b2_ref[...]
    h = jnp.maximum(h, 0.0).astype(jnp.bfloat16)                          # (B, 512)
    h = jnp.dot(h, w3_ref[...], preferred_element_type=jnp.float32) + b3_ref[...]
    h = jnp.maximum(h, 0.0).astype(jnp.bfloat16)                          # (B, 1024)
    # Output layer: one N-tile of the 1024 x 12288 weight per grid step.
    y = jnp.dot(h, w4_ref[...], preferred_element_type=jnp.float32) + b4_ref[...]
    o_ref[...] = jnp.tanh(y).astype(o_ref.dtype)                          # (B, tn)


def generator_forward(text_features, params, *, tn=2048):
    """Fused Generator forward. text_features: (B, 768) f32 -> (B, 3, 64, 64) f32."""
    B, K = text_features.shape
    assert K == 768, K
    (w1, b1), (w2, b2), (w3, b3), (w4, b4) = params
    N = w4.shape[1]
    assert N == IMG_FEATS and N % tn == 0 and tn % 128 == 0
    # Even number of N-tiles so the "parallel" axis splits cleanly over 2 TCs (v7x).
    assert (N // tn) % 2 == 0

    # Weights in bf16 (halves the HBM streaming that dominates runtime);
    # biases and all accumulation stay f32.
    w1b, w2b, w3b, w4b = (w.astype(jnp.bfloat16) for w in (w1, w2, w3, w4))
    b1r, b2r, b3r, b4r = (b.reshape(1, -1).astype(jnp.float32)
                          for b in (b1, b2, b3, b4))

    weight_bytes = sum(w.size * w.dtype.itemsize for w in (w1b, w2b, w3b, w4b))
    bias_bytes = sum(b.size * b.dtype.itemsize for b in (b1r, b2r, b3r, b4r))
    io_bytes = text_features.size * 4 + B * N * 4
    total_flops = 2 * B * sum(fi * fo for fi, fo in LAYER_DIMS)

    const = lambda j: (0, 0)        # resident blocks (x, W1-3, b1-3)
    tiled = lambda j: (0, j)        # N-tiled blocks (W4, b4, out)

    out = pl.pallas_call(
        _generator_kernel,
        out_shape=jax.ShapeDtypeStruct((B, N), jnp.float32),
        grid_spec=pltpu.PrefetchScalarGridSpec(
            num_scalar_prefetch=0,
            grid=(N // tn,),
            in_specs=[
                pl.BlockSpec((B, 768), const),      # x          (resident)
                pl.BlockSpec((768, 256), const),    # W1         (resident)
                pl.BlockSpec((1, 256), const),      # b1
                pl.BlockSpec((256, 512), const),    # W2         (resident)
                pl.BlockSpec((1, 512), const),      # b2
                pl.BlockSpec((512, 1024), const),   # W3         (resident)
                pl.BlockSpec((1, 1024), const),     # b3
                pl.BlockSpec((1024, tn), tiled),    # W4 N-tile  (streamed)
                pl.BlockSpec((1, tn), tiled),       # b4 N-tile
            ],
            out_specs=pl.BlockSpec((B, tn), tiled),
        ),
        compiler_params=pltpu.CompilerParams(
            dimension_semantics=("parallel",),
            # Size to need (~12 MiB live), not physical VMEM: safe on v7x (64 MiB)
            # and raises v5e's 16 MiB scoped default.
            vmem_limit_bytes=32 << 20,
        ),
        cost_estimate=pl.CostEstimate(
            flops=total_flops,
            transcendentals=B * N,                      # tanh
            bytes_accessed=weight_bytes + bias_bytes + io_bytes,
        ),
    )(text_features, w1b, b1r, w2b, b2r, w3b, b3r, w4b, b4r)

    # NOTE: for B >> 8 add a batch grid axis (tile B to multiples of 8) so the
    # MXU sees full-height passes; at B=2 the kernel is purely weight-BW bound.
    return out.reshape(-1, 3, 64, 64)


def init_params(key):
    """Deterministic init matching PyTorch nn.Linear default (U(-1/sqrt(fan_in), +))."""
    params = []
    for i, (fan_in, fan_out) in enumerate(LAYER_DIMS):
        kw, kb = jax.random.split(jax.random.fold_in(key, i))
        bound = 1.0 / jnp.sqrt(jnp.float32(fan_in))
        w = jax.random.uniform(kw, (fan_in, fan_out), jnp.float32, -bound, bound)
        b = jax.random.uniform(kb, (fan_out,), jnp.float32, -bound, bound)
        params.append((w, b))
    return params


def generator_ref(text_features, params, weight_dtype=jnp.float32):
    """Pure-JAX reference. weight_dtype=bf16 reproduces the kernel's quantization."""
    x = text_features
    n = len(params)
    for i, (w, b) in enumerate(params):
        xa = x.astype(weight_dtype).astype(jnp.float32)
        wa = w.astype(weight_dtype).astype(jnp.float32)
        x = xa @ wa + b
        x = jnp.tanh(x) if i == n - 1 else jnp.maximum(x, 0.0)
    return x.reshape(-1, 3, 64, 64)


if __name__ == "__main__":
    key = jax.random.PRNGKey(0)
    k_in, k_par = jax.random.split(key)

    B = 2
    text_features = jax.random.normal(k_in, (B, 768), jnp.float32)
    params = init_params(k_par)

    out = jax.jit(generator_forward)(text_features, params)
    out = jax.block_until_ready(out)
    assert out.shape == (B, 3, 64, 64), out.shape

    # Exact-logic check against a reference using the same bf16 weight cast.
    ref_bf16 = generator_ref(text_features, params, weight_dtype=jnp.bfloat16)
    assert jnp.allclose(out, ref_bf16, atol=1e-2, rtol=1e-2), "mismatch vs bf16 reference"

    # Sanity check against the full-f32 reference (loose: bf16 weight quantization).
    ref_f32 = generator_ref(text_features, params)
    assert jnp.allclose(out, ref_f32, atol=1e-1, rtol=0.0), "mismatch vs f32 reference"

    print("KERNEL_OK")
</pallas_src>

<mosaic_0001>
module attributes {stable_mosaic.version = 11 : i64} {
  func.func @_generator_kernel(%arg0: i32, %arg1: memref<2x768xf32, #tpu.memory_space<vmem>>, %arg2: memref<768x256xbf16, #tpu.memory_space<vmem>>, %arg3: memref<1x256xf32, #tpu.memory_space<vmem>>, %arg4: memref<256x512xbf16, #tpu.memory_space<vmem>>, %arg5: memref<1x512xf32, #tpu.memory_space<vmem>>, %arg6: memref<512x1024xbf16, #tpu.memory_space<vmem>>, %arg7: memref<1x1024xf32, #tpu.memory_space<vmem>>, %arg8: memref<1024x2048xbf16, #tpu.memory_space<vmem>>, %arg9: memref<1x2048xf32, #tpu.memory_space<vmem>>, %arg10: memref<2x2048xf32, #tpu.memory_space<vmem>>) attributes {dimension_semantics = [#tpu.dimension_semantics<parallel>], iteration_bounds = array<i64: 6>, scalar_prefetch = 0 : i64, scratch_operands = 0 : i64, tpu.core_type = #tpu.core_type<tc>, window_params = [{pipeline_mode = #tpu.pipeline_mode<synchronous>, transform_indices = @transform_0, window_bounds = array<i64: 2, 768>}, {pipeline_mode = #tpu.pipeline_mode<synchronous>, transform_indices = @transform_1, window_bounds = array<i64: 768, 256>}, {pipeline_mode = #tpu.pipeline_mode<synchronous>, transform_indices = @transform_2, window_bounds = array<i64: 1, 256>}, {pipeline_mode = #tpu.pipeline_mode<synchronous>, transform_indices = @transform_3, window_bounds = array<i64: 256, 512>}, {pipeline_mode = #tpu.pipeline_mode<synchronous>, transform_indices = @transform_4, window_bounds = array<i64: 1, 512>}, {pipeline_mode = #tpu.pipeline_mode<synchronous>, transform_indices = @transform_5, window_bounds = array<i64: 512, 1024>}, {pipeline_mode = #tpu.pipeline_mode<synchronous>, transform_indices = @transform_6, window_bounds = array<i64: 1, 1024>}, {transform_indices = @transform_7, window_bounds = array<i64: 1024, 2048>}, {transform_indices = @transform_8, window_bounds = array<i64: 1, 2048>}, {transform_indices = @transform_9, window_bounds = array<i64: 2, 2048>}]} {
    %c0 = arith.constant 0 : index
    %c0_0 = arith.constant 0 : index
    %0 = vector.load %arg1[%c0, %c0_0] : memref<2x768xf32, #tpu.memory_space<vmem>>, vector<2x768xf32>
    %1 = arith.truncf %0 : vector<2x768xf32> to vector<2x768xbf16>
    %c0_1 = arith.constant 0 : index
    %c0_2 = arith.constant 0 : index
    %2 = vector.load %arg2[%c0_1, %c0_2] : memref<768x256xbf16, #tpu.memory_space<vmem>>, vector<768x256xbf16>
    %cst = arith.constant dense<0.000000e+00> : vector<2x256xf32>
    %3 = tpu.matmul %1, %2, %cst {dimension_numbers = #tpu.dot_dimension_numbers<[1], [0], [0], [1], [0, 0, 1, 1], [], []>} : vector<2x768xbf16>, vector<768x256xbf16>, vector<2x256xf32> -> vector<2x256xf32>
    %c0_3 = arith.constant 0 : index
    %c0_4 = arith.constant 0 : index
    %4 = vector.load %arg3[%c0_3, %c0_4] : memref<1x256xf32, #tpu.memory_space<vmem>>, vector<1x256xf32>
    %5 = vector.broadcast %4 : vector<1x256xf32> to vector<2x256xf32>
    %6 = arith.addf %3, %5 : vector<2x256xf32>
    %cst_5 = arith.constant 0.000000e+00 : f32
    %7 = vector.broadcast %cst_5 : f32 to vector<2x256xf32>
    %8 = arith.maximumf %6, %7 : vector<2x256xf32>
    %9 = arith.truncf %8 : vector<2x256xf32> to vector<2x256xbf16>
    %c0_6 = arith.constant 0 : index
    %c0_7 = arith.constant 0 : index
    %10 = vector.load %arg4[%c0_6, %c0_7] : memref<256x512xbf16, #tpu.memory_space<vmem>>, vector<256x512xbf16>
    %cst_8 = arith.constant dense<0.000000e+00> : vector<2x512xf32>
    %11 = tpu.matmul %9, %10, %cst_8 {dimension_numbers = #tpu.dot_dimension_numbers<[1], [0], [0], [1], [0, 0, 1, 1], [], []>} : vector<2x256xbf16>, vector<256x512xbf16>, vector<2x512xf32> -> vector<2x512xf32>
    %c0_9 = arith.constant 0 : index
    %c0_10 = arith.constant 0 : index
    %12 = vector.load %arg5[%c0_9, %c0_10] : memref<1x512xf32, #tpu.memory_space<vmem>>, vector<1x512xf32>
    %13 = vector.broadcast %12 : vector<1x512xf32> to vector<2x512xf32>
    %14 = arith.addf %11, %13 : vector<2x512xf32>
    %cst_11 = arith.constant 0.000000e+00 : f32
    %15 = vector.broadcast %cst_11 : f32 to vector<2x512xf32>
    %16 = arith.maximumf %14, %15 : vector<2x512xf32>
    %17 = arith.truncf %16 : vector<2x512xf32> to vector<2x512xbf16>
    %c0_12 = arith.constant 0 : index
    %c0_13 = arith.constant 0 : index
    %18 = vector.load %arg6[%c0_12, %c0_13] : memref<512x1024xbf16, #tpu.memory_space<vmem>>, vector<512x1024xbf16>
    %cst_14 = arith.constant dense<0.000000e+00> : vector<2x1024xf32>
    %19 = tpu.matmul %17, %18, %cst_14 {dimension_numbers = #tpu.dot_dimension_numbers<[1], [0], [0], [1], [0, 0, 1, 1], [], []>} : vector<2x512xbf16>, vector<512x1024xbf16>, vector<2x1024xf32> -> vector<2x1024xf32>
    %c0_15 = arith.constant 0 : index
    %c0_16 = arith.constant 0 : index
    %20 = vector.load %arg7[%c0_15, %c0_16] : memref<1x1024xf32, #tpu.memory_space<vmem>>, vector<1x1024xf32>
    %21 = vector.broadcast %20 : vector<1x1024xf32> to vector<2x1024xf32>
    %22 = arith.addf %19, %21 : vector<2x1024xf32>
    %cst_17 = arith.constant 0.000000e+00 : f32
    %23 = vector.broadcast %cst_17 : f32 to vector<2x1024xf32>
    %24 = arith.maximumf %22, %23 : vector<2x1024xf32>
    %25 = arith.truncf %24 : vector<2x1024xf32> to vector<2x1024xbf16>
    %c0_18 = arith.constant 0 : index
    %c0_19 = arith.constant 0 : index
    %26 = vector.load %arg8[%c0_18, %c0_19] : memref<1024x2048xbf16, #tpu.memory_space<vmem>>, vector<1024x2048xbf16>
    %cst_20 = arith.constant dense<0.000000e+00> : vector<2x2048xf32>
    %27 = tpu.matmul %25, %26, %cst_20 {dimension_numbers = #tpu.dot_dimension_numbers<[1], [0], [0], [1], [0, 0, 1, 1], [], []>} : vector<2x1024xbf16>, vector<1024x2048xbf16>, vector<2x2048xf32> -> vector<2x2048xf32>
    %c0_21 = arith.constant 0 : index
    %c0_22 = arith.constant 0 : index
    %28 = vector.load %arg9[%c0_21, %c0_22] : memref<1x2048xf32, #tpu.memory_space<vmem>>, vector<1x2048xf32>
    %29 = vector.broadcast %28 : vector<1x2048xf32> to vector<2x2048xf32>
    %30 = arith.addf %27, %29 : vector<2x2048xf32>
    %31 = math.tanh %30 : vector<2x2048xf32>
    %c0_23 = arith.constant 0 : index
    %c0_24 = arith.constant 0 : index
    %32 = vector.load %arg10[%c0_23, %c0_24] : memref<2x2048xf32, #tpu.memory_space<vmem>>, vector<2x2048xf32>
    tpu.vector_store %arg10[%c0_23, %c0_24], %31 {strides = array<i32>} : memref<2x2048xf32, #tpu.memory_space<vmem>>, vector<2x2048xf32>,
    return
  }
  func.func @transform_0(%arg0: i32) -> (i32, i32) {
    %c0_i32 = arith.constant 0 : i32
    %c0_i32_0 = arith.constant 0 : i32
    %c0_i32_1 = arith.constant 0 : i32
    return %c0_i32, %c0_i32_0 : i32, i32
  }
  func.func @transform_1(%arg0: i32) -> (i32, i32) {
    %c0_i32 = arith.constant 0 : i32
    %c0_i32_0 = arith.constant 0 : i32
    %c0_i32_1 = arith.constant 0 : i32
    return %c0_i32, %c0_i32_0 : i32, i32
  }
  func.func @transform_2(%arg0: i32) -> (i32, i32) {
    %c0_i32 = arith.constant 0 : i32
    %c0_i32_0 = arith.constant 0 : i32
    %c0_i32_1 = arith.constant 0 : i32
    return %c0_i32, %c0_i32_0 : i32, i32
  }
  func.func @transform_3(%arg0: i32) -> (i32, i32) {
    %c0_i32 = arith.constant 0 : i32
    %c0_i32_0 = arith.constant 0 : i32
    %c0_i32_1 = arith.constant 0 : i32
    return %c0_i32, %c0_i32_0 : i32, i32
  }
  func.func @transform_4(%arg0: i32) -> (i32, i32) {
    %c0_i32 = arith.constant 0 : i32
    %c0_i32_0 = arith.constant 0 : i32
    %c0_i32_1 = arith.constant 0 : i32
    return %c0_i32, %c0_i32_0 : i32, i32
  }
  func.func @transform_5(%arg0: i32) -> (i32, i32) {
    %c0_i32 = arith.constant 0 : i32
    %c0_i32_0 = arith.constant 0 : i32
    %c0_i32_1 = arith.constant 0 : i32
    return %c0_i32, %c0_i32_0 : i32, i32
  }
  func.func @transform_6(%arg0: i32) -> (i32, i32) {
    %c0_i32 = arith.constant 0 : i32
    %c0_i32_0 = arith.constant 0 : i32
    %c0_i32_1 = arith.constant 0 : i32
    return %c0_i32, %c0_i32_0 : i32, i32
  }
  func.func @transform_7(%arg0: i32) -> (i32, i32) {
    %c0_i32 = arith.constant 0 : i32
    %c0_i32_0 = arith.constant 0 : i32
    return %c0_i32, %arg0 : i32, i32
  }
  func.func @transform_8(%arg0: i32) -> (i32, i32) {
    %c0_i32 = arith.constant 0 : i32
    %c0_i32_0 = arith.constant 0 : i32
    return %c0_i32, %arg0 : i32, i32
  }
  func.func @transform_9(%arg0: i32) -> (i32, i32) {
    %c0_i32 = arith.constant 0 : i32
    %c0_i32_0 = arith.constant 0 : i32
    return %c0_i32, %arg0 : i32, i32
  }
}

</mosaic_0001>

<bundles_post_ra>
// kernel: generator_forward.1
= control target key start
LH: loop header
LB: loop body
LE: loop exit
PB: predicated region body
PF: predicated region fallthrough
CT: control target
= control target key end

     0   :  { %s15290_s30 = smov 0   ;;  %s15292_s10 = smov 0   ;;  %s19947_s0 = inlined_call_operand.vmem [shape: f32[2,768], index: 0, kind: input, shape index: {}]   ;;  %s19948_s1 = inlined_call_operand.vmem [shape: bf16[768,256], index: 1, kind: input, shape index: {}]   ;;  %s19949_s2 = inlined_call_operand.vmem [shape: f32[1,256], index: 2, kind: input, shape index: {}]   ;;  %s19950_s3 = inlined_call_operand.vmem [shape: bf16[256,512], index: 3, kind: input, shape index: {}]   ;;  %s19951_s4 = inlined_call_operand.vmem [shape: f32[1,512], index: 4, kind: input, shape index: {}]   ;;  %s19952_s5 = inlined_call_operand.vmem [shape: bf16[512,1024], index: 5, kind: input, shape index: {}]   ;;  %s19953_s6 = inlined_call_operand.vmem [shape: f32[1,1024], index: 6, kind: input, shape index: {}]   ;;  %s19954_s7 = inlined_call_operand.vmem [shape: bf16[1024,12288], index: 7, kind: input, shape index: {}]   ;;  %s19955_s8 = inlined_call_operand.vmem [shape: f32[1,12288], index: 8, kind: input, shape index: {}]   ;;  %s19956_s9 = inlined_call_operand.vmem [shape: f32[2,12288], index: 9, kind: output, shape index: {}]  }
   0x1   :  { %s15294_s11 = smov 0  }
   0x2 LB: > { %s13313_s12 = sadd.s32 4294967295, %s15237_s11   ;;  %s15307_s13 = sadd.s32 1, %s15237_s11   ;;  %s15237_s11 = sphi %s15294_s11, %s19959_s11   ;;  %s15233_s10 = sphi %s15292_s10, %s19958_s10   ;;  %s15229_s30 = sphi %s15290_s30, %s19957_s30  }
   0x3   : > { %s170_s14 = ssub.s32 %s15237_s11, %s15307_s13  ;;  %s173_s15 = sadd.s32 1, %s15233_s10 }
   0x4   : > { %p171_p0 = scmp.eq.s32.totalorder %s170_s14, 0  ;;  %p180_p1 = scmp.ne.s32.totalorder %s15233_s10, %s15229_s30 }
   0x5   : > { %p181_p2 = scmp.eq.s32.totalorder %s15237_s11, 0  ;;  %p13316_p4 = scmp.ge.s32.totalorder %s15237_s11, 6 }
   0x6   : > { %s15316_s16 = scalar_select %p171_p0, %s15233_s10, %s173_s15  }
   0x7   : > { %p182_p3 = por %p181_p2, %p180_p1  ;;  %279 = sbr.rel (%p13316_p4) target bundleno = 530 (0x212), region = 44 }
   0xe   : > { %282 = sbr.rel (!%p182_p3) target bundleno = 530 (0x212), region = 48  ;;  %s284_s17 = sand.u32 (%p182_p3), 1, %s15233_s10  }
   0xf   : > { %s14768_s18 = sshll.u32 (%p182_p3), %s15237_s11, 6  ;;  %s13317_s19 = sshll.u32 (%p182_p3), %s284_s17, 13 }
  0x10   : > { %s15324_s22 = scalar_lea.vmem (%p182_p3), %s19954_s7, %s14768_s18  ;;  %s15329_s23 = scalar_lea.vmem (%p182_p3), [#allocation2], %s13317_s19 }
  0x11   : > { %v302_v0 = vld [vmem:[%s15324_s22] sm:$0xff] (%p182_p3)  ;;  %v304_v1 = vld [vmem:[%s15324_s22 + $0x8] sm:$0xff] (%p182_p3)  ;;  %v306_v2 = vld [vmem:[%s15324_s22 + $0x10] sm:$0xff] (%p182_p3) }
  0x12   : > { %303 = vst [vmem:[%s15329_s23] sm:$0xff] (%p182_p3), %v302_v0  ;;  %305 = vst [vmem:[%s15329_s23 + $0x8] sm:$0xff] (%p182_p3), %v304_v1  ;;  %v308_v3 = vld [vmem:[%s15324_s22 + $0x18] sm:$0xff] (%p182_p3)  ;;  %v310_v4 = vld [vmem:[%s15324_s22 + $0x20] sm:$0xff] (%p182_p3) }
  0x13   : > { %307 = vst [vmem:[%s15329_s23 + $0x10] sm:$0xff] (%p182_p3), %v306_v2  ;;  %v312_v5 = vld [vmem:[%s15324_s22 + $0x28] sm:$0xff] (%p182_p3)  ;;  %309 = vst [vmem:[%s15329_s23 + $0x18] sm:$0xff] (%p182_p3), %v308_v3  ;;  %v314_v6 = vld [vmem:[%s15324_s22 + $0x30] sm:$0xff] (%p182_p3) }
  0x14   : > { %311 = vst [vmem:[%s15329_s23 + $0x20] sm:$0xff] (%p182_p3), %v310_v4  ;;  %313 = vst [vmem:[%s15329_s23 + $0x28] sm:$0xff] (%p182_p3), %v312_v5  ;;  %v316_v7 = vld [vmem:[%s15324_s22 + $0x38] sm:$0xff] (%p182_p3)  ;;  %v318_v8 = vld [vmem:[%s15324_s22 + $0x180] sm:$0xff] (%p182_p3) }
  0x15   : > { %315 = vst [vmem:[%s15329_s23 + $0x30] sm:$0xff] %v314_v6  ;;  %317 = vst [vmem:[%s15329_s23 + $0x38] sm:$0xff] %v316_v7  ;;  %v320_v9 = vld [vmem:[%s15324_s22 + $0x188] sm:$0xff]  ;;  %v322_v10 = vld [vmem:[%s15324_s22 + $0x190] sm:$0xff] }
  0x16   : > { %319 = vst [vmem:[%s15329_s23 + $0x40] sm:$0xff] %v318_v8  ;;  %v324_v11 = vld [vmem:[%s15324_s22 + $0x198] sm:$0xff]  ;;  %321 = vst [vmem:[%s15329_s23 + $0x48] sm:$0xff] %v320_v9  ;;  %v326_v12 = vld [vmem:[%s15324_s22 + $0x1a0] sm:$0xff] }
  0x17   : > { %323 = vst [vmem:[%s15329_s23 + $0x50] sm:$0xff] %v322_v10  ;;  %325 = vst [vmem:[%s15329_s23 + $0x58] sm:$0xff] %v324_v11  ;;  %v328_v13 = vld [vmem:[%s15324_s22 + $0x1a8] sm:$0xff]  ;;  %v330_v14 = vld [vmem:[%s15324_s22 + $0x1b0] sm:$0xff] }
  0x18   : > { %327 = vst [vmem:[%s15329_s23 + $0x60] sm:$0xff] %v326_v12  ;;  %329 = vst [vmem:[%s15329_s23 + $0x68] sm:$0xff] %v328_v13  ;;  %v332_v15 = vld [vmem:[%s15324_s22 + $0x1b8] sm:$0xff]  ;;  %v334_v16 = vld [vmem:[%s15324_s22 + $0x300] sm:$0xff] }
  0x19   : > { %331 = vst [vmem:[%s15329_s23 + $0x70] sm:$0xff] %v330_v14  ;;  %v336_v17 = vld [vmem:[%s15324_s22 + $0x308] sm:$0xff]  ;;  %333 = vst [vmem:[%s15329_s23 + $0x78] sm:$0xff] %v332_v15  ;;  %v338_v18 = vld [vmem:[%s15324_s22 + $0x310] sm:$0xff] }
  0x1a   : > { %335 = vst [vmem:[%s15329_s23 + $0x80] sm:$0xff] %v334_v16  ;;  %337 = vst [vmem:[%s15329_s23 + $0x88] sm:$0xff] %v336_v17  ;;  %v340_v19 = vld [vmem:[%s15324_s22 + $0x318] sm:$0xff]  ;;  %v342_v20 = vld [vmem:[%s15324_s22 + $0x320] sm:$0xff] }
  0x1b   : > { %339 = vst [vmem:[%s15329_s23 + $0x90] sm:$0xff] %v338_v18  ;;  %341 = vst [vmem:[%s15329_s23 + $0x98] sm:$0xff] %v340_v19  ;;  %v344_v21 = vld [vmem:[%s15324_s22 + $0x328] sm:$0xff]  ;;  %v346_v22 = vld [vmem:[%s15324_s22 + $0x330] sm:$0xff] }
  0x1c   : > { %343 = vst [vmem:[%s15329_s23 + $0xa0] sm:$0xff] %v342_v20  ;;  %v348_v23 = vld [vmem:[%s15324_s22 + $0x338] sm:$0xff]  ;;  %345 = vst [vmem:[%s15329_s23 + $0xa8] sm:$0xff] %v344_v21  ;;  %v350_v24 = vld [vmem:[%s15324_s22 + $0x480] sm:$0xff] }
  0x1d   : > { %347 = vst [vmem:[%s15329_s23 + $0xb0] sm:$0xff] %v346_v22  ;;  %349 = vst [vmem:[%s15329_s23 + $0xb8] sm:$0xff] %v348_v23  ;;  %v352_v25 = vld [vmem:[%s15324_s22 + $0x488] sm:$0xff]  ;;  %v354_v26 = vld [vmem:[%s15324_s22 + $0x490] sm:$0xff] }
  0x1e   : > { %351 = vst [vmem:[%s15329_s23 + $0xc0] sm:$0xff] %v350_v24  ;;  %353 = vst [vmem:[%s15329_s23 + $0xc8] sm:$0xff] %v352_v25  ;;  %v356_v27 = vld [vmem:[%s15324_s22 + $0x498] sm:$0xff]  ;;  %v358_v28 = vld [vmem:[%s15324_s22 + $0x4a0] sm:$0xff] }
  0x1f   : > { %355 = vst [vmem:[%s15329_s23 + $0xd0] sm:$0xff] %v354_v26  ;;  %v360_v29 = vld [vmem:[%s15324_s22 + $0x4a8] sm:$0xff]  ;;  %357 = vst [vmem:[%s15329_s23 + $0xd8] sm:$0xff] %v356_v27  ;;  %v362_v30 = vld [vmem:[%s15324_s22 + $0x4b0] sm:$0xff] }
  0x20   : > { %359 = vst [vmem:[%s15329_s23 + $0xe0] sm:$0xff] %v358_v28  ;;  %361 = vst [vmem:[%s15329_s23 + $0xe8] sm:$0xff] %v360_v29  ;;  %v364_v31 = vld [vmem:[%s15324_s22 + $0x4b8] sm:$0xff]  ;;  %v366_v32 = vld [vmem:[%s15324_s22 + $0x600] sm:$0xff] }
  0x21   : > { %363 = vst [vmem:[%s15329_s23 + $0xf0] sm:$0xff] %v362_v30  ;;  %365 = vst [vmem:[%s15329_s23 + $0xf8] sm:$0xff] %v364_v31  ;;  %v368_v33 = vld [vmem:[%s15324_s22 + $0x608] sm:$0xff]  ;;  %v370_v34 = vld [vmem:[%s15324_s22 + $0x610] sm:$0xff] }
  0x22   : > { %367 = vst [vmem:[%s15329_s23 + $0x100] sm:$0xff] %v366_v32  ;;  %v372_v35 = vld [vmem:[%s15324_s22 + $0x618] sm:$0xff]  ;;  %369 = vst [vmem:[%s15329_s23 + $0x108] sm:$0xff] %v368_v33  ;;  %v374_v36 = vld [vmem:[%s15324_s22 + $0x620] sm:$0xff] }
  0x23   : > { %371 = vst [vmem:[%s15329_s23 + $0x110] sm:$0xff] %v370_v34  ;;  %373 = vst [vmem:[%s15329_s23 + $0x118] sm:$0xff] %v372_v35  ;;  %v376_v37 = vld [vmem:[%s15324_s22 + $0x628] sm:$0xff]  ;;  %v378_v38 = vld [vmem:[%s15324_s22 + $0x630] sm:$0xff] }
  0x24   : > { %375 = vst [vmem:[%s15329_s23 + $0x120] sm:$0xff] %v374_v36  ;;  %377 = vst [vmem:[%s15329_s23 + $0x128] sm:$0xff] %v376_v37  ;;  %v380_v39 = vld [vmem:[%s15324_s22 + $0x638] sm:$0xff]  ;;  %v382_v40 = vld [vmem:[%s15324_s22 + $0x780] sm:$0xff] }
  0x25   : > { %379 = vst [vmem:[%s15329_s23 + $0x130] sm:$0xff] %v378_v38  ;;  %v384_v41 = vld [vmem:[%s15324_s22 + $0x788] sm:$0xff]  ;;  %381 = vst [vmem:[%s15329_s23 + $0x138] sm:$0xff] %v380_v39  ;;  %v386_v42 = vld [vmem:[%s15324_s22 + $0x790] sm:$0xff] }
  0x26   : > { %383 = vst [vmem:[%s15329_s23 + $0x140] sm:$0xff] %v382_v40  ;;  %385 = vst [vmem:[%s15329_s23 + $0x148] sm:$0xff] %v384_v41  ;;  %v388_v43 = vld [vmem:[%s15324_s22 + $0x798] sm:$0xff]  ;;  %v390_v44 = vld [vmem:[%s15324_s22 + $0x7a0] sm:$0xff] }
  0x27   : > { %387 = vst [vmem:[%s15329_s23 + $0x150] sm:$0xff] %v386_v42  ;;  %389 = vst [vmem:[%s15329_s23 + $0x158] sm:$0xff] %v388_v43  ;;  %v392_v45 = vld [vmem:[%s15324_s22 + $0x7a8] sm:$0xff]  ;;  %v394_v46 = vld [vmem:[%s15324_s22 + $0x7b0] sm:$0xff] }
  0x28   : > { %391 = vst [vmem:[%s15329_s23 + $0x160] sm:$0xff] %v390_v44  ;;  %v396_v47 = vld [vmem:[%s15324_s22 + $0x7b8] sm:$0xff]  ;;  %393 = vst [vmem:[%s15329_s23 + $0x168] sm:$0xff] %v392_v45  ;;  %v398_v48 = vld [vmem:[%s15324_s22 + $0x900] sm:$0xff] }
  0x29   : > { %395 = vst [vmem:[%s15329_s23 + $0x170] sm:$0xff] %v394_v46  ;;  %397 = vst [vmem:[%s15329_s23 + $0x178] sm:$0xff] %v396_v47  ;;  %v400_v49 = vld [vmem:[%s15324_s22 + $0x908] sm:$0xff]  ;;  %v402_v50 = vld [vmem:[%s15324_s22 + $0x910] sm:$0xff] }
  0x2a   : > { %399 = vst [vmem:[%s15329_s23 + $0x180] sm:$0xff] %v398_v48  ;;  %401 = vst [vmem:[%s15329_s23 + $0x188] sm:$0xff] %v400_v49  ;;  %v404_v51 = vld [vmem:[%s15324_s22 + $0x918] sm:$0xff]  ;;  %v406_v52 = vld [vmem:[%s15324_s22 + $0x920] sm:$0xff] }
  0x2b   : > { %403 = vst [vmem:[%s15329_s23 + $0x190] sm:$0xff] %v402_v50  ;;  %v408_v53 = vld [vmem:[%s15324_s22 + $0x928] sm:$0xff]  ;;  %405 = vst [vmem:[%s15329_s23 + $0x198] sm:$0xff] %v404_v51  ;;  %v410_v54 = vld [vmem:[%s15324_s22 + $0x930] sm:$0xff] }
  0x2c   : > { %407 = vst [vmem:[%s15329_s23 + $0x1a0] sm:$0xff] %v406_v52  ;;  %409 = vst [vmem:[%s15329_s23 + $0x1a8] sm:$0xff] %v408_v53  ;;  %v412_v55 = vld [vmem:[%s15324_s22 + $0x938] sm:$0xff]  ;;  %v414_v56 = vld [vmem:[%s15324_s22 + $0xa80] sm:$0xff] }
  0x2d   : > { %411 = vst [vmem:[%s15329_s23 + $0x1b0] sm:$0xff] %v410_v54  ;;  %413 = vst [vmem:[%s15329_s23 + $0x1b8] sm:$0xff] %v412_v55  ;;  %v416_v57 = vld [vmem:[%s15324_s22 + $0xa88] sm:$0xff]  ;;  %v418_v58 = vld [vmem:[%s15324_s22 + $0xa90] sm:$0xff] }
  0x2e   : > { %415 = vst [vmem:[%s15329_s23 + $0x1c0] sm:$0xff] %v414_v56  ;;  %v420_v59 = vld [vmem:[%s15324_s22 + $0xa98] sm:$0xff]  ;;  %417 = vst [vmem:[%s15329_s23 + $0x1c8] sm:$0xff] %v416_v57  ;;  %v422_v60 = vld [vmem:[%s15324_s22 + $0xaa0] sm:$0xff] }
  0x2f   : > { %419 = vst [vmem:[%s15329_s23 + $0x1d0] sm:$0xff] %v418_v58  ;;  %421 = vst [vmem:[%s15329_s23 + $0x1d8] sm:$0xff] %v420_v59  ;;  %v424_v61 = vld [vmem:[%s15324_s22 + $0xaa8] sm:$0xff]  ;;  %v426_v62 = vld [vmem:[%s15324_s22 + $0xab0] sm:$0xff] }
  0x30   : > { %423 = vst [vmem:[%s15329_s23 + $0x1e0] sm:$0xff] %v422_v60  ;;  %425 = vst [vmem:[%s15329_s23 + $0x1e8] sm:$0xff] %v424_v61  ;;  %v428_v63 = vld [vmem:[%s15324_s22 + $0xab8] sm:$0xff]  ;;  %v430_v0 = vld [vmem:[%s15324_s22 + $0xc00] sm:$0xff] }
  0x31   : > { %427 = vst [vmem:[%s15329_s23 + $0x1f0] sm:$0xff] %v426_v62  ;;  %v432_v1 = vld [vmem:[%s15324_s22 + $0xc08] sm:$0xff]  ;;  %429 = vst [vmem:[%s15329_s23 + $0x1f8] sm:$0xff] %v428_v63  ;;  %v434_v2 = vld [vmem:[%s15324_s22 + $0xc10] sm:$0xff] }
  0x32   : > { %431 = vst [vmem:[%s15329_s23 + $0x200] sm:$0xff] %v430_v0  ;;  %433 = vst [vmem:[%s15329_s23 + $0x208] sm:$0xff] %v432_v1  ;;  %v436_v3 = vld [vmem:[%s15324_s22 + $0xc18] sm:$0xff]  ;;  %v438_v4 = vld [vmem:[%s15324_s22 + $0xc20] sm:$0xff] }
  0x33   : > { %435 = vst [vmem:[%s15329_s23 + $0x210] sm:$0xff] %v434_v2  ;;  %437 = vst [vmem:[%s15329_s23 + $0x218] sm:$0xff] %v436_v3  ;;  %v440_v5 = vld [vmem:[%s15324_s22 + $0xc28] sm:$0xff]  ;;  %v442_v6 = vld [vmem:[%s15324_s22 + $0xc30] sm:$0xff] }
  0x34   : > { %439 = vst [vmem:[%s15329_s23 + $0x220] sm:$0xff] %v438_v4  ;;  %v444_v7 = vld [vmem:[%s15324_s22 + $0xc38] sm:$0xff]  ;;  %441 = vst [vmem:[%s15329_s23 + $0x228] sm:$0xff] %v440_v5  ;;  %v446_v8 = vld [vmem:[%s15324_s22 + $0xd80] sm:$0xff] }
  0x35   : > { %443 = vst [vmem:[%s15329_s23 + $0x230] sm:$0xff] %v442_v6  ;;  %445 = vst [vmem:[%s15329_s23 + $0x238] sm:$0xff] %v444_v7  ;;  %v448_v9 = vld [vmem:[%s15324_s22 + $0xd88] sm:$0xff]  ;;  %v450_v10 = vld [vmem:[%s15324_s22 + $0xd90] sm:$0xff] }
  0x36   : > { %447 = vst [vmem:[%s15329_s23 + $0x240] sm:$0xff] %v446_v8  ;;  %449 = vst [vmem:[%s15329_s23 + $0x248] sm:$0xff] %v448_v9  ;;  %v452_v11 = vld [vmem:[%s15324_s22 + $0xd98] sm:$0xff]  ;;  %v454_v12 = vld [vmem:[%s15324_s22 + $0xda0] sm:$0xff] }
  0x37   : > { %451 = vst [vmem:[%s15329_s23 + $0x250] sm:$0xff] %v450_v10  ;;  %v456_v13 = vld [vmem:[%s15324_s22 + $0xda8] sm:$0xff]  ;;  %453 = vst [vmem:[%s15329_s23 + $0x258] sm:$0xff] %v452_v11  ;;  %v458_v14 = vld [vmem:[%s15324_s22 + $0xdb0] sm:$0xff] }
  0x38   : > { %455 = vst [vmem:[%s15329_s23 + $0x260] sm:$0xff] %v454_v12  ;;  %457 = vst [vmem:[%s15329_s23 + $0x268] sm:$0xff] %v456_v13  ;;  %v460_v15 = vld [vmem:[%s15324_s22 + $0xdb8] sm:$0xff]  ;;  %v462_v16 = vld [vmem:[%s15324_s22 + $0xf00] sm:$0xff] }
  0x39   : > { %459 = vst [vmem:[%s15329_s23 + $0x270] sm:$0xff] %v458_v14  ;;  %461 = vst [vmem:[%s15329_s23 + $0x278] sm:$0xff] %v460_v15  ;;  %v464_v17 = vld [vmem:[%s15324_s22 + $0xf08] sm:$0xff]  ;;  %v466_v18 = vld [vmem:[%s15324_s22 + $0xf10] sm:$0xff] }
  0x3a   : > { %463 = vst [vmem:[%s15329_s23 + $0x280] sm:$0xff] %v462_v16  ;;  %v468_v19 = vld [vmem:[%s15324_s22 + $0xf18] sm:$0xff]  ;;  %465 = vst [vmem:[%s15329_s23 + $0x288] sm:$0xff] %v464_v17  ;;  %v470_v20 = vld [vmem:[%s15324_s22 + $0xf20] sm:$0xff] }
  0x3b   : > { %467 = vst [vmem:[%s15329_s23 + $0x290] sm:$0xff] %v466_v18  ;;  %469 = vst [vmem:[%s15329_s23 + $0x298] sm:$0xff] %v468_v19  ;;  %v472_v21 = vld [vmem:[%s15324_s22 + $0xf28] sm:$0xff]  ;;  %v474_v22 = vld [vmem:[%s15324_s22 + $0xf30] sm:$0xff] }
  0x3c   : > { %471 = vst [vmem:[%s15329_s23 + $0x2a0] sm:$0xff] %v470_v20  ;;  %473 = vst [vmem:[%s15329_s23 + $0x2a8] sm:$0xff] %v472_v21  ;;  %v476_v23 = vld [vmem:[%s15324_s22 + $0xf38] sm:$0xff]  ;;  %v478_v24 = vld [vmem:[%s15324_s22 + $0x1080] sm:$0xff] }
  0x3d   : > { %475 = vst [vmem:[%s15329_s23 + $0x2b0] sm:$0xff] %v474_v22  ;;  %v480_v25 = vld [vmem:[%s15324_s22 + $0x1088] sm:$0xff]  ;;  %477 = vst [vmem:[%s15329_s23 + $0x2b8] sm:$0xff] %v476_v23  ;;  %v482_v26 = vld [vmem:[%s15324_s22 + $0x1090] sm:$0xff] }
  0x3e   : > { %479 = vst [vmem:[%s15329_s23 + $0x2c0] sm:$0xff] %v478_v24  ;;  %481 = vst [vmem:[%s15329_s23 + $0x2c8] sm:$0xff] %v480_v25  ;;  %v484_v27 = vld [vmem:[%s15324_s22 + $0x1098] sm:$0xff]  ;;  %v486_v28 = vld [vmem:[%s15324_s22 + $0x10a0] sm:$0xff] }
  0x3f   : > { %483 = vst [vmem:[%s15329_s23 + $0x2d0] sm:$0xff] %v482_v26  ;;  %485 = vst [vmem:[%s15329_s23 + $0x2d8] sm:$0xff] %v484_v27  ;;  %v488_v29 = vld [vmem:[%s15324_s22 + $0x10a8] sm:$0xff]  ;;  %v490_v30 = vld [vmem:[%s15324_s22 + $0x10b0] sm:$0xff] }
  0x40   : > { %487 = vst [vmem:[%s15329_s23 + $0x2e0] sm:$0xff] %v486_v28  ;;  %v492_v31 = vld [vmem:[%s15324_s22 + $0x10b8] sm:$0xff]  ;;  %489 = vst [vmem:[%s15329_s23 + $0x2e8] sm:$0xff] %v488_v29  ;;  %v494_v32 = vld [vmem:[%s15324_s22 + $0x1200] sm:$0xff] }
  0x41   : > { %491 = vst [vmem:[%s15329_s23 + $0x2f0] sm:$0xff] %v490_v30  ;;  %493 = vst [vmem:[%s15329_s23 + $0x2f8] sm:$0xff] %v492_v31  ;;  %v496_v33 = vld [vmem:[%s15324_s22 + $0x1208] sm:$0xff]  ;;  %v498_v34 = vld [vmem:[%s15324_s22 + $0x1210] sm:$0xff] }
  0x42   : > { %495 = vst [vmem:[%s15329_s23 + $0x300] sm:$0xff] %v494_v32  ;;  %497 = vst [vmem:[%s15329_s23 + $0x308] sm:$0xff] %v496_v33  ;;  %v500_v35 = vld [vmem:[%s15324_s22 + $0x1218] sm:$0xff]  ;;  %v502_v36 = vld [vmem:[%s15324_s22 + $0x1220] sm:$0xff] }
  0x43   : > { %499 = vst [vmem:[%s15329_s23 + $0x310] sm:$0xff] %v498_v34  ;;  %v504_v37 = vld [vmem:[%s15324_s22 + $0x1228] sm:$0xff]  ;;  %501 = vst [vmem:[%s15329_s23 + $0x318] sm:$0xff] %v500_v35  ;;  %v506_v38 = vld [vmem:[%s15324_s22 + $0x1230] sm:$0xff] }
  0x44   : > { %503 = vst [vmem:[%s15329_s23 + $0x320] sm:$0xff] %v502_v36  ;;  %505 = vst [vmem:[%s15329_s23 + $0x328] sm:$0xff] %v504_v37  ;;  %v508_v39 = vld [vmem:[%s15324_s22 + $0x1238] sm:$0xff]  ;;  %v510_v40 = vld [vmem:[%s15324_s22 + $0x1380] sm:$0xff] }
  0x45   : > { %507 = vst [vmem:[%s15329_s23 + $0x330] sm:$0xff] %v506_v38  ;;  %509 = vst [vmem:[%s15329_s23 + $0x338] sm:$0xff] %v508_v39  ;;  %v512_v41 = vld [vmem:[%s15324_s22 + $0x1388] sm:$0xff]  ;;  %v514_v42 = vld [vmem:[%s15324_s22 + $0x1390] sm:$0xff] }
  0x46   : > { %511 = vst [vmem:[%s15329_s23 + $0x340] sm:$0xff] %v510_v40  ;;  %v516_v43 = vld [vmem:[%s15324_s22 + $0x1398] sm:$0xff]  ;;  %513 = vst [vmem:[%s15329_s23 + $0x348] sm:$0xff] %v512_v41  ;;  %v518_v44 = vld [vmem:[%s15324_s22 + $0x13a0] sm:$0xff] }
  0x47   : > { %515 = vst [vmem:[%s15329_s23 + $0x350] sm:$0xff] %v514_v42  ;;  %517 = vst [vmem:[%s15329_s23 + $0x358] sm:$0xff] %v516_v43  ;;  %v520_v45 = vld [vmem:[%s15324_s22 + $0x13a8] sm:$0xff]  ;;  %v522_v46 = vld [vmem:[%s15324_s22 + $0x13b0] sm:$0xff] }
  0x48   : > { %519 = vst [vmem:[%s15329_s23 + $0x360] sm:$0xff] %v518_v44  ;;  %521 = vst [vmem:[%s15329_s23 + $0x368] sm:$0xff] %v520_v45  ;;  %v524_v47 = vld [vmem:[%s15324_s22 + $0x13b8] sm:$0xff]  ;;  %v526_v48 = vld [vmem:[%s15324_s22 + $0x1500] sm:$0xff] }
  0x49   : > { %523 = vst [vmem:[%s15329_s23 + $0x370] sm:$0xff] %v522_v46  ;;  %v528_v49 = vld [vmem:[%s15324_s22 + $0x1508] sm:$0xff]  ;;  %525 = vst [vmem:[%s15329_s23 + $0x378] sm:$0xff] %v524_v47  ;;  %v530_v50 = vld [vmem:[%s15324_s22 + $0x1510] sm:$0xff] }
  0x4a   : > { %527 = vst [vmem:[%s15329_s23 + $0x380] sm:$0xff] %v526_v48  ;;  %529 = vst [vmem:[%s15329_s23 + $0x388] sm:$0xff] %v528_v49  ;;  %v532_v51 = vld [vmem:[%s15324_s22 + $0x1518] sm:$0xff]  ;;  %v534_v52 = vld [vmem:[%s15324_s22 + $0x1520] sm:$0xff] }
  0x4b   : > { %531 = vst [vmem:[%s15329_s23 + $0x390] sm:$0xff] %v530_v50  ;;  %533 = vst [vmem:[%s15329_s23 + $0x398] sm:$0xff] %v532_v51  ;;  %v536_v53 = vld [vmem:[%s15324_s22 + $0x1528] sm:$0xff]  ;;  %v538_v54 = vld [vmem:[%s15324_s22 + $0x1530] sm:$0xff] }
  0x4c   : > { %535 = vst [vmem:[%s15329_s23 + $0x3a0] sm:$0xff] %v534_v52  ;;  %v540_v55 = vld [vmem:[%s15324_s22 + $0x1538] sm:$0xff]  ;;  %537 = vst [vmem:[%s15329_s23 + $0x3a8] sm:$0xff] %v536_v53  ;;  %v542_v56 = vld [vmem:[%s15324_s22 + $0x1680] sm:$0xff] }
  0x4d   : > { %539 = vst [vmem:[%s15329_s23 + $0x3b0] sm:$0xff] %v538_v54  ;;  %541 = vst [vmem:[%s15329_s23 + $0x3b8] sm:$0xff] %v540_v55  ;;  %v544_v57 = vld [vmem:[%s15324_s22 + $0x1688] sm:$0xff]  ;;  %v546_v58 = vld [vmem:[%s15324_s22 + $0x1690] sm:$0xff] }
  0x4e   : > { %543 = vst [vmem:[%s15329_s23 + $0x3c0] sm:$0xff] %v542_v56  ;;  %545 = vst [vmem:[%s15329_s23 + $0x3c8] sm:$0xff] %v544_v57  ;;  %v548_v59 = vld [vmem:[%s15324_s22 + $0x1698] sm:$0xff]  ;;  %v550_v60 = vld [vmem:[%s15324_s22 + $0x16a0] sm:$0xff] }
  0x4f   : > { %547 = vst [vmem:[%s15329_s23 + $0x3d0] sm:$0xff] %v546_v58  ;;  %v552_v61 = vld [vmem:[%s15324_s22 + $0x16a8] sm:$0xff]  ;;  %549 = vst [vmem:[%s15329_s23 + $0x3d8] sm:$0xff] %v548_v59  ;;  %v554_v62 = vld [vmem:[%s15324_s22 + $0x16b0] sm:$0xff] }
  0x50   : > { %551 = vst [vmem:[%s15329_s23 + $0x3e0] sm:$0xff] %v550_v60  ;;  %553 = vst [vmem:[%s15329_s23 + $0x3e8] sm:$0xff] %v552_v61  ;;  %v556_v63 = vld [vmem:[%s15324_s22 + $0x16b8] sm:$0xff]  ;;  %v558_v0 = vld [vmem:[%s15324_s22 + $0x1800] sm:$0xff] }
  0x51   : > { %555 = vst [vmem:[%s15329_s23 + $0x3f0] sm:$0xff] %v554_v62  ;;  %557 = vst [vmem:[%s15329_s23 + $0x3f8] sm:$0xff] %v556_v63  ;;  %v560_v1 = vld [vmem:[%s15324_s22 + $0x1808] sm:$0xff]  ;;  %v562_v2 = vld [vmem:[%s15324_s22 + $0x1810] sm:$0xff] }
  0x52   : > { %559 = vst [vmem:[%s15329_s23 + $0x400] sm:$0xff] %v558_v0  ;;  %v564_v3 = vld [vmem:[%s15324_s22 + $0x1818] sm:$0xff]  ;;  %561 = vst [vmem:[%s15329_s23 + $0x408] sm:$0xff] %v560_v1  ;;  %v566_v4 = vld [vmem:[%s15324_s22 + $0x1820] sm:$0xff] }
  0x53   : > { %563 = vst [vmem:[%s15329_s23 + $0x410] sm:$0xff] %v562_v2  ;;  %565 = vst [vmem:[%s15329_s23 + $0x418] sm:$0xff] %v564_v3  ;;  %v568_v5 = vld [vmem:[%s15324_s22 + $0x1828] sm:$0xff]  ;;  %v570_v6 = vld [vmem:[%s15324_s22 + $0x1830] sm:$0xff] }
  0x54   : > { %567 = vst [vmem:[%s15329_s23 + $0x420] sm:$0xff] %v566_v4  ;;  %569 = vst [vmem:[%s15329_s23 + $0x428] sm:$0xff] %v568_v5  ;;  %v572_v7 = vld [vmem:[%s15324_s22 + $0x1838] sm:$0xff]  ;;  %v574_v8 = vld [vmem:[%s15324_s22 + $0x1980] sm:$0xff] }
  0x55   : > { %571 = vst [vmem:[%s15329_s23 + $0x430] sm:$0xff] %v570_v6  ;;  %v576_v9 = vld [vmem:[%s15324_s22 + $0x1988] sm:$0xff]  ;;  %573 = vst [vmem:[%s15329_s23 + $0x438] sm:$0xff] %v572_v7  ;;  %v578_v10 = vld [vmem:[%s15324_s22 + $0x1990] sm:$0xff] }
  0x56   : > { %575 = vst [vmem:[%s15329_s23 + $0x440] sm:$0xff] %v574_v8  ;;  %577 = vst [vmem:[%s15329_s23 + $0x448] sm:$0xff] %v576_v9  ;;  %v580_v11 = vld [vmem:[%s15324_s22 + $0x1998] sm:$0xff]  ;;  %v582_v12 = vld [vmem:[%s15324_s22 + $0x19a0] sm:$0xff] }
  0x57   : > { %579 = vst [vmem:[%s15329_s23 + $0x450] sm:$0xff] %v578_v10  ;;  %581 = vst [vmem:[%s15329_s23 + $0x458] sm:$0xff] %v580_v11  ;;  %v584_v13 = vld [vmem:[%s15324_s22 + $0x19a8] sm:$0xff]  ;;  %v586_v14 = vld [vmem:[%s15324_s22 + $0x19b0] sm:$0xff] }
  0x58   : > { %583 = vst [vmem:[%s15329_s23 + $0x460] sm:$0xff] %v582_v12  ;;  %v588_v15 = vld [vmem:[%s15324_s22 + $0x19b8] sm:$0xff]  ;;  %585 = vst [vmem:[%s15329_s23 + $0x468] sm:$0xff] %v584_v13  ;;  %v590_v16 = vld [vmem:[%s15324_s22 + $0x1b00] sm:$0xff] }
  0x59   : > { %587 = vst [vmem:[%s15329_s23 + $0x470] sm:$0xff] %v586_v14  ;;  %589 = vst [vmem:[%s15329_s23 + $0x478] sm:$0xff] %v588_v15  ;;  %v592_v17 = vld [vmem:[%s15324_s22 + $0x1b08] sm:$0xff]  ;;  %v594_v18 = vld [vmem:[%s15324_s22 + $0x1b10] sm:$0xff] }
  0x5a   : > { %591 = vst [vmem:[%s15329_s23 + $0x480] sm:$0xff] %v590_v16  ;;  %593 = vst [vmem:[%s15329_s23 + $0x488] sm:$0xff] %v592_v17  ;;  %v596_v19 = vld [vmem:[%s15324_s22 + $0x1b18] sm:$0xff]  ;;  %v598_v20 = vld [vmem:[%s15324_s22 + $0x1b20] sm:$0xff] }
  0x5b   : > { %595 = vst [vmem:[%s15329_s23 + $0x490] sm:$0xff] %v594_v18  ;;  %v600_v21 = vld [vmem:[%s15324_s22 + $0x1b28] sm:$0xff]  ;;  %597 = vst [vmem:[%s15329_s23 + $0x498] sm:$0xff] %v596_v19  ;;  %v602_v22 = vld [vmem:[%s15324_s22 + $0x1b30] sm:$0xff] }
  0x5c   : > { %599 = vst [vmem:[%s15329_s23 + $0x4a0] sm:$0xff] %v598_v20  ;;  %601 = vst [vmem:[%s15329_s23 + $0x4a8] sm:$0xff] %v600_v21  ;;  %v604_v23 = vld [vmem:[%s15324_s22 + $0x1b38] sm:$0xff]  ;;  %v606_v24 = vld [vmem:[%s15324_s22 + $0x1c80] sm:$0xff] }
  0x5d   : > { %603 = vst [vmem:[%s15329_s23 + $0x4b0] sm:$0xff] %v602_v22  ;;  %605 = vst [vmem:[%s15329_s23 + $0x4b8] sm:$0xff] %v604_v23  ;;  %v608_v25 = vld [vmem:[%s15324_s22 + $0x1c88] sm:$0xff]  ;;  %v610_v26 = vld [vmem:[%s15324_s22 + $0x1c90] sm:$0xff] }
  0x5e   : > { %607 = vst [vmem:[%s15329_s23 + $0x4c0] sm:$0xff] %v606_v24  ;;  %v612_v27 = vld [vmem:[%s15324_s22 + $0x1c98] sm:$0xff]  ;;  %609 = vst [vmem:[%s15329_s23 + $0x4c8] sm:$0xff] %v608_v25  ;;  %v614_v28 = vld [vmem:[%s15324_s22 + $0x1ca0] sm:$0xff] }
  0x5f   : > { %611 = vst [vmem:[%s15329_s23 + $0x4d0] sm:$0xff] %v610_v26  ;;  %613 = vst [vmem:[%s15329_s23 + $0x4d8] sm:$0xff] %v612_v27  ;;  %v616_v29 = vld [vmem:[%s15324_s22 + $0x1ca8] sm:$0xff]  ;;  %v618_v30 = vld [vmem:[%s15324_s22 + $0x1cb0] sm:$0xff] }
  0x60   : > { %615 = vst [vmem:[%s15329_s23 + $0x4e0] sm:$0xff] %v614_v28  ;;  %617 = vst [vmem:[%s15329_s23 + $0x4e8] sm:$0xff] %v616_v29  ;;  %v620_v31 = vld [vmem:[%s15324_s22 + $0x1cb8] sm:$0xff]  ;;  %v622_v32 = vld [vmem:[%s15324_s22 + $0x1e00] sm:$0xff] }
  0x61   : > { %619 = vst [vmem:[%s15329_s23 + $0x4f0] sm:$0xff] %v618_v30  ;;  %v624_v33 = vld [vmem:[%s15324_s22 + $0x1e08] sm:$0xff]  ;;  %621 = vst [vmem:[%s15329_s23 + $0x4f8] sm:$0xff] %v620_v31  ;;  %v626_v34 = vld [vmem:[%s15324_s22 + $0x1e10] sm:$0xff] }
  0x62   : > { %623 = vst [vmem:[%s15329_s23 + $0x500] sm:$0xff] %v622_v32  ;;  %625 = vst [vmem:[%s15329_s23 + $0x508] sm:$0xff] %v624_v33  ;;  %v628_v35 = vld [vmem:[%s15324_s22 + $0x1e18] sm:$0xff]  ;;  %v630_v36 = vld [vmem:[%s15324_s22 + $0x1e20] sm:$0xff] }
  0x63   : > { %627 = vst [vmem:[%s15329_s23 + $0x510] sm:$0xff] %v626_v34  ;;  %629 = vst [vmem:[%s15329_s23 + $0x518] sm:$0xff] %v628_v35  ;;  %v632_v37 = vld [vmem:[%s15324_s22 + $0x1e28] sm:$0xff]  ;;  %v634_v38 = vld [vmem:[%s15324_s22 + $0x1e30] sm:$0xff] }
  0x64   : > { %631 = vst [vmem:[%s15329_s23 + $0x520] sm:$0xff] %v630_v36  ;;  %v636_v39 = vld [vmem:[%s15324_s22 + $0x1e38] sm:$0xff]  ;;  %633 = vst [vmem:[%s15329_s23 + $0x528] sm:$0xff] %v632_v37  ;;  %v638_v40 = vld [vmem:[%s15324_s22 + $0x1f80] sm:$0xff] }
  0x65   : > { %635 = vst [vmem:[%s15329_s23 + $0x530] sm:$0xff] %v634_v38  ;;  %637 = vst [vmem:[%s15329_s23 + $0x538] sm:$0xff] %v636_v39  ;;  %v640_v41 = vld [vmem:[%s15324_s22 + $0x1f88] sm:$0xff]  ;;  %v642_v42 = vld [vmem:[%s15324_s22 + $0x1f90] sm:$0xff] }
  0x66   : > { %639 = vst [vmem:[%s15329_s23 + $0x540] sm:$0xff] %v638_v40  ;;  %641 = vst [vmem:[%s15329_s23 + $0x548] sm:$0xff] %v640_v41  ;;  %v644_v43 = vld [vmem:[%s15324_s22 + $0x1f98] sm:$0xff]  ;;  %v646_v44 = vld [vmem:[%s15324_s22 + $0x1fa0] sm:$0xff] }
  0x67   : > { %643 = vst [vmem:[%s15329_s23 + $0x550] sm:$0xff] %v642_v42  ;;  %v648_v45 = vld [vmem:[%s15324_s22 + $0x1fa8] sm:$0xff]  ;;  %645 = vst [vmem:[%s15329_s23 + $0x558] sm:$0xff] %v644_v43  ;;  %v650_v46 = vld [vmem:[%s15324_s22 + $0x1fb0] sm:$0xff] }
  0x68   : > { %647 = vst [vmem:[%s15329_s23 + $0x560] sm:$0xff] %v646_v44  ;;  %649 = vst [vmem:[%s15329_s23 + $0x568] sm:$0xff] %v648_v45  ;;  %v652_v47 = vld [vmem:[%s15324_s22 + $0x1fb8] sm:$0xff]  ;;  %v654_v48 = vld [vmem:[%s15324_s22 + $0x2100] sm:$0xff] }
  0x69   : > { %651 = vst [vmem:[%s15329_s23 + $0x570] sm:$0xff] %v650_v46  ;;  %653 = vst [vmem:[%s15329_s23 + $0x578] sm:$0xff] %v652_v47  ;;  %v656_v49 = vld [vmem:[%s15324_s22 + $0x2108] sm:$0xff]  ;;  %v658_v50 = vld [vmem:[%s15324_s22 + $0x2110] sm:$0xff] }
  0x6a   : > { %655 = vst [vmem:[%s15329_s23 + $0x580] sm:$0xff] %v654_v48  ;;  %v660_v51 = vld [vmem:[%s15324_s22 + $0x2118] sm:$0xff]  ;;  %657 = vst [vmem:[%s15329_s23 + $0x588] sm:$0xff] %v656_v49  ;;  %v662_v52 = vld [vmem:[%s15324_s22 + $0x2120] sm:$0xff] }
  0x6b   : > { %659 = vst [vmem:[%s15329_s23 + $0x590] sm:$0xff] %v658_v50  ;;  %661 = vst [vmem:[%s15329_s23 + $0x598] sm:$0xff] %v660_v51  ;;  %v664_v53 = vld [vmem:[%s15324_s22 + $0x2128] sm:$0xff]  ;;  %v666_v54 = vld [vmem:[%s15324_s22 + $0x2130] sm:$0xff] }
  0x6c   : > { %663 = vst [vmem:[%s15329_s23 + $0x5a0] sm:$0xff] %v662_v52  ;;  %665 = vst [vmem:[%s15329_s23 + $0x5a8] sm:$0xff] %v664_v53  ;;  %v668_v55 = vld [vmem:[%s15324_s22 + $0x2138] sm:$0xff]  ;;  %v670_v56 = vld [vmem:[%s15324_s22 + $0x2280] sm:$0xff] }
  0x6d   : > { %667 = vst [vmem:[%s15329_s23 + $0x5b0] sm:$0xff] %v666_v54  ;;  %v672_v57 = vld [vmem:[%s15324_s22 + $0x2288] sm:$0xff]  ;;  %669 = vst [vmem:[%s15329_s23 + $0x5b8] sm:$0xff] %v668_v55  ;;  %v674_v58 = vld [vmem:[%s15324_s22 + $0x2290] sm:$0xff] }
  0x6e   : > { %671 = vst [vmem:[%s15329_s23 + $0x5c0] sm:$0xff] %v670_v56  ;;  %673 = vst [vmem:[%s15329_s23 + $0x5c8] sm:$0xff] %v672_v57  ;;  %v676_v59 = vld [vmem:[%s15324_s22 + $0x2298] sm:$0xff]  ;;  %v678_v60 = vld [vmem:[%s15324_s22 + $0x22a0] sm:$0xff] }
  0x6f   : > { %675 = vst [vmem:[%s15329_s23 + $0x5d0] sm:$0xff] %v674_v58  ;;  %677 = vst [vmem:[%s15329_s23 + $0x5d8] sm:$0xff] %v676_v59  ;;  %v680_v61 = vld [vmem:[%s15324_s22 + $0x22a8] sm:$0xff]  ;;  %v682_v62 = vld [vmem:[%s15324_s22 + $0x22b0] sm:$0xff] }
  0x70   : > { %679 = vst [vmem:[%s15329_s23 + $0x5e0] sm:$0xff] %v678_v60  ;;  %v684_v63 = vld [vmem:[%s15324_s22 + $0x22b8] sm:$0xff]  ;;  %681 = vst [vmem:[%s15329_s23 + $0x5e8] sm:$0xff] %v680_v61  ;;  %v686_v0 = vld [vmem:[%s15324_s22 + $0x2400] sm:$0xff] }
  0x71   : > { %683 = vst [vmem:[%s15329_s23 + $0x5f0] sm:$0xff] %v682_v62  ;;  %685 = vst [vmem:[%s15329_s23 + $0x5f8] sm:$0xff] %v684_v63  ;;  %v688_v1 = vld [vmem:[%s15324_s22 + $0x2408] sm:$0xff]  ;;  %v690_v2 = vld [vmem:[%s15324_s22 + $0x2410] sm:$0xff] }
  0x72   : > { %687 = vst [vmem:[%s15329_s23 + $0x600] sm:$0xff] %v686_v0  ;;  %689 = vst [vmem:[%s15329_s23 + $0x608] sm:$0xff] %v688_v1  ;;  %v692_v3 = vld [vmem:[%s15324_s22 + $0x2418] sm:$0xff]  ;;  %v694_v4 = vld [vmem:[%s15324_s22 + $0x2420] sm:$0xff] }
  0x73   : > { %691 = vst [vmem:[%s15329_s23 + $0x610] sm:$0xff] %v690_v2  ;;  %v696_v5 = vld [vmem:[%s15324_s22 + $0x2428] sm:$0xff]  ;;  %693 = vst [vmem:[%s15329_s23 + $0x618] sm:$0xff] %v692_v3  ;;  %v698_v6 = vld [vmem:[%s15324_s22 + $0x2430] sm:$0xff] }
  0x74   : > { %695 = vst [vmem:[%s15329_s23 + $0x620] sm:$0xff] %v694_v4  ;;  %697 = vst [vmem:[%s15329_s23 + $0x628] sm:$0xff] %v696_v5  ;;  %v700_v7 = vld [vmem:[%s15324_s22 + $0x2438] sm:$0xff]  ;;  %v702_v8 = vld [vmem:[%s15324_s22 + $0x2580] sm:$0xff] }
  0x75   : > { %699 = vst [vmem:[%s15329_s23 + $0x630] sm:$0xff] %v698_v6  ;;  %701 = vst [vmem:[%s15329_s23 + $0x638] sm:$0xff] %v700_v7  ;;  %v704_v9 = vld [vmem:[%s15324_s22 + $0x2588] sm:$0xff]  ;;  %v706_v10 = vld [vmem:[%s15324_s22 + $0x2590] sm:$0xff] }
  0x76   : > { %703 = vst [vmem:[%s15329_s23 + $0x640] sm:$0xff] %v702_v8  ;;  %v708_v11 = vld [vmem:[%s15324_s22 + $0x2598] sm:$0xff]  ;;  %705 = vst [vmem:[%s15329_s23 + $0x648] sm:$0xff] %v704_v9  ;;  %v710_v12 = vld [vmem:[%s15324_s22 + $0x25a0] sm:$0xff] }
  0x77   : > { %707 = vst [vmem:[%s15329_s23 + $0x650] sm:$0xff] %v706_v10  ;;  %709 = vst [vmem:[%s15329_s23 + $0x658] sm:$0xff] %v708_v11  ;;  %v712_v13 = vld [vmem:[%s15324_s22 + $0x25a8] sm:$0xff]  ;;  %v714_v14 = vld [vmem:[%s15324_s22 + $0x25b0] sm:$0xff] }
  0x78   : > { %711 = vst [vmem:[%s15329_s23 + $0x660] sm:$0xff] %v710_v12  ;;  %713 = vst [vmem:[%s15329_s23 + $0x668] sm:$0xff] %v712_v13  ;;  %v716_v15 = vld [vmem:[%s15324_s22 + $0x25b8] sm:$0xff]  ;;  %v718_v16 = vld [vmem:[%s15324_s22 + $0x2700] sm:$0xff] }
  0x79   : > { %715 = vst [vmem:[%s15329_s23 + $0x670] sm:$0xff] %v714_v14  ;;  %v720_v17 = vld [vmem:[%s15324_s22 + $0x2708] sm:$0xff]  ;;  %717 = vst [vmem:[%s15329_s23 + $0x678] sm:$0xff] %v716_v15  ;;  %v722_v18 = vld [vmem:[%s15324_s22 + $0x2710] sm:$0xff] }
  0x7a   : > { %719 = vst [vmem:[%s15329_s23 + $0x680] sm:$0xff] %v718_v16  ;;  %721 = vst [vmem:[%s15329_s23 + $0x688] sm:$0xff] %v720_v17  ;;  %v724_v19 = vld [vmem:[%s15324_s22 + $0x2718] sm:$0xff]  ;;  %v726_v20 = vld [vmem:[%s15324_s22 + $0x2720] sm:$0xff] }
  0x7b   : > { %723 = vst [vmem:[%s15329_s23 + $0x690] sm:$0xff] %v722_v18  ;;  %725 = vst [vmem:[%s15329_s23 + $0x698] sm:$0xff] %v724_v19  ;;  %v728_v21 = vld [vmem:[%s15324_s22 + $0x2728] sm:$0xff]  ;;  %v730_v22 = vld [vmem:[%s15324_s22 + $0x2730] sm:$0xff] }
  0x7c   : > { %727 = vst [vmem:[%s15329_s23 + $0x6a0] sm:$0xff] %v726_v20  ;;  %v732_v23 = vld [vmem:[%s15324_s22 + $0x2738] sm:$0xff]  ;;  %729 = vst [vmem:[%s15329_s23 + $0x6a8] sm:$0xff] %v728_v21  ;;  %v734_v24 = vld [vmem:[%s15324_s22 + $0x2880] sm:$0xff] }
  0x7d   : > { %731 = vst [vmem:[%s15329_s23 + $0x6b0] sm:$0xff] %v730_v22  ;;  %733 = vst [vmem:[%s15329_s23 + $0x6b8] sm:$0xff] %v732_v23  ;;  %v736_v25 = vld [vmem:[%s15324_s22 + $0x2888] sm:$0xff]  ;;  %v738_v26 = vld [vmem:[%s15324_s22 + $0x2890] sm:$0xff] }
  0x7e   : > { %735 = vst [vmem:[%s15329_s23 + $0x6c0] sm:$0xff] %v734_v24  ;;  %737 = vst [vmem:[%s15329_s23 + $0x6c8] sm:$0xff] %v736_v25  ;;  %v740_v27 = vld [vmem:[%s15324_s22 + $0x2898] sm:$0xff]  ;;  %v742_v28 = vld [vmem:[%s15324_s22 + $0x28a0] sm:$0xff] }
  0x7f   : > { %739 = vst [vmem:[%s15329_s23 + $0x6d0] sm:$0xff] %v738_v26  ;;  %v744_v29 = vld [vmem:[%s15324_s22 + $0x28a8] sm:$0xff]  ;;  %741 = vst [vmem:[%s15329_s23 + $0x6d8] sm:$0xff] %v740_v27  ;;  %v746_v30 = vld [vmem:[%s15324_s22 + $0x28b0] sm:$0xff] }
  0x80   : > { %743 = vst [vmem:[%s15329_s23 + $0x6e0] sm:$0xff] %v742_v28  ;;  %745 = vst [vmem:[%s15329_s23 + $0x6e8] sm:$0xff] %v744_v29  ;;  %v748_v31 = vld [vmem:[%s15324_s22 + $0x28b8] sm:$0xff]  ;;  %v750_v32 = vld [vmem:[%s15324_s22 + $0x2a00] sm:$0xff] }
  0x81   : > { %747 = vst [vmem:[%s15329_s23 + $0x6f0] sm:$0xff] %v746_v30  ;;  %749 = vst [vmem:[%s15329_s23 + $0x6f8] sm:$0xff] %v748_v31  ;;  %v752_v33 = vld [vmem:[%s15324_s22 + $0x2a08] sm:$0xff]  ;;  %v754_v34 = vld [vmem:[%s15324_s22 + $0x2a10] sm:$0xff] }
  0x82   : > { %751 = vst [vmem:[%s15329_s23 + $0x700] sm:$0xff] %v750_v32  ;;  %v756_v35 = vld [vmem:[%s15324_s22 + $0x2a18] sm:$0xff]  ;;  %753 = vst [vmem:[%s15329_s23 + $0x708] sm:$0xff] %v752_v33  ;;  %v758_v36 = vld [vmem:[%s15324_s22 + $0x2a20] sm:$0xff] }
  0x83   : > { %755 = vst [vmem:[%s15329_s23 + $0x710] sm:$0xff] %v754_v34  ;;  %757 = vst [vmem:[%s15329_s23 + $0x718] sm:$0xff] %v756_v35  ;;  %v760_v37 = vld [vmem:[%s15324_s22 + $0x2a28] sm:$0xff]  ;;  %v762_v38 = vld [vmem:[%s15324_s22 + $0x2a30] sm:$0xff] }
  0x84   : > { %759 = vst [vmem:[%s15329_s23 + $0x720] sm:$0xff] %v758_v36  ;;  %761 = vst [vmem:[%s15329_s23 + $0x728] sm:$0xff] %v760_v37  ;;  %v764_v39 = vld [vmem:[%s15324_s22 + $0x2a38] sm:$0xff]  ;;  %v766_v40 = vld [vmem:[%s15324_s22 + $0x2b80] sm:$0xff] }
  0x85   : > { %763 = vst [vmem:[%s15329_s23 + $0x730] sm:$0xff] %v762_v38  ;;  %v768_v41 = vld [vmem:[%s15324_s22 + $0x2b88] sm:$0xff]  ;;  %765 = vst [vmem:[%s15329_s23 + $0x738] sm:$0xff] %v764_v39  ;;  %v770_v42 = vld [vmem:[%s15324_s22 + $0x2b90] sm:$0xff] }
  0x86   : > { %767 = vst [vmem:[%s15329_s23 + $0x740] sm:$0xff] %v766_v40  ;;  %769 = vst [vmem:[%s15329_s23 + $0x748] sm:$0xff] %v768_v41  ;;  %v772_v43 = vld [vmem:[%s15324_s22 + $0x2b98] sm:$0xff]  ;;  %v774_v44 = vld [vmem:[%s15324_s22 + $0x2ba0] sm:$0xff] }
  0x87   : > { %771 = vst [vmem:[%s15329_s23 + $0x750] sm:$0xff] %v770_v42  ;;  %773 = vst [vmem:[%s15329_s23 + $0x758] sm:$0xff] %v772_v43  ;;  %v776_v45 = vld [vmem:[%s15324_s22 + $0x2ba8] sm:$0xff]  ;;  %v778_v46 = vld [vmem:[%s15324_s22 + $0x2bb0] sm:$0xff] }
  0x88   : > { %775 = vst [vmem:[%s15329_s23 + $0x760] sm:$0xff] %v774_v44  ;;  %v780_v47 = vld [vmem:[%s15324_s22 + $0x2bb8] sm:$0xff]  ;;  %777 = vst [vmem:[%s15329_s23 + $0x768] sm:$0xff] %v776_v45  ;;  %v782_v48 = vld [vmem:[%s15324_s22 + $0x2d00] sm:$0xff] }
  0x89   : > { %779 = vst [vmem:[%s15329_s23 + $0x770] sm:$0xff] %v778_v46  ;;  %781 = vst [vmem:[%s15329_s23 + $0x778] sm:$0xff] %v780_v47  ;;  %v784_v49 = vld [vmem:[%s15324_s22 + $0x2d08] sm:$0xff]  ;;  %v786_v50 = vld [vmem:[%s15324_s22 + $0x2d10] sm:$0xff] }
  0x8a   : > { %783 = vst [vmem:[%s15329_s23 + $0x780] sm:$0xff] %v782_v48  ;;  %785 = vst [vmem:[%s15329_s23 + $0x788] sm:$0xff] %v784_v49  ;;  %v788_v51 = vld [vmem:[%s15324_s22 + $0x2d18] sm:$0xff]  ;;  %v790_v52 = vld [vmem:[%s15324_s22 + $0x2d20] sm:$0xff] }
  0x8b   : > { %787 = vst [vmem:[%s15329_s23 + $0x790] sm:$0xff] %v786_v50  ;;  %v792_v53 = vld [vmem:[%s15324_s22 + $0x2d28] sm:$0xff]  ;;  %789 = vst [vmem:[%s15329_s23 + $0x798] sm:$0xff] %v788_v51  ;;  %v794_v54 = vld [vmem:[%s15324_s22 + $0x2d30] sm:$0xff] }
  0x8c   : > { %791 = vst [vmem:[%s15329_s23 + $0x7a0] sm:$0xff] %v790_v52  ;;  %793 = vst [vmem:[%s15329_s23 + $0x7a8] sm:$0xff] %v792_v53  ;;  %v796_v55 = vld [vmem:[%s15324_s22 + $0x2d38] sm:$0xff]  ;;  %v798_v56 = vld [vmem:[%s15324_s22 + $0x2e80] sm:$0xff] }
  0x8d   : > { %795 = vst [vmem:[%s15329_s23 + $0x7b0] sm:$0xff] %v794_v54  ;;  %797 = vst [vmem:[%s15329_s23 + $0x7b8] sm:$0xff] %v796_v55  ;;  %v800_v57 = vld [vmem:[%s15324_s22 + $0x2e88] sm:$0xff]  ;;  %v802_v58 = vld [vmem:[%s15324_s22 + $0x2e90] sm:$0xff] }
  0x8e   : > { %799 = vst [vmem:[%s15329_s23 + $0x7c0] sm:$0xff] %v798_v56  ;;  %v804_v59 = vld [vmem:[%s15324_s22 + $0x2e98] sm:$0xff]  ;;  %801 = vst [vmem:[%s15329_s23 + $0x7c8] sm:$0xff] %v800_v57  ;;  %v806_v60 = vld [vmem:[%s15324_s22 + $0x2ea0] sm:$0xff] }
  0x8f   : > { %803 = vst [vmem:[%s15329_s23 + $0x7d0] sm:$0xff] %v802_v58  ;;  %805 = vst [vmem:[%s15329_s23 + $0x7d8] sm:$0xff] %v804_v59  ;;  %v808_v61 = vld [vmem:[%s15324_s22 + $0x2ea8] sm:$0xff]  ;;  %v810_v62 = vld [vmem:[%s15324_s22 + $0x2eb0] sm:$0xff] }
  0x90   : > { %807 = vst [vmem:[%s15329_s23 + $0x7e0] sm:$0xff] %v806_v60  ;;  %809 = vst [vmem:[%s15329_s23 + $0x7e8] sm:$0xff] %v808_v61  ;;  %v812_v63 = vld [vmem:[%s15324_s22 + $0x2eb8] sm:$0xff]  ;;  %v814_v0 = vld [vmem:[%s15324_s22 + $0x3000] sm:$0xff] }
  0x91   : > { %811 = vst [vmem:[%s15329_s23 + $0x7f0] sm:$0xff] %v810_v62  ;;  %v816_v1 = vld [vmem:[%s15324_s22 + $0x3008] sm:$0xff]  ;;  %813 = vst [vmem:[%s15329_s23 + $0x7f8] sm:$0xff] %v812_v63  ;;  %v818_v2 = vld [vmem:[%s15324_s22 + $0x3010] sm:$0xff] }
  0x92   : > { %815 = vst [vmem:[%s15329_s23 + $0x800] sm:$0xff] %v814_v0  ;;  %817 = vst [vmem:[%s15329_s23 + $0x808] sm:$0xff] %v816_v1  ;;  %v820_v3 = vld [vmem:[%s15324_s22 + $0x3018] sm:$0xff]  ;;  %v822_v4 = vld [vmem:[%s15324_s22 + $0x3020] sm:$0xff] }
  0x93   : > { %819 = vst [vmem:[%s15329_s23 + $0x810] sm:$0xff] %v818_v2  ;;  %821 = vst [vmem:[%s15329_s23 + $0x818] sm:$0xff] %v820_v3  ;;  %v824_v5 = vld [vmem:[%s15324_s22 + $0x3028] sm:$0xff]  ;;  %v826_v6 = vld [vmem:[%s15324_s22 + $0x3030] sm:$0xff] }
  0x94   : > { %823 = vst [vmem:[%s15329_s23 + $0x820] sm:$0xff] %v822_v4  ;;  %v828_v7 = vld [vmem:[%s15324_s22 + $0x3038] sm:$0xff]  ;;  %825 = vst [vmem:[%s15329_s23 + $0x828] sm:$0xff] %v824_v5  ;;  %v830_v8 = vld [vmem:[%s15324_s22 + $0x3180] sm:$0xff] }
  0x95   : > { %827 = vst [vmem:[%s15329_s23 + $0x830] sm:$0xff] %v826_v6  ;;  %829 = vst [vmem:[%s15329_s23 + $0x838] sm:$0xff] %v828_v7  ;;  %v832_v9 = vld [vmem:[%s15324_s22 + $0x3188] sm:$0xff]  ;;  %v834_v10 = vld [vmem:[%s15324_s22 + $0x3190] sm:$0xff] }
  0x96   : > { %831 = vst [vmem:[%s15329_s23 + $0x840] sm:$0xff] %v830_v8  ;;  %833 = vst [vmem:[%s15329_s23 + $0x848] sm:$0xff] %v832_v9  ;;  %v836_v11 = vld [vmem:[%s15324_s22 + $0x3198] sm:$0xff]  ;;  %v838_v12 = vld [vmem:[%s15324_s22 + $0x31a0] sm:$0xff] }
  0x97   : > { %835 = vst [vmem:[%s15329_s23 + $0x850] sm:$0xff] %v834_v10  ;;  %v840_v13 = vld [vmem:[%s15324_s22 + $0x31a8] sm:$0xff]  ;;  %837 = vst [vmem:[%s15329_s23 + $0x858] sm:$0xff] %v836_v11  ;;  %v842_v14 = vld [vmem:[%s15324_s22 + $0x31b0] sm:$0xff] }
  0x98   : > { %839 = vst [vmem:[%s15329_s23 + $0x860] sm:$0xff] %v838_v12  ;;  %841 = vst [vmem:[%s15329_s23 + $0x868] sm:$0xff] %v840_v13  ;;  %v844_v15 = vld [vmem:[%s15324_s22 + $0x31b8] sm:$0xff]  ;;  %v846_v16 = vld [vmem:[%s15324_s22 + $0x3300] sm:$0xff] }
  0x99   : > { %843 = vst [vmem:[%s15329_s23 + $0x870] sm:$0xff] %v842_v14  ;;  %845 = vst [vmem:[%s15329_s23 + $0x878] sm:$0xff] %v844_v15  ;;  %v848_v17 = vld [vmem:[%s15324_s22 + $0x3308] sm:$0xff]  ;;  %v850_v18 = vld [vmem:[%s15324_s22 + $0x3310] sm:$0xff] }
  0x9a   : > { %847 = vst [vmem:[%s15329_s23 + $0x880] sm:$0xff] %v846_v16  ;;  %v852_v19 = vld [vmem:[%s15324_s22 + $0x3318] sm:$0xff]  ;;  %849 = vst [vmem:[%s15329_s23 + $0x888] sm:$0xff] %v848_v17  ;;  %v854_v20 = vld [vmem:[%s15324_s22 + $0x3320] sm:$0xff] }
  0x9b   : > { %851 = vst [vmem:[%s15329_s23 + $0x890] sm:$0xff] %v850_v18  ;;  %853 = vst [vmem:[%s15329_s23 + $0x898] sm:$0xff] %v852_v19  ;;  %v856_v21 = vld [vmem:[%s15324_s22 + $0x3328] sm:$0xff]  ;;  %v858_v22 = vld [vmem:[%s15324_s22 + $0x3330] sm:$0xff] }
  0x9c   : > { %855 = vst [vmem:[%s15329_s23 + $0x8a0] sm:$0xff] %v854_v20  ;;  %857 = vst [vmem:[%s15329_s23 + $0x8a8] sm:$0xff] %v856_v21  ;;  %v860_v23 = vld [vmem:[%s15324_s22 + $0x3338] sm:$0xff]  ;;  %v862_v24 = vld [vmem:[%s15324_s22 + $0x3480] sm:$0xff] }
  0x9d   : > { %859 = vst [vmem:[%s15329_s23 + $0x8b0] sm:$0xff] %v858_v22  ;;  %v864_v25 = vld [vmem:[%s15324_s22 + $0x3488] sm:$0xff]  ;;  %861 = vst [vmem:[%s15329_s23 + $0x8b8] sm:$0xff] %v860_v23  ;;  %v866_v26 = vld [vmem:[%s15324_s22 + $0x3490] sm:$0xff] }
  0x9e   : > { %863 = vst [vmem:[%s15329_s23 + $0x8c0] sm:$0xff] %v862_v24  ;;  %865 = vst [vmem:[%s15329_s23 + $0x8c8] sm:$0xff] %v864_v25  ;;  %v868_v27 = vld [vmem:[%s15324_s22 + $0x3498] sm:$0xff]  ;;  %v870_v28 = vld [vmem:[%s15324_s22 + $0x34a0] sm:$0xff] }
  0x9f   : > { %867 = vst [vmem:[%s15329_s23 + $0x8d0] sm:$0xff] %v866_v26  ;;  %869 = vst [vmem:[%s15329_s23 + $0x8d8] sm:$0xff] %v868_v27  ;;  %v872_v29 = vld [vmem:[%s15324_s22 + $0x34a8] sm:$0xff]  ;;  %v874_v30 = vld [vmem:[%s15324_s22 + $0x34b0] sm:$0xff] }
  0xa0   : > { %871 = vst [vmem:[%s15329_s23 + $0x8e0] sm:$0xff] %v870_v28  ;;  %v876_v31 = vld [vmem:[%s15324_s22 + $0x34b8] sm:$0xff]  ;;  %873 = vst [vmem:[%s15329_s23 + $0x8e8] sm:$0xff] %v872_v29  ;;  %v878_v32 = vld [vmem:[%s15324_s22 + $0x3600] sm:$0xff] }
  0xa1   : > { %875 = vst [vmem:[%s15329_s23 + $0x8f0] sm:$0xff] %v874_v30  ;;  %877 = vst [vmem:[%s15329_s23 + $0x8f8] sm:$0xff] %v876_v31  ;;  %v880_v33 = vld [vmem:[%s15324_s22 + $0x3608] sm:$0xff]  ;;  %v882_v34 = vld [vmem:[%s15324_s22 + $0x3610] sm:$0xff] }
  0xa2   : > { %879 = vst [vmem:[%s15329_s23 + $0x900] sm:$0xff] %v878_v32  ;;  %881 = vst [vmem:[%s15329_s23 + $0x908] sm:$0xff] %v880_v33  ;;  %v884_v35 = vld [vmem:[%s15324_s22 + $0x3618] sm:$0xff]  ;;  %v886_v36 = vld [vmem:[%s15324_s22 + $0x3620] sm:$0xff] }
  0xa3   : > { %883 = vst [vmem:[%s15329_s23 + $0x910] sm:$0xff] %v882_v34  ;;  %v888_v37 = vld [vmem:[%s15324_s22 + $0x3628] sm:$0xff]  ;;  %885 = vst [vmem:[%s15329_s23 + $0x918] sm:$0xff] %v884_v35  ;;  %v890_v38 = vld [vmem:[%s15324_s22 + $0x3630] sm:$0xff] }
  0xa4   : > { %887 = vst [vmem:[%s15329_s23 + $0x920] sm:$0xff] %v886_v36  ;;  %889 = vst [vmem:[%s15329_s23 + $0x928] sm:$0xff] %v888_v37  ;;  %v892_v39 = vld [vmem:[%s15324_s22 + $0x3638] sm:$0xff]  ;;  %v894_v40 = vld [vmem:[%s15324_s22 + $0x3780] sm:$0xff] }
  0xa5   : > { %891 = vst [vmem:[%s15329_s23 + $0x930] sm:$0xff] %v890_v38  ;;  %893 = vst [vmem:[%s15329_s23 + $0x938] sm:$0xff] %v892_v39  ;;  %v896_v41 = vld [vmem:[%s15324_s22 + $0x3788] sm:$0xff]  ;;  %v898_v42 = vld [vmem:[%s15324_s22 + $0x3790] sm:$0xff] }
  0xa6   : > { %895 = vst [vmem:[%s15329_s23 + $0x940] sm:$0xff] %v894_v40  ;;  %v900_v43 = vld [vmem:[%s15324_s22 + $0x3798] sm:$0xff]  ;;  %897 = vst [vmem:[%s15329_s23 + $0x948] sm:$0xff] %v896_v41  ;;  %v902_v44 = vld [vmem:[%s15324_s22 + $0x37a0] sm:$0xff] }
  0xa7   : > { %899 = vst [vmem:[%s15329_s23 + $0x950] sm:$0xff] %v898_v42  ;;  %901 = vst [vmem:[%s15329_s23 + $0x958] sm:$0xff] %v900_v43  ;;  %v904_v45 = vld [vmem:[%s15324_s22 + $0x37a8] sm:$0xff]  ;;  %v906_v46 = vld [vmem:[%s15324_s22 + $0x37b0] sm:$0xff] }
  0xa8   : > { %903 = vst [vmem:[%s15329_s23 + $0x960] sm:$0xff] %v902_v44  ;;  %905 = vst [vmem:[%s15329_s23 + $0x968] sm:$0xff] %v904_v45  ;;  %v908_v47 = vld [vmem:[%s15324_s22 + $0x37b8] sm:$0xff]  ;;  %v910_v48 = vld [vmem:[%s15324_s22 + $0x3900] sm:$0xff] }
  0xa9   : > { %907 = vst [vmem:[%s15329_s23 + $0x970] sm:$0xff] %v906_v46  ;;  %v912_v49 = vld [vmem:[%s15324_s22 + $0x3908] sm:$0xff]  ;;  %909 = vst [vmem:[%s15329_s23 + $0x978] sm:$0xff] %v908_v47  ;;  %v914_v50 = vld [vmem:[%s15324_s22 + $0x3910] sm:$0xff] }
  0xaa   : > { %911 = vst [vmem:[%s15329_s23 + $0x980] sm:$0xff] %v910_v48  ;;  %913 = vst [vmem:[%s15329_s23 + $0x988] sm:$0xff] %v912_v49  ;;  %v916_v51 = vld [vmem:[%s15324_s22 + $0x3918] sm:$0xff]  ;;  %v918_v52 = vld [vmem:[%s15324_s22 + $0x3920] sm:$0xff] }
  0xab   : > { %915 = vst [vmem:[%s15329_s23 + $0x990] sm:$0xff] %v914_v50  ;;  %917 = vst [vmem:[%s15329_s23 + $0x998] sm:$0xff] %v916_v51  ;;  %v920_v53 = vld [vmem:[%s15324_s22 + $0x3928] sm:$0xff]  ;;  %v922_v54 = vld [vmem:[%s15324_s22 + $0x3930] sm:$0xff] }
  0xac   : > { %919 = vst [vmem:[%s15329_s23 + $0x9a0] sm:$0xff] %v918_v52  ;;  %v924_v55 = vld [vmem:[%s15324_s22 + $0x3938] sm:$0xff]  ;;  %921 = vst [vmem:[%s15329_s23 + $0x9a8] sm:$0xff] %v920_v53  ;;  %v926_v56 = vld [vmem:[%s15324_s22 + $0x3a80] sm:$0xff] }
  0xad   : > { %923 = vst [vmem:[%s15329_s23 + $0x9b0] sm:$0xff] %v922_v54  ;;  %925 = vst [vmem:[%s15329_s23 + $0x9b8] sm:$0xff] %v924_v55  ;;  %v928_v57 = vld [vmem:[%s15324_s22 + $0x3a88] sm:$0xff]  ;;  %v930_v58 = vld [vmem:[%s15324_s22 + $0x3a90] sm:$0xff] }
  0xae   : > { %927 = vst [vmem:[%s15329_s23 + $0x9c0] sm:$0xff] %v926_v56  ;;  %929 = vst [vmem:[%s15329_s23 + $0x9c8] sm:$0xff] %v928_v57  ;;  %v932_v59 = vld [vmem:[%s15324_s22 + $0x3a98] sm:$0xff]  ;;  %v934_v60 = vld [vmem:[%s15324_s22 + $0x3aa0] sm:$0xff] }
  0xaf   : > { %931 = vst [vmem:[%s15329_s23 + $0x9d0] sm:$0xff] %v930_v58  ;;  %v936_v61 = vld [vmem:[%s15324_s22 + $0x3aa8] sm:$0xff]  ;;  %933 = vst [vmem:[%s15329_s23 + $0x9d8] sm:$0xff] %v932_v59  ;;  %v938_v62 = vld [vmem:[%s15324_s22 + $0x3ab0] sm:$0xff] }
  0xb0   : > { %935 = vst [vmem:[%s15329_s23 + $0x9e0] sm:$0xff] %v934_v60  ;;  %937 = vst [vmem:[%s15329_s23 + $0x9e8] sm:$0xff] %v936_v61  ;;  %v940_v63 = vld [vmem:[%s15324_s22 + $0x3ab8] sm:$0xff]  ;;  %v942_v0 = vld [vmem:[%s15324_s22 + $0x3c00] sm:$0xff] }
  0xb1   : > { %939 = vst [vmem:[%s15329_s23 + $0x9f0] sm:$0xff] %v938_v62  ;;  %941 = vst [vmem:[%s15329_s23 + $0x9f8] sm:$0xff] %v940_v63  ;;  %v944_v1 = vld [vmem:[%s15324_s22 + $0x3c08] sm:$0xff]  ;;  %v946_v2 = vld [vmem:[%s15324_s22 + $0x3c10] sm:$0xff] }
  0xb2   : > { %943 = vst [vmem:[%s15329_s23 + $0xa00] sm:$0xff] %v942_v0  ;;  %v948_v3 = vld [vmem:[%s15324_s22 + $0x3c18] sm:$0xff]  ;;  %945 = vst [vmem:[%s15329_s23 + $0xa08] sm:$0xff] %v944_v1  ;;  %v950_v4 = vld [vmem:[%s15324_s22 + $0x3c20] sm:$0xff] }
  0xb3   : > { %947 = vst [vmem:[%s15329_s23 + $0xa10] sm:$0xff] %v946_v2  ;;  %949 = vst [vmem:[%s15329_s23 + $0xa18] sm:$0xff] %v948_v3  ;;  %v952_v5 = vld [vmem:[%s15324_s22 + $0x3c28] sm:$0xff]  ;;  %v954_v6 = vld [vmem:[%s15324_s22 + $0x3c30] sm:$0xff] }
  0xb4   : > { %951 = vst [vmem:[%s15329_s23 + $0xa20] sm:$0xff] %v950_v4  ;;  %953 = vst [vmem:[%s15329_s23 + $0xa28] sm:$0xff] %v952_v5  ;;  %v956_v7 = vld [vmem:[%s15324_s22 + $0x3c38] sm:$0xff]  ;;  %v958_v8 = vld [vmem:[%s15324_s22 + $0x3d80] sm:$0xff] }
  0xb5   : > { %955 = vst [vmem:[%s15329_s23 + $0xa30] sm:$0xff] %v954_v6  ;;  %v960_v9 = vld [vmem:[%s15324_s22 + $0x3d88] sm:$0xff]  ;;  %957 = vst [vmem:[%s15329_s23 + $0xa38] sm:$0xff] %v956_v7  ;;  %v962_v10 = vld [vmem:[%s15324_s22 + $0x3d90] sm:$0xff] }
  0xb6   : > { %959 = vst [vmem:[%s15329_s23 + $0xa40] sm:$0xff] %v958_v8  ;;  %961 = vst [vmem:[%s15329_s23 + $0xa48] sm:$0xff] %v960_v9  ;;  %v964_v11 = vld [vmem:[%s15324_s22 + $0x3d98] sm:$0xff]  ;;  %v966_v12 = vld [vmem:[%s15324_s22 + $0x3da0] sm:$0xff] }
  0xb7   : > { %963 = vst [vmem:[%s15329_s23 + $0xa50] sm:$0xff] %v962_v10  ;;  %965 = vst [vmem:[%s15329_s23 + $0xa58] sm:$0xff] %v964_v11  ;;  %v968_v13 = vld [vmem:[%s15324_s22 + $0x3da8] sm:$0xff]  ;;  %v970_v14 = vld [vmem:[%s15324_s22 + $0x3db0] sm:$0xff] }
  0xb8   : > { %967 = vst [vmem:[%s15329_s23 + $0xa60] sm:$0xff] %v966_v12  ;;  %v972_v15 = vld [vmem:[%s15324_s22 + $0x3db8] sm:$0xff]  ;;  %969 = vst [vmem:[%s15329_s23 + $0xa68] sm:$0xff] %v968_v13  ;;  %v974_v16 = vld [vmem:[%s15324_s22 + $0x3f00] sm:$0xff] }
  0xb9   : > { %971 = vst [vmem:[%s15329_s23 + $0xa70] sm:$0xff] %v970_v14  ;;  %973 = vst [vmem:[%s15329_s23 + $0xa78] sm:$0xff] %v972_v15  ;;  %v976_v17 = vld [vmem:[%s15324_s22 + $0x3f08] sm:$0xff]  ;;  %v978_v18 = vld [vmem:[%s15324_s22 + $0x3f10] sm:$0xff] }
  0xba   : > { %975 = vst [vmem:[%s15329_s23 + $0xa80] sm:$0xff] %v974_v16  ;;  %977 = vst [vmem:[%s15329_s23 + $0xa88] sm:$0xff] %v976_v17  ;;  %v980_v19 = vld [vmem:[%s15324_s22 + $0x3f18] sm:$0xff]  ;;  %v982_v20 = vld [vmem:[%s15324_s22 + $0x3f20] sm:$0xff] }
  0xbb   : > { %979 = vst [vmem:[%s15329_s23 + $0xa90] sm:$0xff] %v978_v18  ;;  %v984_v21 = vld [vmem:[%s15324_s22 + $0x3f28] sm:$0xff]  ;;  %981 = vst [vmem:[%s15329_s23 + $0xa98] sm:$0xff] %v980_v19  ;;  %v986_v22 = vld [vmem:[%s15324_s22 + $0x3f30] sm:$0xff] }
  0xbc   : > { %983 = vst [vmem:[%s15329_s23 + $0xaa0] sm:$0xff] %v982_v20  ;;  %985 = vst [vmem:[%s15329_s23 + $0xaa8] sm:$0xff] %v984_v21  ;;  %v988_v23 = vld [vmem:[%s15324_s22 + $0x3f38] sm:$0xff]  ;;  %v990_v24 = vld [vmem:[%s15324_s22 + $0x4080] sm:$0xff] }
  0xbd   : > { %987 = vst [vmem:[%s15329_s23 + $0xab0] sm:$0xff] %v986_v22  ;;  %989 = vst [vmem:[%s15329_s23 + $0xab8] sm:$0xff] %v988_v23  ;;  %v992_v25 = vld [vmem:[%s15324_s22 + $0x4088] sm:$0xff]  ;;  %v994_v26 = vld [vmem:[%s15324_s22 + $0x4090] sm:$0xff] }
  0xbe   : > { %991 = vst [vmem:[%s15329_s23 + $0xac0] sm:$0xff] %v990_v24  ;;  %v996_v27 = vld [vmem:[%s15324_s22 + $0x4098] sm:$0xff]  ;;  %993 = vst [vmem:[%s15329_s23 + $0xac8] sm:$0xff] %v992_v25  ;;  %v998_v28 = vld [vmem:[%s15324_s22 + $0x40a0] sm:$0xff] }
  0xbf   : > { %995 = vst [vmem:[%s15329_s23 + $0xad0] sm:$0xff] %v994_v26  ;;  %997 = vst [vmem:[%s15329_s23 + $0xad8] sm:$0xff] %v996_v27  ;;  %v1000_v29 = vld [vmem:[%s15324_s22 + $0x40a8] sm:$0xff]  ;;  %v1002_v30 = vld [vmem:[%s15324_s22 + $0x40b0] sm:$0xff] }
  0xc0   : > { %999 = vst [vmem:[%s15329_s23 + $0xae0] sm:$0xff] %v998_v28  ;;  %1001 = vst [vmem:[%s15329_s23 + $0xae8] sm:$0xff] %v1000_v29  ;;  %v1004_v31 = vld [vmem:[%s15324_s22 + $0x40b8] sm:$0xff]  ;;  %v1006_v32 = vld [vmem:[%s15324_s22 + $0x4200] sm:$0xff] }
  0xc1   : > { %1003 = vst [vmem:[%s15329_s23 + $0xaf0] sm:$0xff] %v1002_v30  ;;  %v1008_v33 = vld [vmem:[%s15324_s22 + $0x4208] sm:$0xff]  ;;  %1005 = vst [vmem:[%s15329_s23 + $0xaf8] sm:$0xff] %v1004_v31  ;;  %v1010_v34 = vld [vmem:[%s15324_s22 + $0x4210] sm:$0xff] }
  0xc2   : > { %1007 = vst [vmem:[%s15329_s23 + $0xb00] sm:$0xff] %v1006_v32  ;;  %1009 = vst [vmem:[%s15329_s23 + $0xb08] sm:$0xff] %v1008_v33  ;;  %v1012_v35 = vld [vmem:[%s15324_s22 + $0x4218] sm:$0xff]  ;;  %v1014_v36 = vld [vmem:[%s15324_s22 + $0x4220] sm:$0xff] }
  0xc3   : > { %1011 = vst [vmem:[%s15329_s23 + $0xb10] sm:$0xff] %v1010_v34  ;;  %1013 = vst [vmem:[%s15329_s23 + $0xb18] sm:$0xff] %v1012_v35  ;;  %v1016_v37 = vld [vmem:[%s15324_s22 + $0x4228] sm:$0xff]  ;;  %v1018_v38 = vld [vmem:[%s15324_s22 + $0x4230] sm:$0xff] }
  0xc4   : > { %1015 = vst [vmem:[%s15329_s23 + $0xb20] sm:$0xff] %v1014_v36  ;;  %v1020_v39 = vld [vmem:[%s15324_s22 + $0x4238] sm:$0xff]  ;;  %1017 = vst [vmem:[%s15329_s23 + $0xb28] sm:$0xff] %v1016_v37  ;;  %v1022_v40 = vld [vmem:[%s15324_s22 + $0x4380] sm:$0xff] }
  0xc5   : > { %1019 = vst [vmem:[%s15329_s23 + $0xb30] sm:$0xff] %v1018_v38  ;;  %1021 = vst [vmem:[%s15329_s23 + $0xb38] sm:$0xff] %v1020_v39  ;;  %v1024_v41 = vld [vmem:[%s15324_s22 + $0x4388] sm:$0xff]  ;;  %v1026_v42 = vld [vmem:[%s15324_s22 + $0x4390] sm:$0xff] }
  0xc6   : > { %1023 = vst [vmem:[%s15329_s23 + $0xb40] sm:$0xff] %v1022_v40  ;;  %1025 = vst [vmem:[%s15329_s23 + $0xb48] sm:$0xff] %v1024_v41  ;;  %v1028_v43 = vld [vmem:[%s15324_s22 + $0x4398] sm:$0xff]  ;;  %v1030_v44 = vld [vmem:[%s15324_s22 + $0x43a0] sm:$0xff] }
  0xc7   : > { %1027 = vst [vmem:[%s15329_s23 + $0xb50] sm:$0xff] %v1026_v42  ;;  %v1032_v45 = vld [vmem:[%s15324_s22 + $0x43a8] sm:$0xff]  ;;  %1029 = vst [vmem:[%s15329_s23 + $0xb58] sm:$0xff] %v1028_v43  ;;  %v1034_v46 = vld [vmem:[%s15324_s22 + $0x43b0] sm:$0xff] }
  0xc8   : > { %1031 = vst [vmem:[%s15329_s23 + $0xb60] sm:$0xff] %v1030_v44  ;;  %1033 = vst [vmem:[%s15329_s23 + $0xb68] sm:$0xff] %v1032_v45  ;;  %v1036_v47 = vld [vmem:[%s15324_s22 + $0x43b8] sm:$0xff]  ;;  %v1038_v48 = vld [vmem:[%s15324_s22 + $0x4500] sm:$0xff] }
  0xc9   : > { %1035 = vst [vmem:[%s15329_s23 + $0xb70] sm:$0xff] %v1034_v46  ;;  %1037 = vst [vmem:[%s15329_s23 + $0xb78] sm:$0xff] %v1036_v47  ;;  %v1040_v49 = vld [vmem:[%s15324_s22 + $0x4508] sm:$0xff]  ;;  %v1042_v50 = vld [vmem:[%s15324_s22 + $0x4510] sm:$0xff] }
  0xca   : > { %1039 = vst [vmem:[%s15329_s23 + $0xb80] sm:$0xff] %v1038_v48  ;;  %v1044_v51 = vld [vmem:[%s15324_s22 + $0x4518] sm:$0xff]  ;;  %1041 = vst [vmem:[%s15329_s23 + $0xb88] sm:$0xff] %v1040_v49  ;;  %v1046_v52 = vld [vmem:[%s15324_s22 + $0x4520] sm:$0xff] }
  0xcb   : > { %1043 = vst [vmem:[%s15329_s23 + $0xb90] sm:$0xff] %v1042_v50  ;;  %1045 = vst [vmem:[%s15329_s23 + $0xb98] sm:$0xff] %v1044_v51  ;;  %v1048_v53 = vld [vmem:[%s15324_s22 + $0x4528] sm:$0xff]  ;;  %v1050_v54 = vld [vmem:[%s15324_s22 + $0x4530] sm:$0xff] }
  0xcc   : > { %1047 = vst [vmem:[%s15329_s23 + $0xba0] sm:$0xff] %v1046_v52  ;;  %1049 = vst [vmem:[%s15329_s23 + $0xba8] sm:$0xff] %v1048_v53  ;;  %v1052_v55 = vld [vmem:[%s15324_s22 + $0x4538] sm:$0xff]  ;;  %v1054_v56 = vld [vmem:[%s15324_s22 + $0x4680] sm:$0xff] }
  0xcd   : > { %1051 = vst [vmem:[%s15329_s23 + $0xbb0] sm:$0xff] %v1050_v54  ;;  %v1056_v57 = vld [vmem:[%s15324_s22 + $0x4688] sm:$0xff]  ;;  %1053 = vst [vmem:[%s15329_s23 + $0xbb8] sm:$0xff] %v1052_v55  ;;  %v1058_v58 = vld [vmem:[%s15324_s22 + $0x4690] sm:$0xff] }
  0xce   : > { %1055 = vst [vmem:[%s15329_s23 + $0xbc0] sm:$0xff] %v1054_v56  ;;  %1057 = vst [vmem:[%s15329_s23 + $0xbc8] sm:$0xff] %v1056_v57  ;;  %v1060_v59 = vld [vmem:[%s15324_s22 + $0x4698] sm:$0xff]  ;;  %v1062_v60 = vld [vmem:[%s15324_s22 + $0x46a0] sm:$0xff] }
  0xcf   : > { %1059 = vst [vmem:[%s15329_s23 + $0xbd0] sm:$0xff] %v1058_v58  ;;  %1061 = vst [vmem:[%s15329_s23 + $0xbd8] sm:$0xff] %v1060_v59  ;;  %v1064_v61 = vld [vmem:[%s15324_s22 + $0x46a8] sm:$0xff]  ;;  %v1066_v62 = vld [vmem:[%s15324_s22 + $0x46b0] sm:$0xff] }
  0xd0   : > { %1063 = vst [vmem:[%s15329_s23 + $0xbe0] sm:$0xff] %v1062_v60  ;;  %v1068_v63 = vld [vmem:[%s15324_s22 + $0x46b8] sm:$0xff]  ;;  %1065 = vst [vmem:[%s15329_s23 + $0xbe8] sm:$0xff] %v1064_v61  ;;  %v1070_v0 = vld [vmem:[%s15324_s22 + $0x4800] sm:$0xff] }
  0xd1   : > { %1067 = vst [vmem:[%s15329_s23 + $0xbf0] sm:$0xff] %v1066_v62  ;;  %1069 = vst [vmem:[%s15329_s23 + $0xbf8] sm:$0xff] %v1068_v63  ;;  %v1072_v1 = vld [vmem:[%s15324_s22 + $0x4808] sm:$0xff]  ;;  %v1074_v2 = vld [vmem:[%s15324_s22 + $0x4810] sm:$0xff] }
  0xd2   : > { %1071 = vst [vmem:[%s15329_s23 + $0xc00] sm:$0xff] %v1070_v0  ;;  %1073 = vst [vmem:[%s15329_s23 + $0xc08] sm:$0xff] %v1072_v1  ;;  %v1076_v3 = vld [vmem:[%s15324_s22 + $0x4818] sm:$0xff]  ;;  %v1078_v4 = vld [vmem:[%s15324_s22 + $0x4820] sm:$0xff] }
  0xd3   : > { %1075 = vst [vmem:[%s15329_s23 + $0xc10] sm:$0xff] %v1074_v2  ;;  %v1080_v5 = vld [vmem:[%s15324_s22 + $0x4828] sm:$0xff]  ;;  %1077 = vst [vmem:[%s15329_s23 + $0xc18] sm:$0xff] %v1076_v3  ;;  %v1082_v6 = vld [vmem:[%s15324_s22 + $0x4830] sm:$0xff] }
  0xd4   : > { %1079 = vst [vmem:[%s15329_s23 + $0xc20] sm:$0xff] %v1078_v4  ;;  %1081 = vst [vmem:[%s15329_s23 + $0xc28] sm:$0xff] %v1080_v5  ;;  %v1084_v7 = vld [vmem:[%s15324_s22 + $0x4838] sm:$0xff]  ;;  %v1086_v8 = vld [vmem:[%s15324_s22 + $0x4980] sm:$0xff] }
  0xd5   : > { %1083 = vst [vmem:[%s15329_s23 + $0xc30] sm:$0xff] %v1082_v6  ;;  %1085 = vst [vmem:[%s15329_s23 + $0xc38] sm:$0xff] %v1084_v7  ;;  %v1088_v9 = vld [vmem:[%s15324_s22 + $0x4988] sm:$0xff]  ;;  %v1090_v10 = vld [vmem:[%s15324_s22 + $0x4990] sm:$0xff] }
  0xd6   : > { %1087 = vst [vmem:[%s15329_s23 + $0xc40] sm:$0xff] %v1086_v8  ;;  %v1092_v11 = vld [vmem:[%s15324_s22 + $0x4998] sm:$0xff]  ;;  %1089 = vst [vmem:[%s15329_s23 + $0xc48] sm:$0xff] %v1088_v9  ;;  %v1094_v12 = vld [vmem:[%s15324_s22 + $0x49a0] sm:$0xff] }
  0xd7   : > { %1091 = vst [vmem:[%s15329_s23 + $0xc50] sm:$0xff] %v1090_v10  ;;  %1093 = vst [vmem:[%s15329_s23 + $0xc58] sm:$0xff] %v1092_v11  ;;  %v1096_v13 = vld [vmem:[%s15324_s22 + $0x49a8] sm:$0xff]  ;;  %v1098_v14 = vld [vmem:[%s15324_s22 + $0x49b0] sm:$0xff] }
  0xd8   : > { %1095 = vst [vmem:[%s15329_s23 + $0xc60] sm:$0xff] %v1094_v12  ;;  %1097 = vst [vmem:[%s15329_s23 + $0xc68] sm:$0xff] %v1096_v13  ;;  %v1100_v15 = vld [vmem:[%s15324_s22 + $0x49b8] sm:$0xff]  ;;  %v1102_v16 = vld [vmem:[%s15324_s22 + $0x4b00] sm:$0xff] }
  0xd9   : > { %1099 = vst [vmem:[%s15329_s23 + $0xc70] sm:$0xff] %v1098_v14  ;;  %v1104_v17 = vld [vmem:[%s15324_s22 + $0x4b08] sm:$0xff]  ;;  %1101 = vst [vmem:[%s15329_s23 + $0xc78] sm:$0xff] %v1100_v15  ;;  %v1106_v18 = vld [vmem:[%s15324_s22 + $0x4b10] sm:$0xff] }
  0xda   : > { %1103 = vst [vmem:[%s15329_s23 + $0xc80] sm:$0xff] %v1102_v16  ;;  %1105 = vst [vmem:[%s15329_s23 + $0xc88] sm:$0xff] %v1104_v17  ;;  %v1108_v19 = vld [vmem:[%s15324_s22 + $0x4b18] sm:$0xff]  ;;  %v1110_v20 = vld [vmem:[%s15324_s22 + $0x4b20] sm:$0xff] }
  0xdb   : > { %1107 = vst [vmem:[%s15329_s23 + $0xc90] sm:$0xff] %v1106_v18  ;;  %1109 = vst [vmem:[%s15329_s23 + $0xc98] sm:$0xff] %v1108_v19  ;;  %v1112_v21 = vld [vmem:[%s15324_s22 + $0x4b28] sm:$0xff]  ;;  %v1114_v22 = vld [vmem:[%s15324_s22 + $0x4b30] sm:$0xff] }
  0xdc   : > { %1111 = vst [vmem:[%s15329_s23 + $0xca0] sm:$0xff] %v1110_v20  ;;  %v1116_v23 = vld [vmem:[%s15324_s22 + $0x4b38] sm:$0xff]  ;;  %1113 = vst [vmem:[%s15329_s23 + $0xca8] sm:$0xff] %v1112_v21  ;;  %v1118_v24 = vld [vmem:[%s15324_s22 + $0x4c80] sm:$0xff] }
  0xdd   : > { %1115 = vst [vmem:[%s15329_s23 + $0xcb0] sm:$0xff] %v1114_v22  ;;  %1117 = vst [vmem:[%s15329_s23 + $0xcb8] sm:$0xff] %v1116_v23  ;;  %v1120_v25 = vld [vmem:[%s15324_s22 + $0x4c88] sm:$0xff]  ;;  %v1122_v26 = vld [vmem:[%s15324_s22 + $0x4c90] sm:$0xff] }
  0xde   : > { %1119 = vst [vmem:[%s15329_s23 + $0xcc0] sm:$0xff] %v1118_v24  ;;  %1121 = vst [vmem:[%s15329_s23 + $0xcc8] sm:$0xff] %v1120_v25  ;;  %v1124_v27 = vld [vmem:[%s15324_s22 + $0x4c98] sm:$0xff]  ;;  %v1126_v28 = vld [vmem:[%s15324_s22 + $0x4ca0] sm:$0xff] }
  0xdf   : > { %1123 = vst [vmem:[%s15329_s23 + $0xcd0] sm:$0xff] %v1122_v26  ;;  %v1128_v29 = vld [vmem:[%s15324_s22 + $0x4ca8] sm:$0xff]  ;;  %1125 = vst [vmem:[%s15329_s23 + $0xcd8] sm:$0xff] %v1124_v27  ;;  %v1130_v30 = vld [vmem:[%s15324_s22 + $0x4cb0] sm:$0xff] }
  0xe0   : > { %1127 = vst [vmem:[%s15329_s23 + $0xce0] sm:$0xff] %v1126_v28  ;;  %1129 = vst [vmem:[%s15329_s23 + $0xce8] sm:$0xff] %v1128_v29  ;;  %v1132_v31 = vld [vmem:[%s15324_s22 + $0x4cb8] sm:$0xff]  ;;  %v1134_v32 = vld [vmem:[%s15324_s22 + $0x4e00] sm:$0xff] }
  0xe1   : > { %1131 = vst [vmem:[%s15329_s23 + $0xcf0] sm:$0xff] %v1130_v30  ;;  %1133 = vst [vmem:[%s15329_s23 + $0xcf8] sm:$0xff] %v1132_v31  ;;  %v1136_v33 = vld [vmem:[%s15324_s22 + $0x4e08] sm:$0xff]  ;;  %v1138_v34 = vld [vmem:[%s15324_s22 + $0x4e10] sm:$0xff] }
  0xe2   : > { %1135 = vst [vmem:[%s15329_s23 + $0xd00] sm:$0xff] %v1134_v32  ;;  %v1140_v35 = vld [vmem:[%s15324_s22 + $0x4e18] sm:$0xff]  ;;  %1137 = vst [vmem:[%s15329_s23 + $0xd08] sm:$0xff] %v1136_v33  ;;  %v1142_v36 = vld [vmem:[%s15324_s22 + $0x4e20] sm:$0xff] }
  0xe3   : > { %1139 = vst [vmem:[%s15329_s23 + $0xd10] sm:$0xff] %v1138_v34  ;;  %1141 = vst [vmem:[%s15329_s23 + $0xd18] sm:$0xff] %v1140_v35  ;;  %v1144_v37 = vld [vmem:[%s15324_s22 + $0x4e28] sm:$0xff]  ;;  %v1146_v38 = vld [vmem:[%s15324_s22 + $0x4e30] sm:$0xff] }
  0xe4   : > { %1143 = vst [vmem:[%s15329_s23 + $0xd20] sm:$0xff] %v1142_v36  ;;  %1145 = vst [vmem:[%s15329_s23 + $0xd28] sm:$0xff] %v1144_v37  ;;  %v1148_v39 = vld [vmem:[%s15324_s22 + $0x4e38] sm:$0xff]  ;;  %v1150_v40 = vld [vmem:[%s15324_s22 + $0x4f80] sm:$0xff] }
  0xe5   : > { %1147 = vst [vmem:[%s15329_s23 + $0xd30] sm:$0xff] %v1146_v38  ;;  %v1152_v41 = vld [vmem:[%s15324_s22 + $0x4f88] sm:$0xff]  ;;  %1149 = vst [vmem:[%s15329_s23 + $0xd38] sm:$0xff] %v1148_v39  ;;  %v1154_v42 = vld [vmem:[%s15324_s22 + $0x4f90] sm:$0xff] }
  0xe6   : > { %1151 = vst [vmem:[%s15329_s23 + $0xd40] sm:$0xff] %v1150_v40  ;;  %1153 = vst [vmem:[%s15329_s23 + $0xd48] sm:$0xff] %v1152_v41  ;;  %v1156_v43 = vld [vmem:[%s15324_s22 + $0x4f98] sm:$0xff]  ;;  %v1158_v44 = vld [vmem:[%s15324_s22 + $0x4fa0] sm:$0xff] }
  0xe7   : > { %1155 = vst [vmem:[%s15329_s23 + $0xd50] sm:$0xff] %v1154_v42  ;;  %1157 = vst [vmem:[%s15329_s23 + $0xd58] sm:$0xff] %v1156_v43  ;;  %v1160_v45 = vld [vmem:[%s15324_s22 + $0x4fa8] sm:$0xff]  ;;  %v1162_v46 = vld [vmem:[%s15324_s22 + $0x4fb0] sm:$0xff] }
  0xe8   : > { %1159 = vst [vmem:[%s15329_s23 + $0xd60] sm:$0xff] %v1158_v44  ;;  %v1164_v47 = vld [vmem:[%s15324_s22 + $0x4fb8] sm:$0xff]  ;;  %1161 = vst [vmem:[%s15329_s23 + $0xd68] sm:$0xff] %v1160_v45  ;;  %v1166_v48 = vld [vmem:[%s15324_s22 + $0x5100] sm:$0xff] }
  0xe9   : > { %1163 = vst [vmem:[%s15329_s23 + $0xd70] sm:$0xff] %v1162_v46  ;;  %1165 = vst [vmem:[%s15329_s23 + $0xd78] sm:$0xff] %v1164_v47  ;;  %v1168_v49 = vld [vmem:[%s15324_s22 + $0x5108] sm:$0xff]  ;;  %v1170_v50 = vld [vmem:[%s15324_s22 + $0x5110] sm:$0xff] }
  0xea   : > { %1167 = vst [vmem:[%s15329_s23 + $0xd80] sm:$0xff] %v1166_v48  ;;  %1169 = vst [vmem:[%s15329_s23 + $0xd88] sm:$0xff] %v1168_v49  ;;  %v1172_v51 = vld [vmem:[%s15324_s22 + $0x5118] sm:$0xff]  ;;  %v1174_v52 = vld [vmem:[%s15324_s22 + $0x5120] sm:$0xff] }
  0xeb   : > { %1171 = vst [vmem:[%s15329_s23 + $0xd90] sm:$0xff] %v1170_v50  ;;  %v1176_v53 = vld [vmem:[%s15324_s22 + $0x5128] sm:$0xff]  ;;  %1173 = vst [vmem:[%s15329_s23 + $0xd98] sm:$0xff] %v1172_v51  ;;  %v1178_v54 = vld [vmem:[%s15324_s22 + $0x5130] sm:$0xff] }
  0xec   : > { %1175 = vst [vmem:[%s15329_s23 + $0xda0] sm:$0xff] %v1174_v52  ;;  %1177 = vst [vmem:[%s15329_s23 + $0xda8] sm:$0xff] %v1176_v53  ;;  %v1180_v55 = vld [vmem:[%s15324_s22 + $0x5138] sm:$0xff]  ;;  %v1182_v56 = vld [vmem:[%s15324_s22 + $0x5280] sm:$0xff] }
  0xed   : > { %1179 = vst [vmem:[%s15329_s23 + $0xdb0] sm:$0xff] %v1178_v54  ;;  %1181 = vst [vmem:[%s15329_s23 + $0xdb8] sm:$0xff] %v1180_v55  ;;  %v1184_v57 = vld [vmem:[%s15324_s22 + $0x5288] sm:$0xff]  ;;  %v1186_v58 = vld [vmem:[%s15324_s22 + $0x5290] sm:$0xff] }
  0xee   : > { %1183 = vst [vmem:[%s15329_s23 + $0xdc0] sm:$0xff] %v1182_v56  ;;  %v1188_v59 = vld [vmem:[%s15324_s22 + $0x5298] sm:$0xff]  ;;  %1185 = vst [vmem:[%s15329_s23 + $0xdc8] sm:$0xff] %v1184_v57  ;;  %v1190_v60 = vld [vmem:[%s15324_s22 + $0x52a0] sm:$0xff] }
  0xef   : > { %1187 = vst [vmem:[%s15329_s23 + $0xdd0] sm:$0xff] %v1186_v58  ;;  %1189 = vst [vmem:[%s15329_s23 + $0xdd8] sm:$0xff] %v1188_v59  ;;  %v1192_v61 = vld [vmem:[%s15324_s22 + $0x52a8] sm:$0xff]  ;;  %v1194_v62 = vld [vmem:[%s15324_s22 + $0x52b0] sm:$0xff] }
  0xf0   : > { %1191 = vst [vmem:[%s15329_s23 + $0xde0] sm:$0xff] %v1190_v60  ;;  %1193 = vst [vmem:[%s15329_s23 + $0xde8] sm:$0xff] %v1192_v61  ;;  %v1196_v63 = vld [vmem:[%s15324_s22 + $0x52b8] sm:$0xff]  ;;  %v1198_v0 = vld [vmem:[%s15324_s22 + $0x5400] sm:$0xff] }
  0xf1   : > { %1195 = vst [vmem:[%s15329_s23 + $0xdf0] sm:$0xff] %v1194_v62  ;;  %v1200_v1 = vld [vmem:[%s15324_s22 + $0x5408] sm:$0xff]  ;;  %1197 = vst [vmem:[%s15329_s23 + $0xdf8] sm:$0xff] %v1196_v63  ;;  %v1202_v2 = vld [vmem:[%s15324_s22 + $0x5410] sm:$0xff] }
  0xf2   : > { %1199 = vst [vmem:[%s15329_s23 + $0xe00] sm:$0xff] %v1198_v0  ;;  %1201 = vst [vmem:[%s15329_s23 + $0xe08] sm:$0xff] %v1200_v1  ;;  %v1204_v3 = vld [vmem:[%s15324_s22 + $0x5418] sm:$0xff]  ;;  %v1206_v4 = vld [vmem:[%s15324_s22 + $0x5420] sm:$0xff] }
  0xf3   : > { %1203 = vst [vmem:[%s15329_s23 + $0xe10] sm:$0xff] %v1202_v2  ;;  %1205 = vst [vmem:[%s15329_s23 + $0xe18] sm:$0xff] %v1204_v3  ;;  %v1208_v5 = vld [vmem:[%s15324_s22 + $0x5428] sm:$0xff]  ;;  %v1210_v6 = vld [vmem:[%s15324_s22 + $0x5430] sm:$0xff] }
  0xf4   : > { %1207 = vst [vmem:[%s15329_s23 + $0xe20] sm:$0xff] %v1206_v4  ;;  %v1212_v7 = vld [vmem:[%s15324_s22 + $0x5438] sm:$0xff]  ;;  %1209 = vst [vmem:[%s15329_s23 + $0xe28] sm:$0xff] %v1208_v5  ;;  %v1214_v8 = vld [vmem:[%s15324_s22 + $0x5580] sm:$0xff] }
  0xf5   : > { %1211 = vst [vmem:[%s15329_s23 + $0xe30] sm:$0xff] %v1210_v6  ;;  %1213 = vst [vmem:[%s15329_s23 + $0xe38] sm:$0xff] %v1212_v7  ;;  %v1216_v9 = vld [vmem:[%s15324_s22 + $0x5588] sm:$0xff]  ;;  %v1218_v10 = vld [vmem:[%s15324_s22 + $0x5590] sm:$0xff] }
  0xf6   : > { %1215 = vst [vmem:[%s15329_s23 + $0xe40] sm:$0xff] %v1214_v8  ;;  %1217 = vst [vmem:[%s15329_s23 + $0xe48] sm:$0xff] %v1216_v9  ;;  %v1220_v11 = vld [vmem:[%s15324_s22 + $0x5598] sm:$0xff]  ;;  %v1222_v12 = vld [vmem:[%s15324_s22 + $0x55a0] sm:$0xff] }
  0xf7   : > { %1219 = vst [vmem:[%s15329_s23 + $0xe50] sm:$0xff] %v1218_v10  ;;  %v1224_v13 = vld [vmem:[%s15324_s22 + $0x55a8] sm:$0xff]  ;;  %1221 = vst [vmem:[%s15329_s23 + $0xe58] sm:$0xff] %v1220_v11  ;;  %v1226_v14 = vld [vmem:[%s15324_s22 + $0x55b0] sm:$0xff] }
  0xf8   : > { %1223 = vst [vmem:[%s15329_s23 + $0xe60] sm:$0xff] %v1222_v12  ;;  %1225 = vst [vmem:[%s15329_s23 + $0xe68] sm:$0xff] %v1224_v13  ;;  %v1228_v15 = vld [vmem:[%s15324_s22 + $0x55b8] sm:$0xff]  ;;  %v1230_v16 = vld [vmem:[%s15324_s22 + $0x5700] sm:$0xff] }
  0xf9   : > { %1227 = vst [vmem:[%s15329_s23 + $0xe70] sm:$0xff] %v1226_v14  ;;  %1229 = vst [vmem:[%s15329_s23 + $0xe78] sm:$0xff] %v1228_v15  ;;  %v1232_v17 = vld [vmem:[%s15324_s22 + $0x5708] sm:$0xff]  ;;  %v1234_v18 = vld [vmem:[%s15324_s22 + $0x5710] sm:$0xff] }
  0xfa   : > { %1231 = vst [vmem:[%s15329_s23 + $0xe80] sm:$0xff] %v1230_v16  ;;  %v1236_v19 = vld [vmem:[%s15324_s22 + $0x5718] sm:$0xff]  ;;  %1233 = vst [vmem:[%s15329_s23 + $0xe88] sm:$0xff] %v1232_v17  ;;  %v1238_v20 = vld [vmem:[%s15324_s22 + $0x5720] sm:$0xff] }
  0xfb   : > { %1235 = vst [vmem:[%s15329_s23 + $0xe90] sm:$0xff] %v1234_v18  ;;  %1237 = vst [vmem:[%s15329_s23 + $0xe98] sm:$0xff] %v1236_v19  ;;  %v1240_v21 = vld [vmem:[%s15324_s22 + $0x5728] sm:$0xff]  ;;  %v1242_v22 = vld [vmem:[%s15324_s22 + $0x5730] sm:$0xff] }
  0xfc   : > { %1239 = vst [vmem:[%s15329_s23 + $0xea0] sm:$0xff] %v1238_v20  ;;  %1241 = vst [vmem:[%s15329_s23 + $0xea8] sm:$0xff] %v1240_v21  ;;  %v1244_v23 = vld [vmem:[%s15324_s22 + $0x5738] sm:$0xff]  ;;  %v1246_v24 = vld [vmem:[%s15324_s22 + $0x5880] sm:$0xff] }
  0xfd   : > { %1243 = vst [vmem:[%s15329_s23 + $0xeb0] sm:$0xff] %v1242_v22  ;;  %v1248_v25 = vld [vmem:[%s15324_s22 + $0x5888] sm:$0xff]  ;;  %1245 = vst [vmem:[%s15329_s23 + $0xeb8] sm:$0xff] %v1244_v23  ;;  %v1250_v26 = vld [vmem:[%s15324_s22 + $0x5890] sm:$0xff] }
  0xfe   : > { %1247 = vst [vmem:[%s15329_s23 + $0xec0] sm:$0xff] %v1246_v24  ;;  %1249 = vst [vmem:[%s15329_s23 + $0xec8] sm:$0xff] %v1248_v25  ;;  %v1252_v27 = vld [vmem:[%s15324_s22 + $0x5898] sm:$0xff]  ;;  %v1254_v28 = vld [vmem:[%s15324_s22 + $0x58a0] sm:$0xff] }
  0xff   : > { %1251 = vst [vmem:[%s15329_s23 + $0xed0] sm:$0xff] %v1250_v26  ;;  %1253 = vst [vmem:[%s15329_s23 + $0xed8] sm:$0xff] %v1252_v27  ;;  %v1256_v29 = vld [vmem:[%s15324_s22 + $0x58a8] sm:$0xff]  ;;  %v1258_v30 = vld [vmem:[%s15324_s22 + $0x58b0] sm:$0xff] }
 0x100   : > { %1255 = vst [vmem:[%s15329_s23 + $0xee0] sm:$0xff] %v1254_v28  ;;  %v1260_v31 = vld [vmem:[%s15324_s22 + $0x58b8] sm:$0xff]  ;;  %1257 = vst [vmem:[%s15329_s23 + $0xee8] sm:$0xff] %v1256_v29  ;;  %v1262_v32 = vld [vmem:[%s15324_s22 + $0x5a00] sm:$0xff] }
 0x101   : > { %1259 = vst [vmem:[%s15329_s23 + $0xef0] sm:$0xff] %v1258_v30  ;;  %1261 = vst [vmem:[%s15329_s23 + $0xef8] sm:$0xff] %v1260_v31  ;;  %v1264_v33 = vld [vmem:[%s15324_s22 + $0x5a08] sm:$0xff]  ;;  %v1266_v34 = vld [vmem:[%s15324_s22 + $0x5a10] sm:$0xff] }
 0x102   : > { %1263 = vst [vmem:[%s15329_s23 + $0xf00] sm:$0xff] %v1262_v32  ;;  %1265 = vst [vmem:[%s15329_s23 + $0xf08] sm:$0xff] %v1264_v33  ;;  %v1268_v35 = vld [vmem:[%s15324_s22 + $0x5a18] sm:$0xff]  ;;  %v1270_v36 = vld [vmem:[%s15324_s22 + $0x5a20] sm:$0xff] }
 0x103   : > { %1267 = vst [vmem:[%s15329_s23 + $0xf10] sm:$0xff] %v1266_v34  ;;  %v1272_v37 = vld [vmem:[%s15324_s22 + $0x5a28] sm:$0xff]  ;;  %1269 = vst [vmem:[%s15329_s23 + $0xf18] sm:$0xff] %v1268_v35  ;;  %v1274_v38 = vld [vmem:[%s15324_s22 + $0x5a30] sm:$0xff] }
 0x104   : > { %1271 = vst [vmem:[%s15329_s23 + $0xf20] sm:$0xff] %v1270_v36  ;;  %1273 = vst [vmem:[%s15329_s23 + $0xf28] sm:$0xff] %v1272_v37  ;;  %v1276_v39 = vld [vmem:[%s15324_s22 + $0x5a38] sm:$0xff]  ;;  %v1278_v40 = vld [vmem:[%s15324_s22 + $0x5b80] sm:$0xff] }
 0x105   : > { %1275 = vst [vmem:[%s15329_s23 + $0xf30] sm:$0xff] %v1274_v38  ;;  %1277 = vst [vmem:[%s15329_s23 + $0xf38] sm:$0xff] %v1276_v39  ;;  %v1280_v41 = vld [vmem:[%s15324_s22 + $0x5b88] sm:$0xff]  ;;  %v1282_v42 = vld [vmem:[%s15324_s22 + $0x5b90] sm:$0xff] }
 0x106   : > { %1279 = vst [vmem:[%s15329_s23 + $0xf40] sm:$0xff] %v1278_v40  ;;  %v1284_v43 = vld [vmem:[%s15324_s22 + $0x5b98] sm:$0xff]  ;;  %1281 = vst [vmem:[%s15329_s23 + $0xf48] sm:$0xff] %v1280_v41  ;;  %v1286_v44 = vld [vmem:[%s15324_s22 + $0x5ba0] sm:$0xff] }
 0x107   : > { %1283 = vst [vmem:[%s15329_s23 + $0xf50] sm:$0xff] %v1282_v42  ;;  %1285 = vst [vmem:[%s15329_s23 + $0xf58] sm:$0xff] %v1284_v43  ;;  %v1288_v45 = vld [vmem:[%s15324_s22 + $0x5ba8] sm:$0xff]  ;;  %v1290_v46 = vld [vmem:[%s15324_s22 + $0x5bb0] sm:$0xff] }
 0x108   : > { %1287 = vst [vmem:[%s15329_s23 + $0xf60] sm:$0xff] %v1286_v44  ;;  %1289 = vst [vmem:[%s15329_s23 + $0xf68] sm:$0xff] %v1288_v45  ;;  %v1292_v47 = vld [vmem:[%s15324_s22 + $0x5bb8] sm:$0xff]  ;;  %v1294_v48 = vld [vmem:[%s15324_s22 + $0x5d00] sm:$0xff] }
 0x109   : > { %1291 = vst [vmem:[%s15329_s23 + $0xf70] sm:$0xff] %v1290_v46  ;;  %v1296_v49 = vld [vmem:[%s15324_s22 + $0x5d08] sm:$0xff]  ;;  %1293 = vst [vmem:[%s15329_s23 + $0xf78] sm:$0xff] %v1292_v47  ;;  %v1298_v50 = vld [vmem:[%s15324_s22 + $0x5d10] sm:$0xff] }
 0x10a   : > { %1295 = vst [vmem:[%s15329_s23 + $0xf80] sm:$0xff] %v1294_v48  ;;  %1297 = vst [vmem:[%s15329_s23 + $0xf88] sm:$0xff] %v1296_v49  ;;  %v1300_v51 = vld [vmem:[%s15324_s22 + $0x5d18] sm:$0xff]  ;;  %v1302_v52 = vld [vmem:[%s15324_s22 + $0x5d20] sm:$0xff] }
 0x10b   : > { %1299 = vst [vmem:[%s15329_s23 + $0xf90] sm:$0xff] %v1298_v50  ;;  %1301 = vst [vmem:[%s15329_s23 + $0xf98] sm:$0xff] %v1300_v51  ;;  %v1304_v53 = vld [vmem:[%s15324_s22 + $0x5d28] sm:$0xff]  ;;  %v1306_v54 = vld [vmem:[%s15324_s22 + $0x5d30] sm:$0xff] }
 0x10c   : > { %1303 = vst [vmem:[%s15329_s23 + $0xfa0] sm:$0xff] %v1302_v52  ;;  %v1308_v55 = vld [vmem:[%s15324_s22 + $0x5d38] sm:$0xff]  ;;  %1305 = vst [vmem:[%s15329_s23 + $0xfa8] sm:$0xff] %v1304_v53  ;;  %v1310_v56 = vld [vmem:[%s15324_s22 + $0x5e80] sm:$0xff] }
 0x10d   : > { %1307 = vst [vmem:[%s15329_s23 + $0xfb0] sm:$0xff] %v1306_v54  ;;  %1309 = vst [vmem:[%s15329_s23 + $0xfb8] sm:$0xff] %v1308_v55  ;;  %v1312_v57 = vld [vmem:[%s15324_s22 + $0x5e88] sm:$0xff]  ;;  %v1314_v58 = vld [vmem:[%s15324_s22 + $0x5e90] sm:$0xff] }
 0x10e   : > { %1311 = vst [vmem:[%s15329_s23 + $0xfc0] sm:$0xff] %v1310_v56  ;;  %1313 = vst [vmem:[%s15329_s23 + $0xfc8] sm:$0xff] %v1312_v57  ;;  %v1316_v59 = vld [vmem:[%s15324_s22 + $0x5e98] sm:$0xff]  ;;  %v1318_v60 = vld [vmem:[%s15324_s22 + $0x5ea0] sm:$0xff] }
 0x10f   : > { %1315 = vst [vmem:[%s15329_s23 + $0xfd0] sm:$0xff] %v1314_v58  ;;  %v1320_v61 = vld [vmem:[%s15324_s22 + $0x5ea8] sm:$0xff]  ;;  %1317 = vst [vmem:[%s15329_s23 + $0xfd8] sm:$0xff] %v1316_v59  ;;  %v1322_v62 = vld [vmem:[%s15324_s22 + $0x5eb0] sm:$0xff] }
 0x110   : > { %1319 = vst [vmem:[%s15329_s23 + $0xfe0] sm:$0xff] %v1318_v60  ;;  %1321 = vst [vmem:[%s15329_s23 + $0xfe8] sm:$0xff] %v1320_v61  ;;  %v1324_v63 = vld [vmem:[%s15324_s22 + $0x5eb8] sm:$0xff]  ;;  %v1326_v0 = vld [vmem:[%s15324_s22 + $0x6000] sm:$0xff] }
 0x111   : > { %1323 = vst [vmem:[%s15329_s23 + $0xff0] sm:$0xff] %v1322_v62  ;;  %1325 = vst [vmem:[%s15329_s23 + $0xff8] sm:$0xff] %v1324_v63  ;;  %v1328_v1 = vld [vmem:[%s15324_s22 + $0x6008] sm:$0xff]  ;;  %v1330_v2 = vld [vmem:[%s15324_s22 + $0x6010] sm:$0xff] }
 0x112   : > { %1327 = vst [vmem:[%s15329_s23 + $0x1000] sm:$0xff] %v1326_v0  ;;  %v1332_v3 = vld [vmem:[%s15324_s22 + $0x6018] sm:$0xff]  ;;  %1329 = vst [vmem:[%s15329_s23 + $0x1008] sm:$0xff] %v1328_v1  ;;  %v1334_v4 = vld [vmem:[%s15324_s22 + $0x6020] sm:$0xff] }
 0x113   : > { %1331 = vst [vmem:[%s15329_s23 + $0x1010] sm:$0xff] %v1330_v2  ;;  %1333 = vst [vmem:[%s15329_s23 + $0x1018] sm:$0xff] %v1332_v3  ;;  %v1336_v5 = vld [vmem:[%s15324_s22 + $0x6028] sm:$0xff]  ;;  %v1338_v6 = vld [vmem:[%s15324_s22 + $0x6030] sm:$0xff] }
 0x114   : > { %1335 = vst [vmem:[%s15329_s23 + $0x1020] sm:$0xff] %v1334_v4  ;;  %1337 = vst [vmem:[%s15329_s23 + $0x1028] sm:$0xff] %v1336_v5  ;;  %v1340_v7 = vld [vmem:[%s15324_s22 + $0x6038] sm:$0xff]  ;;  %v1342_v8 = vld [vmem:[%s15324_s22 + $0x6180] sm:$0xff] }
 0x115   : > { %1339 = vst [vmem:[%s15329_s23 + $0x1030] sm:$0xff] %v1338_v6  ;;  %v1344_v9 = vld [vmem:[%s15324_s22 + $0x6188] sm:$0xff]  ;;  %1341 = vst [vmem:[%s15329_s23 + $0x1038] sm:$0xff] %v1340_v7  ;;  %v1346_v10 = vld [vmem:[%s15324_s22 + $0x6190] sm:$0xff] }
 0x116   : > { %1343 = vst [vmem:[%s15329_s23 + $0x1040] sm:$0xff] %v1342_v8  ;;  %1345 = vst [vmem:[%s15329_s23 + $0x1048] sm:$0xff] %v1344_v9  ;;  %v1348_v11 = vld [vmem:[%s15324_s22 + $0x6198] sm:$0xff]  ;;  %v1350_v12 = vld [vmem:[%s15324_s22 + $0x61a0] sm:$0xff] }
 0x117   : > { %1347 = vst [vmem:[%s15329_s23 + $0x1050] sm:$0xff] %v1346_v10  ;;  %1349 = vst [vmem:[%s15329_s23 + $0x1058] sm:$0xff] %v1348_v11  ;;  %v1352_v13 = vld [vmem:[%s15324_s22 + $0x61a8] sm:$0xff]  ;;  %v1354_v14 = vld [vmem:[%s15324_s22 + $0x61b0] sm:$0xff] }
 0x118   : > { %1351 = vst [vmem:[%s15329_s23 + $0x1060] sm:$0xff] %v1350_v12  ;;  %v1356_v15 = vld [vmem:[%s15324_s22 + $0x61b8] sm:$0xff]  ;;  %1353 = vst [vmem:[%s15329_s23 + $0x1068] sm:$0xff] %v1352_v13  ;;  %v1358_v16 = vld [vmem:[%s15324_s22 + $0x6300] sm:$0xff] }
 0x119   : > { %1355 = vst [vmem:[%s15329_s23 + $0x1070] sm:$0xff] %v1354_v14  ;;  %1357 = vst [vmem:[%s15329_s23 + $0x1078] sm:$0xff] %v1356_v15  ;;  %v1360_v17 = vld [vmem:[%s15324_s22 + $0x6308] sm:$0xff]  ;;  %v1362_v18 = vld [vmem:[%s15324_s22 + $0x6310] sm:$0xff] }
 0x11a   : > { %1359 = vst [vmem:[%s15329_s23 + $0x1080] sm:$0xff] %v1358_v16  ;;  %1361 = vst [vmem:[%s15329_s23 + $0x1088] sm:$0xff] %v1360_v17  ;;  %v1364_v19 = vld [vmem:[%s15324_s22 + $0x6318] sm:$0xff]  ;;  %v1366_v20 = vld [vmem:[%s15324_s22 + $0x6320] sm:$0xff] }
 0x11b   : > { %1363 = vst [vmem:[%s15329_s23 + $0x1090] sm:$0xff] %v1362_v18  ;;  %v1368_v21 = vld [vmem:[%s15324_s22 + $0x6328] sm:$0xff]  ;;  %1365 = vst [vmem:[%s15329_s23 + $0x1098] sm:$0xff] %v1364_v19  ;;  %v1370_v22 = vld [vmem:[%s15324_s22 + $0x6330] sm:$0xff] }
 0x11c   : > { %1367 = vst [vmem:[%s15329_s23 + $0x10a0] sm:$0xff] %v1366_v20  ;;  %1369 = vst [vmem:[%s15329_s23 + $0x10a8] sm:$0xff] %v1368_v21  ;;  %v1372_v23 = vld [vmem:[%s15324_s22 + $0x6338] sm:$0xff]  ;;  %v1374_v24 = vld [vmem:[%s15324_s22 + $0x6480] sm:$0xff] }
 0x11d   : > { %1371 = vst [vmem:[%s15329_s23 + $0x10b0] sm:$0xff] %v1370_v22  ;;  %1373 = vst [vmem:[%s15329_s23 + $0x10b8] sm:$0xff] %v1372_v23  ;;  %v1376_v25 = vld [vmem:[%s15324_s22 + $0x6488] sm:$0xff]  ;;  %v1378_v26 = vld [vmem:[%s15324_s22 + $0x6490] sm:$0xff] }
 0x11e   : > { %1375 = vst [vmem:[%s15329_s23 + $0x10c0] sm:$0xff] %v1374_v24  ;;  %v1380_v27 = vld [vmem:[%s15324_s22 + $0x6498] sm:$0xff]  ;;  %1377 = vst [vmem:[%s15329_s23 + $0x10c8] sm:$0xff] %v1376_v25  ;;  %v1382_v28 = vld [vmem:[%s15324_s22 + $0x64a0] sm:$0xff] }
 0x11f   : > { %1379 = vst [vmem:[%s15329_s23 + $0x10d0] sm:$0xff] %v1378_v26  ;;  %1381 = vst [vmem:[%s15329_s23 + $0x10d8] sm:$0xff] %v1380_v27  ;;  %v1384_v29 = vld [vmem:[%s15324_s22 + $0x64a8] sm:$0xff]  ;;  %v1386_v30 = vld [vmem:[%s15324_s22 + $0x64b0] sm:$0xff] }
 0x120   : > { %1383 = vst [vmem:[%s15329_s23 + $0x10e0] sm:$0xff] %v1382_v28  ;;  %1385 = vst [vmem:[%s15329_s23 + $0x10e8] sm:$0xff] %v1384_v29  ;;  %v1388_v31 = vld [vmem:[%s15324_s22 + $0x64b8] sm:$0xff]  ;;  %v1390_v32 = vld [vmem:[%s15324_s22 + $0x6600] sm:$0xff] }
 0x121   : > { %1387 = vst [vmem:[%s15329_s23 + $0x10f0] sm:$0xff] %v1386_v30  ;;  %v1392_v33 = vld [vmem:[%s15324_s22 + $0x6608] sm:$0xff]  ;;  %1389 = vst [vmem:[%s15329_s23 + $0x10f8] sm:$0xff] %v1388_v31  ;;  %v1394_v34 = vld [vmem:[%s15324_s22 + $0x6610] sm:$0xff] }
 0x122   : > { %1391 = vst [vmem:[%s15329_s23 + $0x1100] sm:$0xff] %v1390_v32  ;;  %1393 = vst [vmem:[%s15329_s23 + $0x1108] sm:$0xff] %v1392_v33  ;;  %v1396_v35 = vld [vmem:[%s15324_s22 + $0x6618] sm:$0xff]  ;;  %v1398_v36 = vld [vmem:[%s15324_s22 + $0x6620] sm:$0xff] }
 0x123   : > { %1395 = vst [vmem:[%s15329_s23 + $0x1110] sm:$0xff] %v1394_v34  ;;  %1397 = vst [vmem:[%s15329_s23 + $0x1118] sm:$0xff] %v1396_v35  ;;  %v1400_v37 = vld [vmem:[%s15324_s22 + $0x6628] sm:$0xff]  ;;  %v1402_v38 = vld [vmem:[%s15324_s22 + $0x6630] sm:$0xff] }
 0x124   : > { %1399 = vst [vmem:[%s15329_s23 + $0x1120] sm:$0xff] %v1398_v36  ;;  %v1404_v39 = vld [vmem:[%s15324_s22 + $0x6638] sm:$0xff]  ;;  %1401 = vst [vmem:[%s15329_s23 + $0x1128] sm:$0xff] %v1400_v37  ;;  %v1406_v40 = vld [vmem:[%s15324_s22 + $0x6780] sm:$0xff] }
 0x125   : > { %1403 = vst [vmem:[%s15329_s23 + $0x1130] sm:$0xff] %v1402_v38  ;;  %1405 = vst [vmem:[%s15329_s23 + $0x1138] sm:$0xff] %v1404_v39  ;;  %v1408_v41 = vld [vmem:[%s15324_s22 + $0x6788] sm:$0xff]  ;;  %v1410_v42 = vld [vmem:[%s15324_s22 + $0x6790] sm:$0xff] }
 0x126   : > { %1407 = vst [vmem:[%s15329_s23 + $0x1140] sm:$0xff] %v1406_v40  ;;  %1409 = vst [vmem:[%s15329_s23 + $0x1148] sm:$0xff] %v1408_v41  ;;  %v1412_v43 = vld [vmem:[%s15324_s22 + $0x6798] sm:$0xff]  ;;  %v1414_v44 = vld [vmem:[%s15324_s22 + $0x67a0] sm:$0xff] }
 0x127   : > { %1411 = vst [vmem:[%s15329_s23 + $0x1150] sm:$0xff] %v1410_v42  ;;  %v1416_v45 = vld [vmem:[%s15324_s22 + $0x67a8] sm:$0xff]  ;;  %1413 = vst [vmem:[%s15329_s23 + $0x1158] sm:$0xff] %v1412_v43  ;;  %v1418_v46 = vld [vmem:[%s15324_s22 + $0x67b0] sm:$0xff] }
 0x128   : > { %1415 = vst [vmem:[%s15329_s23 + $0x1160] sm:$0xff] %v1414_v44  ;;  %1417 = vst [vmem:[%s15329_s23 + $0x1168] sm:$0xff] %v1416_v45  ;;  %v1420_v47 = vld [vmem:[%s15324_s22 + $0x67b8] sm:$0xff]  ;;  %v1422_v48 = vld [vmem:[%s15324_s22 + $0x6900] sm:$0xff] }
 0x129   : > { %1419 = vst [vmem:[%s15329_s23 + $0x1170] sm:$0xff] %v1418_v46  ;;  %1421 = vst [vmem:[%s15329_s23 + $0x1178] sm:$0xff] %v1420_v47  ;;  %v1424_v49 = vld [vmem:[%s15324_s22 + $0x6908] sm:$0xff]  ;;  %v1426_v50 = vld [vmem:[%s15324_s22 + $0x6910] sm:$0xff] }
 0x12a   : > { %1423 = vst [vmem:[%s15329_s23 + $0x1180] sm:$0xff] %v1422_v48  ;;  %v1428_v51 = vld [vmem:[%s15324_s22 + $0x6918] sm:$0xff]  ;;  %1425 = vst [vmem:[%s15329_s23 + $0x1188] sm:$0xff] %v1424_v49  ;;  %v1430_v52 = vld [vmem:[%s15324_s22 + $0x6920] sm:$0xff] }
 0x12b   : > { %1427 = vst [vmem:[%s15329_s23 + $0x1190] sm:$0xff] %v1426_v50  ;;  %1429 = vst [vmem:[%s15329_s23 + $0x1198] sm:$0xff] %v1428_v51  ;;  %v1432_v53 = vld [vmem:[%s15324_s22 + $0x6928] sm:$0xff]  ;;  %v1434_v54 = vld [vmem:[%s15324_s22 + $0x6930] sm:$0xff] }
 0x12c   : > { %1431 = vst [vmem:[%s15329_s23 + $0x11a0] sm:$0xff] %v1430_v52  ;;  %1433 = vst [vmem:[%s15329_s23 + $0x11a8] sm:$0xff] %v1432_v53  ;;  %v1436_v55 = vld [vmem:[%s15324_s22 + $0x6938] sm:$0xff]  ;;  %v1438_v56 = vld [vmem:[%s15324_s22 + $0x6a80] sm:$0xff] }
 0x12d   : > { %1435 = vst [vmem:[%s15329_s23 + $0x11b0] sm:$0xff] %v1434_v54  ;;  %v1440_v57 = vld [vmem:[%s15324_s22 + $0x6a88] sm:$0xff]  ;;  %1437 = vst [vmem:[%s15329_s23 + $0x11b8] sm:$0xff] %v1436_v55  ;;  %v1442_v58 = vld [vmem:[%s15324_s22 + $0x6a90] sm:$0xff] }
 0x12e   : > { %1439 = vst [vmem:[%s15329_s23 + $0x11c0] sm:$0xff] %v1438_v56  ;;  %1441 = vst [vmem:[%s15329_s23 + $0x11c8] sm:$0xff] %v1440_v57  ;;  %v1444_v59 = vld [vmem:[%s15324_s22 + $0x6a98] sm:$0xff]  ;;  %v1446_v60 = vld [vmem:[%s15324_s22 + $0x6aa0] sm:$0xff] }
 0x12f   : > { %1443 = vst [vmem:[%s15329_s23 + $0x11d0] sm:$0xff] %v1442_v58  ;;  %1445 = vst [vmem:[%s15329_s23 + $0x11d8] sm:$0xff] %v1444_v59  ;;  %v1448_v61 = vld [vmem:[%s15324_s22 + $0x6aa8] sm:$0xff]  ;;  %v1450_v62 = vld [vmem:[%s15324_s22 + $0x6ab0] sm:$0xff] }
 0x130   : > { %1447 = vst [vmem:[%s15329_s23 + $0x11e0] sm:$0xff] %v1446_v60  ;;  %v1452_v63 = vld [vmem:[%s15324_s22 + $0x6ab8] sm:$0xff]  ;;  %1449 = vst [vmem:[%s15329_s23 + $0x11e8] sm:$0xff] %v1448_v61  ;;  %v1454_v0 = vld [vmem:[%s15324_s22 + $0x6c00] sm:$0xff] }
 0x131   : > { %1451 = vst [vmem:[%s15329_s23 + $0x11f0] sm:$0xff] %v1450_v62  ;;  %1453 = vst [vmem:[%s15329_s23 + $0x11f8] sm:$0xff] %v1452_v63  ;;  %v1456_v1 = vld [vmem:[%s15324_s22 + $0x6c08] sm:$0xff]  ;;  %v1458_v2 = vld [vmem:[%s15324_s22 + $0x6c10] sm:$0xff] }
 0x132   : > { %1455 = vst [vmem:[%s15329_s23 + $0x1200] sm:$0xff] %v1454_v0  ;;  %1457 = vst [vmem:[%s15329_s23 + $0x1208] sm:$0xff] %v1456_v1  ;;  %v1460_v3 = vld [vmem:[%s15324_s22 + $0x6c18] sm:$0xff]  ;;  %v1462_v4 = vld [vmem:[%s15324_s22 + $0x6c20] sm:$0xff] }
 0x133   : > { %1459 = vst [vmem:[%s15329_s23 + $0x1210] sm:$0xff] %v1458_v2  ;;  %v1464_v5 = vld [vmem:[%s15324_s22 + $0x6c28] sm:$0xff]  ;;  %1461 = vst [vmem:[%s15329_s23 + $0x1218] sm:$0xff] %v1460_v3  ;;  %v1466_v6 = vld [vmem:[%s15324_s22 + $0x6c30] sm:$0xff] }
 0x134   : > { %1463 = vst [vmem:[%s15329_s23 + $0x1220] sm:$0xff] %v1462_v4  ;;  %1465 = vst [vmem:[%s15329_s23 + $0x1228] sm:$0xff] %v1464_v5  ;;  %v1468_v7 = vld [vmem:[%s15324_s22 + $0x6c38] sm:$0xff]  ;;  %v1470_v8 = vld [vmem:[%s15324_s22 + $0x6d80] sm:$0xff] }
 0x135   : > { %1467 = vst [vmem:[%s15329_s23 + $0x1230] sm:$0xff] %v1466_v6  ;;  %1469 = vst [vmem:[%s15329_s23 + $0x1238] sm:$0xff] %v1468_v7  ;;  %v1472_v9 = vld [vmem:[%s15324_s22 + $0x6d88] sm:$0xff]  ;;  %v1474_v10 = vld [vmem:[%s15324_s22 + $0x6d90] sm:$0xff] }
 0x136   : > { %1471 = vst [vmem:[%s15329_s23 + $0x1240] sm:$0xff] %v1470_v8  ;;  %v1476_v11 = vld [vmem:[%s15324_s22 + $0x6d98] sm:$0xff]  ;;  %1473 = vst [vmem:[%s15329_s23 + $0x1248] sm:$0xff] %v1472_v9  ;;  %v1478_v12 = vld [vmem:[%s15324_s22 + $0x6da0] sm:$0xff] }
 0x137   : > { %1475 = vst [vmem:[%s15329_s23 + $0x1250] sm:$0xff] %v1474_v10  ;;  %1477 = vst [vmem:[%s15329_s23 + $0x1258] sm:$0xff] %v1476_v11  ;;  %v1480_v13 = vld [vmem:[%s15324_s22 + $0x6da8] sm:$0xff]  ;;  %v1482_v14 = vld [vmem:[%s15324_s22 + $0x6db0] sm:$0xff] }
 0x138   : > { %1479 = vst [vmem:[%s15329_s23 + $0x1260] sm:$0xff] %v1478_v12  ;;  %1481 = vst [vmem:[%s15329_s23 + $0x1268] sm:$0xff] %v1480_v13  ;;  %v1484_v15 = vld [vmem:[%s15324_s22 + $0x6db8] sm:$0xff]  ;;  %v1486_v16 = vld [vmem:[%s15324_s22 + $0x6f00] sm:$0xff] }
 0x139   : > { %1483 = vst [vmem:[%s15329_s23 + $0x1270] sm:$0xff] %v1482_v14  ;;  %v1488_v17 = vld [vmem:[%s15324_s22 + $0x6f08] sm:$0xff]  ;;  %1485 = vst [vmem:[%s15329_s23 + $0x1278] sm:$0xff] %v1484_v15  ;;  %v1490_v18 = vld [vmem:[%s15324_s22 + $0x6f10] sm:$0xff] }
 0x13a   : > { %1487 = vst [vmem:[%s15329_s23 + $0x1280] sm:$0xff] %v1486_v16  ;;  %1489 = vst [vmem:[%s15329_s23 + $0x1288] sm:$0xff] %v1488_v17  ;;  %v1492_v19 = vld [vmem:[%s15324_s22 + $0x6f18] sm:$0xff]  ;;  %v1494_v20 = vld [vmem:[%s15324_s22 + $0x6f20] sm:$0xff] }
 0x13b   : > { %1491 = vst [vmem:[%s15329_s23 + $0x1290] sm:$0xff] %v1490_v18  ;;  %1493 = vst [vmem:[%s15329_s23 + $0x1298] sm:$0xff] %v1492_v19  ;;  %v1496_v21 = vld [vmem:[%s15324_s22 + $0x6f28] sm:$0xff]  ;;  %v1498_v22 = vld [vmem:[%s15324_s22 + $0x6f30] sm:$0xff] }
 0x13c   : > { %1495 = vst [vmem:[%s15329_s23 + $0x12a0] sm:$0xff] %v1494_v20  ;;  %v1500_v23 = vld [vmem:[%s15324_s22 + $0x6f38] sm:$0xff]  ;;  %1497 = vst [vmem:[%s15329_s23 + $0x12a8] sm:$0xff] %v1496_v21  ;;  %v1502_v24 = vld [vmem:[%s15324_s22 + $0x7080] sm:$0xff] }
 0x13d   : > { %1499 = vst [vmem:[%s15329_s23 + $0x12b0] sm:$0xff] %v1498_v22  ;;  %1501 = vst [vmem:[%s15329_s23 + $0x12b8] sm:$0xff] %v1500_v23  ;;  %v1504_v25 = vld [vmem:[%s15324_s22 + $0x7088] sm:$0xff]  ;;  %v1506_v26 = vld [vmem:[%s15324_s22 + $0x7090] sm:$0xff] }
 0x13e   : > { %1503 = vst [vmem:[%s15329_s23 + $0x12c0] sm:$0xff] %v1502_v24  ;;  %1505 = vst [vmem:[%s15329_s23 + $0x12c8] sm:$0xff] %v1504_v25  ;;  %v1508_v27 = vld [vmem:[%s15324_s22 + $0x7098] sm:$0xff]  ;;  %v1510_v28 = vld [vmem:[%s15324_s22 + $0x70a0] sm:$0xff] }
 0x13f   : > { %1507 = vst [vmem:[%s15329_s23 + $0x12d0] sm:$0xff] %v1506_v26  ;;  %v1512_v29 = vld [vmem:[%s15324_s22 + $0x70a8] sm:$0xff]  ;;  %1509 = vst [vmem:[%s15329_s23 + $0x12d8] sm:$0xff] %v1508_v27  ;;  %v1514_v30 = vld [vmem:[%s15324_s22 + $0x70b0] sm:$0xff] }
 0x140   : > { %1511 = vst [vmem:[%s15329_s23 + $0x12e0] sm:$0xff] %v1510_v28  ;;  %1513 = vst [vmem:[%s15329_s23 + $0x12e8] sm:$0xff] %v1512_v29  ;;  %v1516_v31 = vld [vmem:[%s15324_s22 + $0x70b8] sm:$0xff]  ;;  %v1518_v32 = vld [vmem:[%s15324_s22 + $0x7200] sm:$0xff] }
 0x141   : > { %1515 = vst [vmem:[%s15329_s23 + $0x12f0] sm:$0xff] %v1514_v30  ;;  %1517 = vst [vmem:[%s15329_s23 + $0x12f8] sm:$0xff] %v1516_v31  ;;  %v1520_v33 = vld [vmem:[%s15324_s22 + $0x7208] sm:$0xff]  ;;  %v1522_v34 = vld [vmem:[%s15324_s22 + $0x7210] sm:$0xff] }
 0x142   : > { %1519 = vst [vmem:[%s15329_s23 + $0x1300] sm:$0xff] %v1518_v32  ;;  %v1524_v35 = vld [vmem:[%s15324_s22 + $0x7218] sm:$0xff]  ;;  %1521 = vst [vmem:[%s15329_s23 + $0x1308] sm:$0xff] %v1520_v33  ;;  %v1526_v36 = vld [vmem:[%s15324_s22 + $0x7220] sm:$0xff] }
 0x143   : > { %1523 = vst [vmem:[%s15329_s23 + $0x1310] sm:$0xff] %v1522_v34  ;;  %1525 = vst [vmem:[%s15329_s23 + $0x1318] sm:$0xff] %v1524_v35  ;;  %v1528_v37 = vld [vmem:[%s15324_s22 + $0x7228] sm:$0xff]  ;;  %v1530_v38 = vld [vmem:[%s15324_s22 + $0x7230] sm:$0xff] }
 0x144   : > { %1527 = vst [vmem:[%s15329_s23 + $0x1320] sm:$0xff] %v1526_v36  ;;  %1529 = vst [vmem:[%s15329_s23 + $0x1328] sm:$0xff] %v1528_v37  ;;  %v1532_v39 = vld [vmem:[%s15324_s22 + $0x7238] sm:$0xff]  ;;  %v1534_v40 = vld [vmem:[%s15324_s22 + $0x7380] sm:$0xff] }
 0x145   : > { %1531 = vst [vmem:[%s15329_s23 + $0x1330] sm:$0xff] %v1530_v38  ;;  %v1536_v41 = vld [vmem:[%s15324_s22 + $0x7388] sm:$0xff]  ;;  %1533 = vst [vmem:[%s15329_s23 + $0x1338] sm:$0xff] %v1532_v39  ;;  %v1538_v42 = vld [vmem:[%s15324_s22 + $0x7390] sm:$0xff] }
 0x146   : > { %1535 = vst [vmem:[%s15329_s23 + $0x1340] sm:$0xff] %v1534_v40  ;;  %1537 = vst [vmem:[%s15329_s23 + $0x1348] sm:$0xff] %v1536_v41  ;;  %v1540_v43 = vld [vmem:[%s15324_s22 + $0x7398] sm:$0xff]  ;;  %v1542_v44 = vld [vmem:[%s15324_s22 + $0x73a0] sm:$0xff] }
 0x147   : > { %1539 = vst [vmem:[%s15329_s23 + $0x1350] sm:$0xff] %v1538_v42  ;;  %1541 = vst [vmem:[%s15329_s23 + $0x1358] sm:$0xff] %v1540_v43  ;;  %v1544_v45 = vld [vmem:[%s15324_s22 + $0x73a8] sm:$0xff]  ;;  %v1546_v46 = vld [vmem:[%s15324_s22 + $0x73b0] sm:$0xff] }
 0x148   : > { %1543 = vst [vmem:[%s15329_s23 + $0x1360] sm:$0xff] %v1542_v44  ;;  %v1548_v47 = vld [vmem:[%s15324_s22 + $0x73b8] sm:$0xff]  ;;  %1545 = vst [vmem:[%s15329_s23 + $0x1368] sm:$0xff] %v1544_v45  ;;  %v1550_v48 = vld [vmem:[%s15324_s22 + $0x7500] sm:$0xff] }
 0x149   : > { %1547 = vst [vmem:[%s15329_s23 + $0x1370] sm:$0xff] %v1546_v46  ;;  %1549 = vst [vmem:[%s15329_s23 + $0x1378] sm:$0xff] %v1548_v47  ;;  %v1552_v49 = vld [vmem:[%s15324_s22 + $0x7508] sm:$0xff]  ;;  %v1554_v50 = vld [vmem:[%s15324_s22 + $0x7510] sm:$0xff] }
 0x14a   : > { %1551 = vst [vmem:[%s15329_s23 + $0x1380] sm:$0xff] %v1550_v48  ;;  %1553 = vst [vmem:[%s15329_s23 + $0x1388] sm:$0xff] %v1552_v49  ;;  %v1556_v51 = vld [vmem:[%s15324_s22 + $0x7518] sm:$0xff]  ;;  %v1558_v52 = vld [vmem:[%s15324_s22 + $0x7520] sm:$0xff] }
 0x14b   : > { %1555 = vst [vmem:[%s15329_s23 + $0x1390] sm:$0xff] %v1554_v50  ;;  %v1560_v53 = vld [vmem:[%s15324_s22 + $0x7528] sm:$0xff]  ;;  %1557 = vst [vmem:[%s15329_s23 + $0x1398] sm:$0xff] %v1556_v51  ;;  %v1562_v54 = vld [vmem:[%s15324_s22 + $0x7530] sm:$0xff] }
 0x14c   : > { %1559 = vst [vmem:[%s15329_s23 + $0x13a0] sm:$0xff] %v1558_v52  ;;  %1561 = vst [vmem:[%s15329_s23 + $0x13a8] sm:$0xff] %v1560_v53  ;;  %v1564_v55 = vld [vmem:[%s15324_s22 + $0x7538] sm:$0xff]  ;;  %v1566_v56 = vld [vmem:[%s15324_s22 + $0x7680] sm:$0xff] }
 0x14d   : > { %1563 = vst [vmem:[%s15329_s23 + $0x13b0] sm:$0xff] %v1562_v54  ;;  %1565 = vst [vmem:[%s15329_s23 + $0x13b8] sm:$0xff] %v1564_v55  ;;  %v1568_v57 = vld [vmem:[%s15324_s22 + $0x7688] sm:$0xff]  ;;  %v1570_v58 = vld [vmem:[%s15324_s22 + $0x7690] sm:$0xff] }
 0x14e   : > { %1567 = vst [vmem:[%s15329_s23 + $0x13c0] sm:$0xff] %v1566_v56  ;;  %v1572_v59 = vld [vmem:[%s15324_s22 + $0x7698] sm:$0xff]  ;;  %1569 = vst [vmem:[%s15329_s23 + $0x13c8] sm:$0xff] %v1568_v57  ;;  %v1574_v60 = vld [vmem:[%s15324_s22 + $0x76a0] sm:$0xff] }
 0x14f   : > { %1571 = vst [vmem:[%s15329_s23 + $0x13d0] sm:$0xff] %v1570_v58  ;;  %1573 = vst [vmem:[%s15329_s23 + $0x13d8] sm:$0xff] %v1572_v59  ;;  %v1576_v61 = vld [vmem:[%s15324_s22 + $0x76a8] sm:$0xff]  ;;  %v1578_v62 = vld [vmem:[%s15324_s22 + $0x76b0] sm:$0xff] }
 0x150   : > { %1575 = vst [vmem:[%s15329_s23 + $0x13e0] sm:$0xff] %v1574_v60  ;;  %1577 = vst [vmem:[%s15329_s23 + $0x13e8] sm:$0xff] %v1576_v61  ;;  %v1580_v63 = vld [vmem:[%s15324_s22 + $0x76b8] sm:$0xff]  ;;  %v1582_v0 = vld [vmem:[%s15324_s22 + $0x7800] sm:$0xff] }
 0x151   : > { %1579 = vst [vmem:[%s15329_s23 + $0x13f0] sm:$0xff] %v1578_v62  ;;  %v1584_v1 = vld [vmem:[%s15324_s22 + $0x7808] sm:$0xff]  ;;  %1581 = vst [vmem:[%s15329_s23 + $0x13f8] sm:$0xff] %v1580_v63  ;;  %v1586_v2 = vld [vmem:[%s15324_s22 + $0x7810] sm:$0xff] }
 0x152   : > { %1583 = vst [vmem:[%s15329_s23 + $0x1400] sm:$0xff] %v1582_v0  ;;  %1585 = vst [vmem:[%s15329_s23 + $0x1408] sm:$0xff] %v1584_v1  ;;  %v1588_v3 = vld [vmem:[%s15324_s22 + $0x7818] sm:$0xff]  ;;  %v1590_v4 = vld [vmem:[%s15324_s22 + $0x7820] sm:$0xff] }
 0x153   : > { %1587 = vst [vmem:[%s15329_s23 + $0x1410] sm:$0xff] %v1586_v2  ;;  %1589 = vst [vmem:[%s15329_s23 + $0x1418] sm:$0xff] %v1588_v3  ;;  %v1592_v5 = vld [vmem:[%s15324_s22 + $0x7828] sm:$0xff]  ;;  %v1594_v6 = vld [vmem:[%s15324_s22 + $0x7830] sm:$0xff] }
 0x154   : > { %1591 = vst [vmem:[%s15329_s23 + $0x1420] sm:$0xff] %v1590_v4  ;;  %v1596_v7 = vld [vmem:[%s15324_s22 + $0x7838] sm:$0xff]  ;;  %1593 = vst [vmem:[%s15329_s23 + $0x1428] sm:$0xff] %v1592_v5  ;;  %v1598_v8 = vld [vmem:[%s15324_s22 + $0x7980] sm:$0xff] }
 0x155   : > { %1595 = vst [vmem:[%s15329_s23 + $0x1430] sm:$0xff] %v1594_v6  ;;  %1597 = vst [vmem:[%s15329_s23 + $0x1438] sm:$0xff] %v1596_v7  ;;  %v1600_v9 = vld [vmem:[%s15324_s22 + $0x7988] sm:$0xff]  ;;  %v1602_v10 = vld [vmem:[%s15324_s22 + $0x7990] sm:$0xff] }
 0x156   : > { %1599 = vst [vmem:[%s15329_s23 + $0x1440] sm:$0xff] %v1598_v8  ;;  %1601 = vst [vmem:[%s15329_s23 + $0x1448] sm:$0xff] %v1600_v9  ;;  %v1604_v11 = vld [vmem:[%s15324_s22 + $0x7998] sm:$0xff]  ;;  %v1606_v12 = vld [vmem:[%s15324_s22 + $0x79a0] sm:$0xff] }
 0x157   : > { %1603 = vst [vmem:[%s15329_s23 + $0x1450] sm:$0xff] %v1602_v10  ;;  %v1608_v13 = vld [vmem:[%s15324_s22 + $0x79a8] sm:$0xff]  ;;  %1605 = vst [vmem:[%s15329_s23 + $0x1458] sm:$0xff] %v1604_v11  ;;  %v1610_v14 = vld [vmem:[%s15324_s22 + $0x79b0] sm:$0xff] }
 0x158   : > { %1607 = vst [vmem:[%s15329_s23 + $0x1460] sm:$0xff] %v1606_v12  ;;  %1609 = vst [vmem:[%s15329_s23 + $0x1468] sm:$0xff] %v1608_v13  ;;  %v1612_v15 = vld [vmem:[%s15324_s22 + $0x79b8] sm:$0xff]  ;;  %v1614_v16 = vld [vmem:[%s15324_s22 + $0x7b00] sm:$0xff] }
 0x159   : > { %1611 = vst [vmem:[%s15329_s23 + $0x1470] sm:$0xff] %v1610_v14  ;;  %1613 = vst [vmem:[%s15329_s23 + $0x1478] sm:$0xff] %v1612_v15  ;;  %v1616_v17 = vld [vmem:[%s15324_s22 + $0x7b08] sm:$0xff]  ;;  %v1618_v18 = vld [vmem:[%s15324_s22 + $0x7b10] sm:$0xff] }
 0x15a   : > { %1615 = vst [vmem:[%s15329_s23 + $0x1480] sm:$0xff] %v1614_v16  ;;  %v1620_v19 = vld [vmem:[%s15324_s22 + $0x7b18] sm:$0xff]  ;;  %1617 = vst [vmem:[%s15329_s23 + $0x1488] sm:$0xff] %v1616_v17  ;;  %v1622_v20 = vld [vmem:[%s15324_s22 + $0x7b20] sm:$0xff] }
 0x15b   : > { %1619 = vst [vmem:[%s15329_s23 + $0x1490] sm:$0xff] %v1618_v18  ;;  %1621 = vst [vmem:[%s15329_s23 + $0x1498] sm:$0xff] %v1620_v19  ;;  %v1624_v21 = vld [vmem:[%s15324_s22 + $0x7b28] sm:$0xff]  ;;  %v1626_v22 = vld [vmem:[%s15324_s22 + $0x7b30] sm:$0xff] }
 0x15c   : > { %1623 = vst [vmem:[%s15329_s23 + $0x14a0] sm:$0xff] %v1622_v20  ;;  %1625 = vst [vmem:[%s15329_s23 + $0x14a8] sm:$0xff] %v1624_v21  ;;  %v1628_v23 = vld [vmem:[%s15324_s22 + $0x7b38] sm:$0xff]  ;;  %v1630_v24 = vld [vmem:[%s15324_s22 + $0x7c80] sm:$0xff] }
 0x15d   : > { %1627 = vst [vmem:[%s15329_s23 + $0x14b0] sm:$0xff] %v1626_v22  ;;  %v1632_v25 = vld [vmem:[%s15324_s22 + $0x7c88] sm:$0xff]  ;;  %1629 = vst [vmem:[%s15329_s23 + $0x14b8] sm:$0xff] %v1628_v23  ;;  %v1634_v26 = vld [vmem:[%s15324_s22 + $0x7c90] sm:$0xff] }
 0x15e   : > { %1631 = vst [vmem:[%s15329_s23 + $0x14c0] sm:$0xff] %v1630_v24  ;;  %1633 = vst [vmem:[%s15329_s23 + $0x14c8] sm:$0xff] %v1632_v25  ;;  %v1636_v27 = vld [vmem:[%s15324_s22 + $0x7c98] sm:$0xff]  ;;  %v1638_v28 = vld [vmem:[%s15324_s22 + $0x7ca0] sm:$0xff] }
 0x15f   : > { %1635 = vst [vmem:[%s15329_s23 + $0x14d0] sm:$0xff] %v1634_v26  ;;  %1637 = vst [vmem:[%s15329_s23 + $0x14d8] sm:$0xff] %v1636_v27  ;;  %v1640_v29 = vld [vmem:[%s15324_s22 + $0x7ca8] sm:$0xff]  ;;  %v1642_v30 = vld [vmem:[%s15324_s22 + $0x7cb0] sm:$0xff] }
 0x160   : > { %1639 = vst [vmem:[%s15329_s23 + $0x14e0] sm:$0xff] %v1638_v28  ;;  %v1644_v31 = vld [vmem:[%s15324_s22 + $0x7cb8] sm:$0xff]  ;;  %1641 = vst [vmem:[%s15329_s23 + $0x14e8] sm:$0xff] %v1640_v29  ;;  %v1646_v32 = vld [vmem:[%s15324_s22 + $0x7e00] sm:$0xff] }
 0x161   : > { %1643 = vst [vmem:[%s15329_s23 + $0x14f0] sm:$0xff] %v1642_v30  ;;  %1645 = vst [vmem:[%s15329_s23 + $0x14f8] sm:$0xff] %v1644_v31  ;;  %v1648_v33 = vld [vmem:[%s15324_s22 + $0x7e08] sm:$0xff]  ;;  %v1650_v34 = vld [vmem:[%s15324_s22 + $0x7e10] sm:$0xff] }
 0x162   : > { %1647 = vst [vmem:[%s15329_s23 + $0x1500] sm:$0xff] %v1646_v32  ;;  %1649 = vst [vmem:[%s15329_s23 + $0x1508] sm:$0xff] %v1648_v33  ;;  %v1652_v35 = vld [vmem:[%s15324_s22 + $0x7e18] sm:$0xff]  ;;  %v1654_v36 = vld [vmem:[%s15324_s22 + $0x7e20] sm:$0xff] }
 0x163   : > { %1651 = vst [vmem:[%s15329_s23 + $0x1510] sm:$0xff] %v1650_v34  ;;  %v1656_v37 = vld [vmem:[%s15324_s22 + $0x7e28] sm:$0xff]  ;;  %1653 = vst [vmem:[%s15329_s23 + $0x1518] sm:$0xff] %v1652_v35  ;;  %v1658_v38 = vld [vmem:[%s15324_s22 + $0x7e30] sm:$0xff] }
 0x164   : > { %1655 = vst [vmem:[%s15329_s23 + $0x1520] sm:$0xff] %v1654_v36  ;;  %1657 = vst [vmem:[%s15329_s23 + $0x1528] sm:$0xff] %v1656_v37  ;;  %v1660_v39 = vld [vmem:[%s15324_s22 + $0x7e38] sm:$0xff]  ;;  %v1662_v40 = vld [vmem:[%s15324_s22 + $0x7f80] sm:$0xff] }
 0x165   : > { %1659 = vst [vmem:[%s15329_s23 + $0x1530] sm:$0xff] %v1658_v38  ;;  %1661 = vst [vmem:[%s15329_s23 + $0x1538] sm:$0xff] %v1660_v39  ;;  %v1664_v41 = vld [vmem:[%s15324_s22 + $0x7f88] sm:$0xff]  ;;  %v1666_v42 = vld [vmem:[%s15324_s22 + $0x7f90] sm:$0xff] }
 0x166   : > { %1663 = vst [vmem:[%s15329_s23 + $0x1540] sm:$0xff] %v1662_v40  ;;  %v1668_v43 = vld [vmem:[%s15324_s22 + $0x7f98] sm:$0xff]  ;;  %1665 = vst [vmem:[%s15329_s23 + $0x1548] sm:$0xff] %v1664_v41  ;;  %v1670_v44 = vld [vmem:[%s15324_s22 + $0x7fa0] sm:$0xff] }
 0x167   : > { %1667 = vst [vmem:[%s15329_s23 + $0x1550] sm:$0xff] %v1666_v42  ;;  %1669 = vst [vmem:[%s15329_s23 + $0x1558] sm:$0xff] %v1668_v43  ;;  %v1672_v45 = vld [vmem:[%s15324_s22 + $0x7fa8] sm:$0xff]  ;;  %v1674_v46 = vld [vmem:[%s15324_s22 + $0x7fb0] sm:$0xff] }
 0x168   : > { %1671 = vst [vmem:[%s15329_s23 + $0x1560] sm:$0xff] %v1670_v44  ;;  %1673 = vst [vmem:[%s15329_s23 + $0x1568] sm:$0xff] %v1672_v45  ;;  %v1676_v47 = vld [vmem:[%s15324_s22 + $0x7fb8] sm:$0xff]  ;;  %v1678_v48 = vld [vmem:[%s15324_s22 + $0x8100] sm:$0xff] }
 0x169   : > { %1675 = vst [vmem:[%s15329_s23 + $0x1570] sm:$0xff] %v1674_v46  ;;  %v1680_v49 = vld [vmem:[%s15324_s22 + $0x8108] sm:$0xff]  ;;  %1677 = vst [vmem:[%s15329_s23 + $0x1578] sm:$0xff] %v1676_v47  ;;  %v1682_v50 = vld [vmem:[%s15324_s22 + $0x8110] sm:$0xff] }
 0x16a   : > { %1679 = vst [vmem:[%s15329_s23 + $0x1580] sm:$0xff] %v1678_v48  ;;  %1681 = vst [vmem:[%s15329_s23 + $0x1588] sm:$0xff] %v1680_v49  ;;  %v1684_v51 = vld [vmem:[%s15324_s22 + $0x8118] sm:$0xff]  ;;  %v1686_v52 = vld [vmem:[%s15324_s22 + $0x8120] sm:$0xff] }
 0x16b   : > { %1683 = vst [vmem:[%s15329_s23 + $0x1590] sm:$0xff] %v1682_v50  ;;  %1685 = vst [vmem:[%s15329_s23 + $0x1598] sm:$0xff] %v1684_v51  ;;  %v1688_v53 = vld [vmem:[%s15324_s22 + $0x8128] sm:$0xff]  ;;  %v1690_v54 = vld [vmem:[%s15324_s22 + $0x8130] sm:$0xff] }
 0x16c   : > { %1687 = vst [vmem:[%s15329_s23 + $0x15a0] sm:$0xff] %v1686_v52  ;;  %v1692_v55 = vld [vmem:[%s15324_s22 + $0x8138] sm:$0xff]  ;;  %1689 = vst [vmem:[%s15329_s23 + $0x15a8] sm:$0xff] %v1688_v53  ;;  %v1694_v56 = vld [vmem:[%s15324_s22 + $0x8280] sm:$0xff] }
 0x16d   : > { %1691 = vst [vmem:[%s15329_s23 + $0x15b0] sm:$0xff] %v1690_v54  ;;  %1693 = vst [vmem:[%s15329_s23 + $0x15b8] sm:$0xff] %v1692_v55  ;;  %v1696_v57 = vld [vmem:[%s15324_s22 + $0x8288] sm:$0xff]  ;;  %v1698_v58 = vld [vmem:[%s15324_s22 + $0x8290] sm:$0xff] }
 0x16e   : > { %1695 = vst [vmem:[%s15329_s23 + $0x15c0] sm:$0xff] %v1694_v56  ;;  %1697 = vst [vmem:[%s15329_s23 + $0x15c8] sm:$0xff] %v1696_v57  ;;  %v1700_v59 = vld [vmem:[%s15324_s22 + $0x8298] sm:$0xff]  ;;  %v1702_v60 = vld [vmem:[%s15324_s22 + $0x82a0] sm:$0xff] }
 0x16f   : > { %1699 = vst [vmem:[%s15329_s23 + $0x15d0] sm:$0xff] %v1698_v58  ;;  %v1704_v61 = vld [vmem:[%s15324_s22 + $0x82a8] sm:$0xff]  ;;  %1701 = vst [vmem:[%s15329_s23 + $0x15d8] sm:$0xff] %v1700_v59  ;;  %v1706_v62 = vld [vmem:[%s15324_s22 + $0x82b0] sm:$0xff] }
 0x170   : > { %1703 = vst [vmem:[%s15329_s23 + $0x15e0] sm:$0xff] %v1702_v60  ;;  %1705 = vst [vmem:[%s15329_s23 + $0x15e8] sm:$0xff] %v1704_v61  ;;  %v1708_v63 = vld [vmem:[%s15324_s22 + $0x82b8] sm:$0xff]  ;;  %v1710_v0 = vld [vmem:[%s15324_s22 + $0x8400] sm:$0xff] }
 0x171   : > { %1707 = vst [vmem:[%s15329_s23 + $0x15f0] sm:$0xff] %v1706_v62  ;;  %1709 = vst [vmem:[%s15329_s23 + $0x15f8] sm:$0xff] %v1708_v63  ;;  %v1712_v1 = vld [vmem:[%s15324_s22 + $0x8408] sm:$0xff]  ;;  %v1714_v2 = vld [vmem:[%s15324_s22 + $0x8410] sm:$0xff] }
 0x172   : > { %1711 = vst [vmem:[%s15329_s23 + $0x1600] sm:$0xff] %v1710_v0  ;;  %v1716_v3 = vld [vmem:[%s15324_s22 + $0x8418] sm:$0xff]  ;;  %1713 = vst [vmem:[%s15329_s23 + $0x1608] sm:$0xff] %v1712_v1  ;;  %v1718_v4 = vld [vmem:[%s15324_s22 + $0x8420] sm:$0xff] }
 0x173   : > { %1715 = vst [vmem:[%s15329_s23 + $0x1610] sm:$0xff] %v1714_v2  ;;  %1717 = vst [vmem:[%s15329_s23 + $0x1618] sm:$0xff] %v1716_v3  ;;  %v1720_v5 = vld [vmem:[%s15324_s22 + $0x8428] sm:$0xff]  ;;  %v1722_v6 = vld [vmem:[%s15324_s22 + $0x8430] sm:$0xff] }
 0x174   : > { %1719 = vst [vmem:[%s15329_s23 + $0x1620] sm:$0xff] %v1718_v4  ;;  %1721 = vst [vmem:[%s15329_s23 + $0x1628] sm:$0xff] %v1720_v5  ;;  %v1724_v7 = vld [vmem:[%s15324_s22 + $0x8438] sm:$0xff]  ;;  %v1726_v8 = vld [vmem:[%s15324_s22 + $0x8580] sm:$0xff] }
 0x175   : > { %1723 = vst [vmem:[%s15329_s23 + $0x1630] sm:$0xff] %v1722_v6  ;;  %v1728_v9 = vld [vmem:[%s15324_s22 + $0x8588] sm:$0xff]  ;;  %1725 = vst [vmem:[%s15329_s23 + $0x1638] sm:$0xff] %v1724_v7  ;;  %v1730_v10 = vld [vmem:[%s15324_s22 + $0x8590] sm:$0xff] }
 0x176   : > { %1727 = vst [vmem:[%s15329_s23 + $0x1640] sm:$0xff] %v1726_v8  ;;  %1729 = vst [vmem:[%s15329_s23 + $0x1648] sm:$0xff] %v1728_v9  ;;  %v1732_v11 = vld [vmem:[%s15324_s22 + $0x8598] sm:$0xff]  ;;  %v1734_v12 = vld [vmem:[%s15324_s22 + $0x85a0] sm:$0xff] }
 0x177   : > { %1731 = vst [vmem:[%s15329_s23 + $0x1650] sm:$0xff] %v1730_v10  ;;  %1733 = vst [vmem:[%s15329_s23 + $0x1658] sm:$0xff] %v1732_v11  ;;  %v1736_v13 = vld [vmem:[%s15324_s22 + $0x85a8] sm:$0xff]  ;;  %v1738_v14 = vld [vmem:[%s15324_s22 + $0x85b0] sm:$0xff] }
 0x178   : > { %1735 = vst [vmem:[%s15329_s23 + $0x1660] sm:$0xff] %v1734_v12  ;;  %v1740_v15 = vld [vmem:[%s15324_s22 + $0x85b8] sm:$0xff]  ;;  %1737 = vst [vmem:[%s15329_s23 + $0x1668] sm:$0xff] %v1736_v13  ;;  %v1742_v16 = vld [vmem:[%s15324_s22 + $0x8700] sm:$0xff] }
 0x179   : > { %1739 = vst [vmem:[%s15329_s23 + $0x1670] sm:$0xff] %v1738_v14  ;;  %1741 = vst [vmem:[%s15329_s23 + $0x1678] sm:$0xff] %v1740_v15  ;;  %v1744_v17 = vld [vmem:[%s15324_s22 + $0x8708] sm:$0xff]  ;;  %v1746_v18 = vld [vmem:[%s15324_s22 + $0x8710] sm:$0xff] }
 0x17a   : > { %1743 = vst [vmem:[%s15329_s23 + $0x1680] sm:$0xff] %v1742_v16  ;;  %1745 = vst [vmem:[%s15329_s23 + $0x1688] sm:$0xff] %v1744_v17  ;;  %v1748_v19 = vld [vmem:[%s15324_s22 + $0x8718] sm:$0xff]  ;;  %v1750_v20 = vld [vmem:[%s15324_s22 + $0x8720] sm:$0xff] }
 0x17b   : > { %1747 = vst [vmem:[%s15329_s23 + $0x1690] sm:$0xff] %v1746_v18  ;;  %v1752_v21 = vld [vmem:[%s15324_s22 + $0x8728] sm:$0xff]  ;;  %1749 = vst [vmem:[%s15329_s23 + $0x1698] sm:$0xff] %v1748_v19  ;;  %v1754_v22 = vld [vmem:[%s15324_s22 + $0x8730] sm:$0xff] }
 0x17c   : > { %1751 = vst [vmem:[%s15329_s23 + $0x16a0] sm:$0xff] %v1750_v20  ;;  %1753 = vst [vmem:[%s15329_s23 + $0x16a8] sm:$0xff] %v1752_v21  ;;  %v1756_v23 = vld [vmem:[%s15324_s22 + $0x8738] sm:$0xff]  ;;  %v1758_v24 = vld [vmem:[%s15324_s22 + $0x8880] sm:$0xff] }
 0x17d   : > { %1755 = vst [vmem:[%s15329_s23 + $0x16b0] sm:$0xff] %v1754_v22  ;;  %1757 = vst [vmem:[%s15329_s23 + $0x16b8] sm:$0xff] %v1756_v23  ;;  %v1760_v25 = vld [vmem:[%s15324_s22 + $0x8888] sm:$0xff]  ;;  %v1762_v26 = vld [vmem:[%s15324_s22 + $0x8890] sm:$0xff] }
 0x17e   : > { %1759 = vst [vmem:[%s15329_s23 + $0x16c0] sm:$0xff] %v1758_v24  ;;  %v1764_v27 = vld [vmem:[%s15324_s22 + $0x8898] sm:$0xff]  ;;  %1761 = vst [vmem:[%s15329_s23 + $0x16c8] sm:$0xff] %v1760_v25  ;;  %v1766_v28 = vld [vmem:[%s15324_s22 + $0x88a0] sm:$0xff] }
 0x17f   : > { %1763 = vst [vmem:[%s15329_s23 + $0x16d0] sm:$0xff] %v1762_v26  ;;  %1765 = vst [vmem:[%s15329_s23 + $0x16d8] sm:$0xff] %v1764_v27  ;;  %v1768_v29 = vld [vmem:[%s15324_s22 + $0x88a8] sm:$0xff]  ;;  %v1770_v30 = vld [vmem:[%s15324_s22 + $0x88b0] sm:$0xff] }
 0x180   : > { %1767 = vst [vmem:[%s15329_s23 + $0x16e0] sm:$0xff] %v1766_v28  ;;  %1769 = vst [vmem:[%s15329_s23 + $0x16e8] sm:$0xff] %v1768_v29  ;;  %v1772_v31 = vld [vmem:[%s15324_s22 + $0x88b8] sm:$0xff]  ;;  %v1774_v32 = vld [vmem:[%s15324_s22 + $0x8a00] sm:$0xff] }
 0x181   : > { %1771 = vst [vmem:[%s15329_s23 + $0x16f0] sm:$0xff] %v1770_v30  ;;  %v1776_v33 = vld [vmem:[%s15324_s22 + $0x8a08] sm:$0xff]  ;;  %1773 = vst [vmem:[%s15329_s23 + $0x16f8] sm:$0xff] %v1772_v31  ;;  %v1778_v34 = vld [vmem:[%s15324_s22 + $0x8a10] sm:$0xff] }
 0x182   : > { %1775 = vst [vmem:[%s15329_s23 + $0x1700] sm:$0xff] %v1774_v32  ;;  %1777 = vst [vmem:[%s15329_s23 + $0x1708] sm:$0xff] %v1776_v33  ;;  %v1780_v35 = vld [vmem:[%s15324_s22 + $0x8a18] sm:$0xff]  ;;  %v1782_v36 = vld [vmem:[%s15324_s22 + $0x8a20] sm:$0xff] }
 0x183   : > { %1779 = vst [vmem:[%s15329_s23 + $0x1710] sm:$0xff] %v1778_v34  ;;  %1781 = vst [vmem:[%s15329_s23 + $0x1718] sm:$0xff] %v1780_v35  ;;  %v1784_v37 = vld [vmem:[%s15324_s22 + $0x8a28] sm:$0xff]  ;;  %v1786_v38 = vld [vmem:[%s15324_s22 + $0x8a30] sm:$0xff] }
 0x184   : > { %1783 = vst [vmem:[%s15329_s23 + $0x1720] sm:$0xff] %v1782_v36  ;;  %v1788_v39 = vld [vmem:[%s15324_s22 + $0x8a38] sm:$0xff]  ;;  %1785 = vst [vmem:[%s15329_s23 + $0x1728] sm:$0xff] %v1784_v37  ;;  %v1790_v40 = vld [vmem:[%s15324_s22 + $0x8b80] sm:$0xff] }
 0x185   : > { %1787 = vst [vmem:[%s15329_s23 + $0x1730] sm:$0xff] %v1786_v38  ;;  %1789 = vst [vmem:[%s15329_s23 + $0x1738] sm:$0xff] %v1788_v39  ;;  %v1792_v41 = vld [vmem:[%s15324_s22 + $0x8b88] sm:$0xff]  ;;  %v1794_v42 = vld [vmem:[%s15324_s22 + $0x8b90] sm:$0xff] }
 0x186   : > { %1791 = vst [vmem:[%s15329_s23 + $0x1740] sm:$0xff] %v1790_v40  ;;  %1793 = vst [vmem:[%s15329_s23 + $0x1748] sm:$0xff] %v1792_v41  ;;  %v1796_v43 = vld [vmem:[%s15324_s22 + $0x8b98] sm:$0xff]  ;;  %v1798_v44 = vld [vmem:[%s15324_s22 + $0x8ba0] sm:$0xff] }
 0x187   : > { %1795 = vst [vmem:[%s15329_s23 + $0x1750] sm:$0xff] %v1794_v42  ;;  %v1800_v45 = vld [vmem:[%s15324_s22 + $0x8ba8] sm:$0xff]  ;;  %1797 = vst [vmem:[%s15329_s23 + $0x1758] sm:$0xff] %v1796_v43  ;;  %v1802_v46 = vld [vmem:[%s15324_s22 + $0x8bb0] sm:$0xff] }
 0x188   : > { %1799 = vst [vmem:[%s15329_s23 + $0x1760] sm:$0xff] %v1798_v44  ;;  %1801 = vst [vmem:[%s15329_s23 + $0x1768] sm:$0xff] %v1800_v45  ;;  %v1804_v47 = vld [vmem:[%s15324_s22 + $0x8bb8] sm:$0xff]  ;;  %v1806_v48 = vld [vmem:[%s15324_s22 + $0x8d00] sm:$0xff] }
 0x189   : > { %1803 = vst [vmem:[%s15329_s23 + $0x1770] sm:$0xff] %v1802_v46  ;;  %1805 = vst [vmem:[%s15329_s23 + $0x1778] sm:$0xff] %v1804_v47  ;;  %v1808_v49 = vld [vmem:[%s15324_s22 + $0x8d08] sm:$0xff]  ;;  %v1810_v50 = vld [vmem:[%s15324_s22 + $0x8d10] sm:$0xff] }
 0x18a   : > { %1807 = vst [vmem:[%s15329_s23 + $0x1780] sm:$0xff] %v1806_v48  ;;  %v1812_v51 = vld [vmem:[%s15324_s22 + $0x8d18] sm:$0xff]  ;;  %1809 = vst [vmem:[%s15329_s23 + $0x1788] sm:$0xff] %v1808_v49  ;;  %v1814_v52 = vld [vmem:[%s15324_s22 + $0x8d20] sm:$0xff] }
 0x18b   : > { %1811 = vst [vmem:[%s15329_s23 + $0x1790] sm:$0xff] %v1810_v50  ;;  %1813 = vst [vmem:[%s15329_s23 + $0x1798] sm:$0xff] %v1812_v51  ;;  %v1816_v53 = vld [vmem:[%s15324_s22 + $0x8d28] sm:$0xff]  ;;  %v1818_v54 = vld [vmem:[%s15324_s22 + $0x8d30] sm:$0xff] }
 0x18c   : > { %1815 = vst [vmem:[%s15329_s23 + $0x17a0] sm:$0xff] %v1814_v52  ;;  %1817 = vst [vmem:[%s15329_s23 + $0x17a8] sm:$0xff] %v1816_v53  ;;  %v1820_v55 = vld [vmem:[%s15324_s22 + $0x8d38] sm:$0xff]  ;;  %v1822_v56 = vld [vmem:[%s15324_s22 + $0x8e80] sm:$0xff] }
 0x18d   : > { %1819 = vst [vmem:[%s15329_s23 + $0x17b0] sm:$0xff] %v1818_v54  ;;  %v1824_v57 = vld [vmem:[%s15324_s22 + $0x8e88] sm:$0xff]  ;;  %1821 = vst [vmem:[%s15329_s23 + $0x17b8] sm:$0xff] %v1820_v55  ;;  %v1826_v58 = vld [vmem:[%s15324_s22 + $0x8e90] sm:$0xff] }
 0x18e   : > { %1823 = vst [vmem:[%s15329_s23 + $0x17c0] sm:$0xff] %v1822_v56  ;;  %1825 = vst [vmem:[%s15329_s23 + $0x17c8] sm:$0xff] %v1824_v57  ;;  %v1828_v59 = vld [vmem:[%s15324_s22 + $0x8e98] sm:$0xff]  ;;  %v1830_v60 = vld [vmem:[%s15324_s22 + $0x8ea0] sm:$0xff] }
 0x18f   : > { %1827 = vst [vmem:[%s15329_s23 + $0x17d0] sm:$0xff] %v1826_v58  ;;  %1829 = vst [vmem:[%s15329_s23 + $0x17d8] sm:$0xff] %v1828_v59  ;;  %v1832_v61 = vld [vmem:[%s15324_s22 + $0x8ea8] sm:$0xff]  ;;  %v1834_v62 = vld [vmem:[%s15324_s22 + $0x8eb0] sm:$0xff] }
 0x190   : > { %1831 = vst [vmem:[%s15329_s23 + $0x17e0] sm:$0xff] %v1830_v60  ;;  %v1836_v63 = vld [vmem:[%s15324_s22 + $0x8eb8] sm:$0xff]  ;;  %1833 = vst [vmem:[%s15329_s23 + $0x17e8] sm:$0xff] %v1832_v61  ;;  %v1838_v0 = vld [vmem:[%s15324_s22 + $0x9000] sm:$0xff] }
 0x191   : > { %1835 = vst [vmem:[%s15329_s23 + $0x17f0] sm:$0xff] %v1834_v62  ;;  %1837 = vst [vmem:[%s15329_s23 + $0x17f8] sm:$0xff] %v1836_v63  ;;  %v1840_v1 = vld [vmem:[%s15324_s22 + $0x9008] sm:$0xff]  ;;  %v1842_v2 = vld [vmem:[%s15324_s22 + $0x9010] sm:$0xff] }
 0x192   : > { %1839 = vst [vmem:[%s15329_s23 + $0x1800] sm:$0xff] %v1838_v0  ;;  %1841 = vst [vmem:[%s15329_s23 + $0x1808] sm:$0xff] %v1840_v1  ;;  %v1844_v3 = vld [vmem:[%s15324_s22 + $0x9018] sm:$0xff]  ;;  %v1846_v4 = vld [vmem:[%s15324_s22 + $0x9020] sm:$0xff] }
 0x193   : > { %1843 = vst [vmem:[%s15329_s23 + $0x1810] sm:$0xff] %v1842_v2  ;;  %v1848_v5 = vld [vmem:[%s15324_s22 + $0x9028] sm:$0xff]  ;;  %1845 = vst [vmem:[%s15329_s23 + $0x1818] sm:$0xff] %v1844_v3  ;;  %v1850_v6 = vld [vmem:[%s15324_s22 + $0x9030] sm:$0xff] }
 0x194   : > { %1847 = vst [vmem:[%s15329_s23 + $0x1820] sm:$0xff] %v1846_v4  ;;  %1849 = vst [vmem:[%s15329_s23 + $0x1828] sm:$0xff] %v1848_v5  ;;  %v1852_v7 = vld [vmem:[%s15324_s22 + $0x9038] sm:$0xff]  ;;  %v1854_v8 = vld [vmem:[%s15324_s22 + $0x9180] sm:$0xff] }
 0x195   : > { %1851 = vst [vmem:[%s15329_s23 + $0x1830] sm:$0xff] %v1850_v6  ;;  %1853 = vst [vmem:[%s15329_s23 + $0x1838] sm:$0xff] %v1852_v7  ;;  %v1856_v9 = vld [vmem:[%s15324_s22 + $0x9188] sm:$0xff]  ;;  %v1858_v10 = vld [vmem:[%s15324_s22 + $0x9190] sm:$0xff] }
 0x196   : > { %1855 = vst [vmem:[%s15329_s23 + $0x1840] sm:$0xff] %v1854_v8  ;;  %v1860_v11 = vld [vmem:[%s15324_s22 + $0x9198] sm:$0xff]  ;;  %1857 = vst [vmem:[%s15329_s23 + $0x1848] sm:$0xff] %v1856_v9  ;;  %v1862_v12 = vld [vmem:[%s15324_s22 + $0x91a0] sm:$0xff] }
 0x197   : > { %1859 = vst [vmem:[%s15329_s23 + $0x1850] sm:$0xff] %v1858_v10  ;;  %1861 = vst [vmem:[%s15329_s23 + $0x1858] sm:$0xff] %v1860_v11  ;;  %v1864_v13 = vld [vmem:[%s15324_s22 + $0x91a8] sm:$0xff]  ;;  %v1866_v14 = vld [vmem:[%s15324_s22 + $0x91b0] sm:$0xff] }
 0x198   : > { %1863 = vst [vmem:[%s15329_s23 + $0x1860] sm:$0xff] %v1862_v12  ;;  %1865 = vst [vmem:[%s15329_s23 + $0x1868] sm:$0xff] %v1864_v13  ;;  %v1868_v15 = vld [vmem:[%s15324_s22 + $0x91b8] sm:$0xff]  ;;  %v1870_v16 = vld [vmem:[%s15324_s22 + $0x9300] sm:$0xff] }
 0x199   : > { %1867 = vst [vmem:[%s15329_s23 + $0x1870] sm:$0xff] %v1866_v14  ;;  %v1872_v17 = vld [vmem:[%s15324_s22 + $0x9308] sm:$0xff]  ;;  %1869 = vst [vmem:[%s15329_s23 + $0x1878] sm:$0xff] %v1868_v15  ;;  %v1874_v18 = vld [vmem:[%s15324_s22 + $0x9310] sm:$0xff] }
 0x19a   : > { %1871 = vst [vmem:[%s15329_s23 + $0x1880] sm:$0xff] %v1870_v16  ;;  %1873 = vst [vmem:[%s15329_s23 + $0x1888] sm:$0xff] %v1872_v17  ;;  %v1876_v19 = vld [vmem:[%s15324_s22 + $0x9318] sm:$0xff]  ;;  %v1878_v20 = vld [vmem:[%s15324_s22 + $0x9320] sm:$0xff] }
 0x19b   : > { %1875 = vst [vmem:[%s15329_s23 + $0x1890] sm:$0xff] %v1874_v18  ;;  %1877 = vst [vmem:[%s15329_s23 + $0x1898] sm:$0xff] %v1876_v19  ;;  %v1880_v21 = vld [vmem:[%s15324_s22 + $0x9328] sm:$0xff]  ;;  %v1882_v22 = vld [vmem:[%s15324_s22 + $0x9330] sm:$0xff] }
 0x19c   : > { %1879 = vst [vmem:[%s15329_s23 + $0x18a0] sm:$0xff] %v1878_v20  ;;  %v1884_v23 = vld [vmem:[%s15324_s22 + $0x9338] sm:$0xff]  ;;  %1881 = vst [vmem:[%s15329_s23 + $0x18a8] sm:$0xff] %v1880_v21  ;;  %v1886_v24 = vld [vmem:[%s15324_s22 + $0x9480] sm:$0xff] }
 0x19d   : > { %1883 = vst [vmem:[%s15329_s23 + $0x18b0] sm:$0xff] %v1882_v22  ;;  %1885 = vst [vmem:[%s15329_s23 + $0x18b8] sm:$0xff] %v1884_v23  ;;  %v1888_v25 = vld [vmem:[%s15324_s22 + $0x9488] sm:$0xff]  ;;  %v1890_v26 = vld [vmem:[%s15324_s22 + $0x9490] sm:$0xff] }
 0x19e   : > { %1887 = vst [vmem:[%s15329_s23 + $0x18c0] sm:$0xff] %v1886_v24  ;;  %1889 = vst [vmem:[%s15329_s23 + $0x18c8] sm:$0xff] %v1888_v25  ;;  %v1892_v27 = vld [vmem:[%s15324_s22 + $0x9498] sm:$0xff]  ;;  %v1894_v28 = vld [vmem:[%s15324_s22 + $0x94a0] sm:$0xff] }
 0x19f   : > { %1891 = vst [vmem:[%s15329_s23 + $0x18d0] sm:$0xff] %v1890_v26  ;;  %v1896_v29 = vld [vmem:[%s15324_s22 + $0x94a8] sm:$0xff]  ;;  %1893 = vst [vmem:[%s15329_s23 + $0x18d8] sm:$0xff] %v1892_v27  ;;  %v1898_v30 = vld [vmem:[%s15324_s22 + $0x94b0] sm:$0xff] }
 0x1a0   : > { %1895 = vst [vmem:[%s15329_s23 + $0x18e0] sm:$0xff] %v1894_v28  ;;  %1897 = vst [vmem:[%s15329_s23 + $0x18e8] sm:$0xff] %v1896_v29  ;;  %v1900_v31 = vld [vmem:[%s15324_s22 + $0x94b8] sm:$0xff]  ;;  %v1902_v32 = vld [vmem:[%s15324_s22 + $0x9600] sm:$0xff] }
 0x1a1   : > { %1899 = vst [vmem:[%s15329_s23 + $0x18f0] sm:$0xff] %v1898_v30  ;;  %1901 = vst [vmem:[%s15329_s23 + $0x18f8] sm:$0xff] %v1900_v31  ;;  %v1904_v33 = vld [vmem:[%s15324_s22 + $0x9608] sm:$0xff]  ;;  %v1906_v34 = vld [vmem:[%s15324_s22 + $0x9610] sm:$0xff] }
 0x1a2   : > { %1903 = vst [vmem:[%s15329_s23 + $0x1900] sm:$0xff] %v1902_v32  ;;  %v1908_v35 = vld [vmem:[%s15324_s22 + $0x9618] sm:$0xff]  ;;  %1905 = vst [vmem:[%s15329_s23 + $0x1908] sm:$0xff] %v1904_v33  ;;  %v1910_v36 = vld [vmem:[%s15324_s22 + $0x9620] sm:$0xff] }
 0x1a3   : > { %1907 = vst [vmem:[%s15329_s23 + $0x1910] sm:$0xff] %v1906_v34  ;;  %1909 = vst [vmem:[%s15329_s23 + $0x1918] sm:$0xff] %v1908_v35  ;;  %v1912_v37 = vld [vmem:[%s15324_s22 + $0x9628] sm:$0xff]  ;;  %v1914_v38 = vld [vmem:[%s15324_s22 + $0x9630] sm:$0xff] }
 0x1a4   : > { %1911 = vst [vmem:[%s15329_s23 + $0x1920] sm:$0xff] %v1910_v36  ;;  %1913 = vst [vmem:[%s15329_s23 + $0x1928] sm:$0xff] %v1912_v37  ;;  %v1916_v39 = vld [vmem:[%s15324_s22 + $0x9638] sm:$0xff]  ;;  %v1918_v40 = vld [vmem:[%s15324_s22 + $0x9780] sm:$0xff] }
 0x1a5   : > { %1915 = vst [vmem:[%s15329_s23 + $0x1930] sm:$0xff] %v1914_v38  ;;  %v1920_v41 = vld [vmem:[%s15324_s22 + $0x9788] sm:$0xff]  ;;  %1917 = vst [vmem:[%s15329_s23 + $0x1938] sm:$0xff] %v1916_v39  ;;  %v1922_v42 = vld [vmem:[%s15324_s22 + $0x9790] sm:$0xff] }
 0x1a6   : > { %1919 = vst [vmem:[%s15329_s23 + $0x1940] sm:$0xff] %v1918_v40  ;;  %1921 = vst [vmem:[%s15329_s23 + $0x1948] sm:$0xff] %v1920_v41  ;;  %v1924_v43 = vld [vmem:[%s15324_s22 + $0x9798] sm:$0xff]  ;;  %v1926_v44 = vld [vmem:[%s15324_s22 + $0x97a0] sm:$0xff] }
 0x1a7   : > { %1923 = vst [vmem:[%s15329_s23 + $0x1950] sm:$0xff] %v1922_v42  ;;  %1925 = vst [vmem:[%s15329_s23 + $0x1958] sm:$0xff] %v1924_v43  ;;  %v1928_v45 = vld [vmem:[%s15324_s22 + $0x97a8] sm:$0xff]  ;;  %v1930_v46 = vld [vmem:[%s15324_s22 + $0x97b0] sm:$0xff] }
 0x1a8   : > { %1927 = vst [vmem:[%s15329_s23 + $0x1960] sm:$0xff] %v1926_v44  ;;  %v1932_v47 = vld [vmem:[%s15324_s22 + $0x97b8] sm:$0xff]  ;;  %1929 = vst [vmem:[%s15329_s23 + $0x1968] sm:$0xff] %v1928_v45  ;;  %v1934_v48 = vld [vmem:[%s15324_s22 + $0x9900] sm:$0xff] }
 0x1a9   : > { %1931 = vst [vmem:[%s15329_s23 + $0x1970] sm:$0xff] %v1930_v46  ;;  %1933 = vst [vmem:[%s15329_s23 + $0x1978] sm:$0xff] %v1932_v47  ;;  %v1936_v49 = vld [vmem:[%s15324_s22 + $0x9908] sm:$0xff]  ;;  %v1938_v50 = vld [vmem:[%s15324_s22 + $0x9910] sm:$0xff] }
 0x1aa   : > { %1935 = vst [vmem:[%s15329_s23 + $0x1980] sm:$0xff] %v1934_v48  ;;  %1937 = vst [vmem:[%s15329_s23 + $0x1988] sm:$0xff] %v1936_v49  ;;  %v1940_v51 = vld [vmem:[%s15324_s22 + $0x9918] sm:$0xff]  ;;  %v1942_v52 = vld [vmem:[%s15324_s22 + $0x9920] sm:$0xff] }
 0x1ab   : > { %1939 = vst [vmem:[%s15329_s23 + $0x1990] sm:$0xff] %v1938_v50  ;;  %v1944_v53 = vld [vmem:[%s15324_s22 + $0x9928] sm:$0xff]  ;;  %1941 = vst [vmem:[%s15329_s23 + $0x1998] sm:$0xff] %v1940_v51  ;;  %v1946_v54 = vld [vmem:[%s15324_s22 + $0x9930] sm:$0xff] }
 0x1ac   : > { %1943 = vst [vmem:[%s15329_s23 + $0x19a0] sm:$0xff] %v1942_v52  ;;  %1945 = vst [vmem:[%s15329_s23 + $0x19a8] sm:$0xff] %v1944_v53  ;;  %v1948_v55 = vld [vmem:[%s15324_s22 + $0x9938] sm:$0xff]  ;;  %v1950_v56 = vld [vmem:[%s15324_s22 + $0x9a80] sm:$0xff] }
 0x1ad   : > { %1947 = vst [vmem:[%s15329_s23 + $0x19b0] sm:$0xff] %v1946_v54  ;;  %1949 = vst [vmem:[%s15329_s23 + $0x19b8] sm:$0xff] %v1948_v55  ;;  %v1952_v57 = vld [vmem:[%s15324_s22 + $0x9a88] sm:$0xff]  ;;  %v1954_v58 = vld [vmem:[%s15324_s22 + $0x9a90] sm:$0xff] }
 0x1ae   : > { %1951 = vst [vmem:[%s15329_s23 + $0x19c0] sm:$0xff] %v1950_v56  ;;  %v1956_v59 = vld [vmem:[%s15324_s22 + $0x9a98] sm:$0xff]  ;;  %1953 = vst [vmem:[%s15329_s23 + $0x19c8] sm:$0xff] %v1952_v57  ;;  %v1958_v60 = vld [vmem:[%s15324_s22 + $0x9aa0] sm:$0xff] }
 0x1af   : > { %1955 = vst [vmem:[%s15329_s23 + $0x19d0] sm:$0xff] %v1954_v58  ;;  %1957 = vst [vmem:[%s15329_s23 + $0x19d8] sm:$0xff] %v1956_v59  ;;  %v1960_v61 = vld [vmem:[%s15324_s22 + $0x9aa8] sm:$0xff]  ;;  %v1962_v62 = vld [vmem:[%s15324_s22 + $0x9ab0] sm:$0xff] }
 0x1b0   : > { %1959 = vst [vmem:[%s15329_s23 + $0x19e0] sm:$0xff] %v1958_v60  ;;  %1961 = vst [vmem:[%s15329_s23 + $0x19e8] sm:$0xff] %v1960_v61  ;;  %v1964_v63 = vld [vmem:[%s15324_s22 + $0x9ab8] sm:$0xff]  ;;  %v1966_v0 = vld [vmem:[%s15324_s22 + $0x9c00] sm:$0xff] }
 0x1b1   : > { %1963 = vst [vmem:[%s15329_s23 + $0x19f0] sm:$0xff] %v1962_v62  ;;  %v1968_v1 = vld [vmem:[%s15324_s22 + $0x9c08] sm:$0xff]  ;;  %1965 = vst [vmem:[%s15329_s23 + $0x19f8] sm:$0xff] %v1964_v63  ;;  %v1970_v2 = vld [vmem:[%s15324_s22 + $0x9c10] sm:$0xff] }
 0x1b2   : > { %1967 = vst [vmem:[%s15329_s23 + $0x1a00] sm:$0xff] %v1966_v0  ;;  %1969 = vst [vmem:[%s15329_s23 + $0x1a08] sm:$0xff] %v1968_v1  ;;  %v1972_v3 = vld [vmem:[%s15324_s22 + $0x9c18] sm:$0xff]  ;;  %v1974_v4 = vld [vmem:[%s15324_s22 + $0x9c20] sm:$0xff] }
 0x1b3   : > { %1971 = vst [vmem:[%s15329_s23 + $0x1a10] sm:$0xff] %v1970_v2  ;;  %1973 = vst [vmem:[%s15329_s23 + $0x1a18] sm:$0xff] %v1972_v3  ;;  %v1976_v5 = vld [vmem:[%s15324_s22 + $0x9c28] sm:$0xff]  ;;  %v1978_v6 = vld [vmem:[%s15324_s22 + $0x9c30] sm:$0xff] }
 0x1b4   : > { %1975 = vst [vmem:[%s15329_s23 + $0x1a20] sm:$0xff] %v1974_v4  ;;  %v1980_v7 = vld [vmem:[%s15324_s22 + $0x9c38] sm:$0xff]  ;;  %1977 = vst [vmem:[%s15329_s23 + $0x1a28] sm:$0xff] %v1976_v5  ;;  %v1982_v8 = vld [vmem:[%s15324_s22 + $0x9d80] sm:$0xff] }
 0x1b5   : > { %1979 = vst [vmem:[%s15329_s23 + $0x1a30] sm:$0xff] %v1978_v6  ;;  %1981 = vst [vmem:[%s15329_s23 + $0x1a38] sm:$0xff] %v1980_v7  ;;  %v1984_v9 = vld [vmem:[%s15324_s22 + $0x9d88] sm:$0xff]  ;;  %v1986_v10 = vld [vmem:[%s15324_s22 + $0x9d90] sm:$0xff] }
 0x1b6   : > { %1983 = vst [vmem:[%s15329_s23 + $0x1a40] sm:$0xff] %v1982_v8  ;;  %1985 = vst [vmem:[%s15329_s23 + $0x1a48] sm:$0xff] %v1984_v9  ;;  %v1988_v11 = vld [vmem:[%s15324_s22 + $0x9d98] sm:$0xff]  ;;  %v1990_v12 = vld [vmem:[%s15324_s22 + $0x9da0] sm:$0xff] }
 0x1b7   : > { %1987 = vst [vmem:[%s15329_s23 + $0x1a50] sm:$0xff] %v1986_v10  ;;  %v1992_v13 = vld [vmem:[%s15324_s22 + $0x9da8] sm:$0xff]  ;;  %1989 = vst [vmem:[%s15329_s23 + $0x1a58] sm:$0xff] %v1988_v11  ;;  %v1994_v14 = vld [vmem:[%s15324_s22 + $0x9db0] sm:$0xff] }
 0x1b8   : > { %1991 = vst [vmem:[%s15329_s23 + $0x1a60] sm:$0xff] %v1990_v12  ;;  %1993 = vst [vmem:[%s15329_s23 + $0x1a68] sm:$0xff] %v1992_v13  ;;  %v1996_v15 = vld [vmem:[%s15324_s22 + $0x9db8] sm:$0xff]  ;;  %v1998_v16 = vld [vmem:[%s15324_s22 + $0x9f00] sm:$0xff] }
 0x1b9   : > { %1995 = vst [vmem:[%s15329_s23 + $0x1a70] sm:$0xff] %v1994_v14  ;;  %1997 = vst [vmem:[%s15329_s23 + $0x1a78] sm:$0xff] %v1996_v15  ;;  %v2000_v17 = vld [vmem:[%s15324_s22 + $0x9f08] sm:$0xff]  ;;  %v2002_v18 = vld [vmem:[%s15324_s22 + $0x9f10] sm:$0xff] }
 0x1ba   : > { %1999 = vst [vmem:[%s15329_s23 + $0x1a80] sm:$0xff] %v1998_v16  ;;  %v2004_v19 = vld [vmem:[%s15324_s22 + $0x9f18] sm:$0xff]  ;;  %2001 = vst [vmem:[%s15329_s23 + $0x1a88] sm:$0xff] %v2000_v17  ;;  %v2006_v20 = vld [vmem:[%s15324_s22 + $0x9f20] sm:$0xff] }
 0x1bb   : > { %2003 = vst [vmem:[%s15329_s23 + $0x1a90] sm:$0xff] %v2002_v18  ;;  %2005 = vst [vmem:[%s15329_s23 + $0x1a98] sm:$0xff] %v2004_v19  ;;  %v2008_v21 = vld [vmem:[%s15324_s22 + $0x9f28] sm:$0xff]  ;;  %v2010_v22 = vld [vmem:[%s15324_s22 + $0x9f30] sm:$0xff] }
 0x1bc   : > { %2007 = vst [vmem:[%s15329_s23 + $0x1aa0] sm:$0xff] %v2006_v20  ;;  %2009 = vst [vmem:[%s15329_s23 + $0x1aa8] sm:$0xff] %v2008_v21  ;;  %v2012_v23 = vld [vmem:[%s15324_s22 + $0x9f38] sm:$0xff]  ;;  %v2014_v24 = vld [vmem:[%s15324_s22 + $0xa080] sm:$0xff] }
 0x1bd   : > { %2011 = vst [vmem:[%s15329_s23 + $0x1ab0] sm:$0xff] %v2010_v22  ;;  %v2016_v25 = vld [vmem:[%s15324_s22 + $0xa088] sm:$0xff]  ;;  %2013 = vst [vmem:[%s15329_s23 + $0x1ab8] sm:$0xff] %v2012_v23  ;;  %v2018_v26 = vld [vmem:[%s15324_s22 + $0xa090] sm:$0xff] }
 0x1be   : > { %2015 = vst [vmem:[%s15329_s23 + $0x1ac0] sm:$0xff] %v2014_v24  ;;  %2017 = vst [vmem:[%s15329_s23 + $0x1ac8] sm:$0xff] %v2016_v25  ;;  %v2020_v27 = vld [vmem:[%s15324_s22 + $0xa098] sm:$0xff]  ;;  %v2022_v28 = vld [vmem:[%s15324_s22 + $0xa0a0] sm:$0xff] }
 0x1bf   : > { %2019 = vst [vmem:[%s15329_s23 + $0x1ad0] sm:$0xff] %v2018_v26  ;;  %2021 = vst [vmem:[%s15329_s23 + $0x1ad8] sm:$0xff] %v2020_v27  ;;  %v2024_v29 = vld [vmem:[%s15324_s22 + $0xa0a8] sm:$0xff]  ;;  %v2026_v30 = vld [vmem:[%s15324_s22 + $0xa0b0] sm:$0xff] }
 0x1c0   : > { %2023 = vst [vmem:[%s15329_s23 + $0x1ae0] sm:$0xff] %v2022_v28  ;;  %v2028_v31 = vld [vmem:[%s15324_s22 + $0xa0b8] sm:$0xff]  ;;  %2025 = vst [vmem:[%s15329_s23 + $0x1ae8] sm:$0xff] %v2024_v29  ;;  %v2030_v32 = vld [vmem:[%s15324_s22 + $0xa200] sm:$0xff] }
 0x1c1   : > { %2027 = vst [vmem:[%s15329_s23 + $0x1af0] sm:$0xff] %v2026_v30  ;;  %2029 = vst [vmem:[%s15329_s23 + $0x1af8] sm:$0xff] %v2028_v31  ;;  %v2032_v33 = vld [vmem:[%s15324_s22 + $0xa208] sm:$0xff]  ;;  %v2034_v34 = vld [vmem:[%s15324_s22 + $0xa210] sm:$0xff] }
 0x1c2   : > { %2031 = vst [vmem:[%s15329_s23 + $0x1b00] sm:$0xff] %v2030_v32  ;;  %2033 = vst [vmem:[%s15329_s23 + $0x1b08] sm:$0xff] %v2032_v33  ;;  %v2036_v35 = vld [vmem:[%s15324_s22 + $0xa218] sm:$0xff]  ;;  %v2038_v36 = vld [vmem:[%s15324_s22 + $0xa220] sm:$0xff] }
 0x1c3   : > { %2035 = vst [vmem:[%s15329_s23 + $0x1b10] sm:$0xff] %v2034_v34  ;;  %v2040_v37 = vld [vmem:[%s15324_s22 + $0xa228] sm:$0xff]  ;;  %2037 = vst [vmem:[%s15329_s23 + $0x1b18] sm:$0xff] %v2036_v35  ;;  %v2042_v38 = vld [vmem:[%s15324_s22 + $0xa230] sm:$0xff] }
 0x1c4   : > { %2039 = vst [vmem:[%s15329_s23 + $0x1b20] sm:$0xff] %v2038_v36  ;;  %2041 = vst [vmem:[%s15329_s23 + $0x1b28] sm:$0xff] %v2040_v37  ;;  %v2044_v39 = vld [vmem:[%s15324_s22 + $0xa238] sm:$0xff]  ;;  %v2046_v40 = vld [vmem:[%s15324_s22 + $0xa380] sm:$0xff] }
 0x1c5   : > { %2043 = vst [vmem:[%s15329_s23 + $0x1b30] sm:$0xff] %v2042_v38  ;;  %2045 = vst [vmem:[%s15329_s23 + $0x1b38] sm:$0xff] %v2044_v39  ;;  %v2048_v41 = vld [vmem:[%s15324_s22 + $0xa388] sm:$0xff]  ;;  %v2050_v42 = vld [vmem:[%s15324_s22 + $0xa390] sm:$0xff] }
 0x1c6   : > { %2047 = vst [vmem:[%s15329_s23 + $0x1b40] sm:$0xff] %v2046_v40  ;;  %v2052_v43 = vld [vmem:[%s15324_s22 + $0xa398] sm:$0xff]  ;;  %2049 = vst [vmem:[%s15329_s23 + $0x1b48] sm:$0xff] %v2048_v41  ;;  %v2054_v44 = vld [vmem:[%s15324_s22 + $0xa3a0] sm:$0xff] }
 0x1c7   : > { %2051 = vst [vmem:[%s15329_s23 + $0x1b50] sm:$0xff] %v2050_v42  ;;  %2053 = vst [vmem:[%s15329_s23 + $0x1b58] sm:$0xff] %v2052_v43  ;;  %v2056_v45 = vld [vmem:[%s15324_s22 + $0xa3a8] sm:$0xff]  ;;  %v2058_v46 = vld [vmem:[%s15324_s22 + $0xa3b0] sm:$0xff] }
 0x1c8   : > { %2055 = vst [vmem:[%s15329_s23 + $0x1b60] sm:$0xff] %v2054_v44  ;;  %2057 = vst [vmem:[%s15329_s23 + $0x1b68] sm:$0xff] %v2056_v45  ;;  %v2060_v47 = vld [vmem:[%s15324_s22 + $0xa3b8] sm:$0xff]  ;;  %v2062_v48 = vld [vmem:[%s15324_s22 + $0xa500] sm:$0xff] }
 0x1c9   : > { %2059 = vst [vmem:[%s15329_s23 + $0x1b70] sm:$0xff] %v2058_v46  ;;  %v2064_v49 = vld [vmem:[%s15324_s22 + $0xa508] sm:$0xff]  ;;  %2061 = vst [vmem:[%s15329_s23 + $0x1b78] sm:$0xff] %v2060_v47  ;;  %v2066_v50 = vld [vmem:[%s15324_s22 + $0xa510] sm:$0xff] }
 0x1ca   : > { %2063 = vst [vmem:[%s15329_s23 + $0x1b80] sm:$0xff] %v2062_v48  ;;  %2065 = vst [vmem:[%s15329_s23 + $0x1b88] sm:$0xff] %v2064_v49  ;;  %v2068_v51 = vld [vmem:[%s15324_s22 + $0xa518] sm:$0xff]  ;;  %v2070_v52 = vld [vmem:[%s15324_s22 + $0xa520] sm:$0xff] }
 0x1cb   : > { %2067 = vst [vmem:[%s15329_s23 + $0x1b90] sm:$0xff] %v2066_v50  ;;  %2069 = vst [vmem:[%s15329_s23 + $0x1b98] sm:$0xff] %v2068_v51  ;;  %v2072_v53 = vld [vmem:[%s15324_s22 + $0xa528] sm:$0xff]  ;;  %v2074_v54 = vld [vmem:[%s15324_s22 + $0xa530] sm:$0xff] }
 0x1cc   : > { %2071 = vst [vmem:[%s15329_s23 + $0x1ba0] sm:$0xff] %v2070_v52  ;;  %v2076_v55 = vld [vmem:[%s15324_s22 + $0xa538] sm:$0xff]  ;;  %2073 = vst [vmem:[%s15329_s23 + $0x1ba8] sm:$0xff] %v2072_v53  ;;  %v2078_v56 = vld [vmem:[%s15324_s22 + $0xa680] sm:$0xff] }
 0x1cd   : > { %2075 = vst [vmem:[%s15329_s23 + $0x1bb0] sm:$0xff] %v2074_v54  ;;  %2077 = vst [vmem:[%s15329_s23 + $0x1bb8] sm:$0xff] %v2076_v55  ;;  %v2080_v57 = vld [vmem:[%s15324_s22 + $0xa688] sm:$0xff]  ;;  %v2082_v58 = vld [vmem:[%s15324_s22 + $0xa690] sm:$0xff] }
 0x1ce   : > { %2079 = vst [vmem:[%s15329_s23 + $0x1bc0] sm:$0xff] %v2078_v56  ;;  %2081 = vst [vmem:[%s15329_s23 + $0x1bc8] sm:$0xff] %v2080_v57  ;;  %v2084_v59 = vld [vmem:[%s15324_s22 + $0xa698] sm:$0xff]  ;;  %v2086_v60 = vld [vmem:[%s15324_s22 + $0xa6a0] sm:$0xff] }
 0x1cf   : > { %2083 = vst [vmem:[%s15329_s23 + $0x1bd0] sm:$0xff] %v2082_v58  ;;  %v2088_v61 = vld [vmem:[%s15324_s22 + $0xa6a8] sm:$0xff]  ;;  %2085 = vst [vmem:[%s15329_s23 + $0x1bd8] sm:$0xff] %v2084_v59  ;;  %v2090_v62 = vld [vmem:[%s15324_s22 + $0xa6b0] sm:$0xff] }
 0x1d0   : > { %2087 = vst [vmem:[%s15329_s23 + $0x1be0] sm:$0xff] %v2086_v60  ;;  %2089 = vst [vmem:[%s15329_s23 + $0x1be8] sm:$0xff] %v2088_v61  ;;  %v2092_v63 = vld [vmem:[%s15324_s22 + $0xa6b8] sm:$0xff]  ;;  %v2094_v0 = vld [vmem:[%s15324_s22 + $0xa800] sm:$0xff] }
 0x1d1   : > { %2091 = vst [vmem:[%s15329_s23 + $0x1bf0] sm:$0xff] %v2090_v62  ;;  %2093 = vst [vmem:[%s15329_s23 + $0x1bf8] sm:$0xff] %v2092_v63  ;;  %v2096_v1 = vld [vmem:[%s15324_s22 + $0xa808] sm:$0xff]  ;;  %v2098_v2 = vld [vmem:[%s15324_s22 + $0xa810] sm:$0xff] }
 0x1d2   : > { %2095 = vst [vmem:[%s15329_s23 + $0x1c00] sm:$0xff] %v2094_v0  ;;  %v2100_v3 = vld [vmem:[%s15324_s22 + $0xa818] sm:$0xff]  ;;  %2097 = vst [vmem:[%s15329_s23 + $0x1c08] sm:$0xff] %v2096_v1  ;;  %v2102_v4 = vld [vmem:[%s15324_s22 + $0xa820] sm:$0xff] }
 0x1d3   : > { %2099 = vst [vmem:[%s15329_s23 + $0x1c10] sm:$0xff] %v2098_v2  ;;  %2101 = vst [vmem:[%s15329_s23 + $0x1c18] sm:$0xff] %v2100_v3  ;;  %v2104_v5 = vld [vmem:[%s15324_s22 + $0xa828] sm:$0xff]  ;;  %v2106_v6 = vld [vmem:[%s15324_s22 + $0xa830] sm:$0xff] }
 0x1d4   : > { %2103 = vst [vmem:[%s15329_s23 + $0x1c20] sm:$0xff] %v2102_v4  ;;  %2105 = vst [vmem:[%s15329_s23 + $0x1c28] sm:$0xff] %v2104_v5  ;;  %v2108_v7 = vld [vmem:[%s15324_s22 + $0xa838] sm:$0xff]  ;;  %v2110_v8 = vld [vmem:[%s15324_s22 + $0xa980] sm:$0xff] }
 0x1d5   : > { %2107 = vst [vmem:[%s15329_s23 + $0x1c30] sm:$0xff] %v2106_v6  ;;  %v2112_v9 = vld [vmem:[%s15324_s22 + $0xa988] sm:$0xff]  ;;  %2109 = vst [vmem:[%s15329_s23 + $0x1c38] sm:$0xff] %v2108_v7  ;;  %v2114_v10 = vld [vmem:[%s15324_s22 + $0xa990] sm:$0xff] }
 0x1d6   : > { %2111 = vst [vmem:[%s15329_s23 + $0x1c40] sm:$0xff] %v2110_v8  ;;  %2113 = vst [vmem:[%s15329_s23 + $0x1c48] sm:$0xff] %v2112_v9  ;;  %v2116_v11 = vld [vmem:[%s15324_s22 + $0xa998] sm:$0xff]  ;;  %v2118_v12 = vld [vmem:[%s15324_s22 + $0xa9a0] sm:$0xff] }
 0x1d7   : > { %2115 = vst [vmem:[%s15329_s23 + $0x1c50] sm:$0xff] %v2114_v10  ;;  %2117 = vst [vmem:[%s15329_s23 + $0x1c58] sm:$0xff] %v2116_v11  ;;  %v2120_v13 = vld [vmem:[%s15324_s22 + $0xa9a8] sm:$0xff]  ;;  %v2122_v14 = vld [vmem:[%s15324_s22 + $0xa9b0] sm:$0xff] }
 0x1d8   : > { %2119 = vst [vmem:[%s15329_s23 + $0x1c60] sm:$0xff] %v2118_v12  ;;  %v2124_v15 = vld [vmem:[%s15324_s22 + $0xa9b8] sm:$0xff]  ;;  %2121 = vst [vmem:[%s15329_s23 + $0x1c68] sm:$0xff] %v2120_v13  ;;  %v2126_v16 = vld [vmem:[%s15324_s22 + $0xab00] sm:$0xff] }
 0x1d9   : > { %2123 = vst [vmem:[%s15329_s23 + $0x1c70] sm:$0xff] %v2122_v14  ;;  %2125 = vst [vmem:[%s15329_s23 + $0x1c78] sm:$0xff] %v2124_v15  ;;  %v2128_v17 = vld [vmem:[%s15324_s22 + $0xab08] sm:$0xff]  ;;  %v2130_v18 = vld [vmem:[%s15324_s22 + $0xab10] sm:$0xff] }
 0x1da   : > { %2127 = vst [vmem:[%s15329_s23 + $0x1c80] sm:$0xff] %v2126_v16  ;;  %2129 = vst [vmem:[%s15329_s23 + $0x1c88] sm:$0xff] %v2128_v17  ;;  %v2132_v19 = vld [vmem:[%s15324_s22 + $0xab18] sm:$0xff]  ;;  %v2134_v20 = vld [vmem:[%s15324_s22 + $0xab20] sm:$0xff] }
 0x1db   : > { %2131 = vst [vmem:[%s15329_s23 + $0x1c90] sm:$0xff] %v2130_v18  ;;  %v2136_v21 = vld [vmem:[%s15324_s22 + $0xab28] sm:$0xff]  ;;  %2133 = vst [vmem:[%s15329_s23 + $0x1c98] sm:$0xff] %v2132_v19  ;;  %v2138_v22 = vld [vmem:[%s15324_s22 + $0xab30] sm:$0xff] }
 0x1dc   : > { %2135 = vst [vmem:[%s15329_s23 + $0x1ca0] sm:$0xff] %v2134_v20  ;;  %2137 = vst [vmem:[%s15329_s23 + $0x1ca8] sm:$0xff] %v2136_v21  ;;  %v2140_v23 = vld [vmem:[%s15324_s22 + $0xab38] sm:$0xff]  ;;  %v2142_v24 = vld [vmem:[%s15324_s22 + $0xac80] sm:$0xff] }
 0x1dd   : > { %2139 = vst [vmem:[%s15329_s23 + $0x1cb0] sm:$0xff] %v2138_v22  ;;  %2141 = vst [vmem:[%s15329_s23 + $0x1cb8] sm:$0xff] %v2140_v23  ;;  %v2144_v25 = vld [vmem:[%s15324_s22 + $0xac88] sm:$0xff]  ;;  %v2146_v26 = vld [vmem:[%s15324_s22 + $0xac90] sm:$0xff] }
 0x1de   : > { %2143 = vst [vmem:[%s15329_s23 + $0x1cc0] sm:$0xff] %v2142_v24  ;;  %v2148_v27 = vld [vmem:[%s15324_s22 + $0xac98] sm:$0xff]  ;;  %2145 = vst [vmem:[%s15329_s23 + $0x1cc8] sm:$0xff] %v2144_v25  ;;  %v2150_v28 = vld [vmem:[%s15324_s22 + $0xaca0] sm:$0xff] }
 0x1df   : > { %2147 = vst [vmem:[%s15329_s23 + $0x1cd0] sm:$0xff] %v2146_v26  ;;  %2149 = vst [vmem:[%s15329_s23 + $0x1cd8] sm:$0xff] %v2148_v27  ;;  %v2152_v29 = vld [vmem:[%s15324_s22 + $0xaca8] sm:$0xff]  ;;  %v2154_v30 = vld [vmem:[%s15324_s22 + $0xacb0] sm:$0xff] }
 0x1e0   : > { %2151 = vst [vmem:[%s15329_s23 + $0x1ce0] sm:$0xff] %v2150_v28  ;;  %2153 = vst [vmem:[%s15329_s23 + $0x1ce8] sm:$0xff] %v2152_v29  ;;  %v2156_v31 = vld [vmem:[%s15324_s22 + $0xacb8] sm:$0xff]  ;;  %v2158_v32 = vld [vmem:[%s15324_s22 + $0xae00] sm:$0xff] }
 0x1e1   : > { %2155 = vst [vmem:[%s15329_s23 + $0x1cf0] sm:$0xff] %v2154_v30  ;;  %v2160_v33 = vld [vmem:[%s15324_s22 + $0xae08] sm:$0xff]  ;;  %2157 = vst [vmem:[%s15329_s23 + $0x1cf8] sm:$0xff] %v2156_v31  ;;  %v2162_v34 = vld [vmem:[%s15324_s22 + $0xae10] sm:$0xff] }
 0x1e2   : > { %2159 = vst [vmem:[%s15329_s23 + $0x1d00] sm:$0xff] %v2158_v32  ;;  %2161 = vst [vmem:[%s15329_s23 + $0x1d08] sm:$0xff] %v2160_v33  ;;  %v2164_v35 = vld [vmem:[%s15324_s22 + $0xae18] sm:$0xff]  ;;  %v2166_v36 = vld [vmem:[%s15324_s22 + $0xae20] sm:$0xff] }
 0x1e3   : > { %2163 = vst [vmem:[%s15329_s23 + $0x1d10] sm:$0xff] %v2162_v34  ;;  %2165 = vst [vmem:[%s15329_s23 + $0x1d18] sm:$0xff] %v2164_v35  ;;  %v2168_v37 = vld [vmem:[%s15324_s22 + $0xae28] sm:$0xff]  ;;  %v2170_v38 = vld [vmem:[%s15324_s22 + $0xae30] sm:$0xff] }
 0x1e4   : > { %2167 = vst [vmem:[%s15329_s23 + $0x1d20] sm:$0xff] %v2166_v36  ;;  %v2172_v39 = vld [vmem:[%s15324_s22 + $0xae38] sm:$0xff]  ;;  %2169 = vst [vmem:[%s15329_s23 + $0x1d28] sm:$0xff] %v2168_v37  ;;  %v2174_v40 = vld [vmem:[%s15324_s22 + $0xaf80] sm:$0xff] }
 0x1e5   : > { %2171 = vst [vmem:[%s15329_s23 + $0x1d30] sm:$0xff] %v2170_v38  ;;  %2173 = vst [vmem:[%s15329_s23 + $0x1d38] sm:$0xff] %v2172_v39  ;;  %v2176_v41 = vld [vmem:[%s15324_s22 + $0xaf88] sm:$0xff]  ;;  %v2178_v42 = vld [vmem:[%s15324_s22 + $0xaf90] sm:$0xff] }
 0x1e6   : > { %2175 = vst [vmem:[%s15329_s23 + $0x1d40] sm:$0xff] %v2174_v40  ;;  %2177 = vst [vmem:[%s15329_s23 + $0x1d48] sm:$0xff] %v2176_v41  ;;  %v2180_v43 = vld [vmem:[%s15324_s22 + $0xaf98] sm:$0xff]  ;;  %v2182_v44 = vld [vmem:[%s15324_s22 + $0xafa0] sm:$0xff] }
 0x1e7   : > { %2179 = vst [vmem:[%s15329_s23 + $0x1d50] sm:$0xff] %v2178_v42  ;;  %v2184_v45 = vld [vmem:[%s15324_s22 + $0xafa8] sm:$0xff]  ;;  %2181 = vst [vmem:[%s15329_s23 + $0x1d58] sm:$0xff] %v2180_v43  ;;  %v2186_v46 = vld [vmem:[%s15324_s22 + $0xafb0] sm:$0xff] }
 0x1e8   : > { %2183 = vst [vmem:[%s15329_s23 + $0x1d60] sm:$0xff] %v2182_v44  ;;  %2185 = vst [vmem:[%s15329_s23 + $0x1d68] sm:$0xff] %v2184_v45  ;;  %v2188_v47 = vld [vmem:[%s15324_s22 + $0xafb8] sm:$0xff]  ;;  %v2190_v48 = vld [vmem:[%s15324_s22 + $0xb100] sm:$0xff] }
 0x1e9   : > { %2187 = vst [vmem:[%s15329_s23 + $0x1d70] sm:$0xff] %v2186_v46  ;;  %2189 = vst [vmem:[%s15329_s23 + $0x1d78] sm:$0xff] %v2188_v47  ;;  %v2192_v49 = vld [vmem:[%s15324_s22 + $0xb108] sm:$0xff]  ;;  %v2194_v50 = vld [vmem:[%s15324_s22 + $0xb110] sm:$0xff] }
 0x1ea   : > { %2191 = vst [vmem:[%s15329_s23 + $0x1d80] sm:$0xff] %v2190_v48  ;;  %v2196_v51 = vld [vmem:[%s15324_s22 + $0xb118] sm:$0xff]  ;;  %2193 = vst [vmem:[%s15329_s23 + $0x1d88] sm:$0xff] %v2192_v49  ;;  %v2198_v52 = vld [vmem:[%s15324_s22 + $0xb120] sm:$0xff] }
 0x1eb   : > { %2195 = vst [vmem:[%s15329_s23 + $0x1d90] sm:$0xff] %v2194_v50  ;;  %2197 = vst [vmem:[%s15329_s23 + $0x1d98] sm:$0xff] %v2196_v51  ;;  %v2200_v53 = vld [vmem:[%s15324_s22 + $0xb128] sm:$0xff]  ;;  %v2202_v54 = vld [vmem:[%s15324_s22 + $0xb130] sm:$0xff] }
 0x1ec   : > { %2199 = vst [vmem:[%s15329_s23 + $0x1da0] sm:$0xff] %v2198_v52  ;;  %2201 = vst [vmem:[%s15329_s23 + $0x1da8] sm:$0xff] %v2200_v53  ;;  %v2204_v55 = vld [vmem:[%s15324_s22 + $0xb138] sm:$0xff]  ;;  %v2206_v56 = vld [vmem:[%s15324_s22 + $0xb280] sm:$0xff] }
 0x1ed   : > { %2203 = vst [vmem:[%s15329_s23 + $0x1db0] sm:$0xff] %v2202_v54  ;;  %v2208_v57 = vld [vmem:[%s15324_s22 + $0xb288] sm:$0xff]  ;;  %2205 = vst [vmem:[%s15329_s23 + $0x1db8] sm:$0xff] %v2204_v55  ;;  %v2210_v58 = vld [vmem:[%s15324_s22 + $0xb290] sm:$0xff] }
 0x1ee   : > { %2207 = vst [vmem:[%s15329_s23 + $0x1dc0] sm:$0xff] %v2206_v56  ;;  %2209 = vst [vmem:[%s15329_s23 + $0x1dc8] sm:$0xff] %v2208_v57  ;;  %v2212_v59 = vld [vmem:[%s15324_s22 + $0xb298] sm:$0xff]  ;;  %v2214_v60 = vld [vmem:[%s15324_s22 + $0xb2a0] sm:$0xff] }
 0x1ef   : > { %2211 = vst [vmem:[%s15329_s23 + $0x1dd0] sm:$0xff] %v2210_v58  ;;  %2213 = vst [vmem:[%s15329_s23 + $0x1dd8] sm:$0xff] %v2212_v59  ;;  %v2216_v61 = vld [vmem:[%s15324_s22 + $0xb2a8] sm:$0xff]  ;;  %v2218_v62 = vld [vmem:[%s15324_s22 + $0xb2b0] sm:$0xff] }
 0x1f0   : > { %2215 = vst [vmem:[%s15329_s23 + $0x1de0] sm:$0xff] %v2214_v60  ;;  %v2220_v63 = vld [vmem:[%s15324_s22 + $0xb2b8] sm:$0xff]  ;;  %2217 = vst [vmem:[%s15329_s23 + $0x1de8] sm:$0xff] %v2216_v61  ;;  %v2222_v0 = vld [vmem:[%s15324_s22 + $0xb400] sm:$0xff] }
 0x1f1   : > { %2219 = vst [vmem:[%s15329_s23 + $0x1df0] sm:$0xff] %v2218_v62  ;;  %2221 = vst [vmem:[%s15329_s23 + $0x1df8] sm:$0xff] %v2220_v63  ;;  %v2224_v1 = vld [vmem:[%s15324_s22 + $0xb408] sm:$0xff]  ;;  %v2226_v2 = vld [vmem:[%s15324_s22 + $0xb410] sm:$0xff] }
 0x1f2   : > { %2223 = vst [vmem:[%s15329_s23 + $0x1e00] sm:$0xff] %v2222_v0  ;;  %2225 = vst [vmem:[%s15329_s23 + $0x1e08] sm:$0xff] %v2224_v1  ;;  %v2228_v3 = vld [vmem:[%s15324_s22 + $0xb418] sm:$0xff]  ;;  %v2230_v4 = vld [vmem:[%s15324_s22 + $0xb420] sm:$0xff] }
 0x1f3   : > { %2227 = vst [vmem:[%s15329_s23 + $0x1e10] sm:$0xff] %v2226_v2  ;;  %v2232_v5 = vld [vmem:[%s15324_s22 + $0xb428] sm:$0xff]  ;;  %2229 = vst [vmem:[%s15329_s23 + $0x1e18] sm:$0xff] %v2228_v3  ;;  %v2234_v6 = vld [vmem:[%s15324_s22 + $0xb430] sm:$0xff] }
 0x1f4   : > { %2231 = vst [vmem:[%s15329_s23 + $0x1e20] sm:$0xff] %v2230_v4  ;;  %2233 = vst [vmem:[%s15329_s23 + $0x1e28] sm:$0xff] %v2232_v5  ;;  %v2236_v7 = vld [vmem:[%s15324_s22 + $0xb438] sm:$0xff]  ;;  %v2238_v8 = vld [vmem:[%s15324_s22 + $0xb580] sm:$0xff] }
 0x1f5   : > { %2235 = vst [vmem:[%s15329_s23 + $0x1e30] sm:$0xff] %v2234_v6  ;;  %2237 = vst [vmem:[%s15329_s23 + $0x1e38] sm:$0xff] %v2236_v7  ;;  %v2240_v9 = vld [vmem:[%s15324_s22 + $0xb588] sm:$0xff]  ;;  %v2242_v10 = vld [vmem:[%s15324_s22 + $0xb590] sm:$0xff] }
 0x1f6   : > { %2239 = vst [vmem:[%s15329_s23 + $0x1e40] sm:$0xff] %v2238_v8  ;;  %v2244_v11 = vld [vmem:[%s15324_s22 + $0xb598] sm:$0xff]  ;;  %2241 = vst [vmem:[%s15329_s23 + $0x1e48] sm:$0xff] %v2240_v9  ;;  %v2246_v12 = vld [vmem:[%s15324_s22 + $0xb5a0] sm:$0xff] }
 0x1f7   : > { %2243 = vst [vmem:[%s15329_s23 + $0x1e50] sm:$0xff] %v2242_v10  ;;  %2245 = vst [vmem:[%s15329_s23 + $0x1e58] sm:$0xff] %v2244_v11  ;;  %v2248_v13 = vld [vmem:[%s15324_s22 + $0xb5a8] sm:$0xff]  ;;  %v2250_v14 = vld [vmem:[%s15324_s22 + $0xb5b0] sm:$0xff] }
 0x1f8   : > { %2247 = vst [vmem:[%s15329_s23 + $0x1e60] sm:$0xff] %v2246_v12  ;;  %2249 = vst [vmem:[%s15329_s23 + $0x1e68] sm:$0xff] %v2248_v13  ;;  %v2252_v15 = vld [vmem:[%s15324_s22 + $0xb5b8] sm:$0xff]  ;;  %v2254_v16 = vld [vmem:[%s15324_s22 + $0xb700] sm:$0xff] }
 0x1f9   : > { %2251 = vst [vmem:[%s15329_s23 + $0x1e70] sm:$0xff] %v2250_v14  ;;  %v2256_v17 = vld [vmem:[%s15324_s22 + $0xb708] sm:$0xff]  ;;  %2253 = vst [vmem:[%s15329_s23 + $0x1e78] sm:$0xff] %v2252_v15  ;;  %v2258_v18 = vld [vmem:[%s15324_s22 + $0xb710] sm:$0xff] }
 0x1fa   : > { %2255 = vst [vmem:[%s15329_s23 + $0x1e80] sm:$0xff] %v2254_v16  ;;  %2257 = vst [vmem:[%s15329_s23 + $0x1e88] sm:$0xff] %v2256_v17  ;;  %v2260_v19 = vld [vmem:[%s15324_s22 + $0xb718] sm:$0xff]  ;;  %v2262_v20 = vld [vmem:[%s15324_s22 + $0xb720] sm:$0xff] }
 0x1fb   : > { %2259 = vst [vmem:[%s15329_s23 + $0x1e90] sm:$0xff] %v2258_v18  ;;  %2261 = vst [vmem:[%s15329_s23 + $0x1e98] sm:$0xff] %v2260_v19  ;;  %v2264_v21 = vld [vmem:[%s15324_s22 + $0xb728] sm:$0xff]  ;;  %v2266_v22 = vld [vmem:[%s15324_s22 + $0xb730] sm:$0xff] }
 0x1fc   : > { %2263 = vst [vmem:[%s15329_s23 + $0x1ea0] sm:$0xff] %v2262_v20  ;;  %v2268_v23 = vld [vmem:[%s15324_s22 + $0xb738] sm:$0xff]  ;;  %2265 = vst [vmem:[%s15329_s23 + $0x1ea8] sm:$0xff] %v2264_v21  ;;  %v2270_v24 = vld [vmem:[%s15324_s22 + $0xb880] sm:$0xff] }
 0x1fd   : > { %2267 = vst [vmem:[%s15329_s23 + $0x1eb0] sm:$0xff] %v2266_v22  ;;  %2269 = vst [vmem:[%s15329_s23 + $0x1eb8] sm:$0xff] %v2268_v23  ;;  %v2272_v25 = vld [vmem:[%s15324_s22 + $0xb888] sm:$0xff]  ;;  %v2274_v26 = vld [vmem:[%s15324_s22 + $0xb890] sm:$0xff] }
 0x1fe   : > { %2271 = vst [vmem:[%s15329_s23 + $0x1ec0] sm:$0xff] %v2270_v24  ;;  %2273 = vst [vmem:[%s15329_s23 + $0x1ec8] sm:$0xff] %v2272_v25  ;;  %v2276_v27 = vld [vmem:[%s15324_s22 + $0xb898] sm:$0xff]  ;;  %v2278_v28 = vld [vmem:[%s15324_s22 + $0xb8a0] sm:$0xff] }
 0x1ff   : > { %2275 = vst [vmem:[%s15329_s23 + $0x1ed0] sm:$0xff] %v2274_v26  ;;  %v2280_v29 = vld [vmem:[%s15324_s22 + $0xb8a8] sm:$0xff]  ;;  %2277 = vst [vmem:[%s15329_s23 + $0x1ed8] sm:$0xff] %v2276_v27  ;;  %v2282_v30 = vld [vmem:[%s15324_s22 + $0xb8b0] sm:$0xff] }
 0x200   : > { %2279 = vst [vmem:[%s15329_s23 + $0x1ee0] sm:$0xff] %v2278_v28  ;;  %2281 = vst [vmem:[%s15329_s23 + $0x1ee8] sm:$0xff] %v2280_v29  ;;  %v2284_v31 = vld [vmem:[%s15324_s22 + $0xb8b8] sm:$0xff]  ;;  %v2286_v32 = vld [vmem:[%s15324_s22 + $0xba00] sm:$0xff] }
 0x201   : > { %2283 = vst [vmem:[%s15329_s23 + $0x1ef0] sm:$0xff] %v2282_v30  ;;  %2285 = vst [vmem:[%s15329_s23 + $0x1ef8] sm:$0xff] %v2284_v31  ;;  %v2288_v33 = vld [vmem:[%s15324_s22 + $0xba08] sm:$0xff]  ;;  %v2290_v34 = vld [vmem:[%s15324_s22 + $0xba10] sm:$0xff] }
 0x202   : > { %2287 = vst [vmem:[%s15329_s23 + $0x1f00] sm:$0xff] %v2286_v32  ;;  %v2292_v35 = vld [vmem:[%s15324_s22 + $0xba18] sm:$0xff]  ;;  %2289 = vst [vmem:[%s15329_s23 + $0x1f08] sm:$0xff] %v2288_v33  ;;  %v2294_v36 = vld [vmem:[%s15324_s22 + $0xba20] sm:$0xff] }
 0x203   : > { %2291 = vst [vmem:[%s15329_s23 + $0x1f10] sm:$0xff] %v2290_v34  ;;  %2293 = vst [vmem:[%s15329_s23 + $0x1f18] sm:$0xff] %v2292_v35  ;;  %v2296_v37 = vld [vmem:[%s15324_s22 + $0xba28] sm:$0xff]  ;;  %v2298_v38 = vld [vmem:[%s15324_s22 + $0xba30] sm:$0xff] }
 0x204   : > { %2295 = vst [vmem:[%s15329_s23 + $0x1f20] sm:$0xff] %v2294_v36  ;;  %2297 = vst [vmem:[%s15329_s23 + $0x1f28] sm:$0xff] %v2296_v37  ;;  %v2300_v39 = vld [vmem:[%s15324_s22 + $0xba38] sm:$0xff]  ;;  %v2302_v40 = vld [vmem:[%s15324_s22 + $0xbb80] sm:$0xff] }
 0x205   : > { %2299 = vst [vmem:[%s15329_s23 + $0x1f30] sm:$0xff] %v2298_v38  ;;  %v2304_v41 = vld [vmem:[%s15324_s22 + $0xbb88] sm:$0xff]  ;;  %2301 = vst [vmem:[%s15329_s23 + $0x1f38] sm:$0xff] %v2300_v39  ;;  %v2306_v42 = vld [vmem:[%s15324_s22 + $0xbb90] sm:$0xff] }
 0x206   : > { %2303 = vst [vmem:[%s15329_s23 + $0x1f40] sm:$0xff] %v2302_v40  ;;  %2305 = vst [vmem:[%s15329_s23 + $0x1f48] sm:$0xff] %v2304_v41  ;;  %v2308_v43 = vld [vmem:[%s15324_s22 + $0xbb98] sm:$0xff]  ;;  %v2310_v44 = vld [vmem:[%s15324_s22 + $0xbba0] sm:$0xff] }
 0x207   : > { %2307 = vst [vmem:[%s15329_s23 + $0x1f50] sm:$0xff] %v2306_v42  ;;  %2309 = vst [vmem:[%s15329_s23 + $0x1f58] sm:$0xff] %v2308_v43  ;;  %v2312_v45 = vld [vmem:[%s15324_s22 + $0xbba8] sm:$0xff]  ;;  %v2314_v46 = vld [vmem:[%s15324_s22 + $0xbbb0] sm:$0xff] }
 0x208   : > { %2311 = vst [vmem:[%s15329_s23 + $0x1f60] sm:$0xff] %v2310_v44  ;;  %v2316_v47 = vld [vmem:[%s15324_s22 + $0xbbb8] sm:$0xff]  ;;  %2313 = vst [vmem:[%s15329_s23 + $0x1f68] sm:$0xff] %v2312_v45  ;;  %v2318_v48 = vld [vmem:[%s15324_s22 + $0xbd00] sm:$0xff] }
 0x209   : > { %2315 = vst [vmem:[%s15329_s23 + $0x1f70] sm:$0xff] %v2314_v46  ;;  %2317 = vst [vmem:[%s15329_s23 + $0x1f78] sm:$0xff] %v2316_v47  ;;  %v2320_v49 = vld [vmem:[%s15324_s22 + $0xbd08] sm:$0xff]  ;;  %v2322_v50 = vld [vmem:[%s15324_s22 + $0xbd10] sm:$0xff] }
 0x20a   : > { %2319 = vst [vmem:[%s15329_s23 + $0x1f80] sm:$0xff] %v2318_v48  ;;  %2321 = vst [vmem:[%s15329_s23 + $0x1f88] sm:$0xff] %v2320_v49  ;;  %v2324_v51 = vld [vmem:[%s15324_s22 + $0xbd18] sm:$0xff]  ;;  %v2326_v52 = vld [vmem:[%s15324_s22 + $0xbd20] sm:$0xff] }
 0x20b   : > { %2323 = vst [vmem:[%s15329_s23 + $0x1f90] sm:$0xff] %v2322_v50  ;;  %v2328_v53 = vld [vmem:[%s15324_s22 + $0xbd28] sm:$0xff]  ;;  %2325 = vst [vmem:[%s15329_s23 + $0x1f98] sm:$0xff] %v2324_v51  ;;  %v2330_v54 = vld [vmem:[%s15324_s22 + $0xbd30] sm:$0xff] }
 0x20c   : > { %2327 = vst [vmem:[%s15329_s23 + $0x1fa0] sm:$0xff] %v2326_v52  ;;  %2329 = vst [vmem:[%s15329_s23 + $0x1fa8] sm:$0xff] %v2328_v53  ;;  %v2332_v55 = vld [vmem:[%s15324_s22 + $0xbd38] sm:$0xff]  ;;  %v2334_v56 = vld [vmem:[%s15324_s22 + $0xbe80] sm:$0xff] }
 0x20d   : > { %2331 = vst [vmem:[%s15329_s23 + $0x1fb0] sm:$0xff] %v2330_v54  ;;  %2333 = vst [vmem:[%s15329_s23 + $0x1fb8] sm:$0xff] %v2332_v55  ;;  %v2336_v57 = vld [vmem:[%s15324_s22 + $0xbe88] sm:$0xff]  ;;  %v2338_v58 = vld [vmem:[%s15324_s22 + $0xbe90] sm:$0xff] }
 0x20e   : > { %2335 = vst [vmem:[%s15329_s23 + $0x1fc0] sm:$0xff] %v2334_v56  ;;  %v2340_v59 = vld [vmem:[%s15324_s22 + $0xbe98] sm:$0xff]  ;;  %2337 = vst [vmem:[%s15329_s23 + $0x1fc8] sm:$0xff] %v2336_v57  ;;  %v2342_v60 = vld [vmem:[%s15324_s22 + $0xbea0] sm:$0xff] }
 0x20f   : > { %2339 = vst [vmem:[%s15329_s23 + $0x1fd0] sm:$0xff] %v2338_v58  ;;  %2341 = vst [vmem:[%s15329_s23 + $0x1fd8] sm:$0xff] %v2340_v59  ;;  %v2344_v61 = vld [vmem:[%s15324_s22 + $0xbea8] sm:$0xff]  ;;  %v2346_v62 = vld [vmem:[%s15324_s22 + $0xbeb0] sm:$0xff] }
 0x210   : > { %2343 = vst [vmem:[%s15329_s23 + $0x1fe0] sm:$0xff] %v2342_v60  ;;  %2345 = vst [vmem:[%s15329_s23 + $0x1fe8] sm:$0xff] %v2344_v61  ;;  %v2348_v63 = vld [vmem:[%s15324_s22 + $0xbeb8] sm:$0xff] }
 0x211   : > { %2347 = vst [vmem:[%s15329_s23 + $0x1ff0] sm:$0xff] %v2346_v62  ;;  %2349 = vst [vmem:[%s15329_s23 + $0x1ff8] sm:$0xff] %v2348_v63 }
 0x212 PF: > { %p13320_p5 = scmp.ge.s32.totalorder %s15237_s11, 1  ;;  %p2362_p6 = scmp.lt.s32.totalorder %s15237_s11, 7 }
 0x214   : > { %p2363_p7 = pnand %p13320_p5, %p2362_p6 }
 0x215   : > { %v14940_v0 = vld [vmem:[%s19948_s1 + $0x4] ss:$8 sps:$4 sm:$0xff] (!%p2363_p7)   ;;  %v14942_v1 = vld [vmem:[%s19948_s1] ss:$8 sps:$4 sm:$0xff] (!%p2363_p7)   ;;  %v14943_v2 = vld [vmem:[%s19948_s1 + $0x14] ss:$8 sps:$4 sm:$0xff] (!%p2363_p7)   ;;  %v2428_v9 = vlaneseq (!%p2363_p7) }
 0x216   : > { %2366 = sbr.rel (%p2363_p7) target bundleno = 2645 (0xa55), region = 75  ;;  %3049 = vmatprep.subr.bf16.mxu0 (!%p2363_p7), %v14940_v0  ;;  %v14945_v3 = vld [vmem:[%s19948_s1 + $0x10] ss:$8 sps:$4 sm:$0xff] (!%p2363_p7)   ;;  %v14946_v4 = vld [vmem:[%s19948_s1 + $0x24] ss:$8 sps:$4 sm:$0xff] (!%p2363_p7)   ;;  %s2369_s23 = sand.u32 (!%p2363_p7), 1, %s15229_s30  }
 0x217   : > { %3050 = vmatpush1.bf16.msra.mxu0 (!%p2363_p7), %v14942_v1  ;;  %v14948_v5 = vld [vmem:[%s19948_s1 + $0x20] ss:$8 sps:$4 sm:$0xff] (!%p2363_p7)   ;;  %v14949_v6 = vld [vmem:[%s19948_s1 + $0x34] ss:$8 sps:$4 sm:$0xff] (!%p2363_p7)   ;;  %v15239_v7 = vmov (!%p2363_p7), 1983009808  }
 0x218   : > { %3051 = vmatprep.subr.bf16.mxu0 (!%p2363_p7), %v14943_v2  ;;  %v2426_v8 = vunpack.c.l.s4 (!%p2363_p7), %v15239_v7  ;;  %v14951_v10 = vld [vmem:[%s19948_s1 + $0x30] ss:$8 sps:$4 sm:$0xff] (!%p2363_p7)   ;;  %v14952_v11 = vld [vmem:[%s19948_s1 + $0x44] ss:$8 sps:$4 sm:$0xff] (!%p2363_p7)   ;;  %v17405_v13 = vshrl.u32 (!%p2363_p7), %v2428_v9, 7  ;;  %s13321_s30 = sshll.u32 (!%p2363_p7), %s2369_s23, 13 }
 0x219   : > { %v14954_v14 = vld [vmem:[%s19948_s1 + $0x40] ss:$8 sps:$4 sm:$0xff] (!%p2363_p7)   ;;  %v14955_v15 = vld [vmem:[%s19948_s1 + $0x54] ss:$8 sps:$4 sm:$0xff] (!%p2363_p7)   ;;  %v14957_v17 = vld [vmem:[%s19948_s1 + $0x50] ss:$8 sps:$4 sm:$0xff] (!%p2363_p7)  }
 0x21a   : > { %v2427_v12 = vunpack.c.0.s8 (!%p2363_p7), %v2426_v8  ;;  %v14958_v18 = vld [vmem:[%s19948_s1 + $0x64] ss:$8 sps:$4 sm:$0xff] (!%p2363_p7)   ;;  %v14960_v21 = vld [vmem:[%s19948_s1 + $0x60] ss:$8 sps:$4 sm:$0xff] (!%p2363_p7)   ;;  %v14961_v22 = vld [vmem:[%s19948_s1 + $0x74] ss:$8 sps:$4 sm:$0xff] (!%p2363_p7)  }
 0x21b   : > { %3052 = vmatpush1.bf16.msra.mxu0 (!%p2363_p7), %v14945_v3  ;;  %v2420_v19 = vld [vmem:[%s19947_s0] sm:$0xff] (!%p2363_p7)  ;;  %v14963_v25 = vld [vmem:[%s19948_s1 + $0x70] ss:$8 sps:$4 sm:$0xff] (!%p2363_p7)   ;;  %v14967_v28 = vld [vmem:[%s19948_s1 + $0x94] ss:$8 sps:$4 sm:$0xff] (!%p2363_p7)   ;;  %s18730_s25 = scalar_lea.vmem (!%p2363_p7), [#allocation2], %s13321_s30 }
 0x21c   : > { %3053 = vmatprep.subr.bf16.mxu0 (!%p2363_p7), %v14946_v4  ;;  %v17414_v16 = vsub.s32 (!%p2363_p7), %v2427_v12, %v17405_v13  ;;  %v14964_v26 = vld [vmem:[%s19948_s1 + $0x84] ss:$8 sps:$4 sm:$0xff] (!%p2363_p7)   ;;  %v14966_v27 = vld [vmem:[%s19948_s1 + $0x80] ss:$8 sps:$4 sm:$0xff] (!%p2363_p7)   ;;  %v14969_v29 = vld [vmem:[%s19948_s1 + $0x90] ss:$8 sps:$4 sm:$0xff] (!%p2363_p7)   ;;  %v2424_v38 = vcombine.high (!%p2363_p7), %v2420_v19, %v2420_v19 }
 0x21d   : > { %v14970_v30 = vld [vmem:[%s19948_s1 + $0xa4] ss:$8 sps:$4 sm:$0xff]   ;;  %v14972_v31 = vld [vmem:[%s19948_s1 + $0xa0] ss:$8 sps:$4 sm:$0xff]   ;;  %v14973_v32 = vld [vmem:[%s19948_s1 + $0xb4] ss:$8 sps:$4 sm:$0xff]  }
 0x21e   : > { %v2431_v20 = vrot.slane %v2420_v19, %v17414_v16  ;;  %v14975_v33 = vld [vmem:[%s19948_s1 + $0xb0] ss:$8 sps:$4 sm:$0xff]   ;;  %v14976_v34 = vld [vmem:[%s19948_s1 + $0xc4] ss:$8 sps:$4 sm:$0xff]   ;;  %v14978_v35 = vld [vmem:[%s19948_s1 + $0xc0] ss:$8 sps:$4 sm:$0xff]   ;;  %v17478_v41 = vrot.slane %v2424_v38, %v17414_v16 }
 0x21f   : > { %3054 = vmatpush1.bf16.msra.mxu0 %v14948_v5  ;;  %v14979_v36 = vld [vmem:[%s19948_s1 + $0xd4] ss:$8 sps:$4 sm:$0xff]   ;;  %v14981_v37 = vld [vmem:[%s19948_s1 + $0xd0] ss:$8 sps:$4 sm:$0xff]   ;;  %v14982_v39 = vld [vmem:[%s19948_s1 + $0xe4] ss:$8 sps:$4 sm:$0xff]  }
 0x220   : > { %3055 = vmatprep.subr.bf16.mxu0 %v14949_v6  ;;  %v2439_v23 = vcombine.high %v2431_v20, %v2431_v20  ;;  %v14984_v40 = vld [vmem:[%s19948_s1 + $0xe0] ss:$8 sps:$4 sm:$0xff]   ;;  %v14985_v42 = vld [vmem:[%s19948_s1 + $0xf4] ss:$8 sps:$4 sm:$0xff]   ;;  %v14987_v43 = vld [vmem:[%s19948_s1 + $0xf0] ss:$8 sps:$4 sm:$0xff]   ;;  %v2440_v44 = vcombine.high %v17478_v41, %v17478_v41  ;;  %v2455_v46 = vpack.c.bf16 %v2431_v20, %v2431_v20 }
 0x221   : > { %v14991_v45 = vld [vmem:[%s19948_s1 + $0x104] ss:$8 sps:$4 sm:$0xff]   ;;  %v14989_v47 = vld [vmem:[%s19948_s1 + $0x100] ss:$8 sps:$4 sm:$0xff]   ;;  %v14994_v49 = vld [vmem:[%s19948_s1 + $0x114] ss:$8 sps:$4 sm:$0xff]  }
 0x222   : > { %v2456_v24 = vpack.c.bf16 %v2439_v23, %v2439_v23  ;;  %v2458_v48 = vpack.c.bf16 %v2440_v44, %v2440_v44  ;;  %v15085_v50 = vld [vmem:[%s19950_s3 + $0x4] ss:$16 sps:$4 sm:$0xff]   ;;  %v15087_v51 = vld [vmem:[%s19950_s3] ss:$16 sps:$4 sm:$0xff]   ;;  %s13322_s14 = sshll.u32 %s13313_s12, 4 }
 0x223   : > { %3056 = vmatpush1.bf16.msra.mxu0 %v14951_v10  ;;  %v14992_v52 = vld [vmem:[%s19948_s1 + $0x110] ss:$8 sps:$4 sm:$0xff]   ;;  %v15088_v53 = vld [vmem:[%s19950_s3 + $0x24] ss:$16 sps:$4 sm:$0xff]   ;;  %3582 = vmatprep.subr.bf16.mxu1 %v15085_v50  ;;  %v14995_v57 = vld [vmem:[%s19948_s1 + $0x120] ss:$8 sps:$4 sm:$0xff]  }
 0x224   : > { %3057 = vmatprep.subr.bf16.mxu0 %v14952_v11  ;;  %3081 = vmatprep.mubr.bf16.mxu0 %v2456_v24  ;;  %v14997_v54 = vld [vmem:[%s19948_s1 + $0x124] ss:$8 sps:$4 sm:$0xff]   ;;  %v15090_v55 = vld [vmem:[%s19950_s3 + $0x20] ss:$16 sps:$4 sm:$0xff]   ;;  %v15000_v58 = vld [vmem:[%s19948_s1 + $0x134] ss:$8 sps:$4 sm:$0xff]  }
 0x225   : > { %3583 = vmatpush1.bf16.msra.mxu1 %v15087_v51  ;;  %v15091_v56 = vld [vmem:[%s19950_s3 + $0x44] ss:$16 sps:$4 sm:$0xff]   ;;  %v15093_v59 = vld [vmem:[%s19950_s3 + $0x40] ss:$16 sps:$4 sm:$0xff]   ;;  %p2410_p8 = scmp.lt.s32.totalorder %s13322_s14, 95 }
 0x226   : > { %3584 = vmatprep.subr.bf16.mxu1 %v15088_v53  ;;  %v15094_v60 = vld [vmem:[%s19950_s3 + $0x64] ss:$16 sps:$4 sm:$0xff]   ;;  %v14998_v61 = vld [vmem:[%s19948_s1 + $0x130] ss:$8 sps:$4 sm:$0xff]   ;;  %v15001_v1 = vld [vmem:[%s19948_s1 + $0x140] ss:$8 sps:$4 sm:$0xff]  }
 0x227   : > { %3058 = vmatpush1.bf16.msra.mxu0 %v14954_v14  ;;  %v15003_v62 = vld [vmem:[%s19948_s1 + $0x144] ss:$8 sps:$4 sm:$0xff]   ;;  %v15096_v63 = vld [vmem:[%s19950_s3 + $0x60] ss:$16 sps:$4 sm:$0xff]   ;;  %v15006_v2 = vld [vmem:[%s19948_s1 + $0x154] ss:$8 sps:$4 sm:$0xff]  }
 0x228   : > { %3059 = vmatprep.subr.bf16.mxu0 %v14955_v15  ;;  %v15097_v0 = vld [vmem:[%s19950_s3 + $0x84] ss:$16 sps:$4 sm:$0xff]   ;;  %v15099_v3 = vld [vmem:[%s19950_s3 + $0x80] ss:$16 sps:$4 sm:$0xff]   ;;  %s19961_s14 = smov (!%p2410_p8, %s13322_s14), 95 }
 0x229   : > { %3585 = vmatpush1.bf16.msra.mxu1 %v15090_v55  ;;  %v15100_v4 = vld [vmem:[%s19950_s3 + $0xa4] ss:$16 sps:$4 sm:$0xff]   ;;  %v15004_v5 = vld [vmem:[%s19948_s1 + $0x150] ss:$8 sps:$4 sm:$0xff]   ;;  %v15007_v9 = vld [vmem:[%s19948_s1 + $0x160] ss:$8 sps:$4 sm:$0xff]   ;;  %s19298_s15 = scalar_lea.vmem %s19955_s8, %s19961_s14 }
 0x22a   : > { %3586 = vmatprep.subr.bf16.mxu1 %v15091_v56  ;;  %v15009_v6 = vld [vmem:[%s19948_s1 + $0x164] ss:$8 sps:$4 sm:$0xff]   ;;  %v15102_v7 = vld [vmem:[%s19950_s3 + $0xa0] ss:$16 sps:$4 sm:$0xff]   ;;  %v15012_v10 = vld [vmem:[%s19948_s1 + $0x174] ss:$8 sps:$4 sm:$0xff]  }
 0x22b   : > { %3060 = vmatpush1.bf16.msra.mxu0 %v14957_v17  ;;  %v15103_v8 = vld [vmem:[%s19950_s3 + $0xc4] ss:$16 sps:$4 sm:$0xff]   ;;  %v15105_v11 = vld [vmem:[%s19950_s3 + $0xc0] ss:$16 sps:$4 sm:$0xff]   ;;  %s13324_s30 = sshll.u32 %s19961_s14, 1 }
 0x22c   : > { %3061 = vmatprep.subr.bf16.mxu0 %v14958_v18  ;;  %v15106_v12 = vld [vmem:[%s19950_s3 + $0xe4] ss:$16 sps:$4 sm:$0xff]   ;;  %v15010_v14 = vld [vmem:[%s19948_s1 + $0x170] ss:$8 sps:$4 sm:$0xff]   ;;  %v15013_v19 = vld [vmem:[%s19948_s1 + $0x180] ss:$8 sps:$4 sm:$0xff]   ;;  %s19339_s19 = scalar_lea.vmem %s19956_s9, %s13324_s30 }
 0x22d   : > { %3587 = vmatpush1.bf16.msra.mxu1 %v15093_v59  ;;  %v15015_v15 = vld [vmem:[%s19948_s1 + $0x184] ss:$8 sps:$4 sm:$0xff]   ;;  %v15108_v17 = vld [vmem:[%s19950_s3 + $0xe0] ss:$16 sps:$4 sm:$0xff]   ;;  %v15018_v20 = vld [vmem:[%s19948_s1 + $0x194] ss:$8 sps:$4 sm:$0xff]  }
 0x22e   : > { %3588 = vmatprep.subr.bf16.mxu1 %v15094_v60  ;;  %v15109_v18 = vld [vmem:[%s19950_s3 + $0x104] ss:$16 sps:$4 sm:$0xff]   ;;  %v15016_v23 = vld [vmem:[%s19948_s1 + $0x190] ss:$8 sps:$4 sm:$0xff]   ;;  %v15037_v50 = vld [vmem:[%s19948_s1 + $0x200] ss:$8 sps:$4 sm:$0xff]  }
 0x22f   : > { %3062 = vmatpush1.bf16.msra.mxu0 %v14960_v21  ;;  %v15111_v21 = vld [vmem:[%s19950_s3 + $0x100] ss:$16 sps:$4 sm:$0xff]   ;;  %v15021_v24 = vld [vmem:[%s19948_s1 + $0x1a4] ss:$8 sps:$4 sm:$0xff]   ;;  %v15036_v44 = vld [vmem:[%s19948_s1 + $0x1f4] ss:$8 sps:$4 sm:$0xff]  }
 0x230   : > { %3063 = vmatprep.subr.bf16.mxu0 %v14961_v22  ;;  %v15112_v22 = vld [vmem:[%s19950_s3 + $0x124] ss:$16 sps:$4 sm:$0xff]   ;;  %v15040_v53 = vld [vmem:[%s19948_s1 + $0x210] ss:$8 sps:$4 sm:$0xff]  }
 0x231   : > { %3589 = vmatpush1.bf16.msra.mxu1 %v15096_v63  ;;  %v15124_v38 = vld [vmem:[%s19950_s3 + $0x1a4] ss:$16 sps:$4 sm:$0xff]   ;;  %v15046_v56 = vld [vmem:[%s19948_s1 + $0x230] ss:$8 sps:$4 sm:$0xff]  }
 0x232   : > { %3590 = vmatprep.subr.bf16.mxu1 %v15097_v0  ;;  %v15048_v55 = vld [vmem:[%s19948_s1 + $0x234] ss:$8 sps:$4 sm:$0xff]   ;;  %v15052_v60 = vld [vmem:[%s19948_s1 + $0x250] ss:$8 sps:$4 sm:$0xff]  }
 0x233   : > { %3064 = vmatpush1.bf16.msra.mxu0 %v14963_v25  ;;  %v15114_v25 = vld [vmem:[%s19950_s3 + $0x120] ss:$16 sps:$4 sm:$0xff]   ;;  %v15054_v59 = vld [vmem:[%s19948_s1 + $0x254] ss:$8 sps:$4 sm:$0xff]  }
 0x234   : > { %3065 = vmatprep.subr.bf16.mxu0 %v14964_v26  ;;  %v15115_v26 = vld [vmem:[%s19950_s3 + $0x144] ss:$16 sps:$4 sm:$0xff]   ;;  %v15058_v0 = vld [vmem:[%s19948_s1 + $0x270] ss:$8 sps:$4 sm:$0xff]  }
 0x235   : > { %3591 = vmatpush1.bf16.msra.mxu1 %v15099_v3  ;;  %v15060_v63 = vld [vmem:[%s19948_s1 + $0x274] ss:$8 sps:$4 sm:$0xff]  }
 0x236   : > { %3592 = vmatprep.subr.bf16.mxu1 %v15100_v4  ;;  %v15066_v3 = vld [vmem:[%s19948_s1 + $0x294] ss:$8 sps:$4 sm:$0xff]   ;;  %v15064_v4 = vld [vmem:[%s19948_s1 + $0x290] ss:$8 sps:$4 sm:$0xff]  }
 0x237   : > { %3066 = vmatpush1.bf16.msra.mxu0 %v14966_v27  ;;  %v15019_v27 = vld [vmem:[%s19948_s1 + $0x1a0] ss:$8 sps:$4 sm:$0xff]  }
 0x238   : > { %3067 = vmatprep.subr.bf16.mxu0 %v14967_v28  ;;  %v15024_v28 = vld [vmem:[%s19948_s1 + $0x1b4] ss:$8 sps:$4 sm:$0xff]  }
 0x239   : > { %3593 = vmatpush1.bf16.msra.mxu1 %v15102_v7  ;;  %v15072_v7 = vld [vmem:[%s19948_s1 + $0x2b4] ss:$8 sps:$4 sm:$0xff]  }
 0x23a   : > { %3594 = vmatprep.subr.bf16.mxu1 %v15103_v8  ;;  %v15070_v8 = vld [vmem:[%s19948_s1 + $0x2b0] ss:$8 sps:$4 sm:$0xff]  }
 0x23b   : > { %3068 = vmatpush1.bf16.msra.mxu0 %v14969_v29  ;;  %v15117_v29 = vld [vmem:[%s19950_s3 + $0x140] ss:$16 sps:$4 sm:$0xff]  }
 0x23c   : > { %3069 = vmatprep.subr.bf16.mxu0 %v14970_v30  ;;  %v15118_v30 = vld [vmem:[%s19950_s3 + $0x164] ss:$16 sps:$4 sm:$0xff]  }
 0x23d   : > { %3595 = vmatpush1.bf16.msra.mxu1 %v15105_v11  ;;  %v15078_v11 = vld [vmem:[%s19948_s1 + $0x2d4] ss:$8 sps:$4 sm:$0xff]  }
 0x23e   : > { %3596 = vmatprep.subr.bf16.mxu1 %v15106_v12  ;;  %v15076_v12 = vld [vmem:[%s19948_s1 + $0x2d0] ss:$8 sps:$4 sm:$0xff]  }
 0x23f   : > { %3070 = vmatpush1.bf16.msra.mxu0 %v14972_v31  ;;  %v15022_v31 = vld [vmem:[%s19948_s1 + $0x1b0] ss:$8 sps:$4 sm:$0xff]  }
 0x240   : > { %3071 = vmatprep.subr.bf16.mxu0 %v14973_v32  ;;  %v15027_v32 = vld [vmem:[%s19948_s1 + $0x1c4] ss:$8 sps:$4 sm:$0xff]  }
 0x241   : > { %3597 = vmatpush1.bf16.msra.mxu1 %v15108_v17  ;;  %v15084_v17 = vld [vmem:[%s19948_s1 + $0x2f4] ss:$8 sps:$4 sm:$0xff]  }
 0x242   : > { %3598 = vmatprep.subr.bf16.mxu1 %v15109_v18  ;;  %v15082_v18 = vld [vmem:[%s19948_s1 + $0x2f0] ss:$8 sps:$4 sm:$0xff]  }
 0x243   : > { %3072 = vmatpush1.bf16.msra.mxu0 %v14975_v33  ;;  %v15120_v33 = vld [vmem:[%s19950_s3 + $0x160] ss:$16 sps:$4 sm:$0xff]  }
 0x244   : > { %3073 = vmatprep.subr.bf16.mxu0 %v14976_v34  ;;  %v15121_v34 = vld [vmem:[%s19950_s3 + $0x184] ss:$16 sps:$4 sm:$0xff]  }
 0x245   : > { %3599 = vmatpush1.bf16.msra.mxu1 %v15111_v21  ;;  %v15129_v21 = vld [vmem:[%s19950_s3 + $0x1c0] ss:$16 sps:$4 sm:$0xff]  }
 0x246   : > { %3600 = vmatprep.subr.bf16.mxu1 %v15112_v22  ;;  %v15130_v22 = vld [vmem:[%s19950_s3 + $0x1e4] ss:$16 sps:$4 sm:$0xff]  }
 0x247   : > { %3074 = vmatpush1.bf16.msra.mxu0 %v14978_v35  ;;  %v15025_v35 = vld [vmem:[%s19948_s1 + $0x1c0] ss:$8 sps:$4 sm:$0xff]  }
 0x248   : > { %3075 = vmatprep.subr.bf16.mxu0 %v14979_v36  ;;  %v15030_v36 = vld [vmem:[%s19948_s1 + $0x1d4] ss:$8 sps:$4 sm:$0xff]  }
 0x249   : > { %3601 = vmatpush1.bf16.msra.mxu1 %v15114_v25  ;;  %v3673_v25 = vld [vmem:[%s19952_s5 + $0x8] sm:$0xff] }
 0x24a   : > { %3602 = vmatprep.subr.bf16.mxu1 %v15115_v26  ;;  %v3677_v26 = vld [vmem:[%s19952_s5 + $0x28] sm:$0xff] }
 0x24b   : > { %3076 = vmatpush1.bf16.msra.mxu0 %v14981_v37  ;;  %v15123_v37 = vld [vmem:[%s19950_s3 + $0x180] ss:$16 sps:$4 sm:$0xff]  }
 0x24c   : > { %3077 = vmatprep.subr.bf16.mxu0 %v14982_v39  ;;  %v15028_v39 = vld [vmem:[%s19948_s1 + $0x1d0] ss:$8 sps:$4 sm:$0xff]  }
 0x24d   : > { %3603 = vmatpush1.bf16.msra.mxu1 %v15117_v29  ;;  %v3681_v29 = vld [vmem:[%s19952_s5 + $0x48] sm:$0xff] }
 0x24e   : > { %3604 = vmatprep.subr.bf16.mxu1 %v15118_v30  ;;  %v3685_v30 = vld [vmem:[%s19952_s5 + $0x68] sm:$0xff] }
 0x24f   : > { %3078 = vmatpush1.bf16.msra.mxu0 %v14984_v40  ;;  %v15033_v40 = vld [vmem:[%s19948_s1 + $0x1e4] ss:$8 sps:$4 sm:$0xff]  }
 0x250   : > { %3079 = vmatprep.subr.bf16.mxu0 %v14985_v42  ;;  %v15126_v42 = vld [vmem:[%s19950_s3 + $0x1a0] ss:$16 sps:$4 sm:$0xff]  }
 0x251   : > { %3605 = vmatpush1.bf16.msra.mxu1 %v15120_v33  ;;  %v3689_v33 = vld [vmem:[%s19952_s5 + $0x88] sm:$0xff] }
 0x252   : > { %3606 = vmatprep.subr.bf16.mxu1 %v15121_v34  ;;  %v3693_v34 = vld [vmem:[%s19952_s5 + $0xa8] sm:$0xff] }
 0x253   : > { %3080 = vmatpush1.bf16.msra.mxu0 %v14987_v43  ;;  %v15031_v43 = vld [vmem:[%s19948_s1 + $0x1e0] ss:$8 sps:$4 sm:$0xff]  }
 0x254   : > { %3090 = vmatprep.subr.bf16.mxu0 %v14991_v45  ;;  %v17668_v45 = vld.sshfl [vmem:[%s19947_s0 + $0x8] sm:$0x33 pattern:$0x76325410] }
 0x255   : > { %3607 = vmatpush1.bf16.msra.mxu1 %v15123_v37  ;;  %v3697_v37 = vld [vmem:[%s19952_s5 + $0xc8] sm:$0xff] }
 0x256   : > { %3082 = vmatmul.mubr.bf16.vlgmr.msra.gmra.mrb[0].mxu0 %v2455_v46  ;;  %3608 = vmatprep.subr.bf16.mxu1 %v15124_v38  ;;  %v15034_v46 = vld [vmem:[%s19948_s1 + $0x1f0] ss:$8 sps:$4 sm:$0xff]   ;;  %v3701_v38 = vld [vmem:[%s19952_s5 + $0xe8] sm:$0xff] }
 0x257   : > { %3091 = vmatpush1.bf16.msra.mxu0 %v14989_v47  ;;  %3122 = vmatprep.mubr.bf16.mxu0 %v2458_v48  ;;  %v2448_v47 = vcombine.high %v17668_v45, %v17668_v45  ;;  %v15039_v48 = vld [vmem:[%s19948_s1 + $0x204] ss:$8 sps:$4 sm:$0xff]  }
 0x258   : > { %3092 = vmatprep.subr.bf16.mxu0 %v14994_v49  ;;  %v2457_v49 = vpack.c.bf16 %v17478_v41, %v17478_v41  ;;  %v15045_v41 = vld [vmem:[%s19948_s1 + $0x224] ss:$8 sps:$4 sm:$0xff]  }
 0x259   : > { %3609 = vmatpush1.bf16.msra.mxu1 %v15126_v42  ;;  %v2460_v51 = vpack.c.bf16 %v2448_v47, %v2448_v47  ;;  %v3705_v42 = vld [vmem:[%s19952_s5 + $0x108] sm:$0xff] }
 0x25a   : > { %v3717_v47 = vld [vmem:[%s19952_s5 + $0x168] sm:$0xff] }
 0x25b   : > { %3093 = vmatpush1.bf16.msra.mxu0 %v14992_v52  ;;  %v15042_v52 = vld [vmem:[%s19948_s1 + $0x214] ss:$8 sps:$4 sm:$0xff]  }
 0x25c   : > { %3094 = vmatprep.subr.bf16.mxu0 %v14997_v54  ;;  %v15043_v54 = vld [vmem:[%s19948_s1 + $0x220] ss:$8 sps:$4 sm:$0xff]  }
 0x25f   : > { %3095 = vmatpush1.bf16.msra.mxu0 %v14995_v57  ;;  %v15051_v57 = vld [vmem:[%s19948_s1 + $0x244] ss:$8 sps:$4 sm:$0xff]  }
 0x260   : > { %3096 = vmatprep.subr.bf16.mxu0 %v15000_v58  ;;  %v15049_v58 = vld [vmem:[%s19948_s1 + $0x240] ss:$8 sps:$4 sm:$0xff]  }
 0x263   : > { %3097 = vmatpush1.bf16.msra.mxu0 %v14998_v61  ;;  %v15057_v61 = vld [vmem:[%s19948_s1 + $0x264] ss:$8 sps:$4 sm:$0xff]  }
 0x264   : > { %3098 = vmatprep.subr.bf16.mxu0 %v15003_v62  ;;  %v15055_v62 = vld [vmem:[%s19948_s1 + $0x260] ss:$8 sps:$4 sm:$0xff]  }
 0x267   : > { %3099 = vmatpush1.bf16.msra.mxu0 %v15001_v1  ;;  %v15063_v1 = vld [vmem:[%s19948_s1 + $0x284] ss:$8 sps:$4 sm:$0xff]  }
 0x268   : > { %3100 = vmatprep.subr.bf16.mxu0 %v15006_v2  ;;  %v15061_v2 = vld [vmem:[%s19948_s1 + $0x280] ss:$8 sps:$4 sm:$0xff]  }
 0x26b   : > { %3101 = vmatpush1.bf16.msra.mxu0 %v15004_v5  ;;  %v15069_v5 = vld [vmem:[%s19948_s1 + $0x2a4] ss:$8 sps:$4 sm:$0xff]  }
 0x26c   : > { %3102 = vmatprep.subr.bf16.mxu0 %v15009_v6  ;;  %v15067_v6 = vld [vmem:[%s19948_s1 + $0x2a0] ss:$8 sps:$4 sm:$0xff]  }
 0x26f   : > { %3103 = vmatpush1.bf16.msra.mxu0 %v15007_v9  ;;  %v15075_v9 = vld [vmem:[%s19948_s1 + $0x2c4] ss:$8 sps:$4 sm:$0xff]  }
 0x270   : > { %3104 = vmatprep.subr.bf16.mxu0 %v15012_v10  ;;  %v15073_v10 = vld [vmem:[%s19948_s1 + $0x2c0] ss:$8 sps:$4 sm:$0xff]  }
 0x273   : > { %3105 = vmatpush1.bf16.msra.mxu0 %v15010_v14  ;;  %v15081_v14 = vld [vmem:[%s19948_s1 + $0x2e4] ss:$8 sps:$4 sm:$0xff]  }
 0x274   : > { %3106 = vmatprep.subr.bf16.mxu0 %v15015_v15  ;;  %v15079_v15 = vld [vmem:[%s19948_s1 + $0x2e0] ss:$8 sps:$4 sm:$0xff]  }
 0x277   : > { %3107 = vmatpush1.bf16.msra.mxu0 %v15013_v19  ;;  %v2459_v19 = vpack.c.bf16 %v17668_v45, %v17668_v45 }
 0x278   : > { %3108 = vmatprep.subr.bf16.mxu0 %v15018_v20  ;;  %v15127_v20 = vld [vmem:[%s19950_s3 + $0x1c4] ss:$16 sps:$4 sm:$0xff]  }
 0x279   : > { %3610 = vmatprep.subr.bf16.mxu1 %v15127_v20 }
 0x27a   : > { %3611 = vmatpush1.bf16.msra.mxu1 %v15129_v21 }
 0x27b   : > { %3109 = vmatpush1.bf16.msra.mxu0 %v15016_v23  ;;  %v15132_v23 = vld [vmem:[%s19950_s3 + $0x1e0] ss:$16 sps:$4 sm:$0xff]   ;;  %3612 = vmatprep.subr.bf16.mxu1 %v15130_v22 }
 0x27c   : > { %3110 = vmatprep.subr.bf16.mxu0 %v15021_v24  ;;  %v15135_v24 = vld [vmem:[%s19950_s3 + $0xc] ss:$16 sps:$4 sm:$0xff]  }
 0x27e   : > { %3613 = vmatpush1.bf16.msra.mxu1 %v15132_v23 }
 0x27f   : > { %3111 = vmatpush1.bf16.msra.mxu0 %v15019_v27  ;;  %3623 = vmatprep.subr.bf16.mxu1 %v15135_v24  ;;  %v13488_v27 = vcombine.low %v3673_v25, %v3677_v26 }
 0x280   : > { %3112 = vmatprep.subr.bf16.mxu0 %v15024_v28  ;;  %v13489_v28 = vcombine.high %v3673_v25, %v3677_v26 }
 0x283   : > { %3113 = vmatpush1.bf16.msra.mxu0 %v15022_v31  ;;  %v13497_v31 = vcombine.high %v3681_v29, %v3685_v30 }
 0x284   : > { %3114 = vmatprep.subr.bf16.mxu0 %v15027_v32  ;;  %v13496_v32 = vcombine.low %v3681_v29, %v3685_v30 }
 0x287   : > { %3115 = vmatpush1.bf16.msra.mxu0 %v15025_v35  ;;  %v13505_v35 = vcombine.high %v3689_v33, %v3693_v34 }
 0x288   : > { %3116 = vmatprep.subr.bf16.mxu0 %v15030_v36  ;;  %v13504_v36 = vcombine.low %v3689_v33, %v3693_v34  ;;  %v15133_v33 = vld [vmem:[%s19950_s3 + $0x8] ss:$16 sps:$4 sm:$0xff]  }
 0x28b   : > { %3117 = vmatpush1.bf16.msra.mxu0 %v15028_v39  ;;  %v13513_v39 = vcombine.high %v3697_v37, %v3701_v38 }
 0x28c   : > { %3118 = vmatprep.subr.bf16.mxu0 %v15033_v40  ;;  %v13512_v40 = vcombine.low %v3697_v37, %v3701_v38  ;;  %v15141_v37 = vld [vmem:[%s19950_s3 + $0x4c] ss:$16 sps:$4 sm:$0xff]   ;;  %v15139_v38 = vld [vmem:[%s19950_s3 + $0x48] ss:$16 sps:$4 sm:$0xff]  }
 0x28f   : > { %3119 = vmatpush1.bf16.msra.mxu0 %v15031_v43  ;;  %v3709_v43 = vld [vmem:[%s19952_s5 + $0x128] sm:$0xff] }
 0x290   : > { %3120 = vmatprep.subr.bf16.mxu0 %v15036_v44  ;;  %v13521_v44 = vcombine.high %v3705_v42, %v3709_v43  ;;  %v13520_v45 = vcombine.low %v3705_v42, %v3709_v43  ;;  %v15147_v42 = vld [vmem:[%s19950_s3 + $0x8c] ss:$16 sps:$4 sm:$0xff]   ;;  %v15145_v43 = vld [vmem:[%s19950_s3 + $0x88] ss:$16 sps:$4 sm:$0xff]  }
 0x293   : > { %3121 = vmatpush1.bf16.msra.mxu0 %v15034_v46  ;;  %v3713_v46 = vld [vmem:[%s19952_s5 + $0x148] sm:$0xff] }
 0x294   : > { %3131 = vmatprep.subr.bf16.mxu0 %v15039_v48  ;;  %v13529_v48 = vcombine.high %v3713_v46, %v3717_v47 }
 0x296   : > { %3123 = vmatmul.mubr.bf16.vlgmr.msra.gmra.mrb[0].mxu0 %v2457_v49  ;;  %v13528_v49 = vcombine.low %v3713_v46, %v3717_v47  ;;  %v15153_v46 = vld [vmem:[%s19950_s3 + $0xcc] ss:$16 sps:$4 sm:$0xff]   ;;  %v15151_v47 = vld [vmem:[%s19950_s3 + $0xc8] ss:$16 sps:$4 sm:$0xff]  }
 0x297   : > { %3132 = vmatpush1.bf16.msra.mxu0 %v15037_v50  ;;  %3163 = vmatprep.mubr.bf16.mxu0 %v2460_v51  ;;  %v3721_v50 = vld [vmem:[%s19952_s5 + $0x188] sm:$0xff] }
 0x298   : > { %3133 = vmatprep.subr.bf16.mxu0 %v15042_v52  ;;  %v3725_v51 = vld [vmem:[%s19952_s5 + $0x1a8] sm:$0xff] }
 0x299   : > { %v13537_v52 = vcombine.high %v3721_v50, %v3725_v51 }
 0x29b   : > { %3134 = vmatpush1.bf16.msra.mxu0 %v15040_v53  ;;  %v13536_v53 = vcombine.low %v3721_v50, %v3725_v51  ;;  %v15159_v50 = vld [vmem:[%s19950_s3 + $0x10c] ss:$16 sps:$4 sm:$0xff]   ;;  %v15157_v51 = vld [vmem:[%s19950_s3 + $0x108] ss:$16 sps:$4 sm:$0xff]  }
 0x29c   : > { %3135 = vmatprep.subr.bf16.mxu0 %v15045_v41  ;;  %v3729_v41 = vld [vmem:[%s19952_s5 + $0x1c8] sm:$0xff] }
 0x29f   : > { %3136 = vmatpush1.bf16.msra.mxu0 %v15043_v54  ;;  %v3733_v54 = vld [vmem:[%s19952_s5 + $0x1e8] sm:$0xff] }
 0x2a0   : > { %3137 = vmatprep.subr.bf16.mxu0 %v15048_v55  ;;  %v13545_v55 = vcombine.high %v3729_v41, %v3733_v54 }
 0x2a3   : > { %3138 = vmatpush1.bf16.msra.mxu0 %v15046_v56  ;;  %v13544_v56 = vcombine.low %v3729_v41, %v3733_v54  ;;  %v15165_v41 = vld [vmem:[%s19950_s3 + $0x14c] ss:$16 sps:$4 sm:$0xff]   ;;  %v15163_v54 = vld [vmem:[%s19950_s3 + $0x148] ss:$16 sps:$4 sm:$0xff]  }
 0x2a4   : > { %3139 = vmatprep.subr.bf16.mxu0 %v15051_v57  ;;  %v3737_v57 = vld [vmem:[%s19952_s5 + $0x208] sm:$0xff] }
 0x2a7   : > { %3140 = vmatpush1.bf16.msra.mxu0 %v15049_v58  ;;  %v3741_v58 = vld [vmem:[%s19952_s5 + $0x228] sm:$0xff] }
 0x2a8   : > { %3141 = vmatprep.subr.bf16.mxu0 %v15054_v59  ;;  %v13553_v59 = vcombine.high %v3737_v57, %v3741_v58 }
 0x2ab   : > { %3142 = vmatpush1.bf16.msra.mxu0 %v15052_v60  ;;  %v13552_v60 = vcombine.low %v3737_v57, %v3741_v58  ;;  %v15171_v57 = vld [vmem:[%s19950_s3 + $0x18c] ss:$16 sps:$4 sm:$0xff]   ;;  %v15169_v58 = vld [vmem:[%s19950_s3 + $0x188] ss:$16 sps:$4 sm:$0xff]  }
 0x2ac   : > { %3143 = vmatprep.subr.bf16.mxu0 %v15057_v61  ;;  %v3745_v61 = vld [vmem:[%s19952_s5 + $0x248] sm:$0xff] }
 0x2af   : > { %3144 = vmatpush1.bf16.msra.mxu0 %v15055_v62  ;;  %v3749_v62 = vld [vmem:[%s19952_s5 + $0x268] sm:$0xff] }
 0x2b0   : > { %3145 = vmatprep.subr.bf16.mxu0 %v15060_v63  ;;  %v13561_v63 = vcombine.high %v3745_v61, %v3749_v62 }
 0x2b3   : > { %3146 = vmatpush1.bf16.msra.mxu0 %v15058_v0  ;;  %v13560_v0 = vcombine.low %v3745_v61, %v3749_v62  ;;  %v15177_v61 = vld [vmem:[%s19950_s3 + $0x1cc] ss:$16 sps:$4 sm:$0xff]   ;;  %v15175_v62 = vld [vmem:[%s19950_s3 + $0x1c8] ss:$16 sps:$4 sm:$0xff]  }
 0x2b4   : > { %3147 = vmatprep.subr.bf16.mxu0 %v15063_v1  ;;  %v3753_v1 = vld [vmem:[%s19952_s5 + $0x288] sm:$0xff] }
 0x2b7   : > { %3148 = vmatpush1.bf16.msra.mxu0 %v15061_v2  ;;  %v3757_v2 = vld [vmem:[%s19952_s5 + $0x2a8] sm:$0xff] }
 0x2b8   : > { %3149 = vmatprep.subr.bf16.mxu0 %v15066_v3  ;;  %v13569_v3 = vcombine.high %v3753_v1, %v3757_v2 }
 0x2bb   : > { %3150 = vmatpush1.bf16.msra.mxu0 %v15064_v4  ;;  %v13568_v4 = vcombine.low %v3753_v1, %v3757_v2  ;;  %v3676_v1 = vld [vmem:[%s19952_s5 + $0x20] sm:$0xff]  ;;  %v15178_v2 = vld [vmem:[%s19950_s3 + $0x1e8] ss:$16 sps:$4 sm:$0xff]  }
 0x2bc   : > { %3151 = vmatprep.subr.bf16.mxu0 %v15069_v5  ;;  %v3761_v5 = vld [vmem:[%s19952_s5 + $0x2c8] sm:$0xff] }
 0x2bf   : > { %3152 = vmatpush1.bf16.msra.mxu0 %v15067_v6  ;;  %v3765_v6 = vld [vmem:[%s19952_s5 + $0x2e8] sm:$0xff] }
 0x2c0   : > { %3153 = vmatprep.subr.bf16.mxu0 %v15072_v7  ;;  %v13577_v7 = vcombine.high %v3761_v5, %v3765_v6 }
 0x2c3   : > { %3154 = vmatpush1.bf16.msra.mxu0 %v15070_v8  ;;  %v13576_v8 = vcombine.low %v3761_v5, %v3765_v6  ;;  %v3684_v5 = vld [vmem:[%s19952_s5 + $0x60] sm:$0xff] }
 0x2c4   : > { %3155 = vmatprep.subr.bf16.mxu0 %v15075_v9  ;;  %v3769_v9 = vld [vmem:[%s19952_s5 + $0x308] sm:$0xff] }
 0x2c7   : > { %3156 = vmatpush1.bf16.msra.mxu0 %v15073_v10  ;;  %v3773_v10 = vld [vmem:[%s19952_s5 + $0x328] sm:$0xff] }
 0x2c8   : > { %3157 = vmatprep.subr.bf16.mxu0 %v15078_v11  ;;  %v13585_v11 = vcombine.high %v3769_v9, %v3773_v10 }
 0x2cb   : > { %3158 = vmatpush1.bf16.msra.mxu0 %v15076_v12  ;;  %v17869_v12 = vsub.s32 0, %v17405_v13 }
 0x2cc   : > { %3159 = vmatprep.subr.bf16.mxu0 %v15081_v14  ;;  %v2557_v14 = vld [vmem:[%s19949_s2] sm:$0x3] }
 0x2cd   : > { %v2562_v21 = vrot.slane %v2557_v14, %v17869_v12 }
 0x2cf   : > { %3160 = vmatpush1.bf16.msra.mxu0 %v15079_v15  ;;  %v17875_v15 = vsub.s32 1, %v17405_v13 }
 0x2d0   : > { %3161 = vmatprep.subr.bf16.mxu0 %v15084_v17  ;;  %v13584_v17 = vcombine.low %v3769_v9, %v3773_v10  ;;  %v3692_v9 = vld [vmem:[%s19952_s5 + $0xa0] sm:$0xff] }
 0x2d1   : > { %v2566_v22 = vrot.slane %v2557_v14, %v17875_v15  ;;  %v3696_v14 = vld [vmem:[%s19952_s5 + $0xc0] sm:$0xff] }
 0x2d3   : > { %3162 = vmatpush1.bf16.msra.mxu0 %v15082_v18  ;;  %v3777_v18 = vld [vmem:[%s19952_s5 + $0x348] sm:$0xff] }
 0x2d4   : > { %5332 = vmatprep.subr.bf16.mxu0 %v13489_v28 }
 0x2d6   : > { %3164 = vmatmul.mubr.bf16.vlgmr.msra.gmra.mrb[0].mxu0 %v2459_v19  ;;  %v3781_v19 = vld [vmem:[%s19952_s5 + $0x368] sm:$0xff] }
 0x2d7   : > { %5333 = vmatpush1.bf16.msra.mxu0 %v13488_v27  ;;  %v13593_v20 = vcombine.high %v3777_v18, %v3781_v19  ;;  %v13592_v23 = vcombine.low %v3777_v18, %v3781_v19 }
 0x2d8   : > { %5334 = vmatprep.subr.bf16.mxu0 %v13497_v31 }
 0x2db   : > { %5335 = vmatpush1.bf16.msra.mxu0 %v13496_v32 }
 0x2dc   : > { %5336 = vmatprep.subr.bf16.mxu0 %v13505_v35  ;;  %v15138_v35 = vld [vmem:[%s19950_s3 + $0x2c] ss:$16 sps:$4 sm:$0xff]  }
 0x2df   : > { %5337 = vmatpush1.bf16.msra.mxu0 %v13504_v36  ;;  %v15136_v36 = vld [vmem:[%s19950_s3 + $0x28] ss:$16 sps:$4 sm:$0xff]  }
 0x2e0   : > { %5338 = vmatprep.subr.bf16.mxu0 %v13513_v39  ;;  %v15144_v39 = vld [vmem:[%s19950_s3 + $0x6c] ss:$16 sps:$4 sm:$0xff]  }
 0x2e3   : > { %5339 = vmatpush1.bf16.msra.mxu0 %v13512_v40  ;;  %v15142_v40 = vld [vmem:[%s19950_s3 + $0x68] ss:$16 sps:$4 sm:$0xff]  }
 0x2e4   : > { %5340 = vmatprep.subr.bf16.mxu0 %v13521_v44  ;;  %v15150_v44 = vld [vmem:[%s19950_s3 + $0xac] ss:$16 sps:$4 sm:$0xff]  }
 0x2e7   : > { %5341 = vmatpush1.bf16.msra.mxu0 %v13520_v45  ;;  %v15148_v45 = vld [vmem:[%s19950_s3 + $0xa8] ss:$16 sps:$4 sm:$0xff]  }
 0x2e8   : > { %5342 = vmatprep.subr.bf16.mxu0 %v13529_v48  ;;  %v15156_v48 = vld [vmem:[%s19950_s3 + $0xec] ss:$16 sps:$4 sm:$0xff]  }
 0x2eb   : > { %5343 = vmatpush1.bf16.msra.mxu0 %v13528_v49  ;;  %v15154_v49 = vld [vmem:[%s19950_s3 + $0xe8] ss:$16 sps:$4 sm:$0xff]  }
 0x2ec   : > { %5344 = vmatprep.subr.bf16.mxu0 %v13537_v52  ;;  %v15162_v52 = vld [vmem:[%s19950_s3 + $0x12c] ss:$16 sps:$4 sm:$0xff]  }
 0x2ef   : > { %5345 = vmatpush1.bf16.msra.mxu0 %v13536_v53  ;;  %v15160_v53 = vld [vmem:[%s19950_s3 + $0x128] ss:$16 sps:$4 sm:$0xff]  }
 0x2f0   : > { %5346 = vmatprep.subr.bf16.mxu0 %v13545_v55  ;;  %v15168_v55 = vld [vmem:[%s19950_s3 + $0x16c] ss:$16 sps:$4 sm:$0xff]  }
 0x2f3   : > { %5347 = vmatpush1.bf16.msra.mxu0 %v13544_v56  ;;  %v15166_v56 = vld [vmem:[%s19950_s3 + $0x168] ss:$16 sps:$4 sm:$0xff]  }
 0x2f4   : > { %5348 = vmatprep.subr.bf16.mxu0 %v13553_v59  ;;  %v15174_v59 = vld [vmem:[%s19950_s3 + $0x1ac] ss:$16 sps:$4 sm:$0xff]  }
 0x2f7   : > { %5349 = vmatpush1.bf16.msra.mxu0 %v13552_v60  ;;  %v15172_v60 = vld [vmem:[%s19950_s3 + $0x1a8] ss:$16 sps:$4 sm:$0xff]  }
 0x2f8   : > { %5350 = vmatprep.subr.bf16.mxu0 %v13561_v63  ;;  %v15180_v63 = vld [vmem:[%s19950_s3 + $0x1ec] ss:$16 sps:$4 sm:$0xff]  }
 0x2fb   : > { %5351 = vmatpush1.bf16.msra.mxu0 %v13560_v0  ;;  %v3672_v0 = vld [vmem:[%s19952_s5] sm:$0xff] }
 0x2fc   : > { %5352 = vmatprep.subr.bf16.mxu0 %v13569_v3  ;;  %v13487_v3 = vcombine.high %v3672_v0, %v3676_v1  ;;  %v13486_v6 = vcombine.low %v3672_v0, %v3676_v1  ;;  %v3764_v0 = vld [vmem:[%s19952_s5 + $0x2e0] sm:$0xff] }
 0x2ff   : > { %5353 = vmatpush1.bf16.msra.mxu0 %v13568_v4  ;;  %v3680_v4 = vld [vmem:[%s19952_s5 + $0x40] sm:$0xff] }
 0x300   : > { %5354 = vmatprep.subr.bf16.mxu0 %v13577_v7  ;;  %v13495_v7 = vcombine.high %v3680_v4, %v3684_v5  ;;  %v13494_v10 = vcombine.low %v3680_v4, %v3684_v5  ;;  %v3772_v4 = vld [vmem:[%s19952_s5 + $0x320] sm:$0xff] }
 0x303   : > { %5355 = vmatpush1.bf16.msra.mxu0 %v13576_v8  ;;  %v3688_v8 = vld [vmem:[%s19952_s5 + $0x80] sm:$0xff] }
 0x304   : > { %5356 = vmatprep.subr.bf16.mxu0 %v13585_v11  ;;  %v13503_v11 = vcombine.high %v3688_v8, %v3692_v9  ;;  %v13502_v18 = vcombine.low %v3688_v8, %v3692_v9  ;;  %v3780_v8 = vld [vmem:[%s19952_s5 + $0x360] sm:$0xff] }
 0x307   : > { %5357 = vmatpush1.bf16.msra.mxu0 %v13584_v17  ;;  %v3700_v17 = vld [vmem:[%s19952_s5 + $0xe0] sm:$0xff] }
 0x308   : > { %5358 = vmatprep.subr.bf16.mxu0 %v13593_v20  ;;  %v13511_v19 = vcombine.high %v3696_v14, %v3700_v17  ;;  %v3704_v20 = vld [vmem:[%s19952_s5 + $0x100] sm:$0xff] }
 0x30b   : > { %5359 = vmatpush1.bf16.msra.mxu0 %v13592_v23 }
 0x3a9   : > { %v3165_v24 = vpop.f32.mrb[0].mxu0 }
 0x3aa   : > { %v14769_v25 = vadd.f32 %v3165_v24, %v2562_v21  ;;  %v3167_v26 = vpop.f32.mrb[1].mxu0  ;;  %v3708_v21 = vld [vmem:[%s19952_s5 + $0x120] sm:$0xff] }
 0x3ab   : > { %v14770_v27 = vadd.f32 %v3167_v26, %v2566_v22  ;;  %v3169_v28 = vpop.f32.mrb[2].mxu0  ;;  %v13510_v22 = vcombine.low %v3696_v14, %v3700_v17  ;;  %v13519_v23 = vcombine.high %v3704_v20, %v3708_v21  ;;  %v3712_v24 = vld [vmem:[%s19952_s5 + $0x140] sm:$0xff]  ;;  %v13518_v26 = vcombine.low %v3704_v20, %v3708_v21 }
 0x3ac   : > { %v3172_v29 = vmax.f32 %v14769_v25, 0.0  ;;  %v3170_v30 = vpop.f32.mrb[3].mxu0  ;;  %v3716_v25 = vld [vmem:[%s19952_s5 + $0x160] sm:$0xff] }
 0x3ad   : > { %v3173_v31 = vmax.f32 %v14770_v27, 0.0  ;;  %v13527_v27 = vcombine.high %v3712_v24, %v3716_v25  ;;  %v3720_v28 = vld [vmem:[%s19952_s5 + $0x180] sm:$0xff]  ;;  %v13526_v30 = vcombine.low %v3712_v24, %v3716_v25 }
 0x3ae   : > { %v17888_v34 = vpack.c.bf16 %v3172_v29, %v3172_v29  ;;  %v3724_v29 = vld [vmem:[%s19952_s5 + $0x1a0] sm:$0xff] }
 0x3af   : > { %v3175_v32 = vpack.c.bf16 %v3173_v31, %v3173_v31  ;;  %v3785_v31 = vld [vmem:[%s19952_s5 + $0x388] sm:$0xff]  ;;  %v3788_v14 = vld [vmem:[%s19952_s5 + $0x3a0] sm:$0xff] }
 0x3b0   : > { %v3796_v20 = vld [vmem:[%s19952_s5 + $0x3e0] sm:$0xff] }
 0x3b1   : > { %3614 = vmatprep.mubr.bf16.mxu1 %v3175_v32  ;;  %v18121_v25 = vld [vmem:[%s19951_s4] sm:$0xf] }
 0x3b2   : > { %3615 = vmatmul.mubr.bf16.vlgmr.msra.gmra.mrb[0].mxu1 %v17888_v34 }
 0x3b3   : > { %3624 = vmatpush1.bf16.msra.mxu1 %v15133_v33  ;;  %3655 = vmatprep.mubr.bf16.mxu1 %v3175_v32  ;;  %v13535_v32 = vcombine.high %v3720_v28, %v3724_v29  ;;  %v3789_v33 = vld [vmem:[%s19952_s5 + $0x3a8] sm:$0xff] }
 0x3b4   : > { %3625 = vmatprep.subr.bf16.mxu1 %v15138_v35  ;;  %v3732_v35 = vld [vmem:[%s19952_s5 + $0x1e0] sm:$0xff] }
 0x3b7   : > { %3626 = vmatpush1.bf16.msra.mxu1 %v15136_v36  ;;  %v13600_v36 = vcombine.low %v3785_v31, %v3789_v33 }
 0x3b8   : > { %3627 = vmatprep.subr.bf16.mxu1 %v15141_v37  ;;  %v13601_v37 = vcombine.high %v3785_v31, %v3789_v33 }
 0x3ba   : > { %5360 = vmatprep.subr.bf16.mxu0 %v13601_v37  ;;  %v3812_v37 = vld [vmem:[%s19952_s5 + $0x460] sm:$0xff] }
 0x3bb   : > { %3628 = vmatpush1.bf16.msra.mxu1 %v15139_v38  ;;  %v13534_v38 = vcombine.low %v3720_v28, %v3724_v29  ;;  %5361 = vmatpush1.bf16.msra.mxu0 %v13600_v36 }
 0x3bc   : > { %3629 = vmatprep.subr.bf16.mxu1 %v15144_v39  ;;  %v3793_v39 = vld [vmem:[%s19952_s5 + $0x3c8] sm:$0xff] }
 0x3bf   : > { %3630 = vmatpush1.bf16.msra.mxu1 %v15142_v40 }
 0x3c0   : > { %3631 = vmatprep.subr.bf16.mxu1 %v15147_v42  ;;  %v3797_v42 = vld [vmem:[%s19952_s5 + $0x3e8] sm:$0xff] }
 0x3c3   : > { %3632 = vmatpush1.bf16.msra.mxu1 %v15145_v43  ;;  %v3736_v43 = vld [vmem:[%s19952_s5 + $0x200] sm:$0xff] }
 0x3c4   : > { %3633 = vmatprep.subr.bf16.mxu1 %v15150_v44  ;;  %v3740_v44 = vld [vmem:[%s19952_s5 + $0x220] sm:$0xff] }
 0x3c7   : > { %3634 = vmatpush1.bf16.msra.mxu1 %v15148_v45  ;;  %v13608_v45 = vcombine.low %v3793_v39, %v3797_v42 }
 0x3c8   : > { %3635 = vmatprep.subr.bf16.mxu1 %v15153_v46  ;;  %v13609_v46 = vcombine.high %v3793_v39, %v3797_v42  ;;  %v3813_v39 = vld [vmem:[%s19952_s5 + $0x468] sm:$0xff] }
 0x3ca   : > { %5362 = vmatprep.subr.bf16.mxu0 %v13609_v46  ;;  %v3820_v46 = vld [vmem:[%s19952_s5 + $0x4a0] sm:$0xff] }
 0x3cb   : > { %3636 = vmatpush1.bf16.msra.mxu1 %v15151_v47  ;;  %5363 = vmatpush1.bf16.msra.mxu0 %v13608_v45  ;;  %v3816_v45 = vld [vmem:[%s19952_s5 + $0x480] sm:$0xff] }
 0x3cc   : > { %3637 = vmatprep.subr.bf16.mxu1 %v15156_v48  ;;  %v18051_v48 = vld [vmem:[%s19952_s5 + $0x400] sm:$0xff] }
 0x3cf   : > { %3638 = vmatpush1.bf16.msra.mxu1 %v15154_v49  ;;  %v18056_v49 = vld [vmem:[%s19952_s5 + $0x420] sm:$0xff] }
 0x3d0   : > { %3639 = vmatprep.subr.bf16.mxu1 %v15159_v50  ;;  %v18061_v50 = vld [vmem:[%s19952_s5 + $0x408] sm:$0xff]  ;;  %v13615_v24 = vcombine.high %v18051_v48, %v18056_v49 }
 0x3d3   : > { %3640 = vmatpush1.bf16.msra.mxu1 %v15157_v51  ;;  %v13551_v51 = vcombine.high %v3736_v43, %v3740_v44 }
 0x3d4   : > { %3641 = vmatprep.subr.bf16.mxu1 %v15162_v52  ;;  %v18066_v52 = vld [vmem:[%s19952_s5 + $0x428] sm:$0xff] }
 0x3d7   : > { %3642 = vmatpush1.bf16.msra.mxu1 %v15160_v53  ;;  %v3744_v53 = vld [vmem:[%s19952_s5 + $0x240] sm:$0xff] }
 0x3d8   : > { %3643 = vmatprep.subr.bf16.mxu1 %v15165_v41  ;;  %v3748_v41 = vld [vmem:[%s19952_s5 + $0x260] sm:$0xff] }
 0x3db   : > { %3644 = vmatpush1.bf16.msra.mxu1 %v15163_v54  ;;  %v13614_v54 = vcombine.low %v18051_v48, %v18056_v49  ;;  %v3825_v48 = vld [vmem:[%s19952_s5 + $0x4c8] sm:$0xff] }
 0x3dc   : > { %3645 = vmatprep.subr.bf16.mxu1 %v15168_v55  ;;  %v13616_v55 = vcombine.low %v18061_v50, %v18066_v52  ;;  %v3829_v49 = vld [vmem:[%s19952_s5 + $0x4e8] sm:$0xff] }
 0x3df   : > { %3646 = vmatpush1.bf16.msra.mxu1 %v15166_v56  ;;  %v13617_v56 = vcombine.high %v18061_v50, %v18066_v52  ;;  %v13630_v50 = vcombine.low %v3816_v45, %v3820_v46 }
 0x3e0   : > { %3647 = vmatprep.subr.bf16.mxu1 %v15171_v57  ;;  %v13550_v57 = vcombine.low %v3736_v43, %v3740_v44 }
 0x3e1   : > { %5373 = vmatprep.subr.bf16.mxu0 %v13617_v56  ;;  %v13631_v56 = vcombine.high %v3816_v45, %v3820_v46  ;;  %v3876_v45 = vld [vmem:[%s19952_s5 + $0x660] sm:$0xff]  ;;  %v3873_v46 = vld [vmem:[%s19952_s5 + $0x648] sm:$0xff] }
 0x3e3   : > { %3648 = vmatpush1.bf16.msra.mxu1 %v15169_v58  ;;  %v13559_v58 = vcombine.high %v3744_v53, %v3748_v41 }
 0x3e4   : > { %3649 = vmatprep.subr.bf16.mxu1 %v15174_v59  ;;  %v3752_v59 = vld [vmem:[%s19952_s5 + $0x280] sm:$0xff] }
 0x3e7   : > { %3650 = vmatpush1.bf16.msra.mxu1 %v15172_v60  ;;  %v3756_v60 = vld [vmem:[%s19952_s5 + $0x2a0] sm:$0xff] }
 0x3e8   : > { %3651 = vmatprep.subr.bf16.mxu1 %v15177_v61  ;;  %v13558_v61 = vcombine.low %v3744_v53, %v3748_v41  ;;  %v13566_v1 = vcombine.low %v3752_v59, %v3756_v60 }
 0x3eb   : > { %3652 = vmatpush1.bf16.msra.mxu1 %v15175_v62  ;;  %v13567_v62 = vcombine.high %v3752_v59, %v3756_v60  ;;  %v3828_v59 = vld [vmem:[%s19952_s5 + $0x4e0] sm:$0xff] }
 0x3ec   : > { %3653 = vmatprep.subr.bf16.mxu1 %v15180_v63  ;;  %v3760_v63 = vld [vmem:[%s19952_s5 + $0x2c0] sm:$0xff] }
 0x3ed   : > { %v13574_v5 = vcombine.low %v3760_v63, %v3764_v0  ;;  %v3832_v60 = vld [vmem:[%s19952_s5 + $0x500] sm:$0xff] }
 0x3ef   : > { %3654 = vmatpush1.bf16.msra.mxu1 %v15178_v2  ;;  %v13575_v2 = vcombine.high %v3760_v63, %v3764_v0  ;;  %v3837_v63 = vld [vmem:[%s19952_s5 + $0x528] sm:$0xff] }
 0x3f0   : > { %5250 = vmatprep.subr.bf16.mxu1 %v13487_v3  ;;  %v3768_v3 = vld [vmem:[%s19952_s5 + $0x300] sm:$0xff] }
 0x3f1   : > { %v13582_v9 = vcombine.low %v3768_v3, %v3772_v4 }
 0x3f2   : > { %3656 = vmatmul.mubr.bf16.vlgmr.msra.gmra.mrb[4].mxu1 %v17888_v34  ;;  %v3728_v34 = vld [vmem:[%s19952_s5 + $0x1c0] sm:$0xff] }
 0x3f3   : > { %5251 = vmatpush1.bf16.msra.mxu1 %v13486_v6  ;;  %v13543_v40 = vcombine.high %v3728_v34, %v3732_v35  ;;  %v13542_v47 = vcombine.low %v3728_v34, %v3732_v35  ;;  %v13583_v6 = vcombine.high %v3768_v3, %v3772_v4  ;;  %v3808_v35 = vld [vmem:[%s19952_s5 + $0x440] sm:$0xff] }
 0x3f4   : > { %5252 = vmatprep.subr.bf16.mxu1 %v13495_v7  ;;  %v3776_v7 = vld [vmem:[%s19952_s5 + $0x340] sm:$0xff]  ;;  %v13623_v43 = vcombine.high %v3808_v35, %v3812_v37  ;;  %v13622_v53 = vcombine.low %v3808_v35, %v3812_v37  ;;  %v3865_v35 = vld [vmem:[%s19952_s5 + $0x608] sm:$0xff] }
 0x3f5   : > { %v13590_v17 = vcombine.low %v3776_v7, %v3780_v8  ;;  %v3840_v4 = vld [vmem:[%s19952_s5 + $0x540] sm:$0xff] }
 0x3f7   : > { %5253 = vmatpush1.bf16.msra.mxu1 %v13494_v10  ;;  %v13591_v10 = vcombine.high %v3776_v7, %v3780_v8  ;;  %v3845_v7 = vld [vmem:[%s19952_s5 + $0x568] sm:$0xff] }
 0x3f8   : > { %5254 = vmatprep.subr.bf16.mxu1 %v13503_v11  ;;  %v3784_v11 = vld [vmem:[%s19952_s5 + $0x380] sm:$0xff] }
 0x3f9   : > { %v13598_v21 = vcombine.low %v3784_v11, %v3788_v14 }
 0x3fb   : > { %5255 = vmatpush1.bf16.msra.mxu1 %v13502_v18  ;;  %v13599_v18 = vcombine.high %v3784_v11, %v3788_v14  ;;  %v3848_v14 = vld [vmem:[%s19952_s5 + $0x580] sm:$0xff] }
 0x3fc   : > { %5256 = vmatprep.subr.bf16.mxu1 %v13511_v19  ;;  %v3792_v19 = vld [vmem:[%s19952_s5 + $0x3c0] sm:$0xff] }
 0x3ff   : > { %5257 = vmatpush1.bf16.msra.mxu1 %v13510_v22  ;;  %v13607_v22 = vcombine.high %v3792_v19, %v3796_v20 }
 0x400   : > { %5258 = vmatprep.subr.bf16.mxu1 %v13519_v23  ;;  %v13606_v23 = vcombine.low %v3792_v19, %v3796_v20  ;;  %v3853_v19 = vld [vmem:[%s19952_s5 + $0x5a8] sm:$0xff] }
 0x403   : > { %5259 = vmatpush1.bf16.msra.mxu1 %v13518_v26  ;;  %v3245_v26 = vrot.slane %v18121_v25, %v17869_v12 }
 0x404   : > { %5260 = vmatprep.subr.bf16.mxu1 %v13527_v27  ;;  %v3249_v27 = vrot.slane %v18121_v25, %v17875_v15 }
 0x407   : > { %5261 = vmatpush1.bf16.msra.mxu1 %v13526_v30 }
 0x408   : > { %5262 = vmatprep.subr.bf16.mxu1 %v13535_v32 }
 0x40b   : > { %5263 = vmatpush1.bf16.msra.mxu1 %v13534_v38  ;;  %v3809_v38 = vld [vmem:[%s19952_s5 + $0x448] sm:$0xff] }
 0x40c   : > { %5264 = vmatprep.subr.bf16.mxu1 %v13543_v40  ;;  %v13625_v44 = vcombine.high %v3809_v38, %v3813_v39  ;;  %v13624_v41 = vcombine.low %v3809_v38, %v3813_v39 }
 0x40f   : > { %5265 = vmatpush1.bf16.msra.mxu1 %v13542_v47  ;;  %v3817_v47 = vld [vmem:[%s19952_s5 + $0x488] sm:$0xff] }
 0x410   : > { %5266 = vmatprep.subr.bf16.mxu1 %v13551_v51  ;;  %v3821_v51 = vld [vmem:[%s19952_s5 + $0x4a8] sm:$0xff] }
 0x411   : > { %v13632_v52 = vcombine.low %v3817_v47, %v3821_v51 }
 0x413   : > { %5267 = vmatpush1.bf16.msra.mxu1 %v13550_v57  ;;  %v13633_v57 = vcombine.high %v3817_v47, %v3821_v51  ;;  %v3877_v47 = vld [vmem:[%s19952_s5 + $0x668] sm:$0xff] }
 0x414   : > { %5268 = vmatprep.subr.bf16.mxu1 %v13559_v58  ;;  %v3824_v58 = vld [vmem:[%s19952_s5 + $0x4c0] sm:$0xff] }
 0x415   : > { %v13638_v0 = vcombine.low %v3824_v58, %v3828_v59 }
 0x417   : > { %5269 = vmatpush1.bf16.msra.mxu1 %v13558_v61  ;;  %v3836_v61 = vld [vmem:[%s19952_s5 + $0x520] sm:$0xff] }
 0x418   : > { %5270 = vmatprep.subr.bf16.mxu1 %v13567_v62  ;;  %v3833_v62 = vld [vmem:[%s19952_s5 + $0x508] sm:$0xff]  ;;  %v13646_v8 = vcombine.low %v3832_v60, %v3836_v61 }
 0x419   : > { %v13649_v3 = vcombine.high %v3833_v62, %v3837_v63 }
 0x41b   : > { %5271 = vmatpush1.bf16.msra.mxu1 %v13566_v1  ;;  %v13640_v1 = vcombine.low %v3825_v48, %v3829_v49 }
 0x41c   : > { %5272 = vmatprep.subr.bf16.mxu1 %v13575_v2  ;;  %v13647_v2 = vcombine.high %v3832_v60, %v3836_v61  ;;  %v3892_v60 = vld [vmem:[%s19952_s5 + $0x6e0] sm:$0xff]  ;;  %v3889_v61 = vld [vmem:[%s19952_s5 + $0x6c8] sm:$0xff] }
 0x41f   : > { %5273 = vmatpush1.bf16.msra.mxu1 %v13574_v5  ;;  %v3844_v5 = vld [vmem:[%s19952_s5 + $0x560] sm:$0xff] }
 0x420   : > { %5274 = vmatprep.subr.bf16.mxu1 %v13583_v6  ;;  %v3841_v6 = vld [vmem:[%s19952_s5 + $0x548] sm:$0xff]  ;;  %v13654_v20 = vcombine.low %v3840_v4, %v3844_v5 }
 0x421   : > { %v13657_v11 = vcombine.high %v3841_v6, %v3845_v7 }
 0x423   : > { %5275 = vmatpush1.bf16.msra.mxu1 %v13582_v9  ;;  %v13648_v9 = vcombine.low %v3833_v62, %v3837_v63  ;;  %v3893_v62 = vld [vmem:[%s19952_s5 + $0x6e8] sm:$0xff] }
 0x424   : > { %5276 = vmatprep.subr.bf16.mxu1 %v13591_v10  ;;  %v13655_v10 = vcombine.high %v3840_v4, %v3844_v5  ;;  %v3900_v4 = vld [vmem:[%s19952_s5 + $0x720] sm:$0xff]  ;;  %v3897_v5 = vld [vmem:[%s19952_s5 + $0x708] sm:$0xff] }
 0x427   : > { %5277 = vmatpush1.bf16.msra.mxu1 %v13590_v17  ;;  %v3852_v17 = vld [vmem:[%s19952_s5 + $0x5a0] sm:$0xff] }
 0x428   : > { %5278 = vmatprep.subr.bf16.mxu1 %v13599_v18  ;;  %v3849_v18 = vld [vmem:[%s19952_s5 + $0x588] sm:$0xff] }
 0x42b   : > { %5279 = vmatpush1.bf16.msra.mxu1 %v13598_v21  ;;  %v13656_v21 = vcombine.low %v3841_v6, %v3845_v7  ;;  %v3901_v6 = vld [vmem:[%s19952_s5 + $0x728] sm:$0xff] }
 0x42c   : > { %5280 = vmatprep.subr.bf16.mxu1 %v13607_v22  ;;  %v13663_v22 = vcombine.high %v3848_v14, %v3852_v17 }
 0x42f   : > { %5281 = vmatpush1.bf16.msra.mxu1 %v13606_v23  ;;  %v13665_v23 = vcombine.high %v3849_v18, %v3853_v19 }
 0x430   : > { %5291 = vmatprep.subr.bf16.mxu1 %v13615_v24  ;;  %v3856_v24 = vld [vmem:[%s19952_s5 + $0x5c0] sm:$0xff] }
 0x485   : > { %v3616_v28 = vpop.f32.mrb[0].mxu1 }
 0x486   : > { %v3617_v29 = vadd.f32 %v3616_v28, %v3245_v26  ;;  %v3618_v30 = vpop.f32.mrb[1].mxu1  ;;  %v3860_v26 = vld [vmem:[%s19952_s5 + $0x5e0] sm:$0xff]  ;;  %v3861_v28 = vld [vmem:[%s19952_s5 + $0x5e8] sm:$0xff] }
 0x487   : > { %v3619_v31 = vadd.f32 %v3618_v30, %v3249_v27  ;;  %v3620_v32 = vpop.f32.mrb[2].mxu1  ;;  %v3857_v27 = vld [vmem:[%s19952_s5 + $0x5c8] sm:$0xff]  ;;  %v13664_v30 = vcombine.low %v3849_v18, %v3853_v19  ;;  %v13670_v37 = vcombine.low %v3856_v24, %v3860_v26 }
 0x488   : > { %v3664_v33 = vmax.f32 %v3617_v29, 0.0  ;;  %v3621_v34 = vpop.f32.mrb[3].mxu1  ;;  %v13662_v29 = vcombine.low %v3848_v14, %v3852_v17  ;;  %v13673_v32 = vcombine.high %v3857_v27, %v3861_v28  ;;  %v13672_v38 = vcombine.low %v3857_v27, %v3861_v28  ;;  %v3908_v14 = vld [vmem:[%s19952_s5 + $0x760] sm:$0xff]  ;;  %v3905_v17 = vld [vmem:[%s19952_s5 + $0x748] sm:$0xff] }
 0x489   : > { %v3665_v36 = vmax.f32 %v3619_v31, 0.0  ;;  %v13671_v31 = vcombine.high %v3856_v24, %v3860_v26  ;;  %v3868_v34 = vld [vmem:[%s19952_s5 + $0x620] sm:$0xff]  ;;  %v3909_v18 = vld [vmem:[%s19952_s5 + $0x768] sm:$0xff]  ;;  %v18310_v28 = vsub.s32 2, %v17405_v13 }
 0x48a   : > { %v18141_v42 = vpack.c.bf16 %v3664_v33, %v3664_v33  ;;  %v3864_v33 = vld [vmem:[%s19952_s5 + $0x600] sm:$0xff]  ;;  %v3913_v26 = vld [vmem:[%s19952_s5 + $0x788] sm:$0xff] }
 0x48b   : > { %v18139_v40 = vpack.c.bf16 %v3665_v36, %v3665_v36  ;;  %v3869_v36 = vld [vmem:[%s19952_s5 + $0x628] sm:$0xff]  ;;  %v13679_v39 = vcombine.high %v3864_v33, %v3868_v34  ;;  %v13678_v51 = vcombine.low %v3864_v33, %v3868_v34  ;;  %v3916_v24 = vld [vmem:[%s19952_s5 + $0x7a0] sm:$0xff] }
 0x48c   : > { %v3917_v27 = vld [vmem:[%s19952_s5 + $0x7a8] sm:$0xff]  ;;  %v3920_v34 = vld [vmem:[%s19952_s5 + $0x7c0] sm:$0xff] }
 0x48d   : > { %5282 = vmatprep.mubr.bf16.mxu1 %v18139_v40  ;;  %5364 = vmatprep.mubr.bf16.mxu0 %v18139_v40  ;;  %v13729_v33 = vcombine.high %v3913_v26, %v3917_v27 }
 0x48e   : > { %5283 = vmatmul.mubr.bf16.vlgmr.msra.gmra.mrb[8].mxu1 %v18141_v42  ;;  %5365 = vmatmul.mubr.bf16.vlgmr.msra.gmra.mrb[4].mxu0 %v18141_v42 }
 0x48f   : > { %5292 = vmatpush1.bf16.msra.mxu1 %v13614_v54  ;;  %5374 = vmatpush1.bf16.msra.mxu0 %v13616_v55  ;;  %v13639_v54 = vcombine.high %v3824_v58, %v3828_v59  ;;  %v13641_v55 = vcombine.high %v3825_v48, %v3829_v49  ;;  %v3884_v58 = vld [vmem:[%s19952_s5 + $0x6a0] sm:$0xff]  ;;  %v3881_v59 = vld [vmem:[%s19952_s5 + $0x688] sm:$0xff] }
 0x490   : > { %5293 = vmatprep.subr.bf16.mxu1 %v13623_v43  ;;  %5375 = vmatprep.subr.bf16.mxu0 %v13625_v44  ;;  %v13681_v43 = vcombine.high %v3865_v35, %v3869_v36  ;;  %v3872_v44 = vld [vmem:[%s19952_s5 + $0x640] sm:$0xff]  ;;  %v3885_v48 = vld [vmem:[%s19952_s5 + $0x6a8] sm:$0xff] }
 0x491   : > { %v13686_v49 = vcombine.low %v3872_v44, %v3876_v45 }
 0x493   : > { %5294 = vmatpush1.bf16.msra.mxu1 %v13622_v53  ;;  %5376 = vmatpush1.bf16.msra.mxu0 %v13624_v41  ;;  %v13680_v53 = vcombine.low %v3865_v35, %v3869_v36  ;;  %v13687_v41 = vcombine.high %v3872_v44, %v3876_v45  ;;  %v3924_v35 = vld [vmem:[%s19952_s5 + $0x7e0] sm:$0xff]  ;;  %v3921_v36 = vld [vmem:[%s19952_s5 + $0x7c8] sm:$0xff]  ;;  %v13728_v44 = vcombine.low %v3913_v26, %v3917_v27  ;;  %v3706_v27 = vld [vmem:[%s19952_s5 + $0x110] sm:$0xff] }
 0x494   : > { %5295 = vmatprep.subr.bf16.mxu1 %v13631_v56  ;;  %5377 = vmatprep.subr.bf16.mxu0 %v13633_v57  ;;  %v13689_v56 = vcombine.high %v3873_v46, %v3877_v47  ;;  %v3880_v57 = vld [vmem:[%s19952_s5 + $0x680] sm:$0xff]  ;;  %v13735_v45 = vcombine.high %v3920_v34, %v3924_v35 }
 0x495   : > { %v13694_v63 = vcombine.low %v3880_v57, %v3884_v58 }
 0x497   : > { %5296 = vmatpush1.bf16.msra.mxu1 %v13630_v50  ;;  %5378 = vmatpush1.bf16.msra.mxu0 %v13632_v52  ;;  %v13688_v50 = vcombine.low %v3873_v46, %v3877_v47  ;;  %v13695_v52 = vcombine.high %v3880_v57, %v3884_v58  ;;  %v3674_v47 = vld [vmem:[%s19952_s5 + $0x10] sm:$0xff] }
 0x498   : > { %5297 = vmatprep.subr.bf16.mxu1 %v13639_v54  ;;  %5379 = vmatprep.subr.bf16.mxu0 %v13641_v55  ;;  %v13697_v54 = vcombine.high %v3881_v59, %v3885_v48  ;;  %v3888_v55 = vld [vmem:[%s19952_s5 + $0x6c0] sm:$0xff] }
 0x499   : > { %v13702_v7 = vcombine.low %v3888_v55, %v3892_v60 }
 0x49b   : > { %5298 = vmatpush1.bf16.msra.mxu1 %v13638_v0  ;;  %5380 = vmatpush1.bf16.msra.mxu0 %v13640_v1  ;;  %v13696_v0 = vcombine.low %v3881_v59, %v3885_v48  ;;  %v13703_v1 = vcombine.high %v3888_v55, %v3892_v60  ;;  %v13734_v48 = vcombine.low %v3920_v34, %v3924_v35 }
 0x49c   : > { %5299 = vmatprep.subr.bf16.mxu1 %v13647_v2  ;;  %5381 = vmatprep.subr.bf16.mxu0 %v13649_v3  ;;  %v13705_v2 = vcombine.high %v3889_v61, %v3893_v62  ;;  %v3896_v3 = vld [vmem:[%s19952_s5 + $0x700] sm:$0xff] }
 0x49d   : > { %v13710_v19 = vcombine.low %v3896_v3, %v3900_v4 }
 0x49f   : > { %5300 = vmatpush1.bf16.msra.mxu1 %v13646_v8  ;;  %5382 = vmatpush1.bf16.msra.mxu0 %v13648_v9  ;;  %v13704_v8 = vcombine.low %v3889_v61, %v3893_v62  ;;  %v13711_v9 = vcombine.high %v3896_v3, %v3900_v4  ;;  %v3682_v61 = vld [vmem:[%s19952_s5 + $0x50] sm:$0xff] }
 0x4a0   : > { %5301 = vmatprep.subr.bf16.mxu1 %v13655_v10  ;;  %5383 = vmatprep.subr.bf16.mxu0 %v13657_v11  ;;  %v13713_v10 = vcombine.high %v3897_v5, %v3901_v6  ;;  %v3904_v11 = vld [vmem:[%s19952_s5 + $0x740] sm:$0xff]  ;;  %v3686_v62 = vld [vmem:[%s19952_s5 + $0x70] sm:$0xff] }
 0x4a3   : > { %5302 = vmatpush1.bf16.msra.mxu1 %v13654_v20  ;;  %5384 = vmatpush1.bf16.msra.mxu0 %v13656_v21  ;;  %v13712_v20 = vcombine.low %v3897_v5, %v3901_v6  ;;  %v13719_v21 = vcombine.high %v3904_v11, %v3908_v14  ;;  %v13499_v5 = vcombine.high %v3682_v61, %v3686_v62 }
 0x4a4   : > { %5303 = vmatprep.subr.bf16.mxu1 %v13663_v22  ;;  %5385 = vmatprep.subr.bf16.mxu0 %v13665_v23  ;;  %v13721_v22 = vcombine.high %v3905_v17, %v3909_v18  ;;  %v3912_v23 = vld [vmem:[%s19952_s5 + $0x780] sm:$0xff] }
 0x4a7   : > { %5304 = vmatpush1.bf16.msra.mxu1 %v13662_v29  ;;  %5386 = vmatpush1.bf16.msra.mxu0 %v13664_v30  ;;  %v13718_v29 = vcombine.low %v3904_v11, %v3908_v14  ;;  %v13720_v30 = vcombine.low %v3905_v17, %v3909_v18  ;;  %v13498_v11 = vcombine.low %v3682_v61, %v3686_v62  ;;  %v3738_v62 = vld [vmem:[%s19952_s5 + $0x210] sm:$0xff] }
 0x4a8   : > { %5305 = vmatprep.subr.bf16.mxu1 %v13671_v31  ;;  %5387 = vmatprep.subr.bf16.mxu0 %v13673_v32  ;;  %v18313_v31 = vsub.s32 3, %v17405_v13  ;;  %v13727_v32 = vcombine.high %v3912_v23, %v3916_v24 }
 0x4ab   : > { %5306 = vmatpush1.bf16.msra.mxu1 %v13670_v37  ;;  %5388 = vmatpush1.bf16.msra.mxu0 %v13672_v38  ;;  %v3925_v37 = vld [vmem:[%s19952_s5 + $0x7e8] sm:$0xff]  ;;  %v3253_v38 = vrot.slane %v18121_v25, %v18310_v28 }
 0x4ac   : > { %5307 = vmatprep.subr.bf16.mxu1 %v13679_v39  ;;  %5389 = vmatprep.subr.bf16.mxu0 %v13681_v43  ;;  %v3257_v39 = vrot.slane %v18121_v25, %v18313_v31  ;;  %v13726_v43 = vcombine.low %v3912_v23, %v3916_v24  ;;  %v13737_v46 = vcombine.high %v3921_v36, %v3925_v37  ;;  %v3679_v25 = vld [vmem:[%s19952_s5 + $0x38] sm:$0xff] }
 0x4af   : > { %5308 = vmatpush1.bf16.msra.mxu1 %v13678_v51  ;;  %5390 = vmatpush1.bf16.msra.mxu0 %v13680_v53  ;;  %v3678_v53 = vld [vmem:[%s19952_s5 + $0x30] sm:$0xff] }
 0x4b0   : > { %5309 = vmatprep.subr.bf16.mxu1 %v13687_v41  ;;  %5391 = vmatprep.subr.bf16.mxu0 %v13689_v56  ;;  %v3675_v41 = vld [vmem:[%s19952_s5 + $0x18] sm:$0xff] }
 0x4b1   : > { %v13493_v55 = vcombine.high %v3675_v41, %v3679_v25  ;;  %v13492_v4 = vcombine.low %v3675_v41, %v3679_v25  ;;  %v3723_v41 = vld [vmem:[%s19952_s5 + $0x198] sm:$0xff] }
 0x4b2   : > { %v3727_v25 = vld [vmem:[%s19952_s5 + $0x1b8] sm:$0xff] }
 0x4b3   : > { %5310 = vmatpush1.bf16.msra.mxu1 %v13686_v49  ;;  %5392 = vmatpush1.bf16.msra.mxu0 %v13688_v50  ;;  %v13736_v49 = vcombine.low %v3921_v36, %v3925_v37  ;;  %v3714_v37 = vld [vmem:[%s19952_s5 + $0x150] sm:$0xff] }
 0x4b4   : > { %5311 = vmatprep.subr.bf16.mxu1 %v13695_v52  ;;  %5393 = vmatprep.subr.bf16.mxu0 %v13697_v54  ;;  %v13491_v54 = vcombine.high %v3674_v47, %v3678_v53 }
 0x4b7   : > { %5312 = vmatpush1.bf16.msra.mxu1 %v13694_v63  ;;  %5394 = vmatpush1.bf16.msra.mxu0 %v13696_v0  ;;  %v3683_v63 = vld [vmem:[%s19952_s5 + $0x58] sm:$0xff] }
 0x4b8   : > { %5313 = vmatprep.subr.bf16.mxu1 %v13703_v1  ;;  %5395 = vmatprep.subr.bf16.mxu0 %v13705_v2  ;;  %v3687_v0 = vld [vmem:[%s19952_s5 + $0x78] sm:$0xff]  ;;  %v13490_v2 = vcombine.low %v3674_v47, %v3678_v53  ;;  %v3726_v53 = vld [vmem:[%s19952_s5 + $0x1b0] sm:$0xff] }
 0x4b9   : > { %v13501_v6 = vcombine.high %v3683_v63, %v3687_v0  ;;  %v13500_v14 = vcombine.low %v3683_v63, %v3687_v0  ;;  %v3742_v63 = vld [vmem:[%s19952_s5 + $0x230] sm:$0xff]  ;;  %v3739_v0 = vld [vmem:[%s19952_s5 + $0x218] sm:$0xff] }
 0x4bb   : > { %5314 = vmatpush1.bf16.msra.mxu1 %v13702_v7  ;;  %5396 = vmatpush1.bf16.msra.mxu0 %v13704_v8  ;;  %v3690_v7 = vld [vmem:[%s19952_s5 + $0x90] sm:$0xff] }
 0x4bc   : > { %5315 = vmatprep.subr.bf16.mxu1 %v13711_v9  ;;  %5397 = vmatprep.subr.bf16.mxu0 %v13713_v10  ;;  %v3694_v8 = vld [vmem:[%s19952_s5 + $0xb0] sm:$0xff]  ;;  %v3691_v9 = vld [vmem:[%s19952_s5 + $0x98] sm:$0xff] }
 0x4bd   : > { %v3695_v10 = vld [vmem:[%s19952_s5 + $0xb8] sm:$0xff]  ;;  %v13507_v17 = vcombine.high %v3690_v7, %v3694_v8 }
 0x4be   : > { %v13509_v18 = vcombine.high %v3691_v9, %v3695_v10  ;;  %v13508_v23 = vcombine.low %v3691_v9, %v3695_v10  ;;  %v3750_v9 = vld [vmem:[%s19952_s5 + $0x270] sm:$0xff]  ;;  %v3747_v10 = vld [vmem:[%s19952_s5 + $0x258] sm:$0xff] }
 0x4bf   : > { %5316 = vmatpush1.bf16.msra.mxu1 %v13710_v19  ;;  %5398 = vmatpush1.bf16.msra.mxu0 %v13712_v20  ;;  %v3698_v19 = vld [vmem:[%s19952_s5 + $0xd0] sm:$0xff] }
 0x4c0   : > { %5317 = vmatprep.subr.bf16.mxu1 %v13719_v21  ;;  %5399 = vmatprep.subr.bf16.mxu0 %v13721_v22  ;;  %v3702_v20 = vld [vmem:[%s19952_s5 + $0xf0] sm:$0xff]  ;;  %v3699_v21 = vld [vmem:[%s19952_s5 + $0xd8] sm:$0xff]  ;;  %v13506_v22 = vcombine.low %v3690_v7, %v3694_v8 }
 0x4c1   : > { %v13515_v24 = vcombine.high %v3698_v19, %v3702_v20  ;;  %v3746_v8 = vld [vmem:[%s19952_s5 + $0x250] sm:$0xff] }
 0x4c3   : > { %5318 = vmatpush1.bf16.msra.mxu1 %v13718_v29  ;;  %5400 = vmatpush1.bf16.msra.mxu0 %v13720_v30  ;;  %v3710_v29 = vld [vmem:[%s19952_s5 + $0x130] sm:$0xff]  ;;  %v3707_v30 = vld [vmem:[%s19952_s5 + $0x118] sm:$0xff] }
 0x4c4   : > { %5319 = vmatprep.subr.bf16.mxu1 %v13727_v32  ;;  %5401 = vmatprep.subr.bf16.mxu0 %v13729_v33  ;;  %v3711_v32 = vld [vmem:[%s19952_s5 + $0x138] sm:$0xff]  ;;  %v13514_v33 = vcombine.low %v3698_v19, %v3702_v20  ;;  %v13523_v35 = vcombine.high %v3706_v27, %v3710_v29  ;;  %v3754_v20 = vld [vmem:[%s19952_s5 + $0x290] sm:$0xff] }
 0x4c5   : > { %v3657_v51 = vpop.f32.mrb[4].mxu1  ;;  %v13525_v36 = vcombine.high %v3707_v30, %v3711_v32 }
 0x4c6   : > { %v3658_v56 = vadd.f32 %v3657_v51, %v3253_v38  ;;  %v3659_v57 = vpop.f32.mrb[5].mxu1  ;;  %v3718_v38 = vld [vmem:[%s19952_s5 + $0x170] sm:$0xff] }
 0x4c7   : > { %v3660_v58 = vadd.f32 %v3659_v57, %v3257_v39  ;;  %v3661_v59 = vpop.f32.mrb[6].mxu1  ;;  %5320 = vmatpush1.bf16.msra.mxu1 %v13726_v43  ;;  %5402 = vmatpush1.bf16.msra.mxu0 %v13728_v44  ;;  %v3715_v39 = vld [vmem:[%s19952_s5 + $0x158] sm:$0xff]  ;;  %v13522_v44 = vcombine.low %v3706_v27, %v3710_v29  ;;  %v3722_v51 = vld [vmem:[%s19952_s5 + $0x190] sm:$0xff] }
 0x4c8   : > { %v3666_v50 = vmax.f32 %v3658_v56, 0.0  ;;  %v3662_v52 = vpop.f32.mrb[7].mxu1  ;;  %5321 = vmatprep.subr.bf16.mxu1 %v13735_v45  ;;  %5403 = vmatprep.subr.bf16.mxu0 %v13737_v46  ;;  %v3719_v43 = vld [vmem:[%s19952_s5 + $0x178] sm:$0xff]  ;;  %v13524_v45 = vcombine.low %v3707_v30, %v3711_v32  ;;  %v13531_v46 = vcombine.high %v3714_v37, %v3718_v38  ;;  %v13530_v56 = vcombine.low %v3714_v37, %v3718_v38  ;;  %v3762_v29 = vld [vmem:[%s19952_s5 + $0x2d0] sm:$0xff] }
 0x4c9   : > { %v3667_v60 = vmax.f32 %v3660_v58, 0.0  ;;  %v13533_v47 = vcombine.high %v3715_v39, %v3719_v43  ;;  %v13532_v57 = vcombine.low %v3715_v39, %v3719_v43  ;;  %v13539_v58 = vcombine.high %v3722_v51, %v3726_v53  ;;  %v3735_v52 = vld [vmem:[%s19952_s5 + $0x1f8] sm:$0xff]  ;;  %v3766_v30 = vld [vmem:[%s19952_s5 + $0x2f0] sm:$0xff] }
 0x4ca   : > { %v18357_v3 = vpack.c.bf16 %v3666_v50, %v3666_v50  ;;  %v13541_v59 = vcombine.high %v3723_v41, %v3727_v25  ;;  %v3731_v50 = vld [vmem:[%s19952_s5 + $0x1d8] sm:$0xff]  ;;  %v3770_v38 = vld [vmem:[%s19952_s5 + $0x310] sm:$0xff] }
 0x4cb   : > { %v18355_v1 = vpack.c.bf16 %v3667_v60, %v3667_v60  ;;  %5322 = vmatpush1.bf16.msra.mxu1 %v13734_v48  ;;  %5404 = vmatpush1.bf16.msra.mxu0 %v13736_v49  ;;  %v3730_v48 = vld [vmem:[%s19952_s5 + $0x1d0] sm:$0xff]  ;;  %v13549_v61 = vcombine.high %v3731_v50, %v3735_v52  ;;  %v3763_v32 = vld [vmem:[%s19952_s5 + $0x2d8] sm:$0xff] }
 0x4cc   : > { %5414 = vmatprep.subr.bf16.mxu1 %v13491_v54  ;;  %5496 = vmatprep.subr.bf16.mxu0 %v13493_v55  ;;  %v3734_v49 = vld [vmem:[%s19952_s5 + $0x1f0] sm:$0xff]  ;;  %v13538_v54 = vcombine.low %v3722_v51, %v3726_v53  ;;  %v13540_v55 = vcombine.low %v3723_v41, %v3727_v25  ;;  %v3771_v43 = vld [vmem:[%s19952_s5 + $0x318] sm:$0xff] }
 0x4cd   : > { %5323 = vmatprep.mubr.bf16.mxu1 %v18355_v1  ;;  %5405 = vmatprep.mubr.bf16.mxu0 %v18355_v1  ;;  %v13547_v60 = vcombine.high %v3730_v48, %v3734_v49  ;;  %v3774_v39 = vld [vmem:[%s19952_s5 + $0x330] sm:$0xff]  ;;  %v3779_v25 = vld [vmem:[%s19952_s5 + $0x358] sm:$0xff] }
 0x4ce   : > { %5324 = vmatmul.mubr.bf16.vlgmr.msra.gmra.mrb[8].mxu1 %v18357_v3  ;;  %5406 = vmatmul.mubr.bf16.vlgmr.msra.gmra.mrb[4].mxu0 %v18357_v3  ;;  %v3778_v53 = vld [vmem:[%s19952_s5 + $0x350] sm:$0xff] }
 0x4cf   : > { %5415 = vmatpush1.bf16.msra.mxu1 %v13490_v2  ;;  %5446 = vmatprep.mubr.bf16.mxu1 %v18139_v40  ;;  %v3743_v2 = vld [vmem:[%s19952_s5 + $0x238] sm:$0xff]  ;;  %v3782_v41 = vld [vmem:[%s19952_s5 + $0x370] sm:$0xff] }
 0x4d0   : > { %5497 = vmatpush1.bf16.msra.mxu0 %v13492_v4  ;;  %5528 = vmatprep.mubr.bf16.mxu0 %v18139_v40  ;;  %v3703_v40 = vld [vmem:[%s19952_s5 + $0xf8] sm:$0xff]  ;;  %v13546_v4 = vcombine.low %v3730_v48, %v3734_v49  ;;  %v13557_v7 = vcombine.high %v3739_v0, %v3743_v2  ;;  %v3786_v49 = vld [vmem:[%s19952_s5 + $0x390] sm:$0xff] }
 0x4d1   : > { %5416 = vmatprep.subr.bf16.mxu1 %v13499_v5  ;;  %5498 = vmatprep.subr.bf16.mxu0 %v13501_v6  ;;  %v13517_v26 = vcombine.high %v3699_v21, %v3703_v40  ;;  %v13516_v34 = vcombine.low %v3699_v21, %v3703_v40  ;;  %v13548_v5 = vcombine.low %v3731_v50, %v3735_v52  ;;  %v3758_v21 = vld [vmem:[%s19952_s5 + $0x2b0] sm:$0xff]  ;;  %v3755_v40 = vld [vmem:[%s19952_s5 + $0x298] sm:$0xff] }
 0x4d2   : > { %v13555_v6 = vcombine.high %v3738_v62, %v3742_v63  ;;  %v3790_v50 = vld [vmem:[%s19952_s5 + $0x3b0] sm:$0xff]  ;;  %v3787_v52 = vld [vmem:[%s19952_s5 + $0x398] sm:$0xff] }
 0x4d3   : > { %5417 = vmatpush1.bf16.msra.mxu1 %v13498_v11  ;;  %v3751_v11 = vld [vmem:[%s19952_s5 + $0x278] sm:$0xff] }
 0x4d4   : > { %5499 = vmatpush1.bf16.msra.mxu0 %v13500_v14  ;;  %5418 = vmatprep.subr.bf16.mxu1 %v13507_v17  ;;  %v13554_v14 = vcombine.low %v3738_v62, %v3742_v63  ;;  %v13556_v17 = vcombine.low %v3739_v0, %v3743_v2  ;;  %v13565_v19 = vcombine.high %v3747_v10, %v3751_v11  ;;  %v3794_v63 = vld [vmem:[%s19952_s5 + $0x3d0] sm:$0xff]  ;;  %v3795_v2 = vld [vmem:[%s19952_s5 + $0x3d8] sm:$0xff] }
 0x4d5   : > { %5500 = vmatprep.subr.bf16.mxu0 %v13509_v18  ;;  %v13563_v18 = vcombine.high %v3746_v8, %v3750_v9  ;;  %v3798_v0 = vld [vmem:[%s19952_s5 + $0x3f0] sm:$0xff] }
 0x4d7   : > { %5419 = vmatpush1.bf16.msra.mxu1 %v13506_v22  ;;  %v3759_v22 = vld [vmem:[%s19952_s5 + $0x2b8] sm:$0xff] }
 0x4d8   : > { %5501 = vmatpush1.bf16.msra.mxu0 %v13508_v23  ;;  %5420 = vmatprep.subr.bf16.mxu1 %v13515_v24  ;;  %v13562_v23 = vcombine.low %v3746_v8, %v3750_v9  ;;  %v13564_v24 = vcombine.low %v3747_v10, %v3751_v11  ;;  %v13573_v27 = vcombine.high %v3755_v40, %v3759_v22  ;;  %v3802_v9 = vld [vmem:[%s19952_s5 + $0x410] sm:$0xff]  ;;  %v3803_v11 = vld [vmem:[%s19952_s5 + $0x418] sm:$0xff] }
 0x4d9   : > { %5502 = vmatprep.subr.bf16.mxu0 %v13517_v26  ;;  %v13571_v26 = vcombine.high %v3754_v20, %v3758_v21  ;;  %v3806_v10 = vld [vmem:[%s19952_s5 + $0x430] sm:$0xff] }
 0x4db   : > { %5421 = vmatpush1.bf16.msra.mxu1 %v13514_v33  ;;  %v3767_v33 = vld [vmem:[%s19952_s5 + $0x2f8] sm:$0xff] }
 0x4dc   : > { %5503 = vmatpush1.bf16.msra.mxu0 %v13516_v34  ;;  %5422 = vmatprep.subr.bf16.mxu1 %v13523_v35  ;;  %v13570_v34 = vcombine.low %v3754_v20, %v3758_v21  ;;  %v13572_v35 = vcombine.low %v3755_v40, %v3759_v22  ;;  %v13581_v37 = vcombine.high %v3763_v32, %v3767_v33  ;;  %v3810_v21 = vld [vmem:[%s19952_s5 + $0x450] sm:$0xff] }
 0x4dd   : > { %5504 = vmatprep.subr.bf16.mxu0 %v13525_v36  ;;  %v13579_v36 = vcombine.high %v3762_v29, %v3766_v30  ;;  %v3814_v40 = vld [vmem:[%s19952_s5 + $0x470] sm:$0xff]  ;;  %v13618_v22 = vcombine.low %v3802_v9, %v3806_v10 }
 0x4df   : > { %5423 = vmatpush1.bf16.msra.mxu1 %v13522_v44  ;;  %v3775_v44 = vld [vmem:[%s19952_s5 + $0x338] sm:$0xff] }
 0x4e0   : > { %5505 = vmatpush1.bf16.msra.mxu0 %v13524_v45  ;;  %5424 = vmatprep.subr.bf16.mxu1 %v13531_v46  ;;  %v13578_v45 = vcombine.low %v3762_v29, %v3766_v30  ;;  %v13580_v46 = vcombine.low %v3763_v32, %v3767_v33  ;;  %v13589_v51 = vcombine.high %v3771_v43, %v3775_v44  ;;  %v3818_v29 = vld [vmem:[%s19952_s5 + $0x490] sm:$0xff]  ;;  %v3819_v33 = vld [vmem:[%s19952_s5 + $0x498] sm:$0xff] }
 0x4e1   : > { %5506 = vmatprep.subr.bf16.mxu0 %v13533_v47  ;;  %v13587_v47 = vcombine.high %v3770_v38, %v3774_v39  ;;  %v3822_v30 = vld [vmem:[%s19952_s5 + $0x4b0] sm:$0xff] }
 0x4e3   : > { %5425 = vmatpush1.bf16.msra.mxu1 %v13530_v56  ;;  %v3783_v56 = vld [vmem:[%s19952_s5 + $0x378] sm:$0xff] }
 0x4e4   : > { %5507 = vmatpush1.bf16.msra.mxu0 %v13532_v57  ;;  %5426 = vmatprep.subr.bf16.mxu1 %v13539_v58  ;;  %v13586_v57 = vcombine.low %v3770_v38, %v3774_v39  ;;  %v13588_v58 = vcombine.low %v3771_v43, %v3775_v44  ;;  %v13597_v48 = vcombine.high %v3779_v25, %v3783_v56  ;;  %v3826_v39 = vld [vmem:[%s19952_s5 + $0x4d0] sm:$0xff]  ;;  %v3831_v44 = vld [vmem:[%s19952_s5 + $0x4f8] sm:$0xff] }
 0x4e5   : > { %5508 = vmatprep.subr.bf16.mxu0 %v13541_v59  ;;  %v13595_v59 = vcombine.high %v3778_v53, %v3782_v41  ;;  %v3830_v43 = vld [vmem:[%s19952_s5 + $0x4f0] sm:$0xff] }
 0x4e7   : > { %5427 = vmatpush1.bf16.msra.mxu1 %v13538_v54  ;;  %v3791_v54 = vld [vmem:[%s19952_s5 + $0x3b8] sm:$0xff] }
 0x4e8   : > { %5509 = vmatpush1.bf16.msra.mxu0 %v13540_v55  ;;  %5428 = vmatprep.subr.bf16.mxu1 %v13547_v60  ;;  %v13594_v55 = vcombine.low %v3778_v53, %v3782_v41  ;;  %v13596_v60 = vcombine.low %v3779_v25, %v3783_v56  ;;  %v13605_v62 = vcombine.high %v3787_v52, %v3791_v54  ;;  %v3838_v53 = vld [vmem:[%s19952_s5 + $0x530] sm:$0xff]  ;;  %v3835_v41 = vld [vmem:[%s19952_s5 + $0x518] sm:$0xff] }
 0x4e9   : > { %5510 = vmatprep.subr.bf16.mxu0 %v13549_v61  ;;  %v13603_v61 = vcombine.high %v3786_v49, %v3790_v50  ;;  %v3839_v25 = vld [vmem:[%s19952_s5 + $0x538] sm:$0xff]  ;;  %v13642_v56 = vcombine.low %v3826_v39, %v3830_v43 }
 0x4eb   : > { %5429 = vmatpush1.bf16.msra.mxu1 %v13546_v4  ;;  %v3799_v4 = vld [vmem:[%s19952_s5 + $0x3f8] sm:$0xff] }
 0x4ec   : > { %5511 = vmatpush1.bf16.msra.mxu0 %v13548_v5  ;;  %5430 = vmatprep.subr.bf16.mxu1 %v13555_v6  ;;  %v13602_v5 = vcombine.low %v3786_v49, %v3790_v50  ;;  %v13604_v6 = vcombine.low %v3787_v52, %v3791_v54  ;;  %v13613_v8 = vcombine.high %v3795_v2, %v3799_v4  ;;  %v3846_v49 = vld [vmem:[%s19952_s5 + $0x570] sm:$0xff]  ;;  %v3843_v50 = vld [vmem:[%s19952_s5 + $0x558] sm:$0xff] }
 0x4ed   : > { %5512 = vmatprep.subr.bf16.mxu0 %v13557_v7  ;;  %v13611_v7 = vcombine.high %v3794_v63, %v3798_v0  ;;  %v3847_v52 = vld [vmem:[%s19952_s5 + $0x578] sm:$0xff] }
 0x4ef   : > { %5431 = vmatpush1.bf16.msra.mxu1 %v13554_v14  ;;  %v3807_v14 = vld [vmem:[%s19952_s5 + $0x438] sm:$0xff] }
 0x4f0   : > { %5513 = vmatpush1.bf16.msra.mxu0 %v13556_v17  ;;  %5432 = vmatprep.subr.bf16.mxu1 %v13563_v18  ;;  %v13610_v17 = vcombine.low %v3794_v63, %v3798_v0  ;;  %v13612_v18 = vcombine.low %v3795_v2, %v3799_v4  ;;  %v13621_v20 = vcombine.high %v3803_v11, %v3807_v14  ;;  %v3854_v63 = vld [vmem:[%s19952_s5 + $0x5b0] sm:$0xff]  ;;  %v3851_v0 = vld [vmem:[%s19952_s5 + $0x598] sm:$0xff] }
 0x4f1   : > { %5514 = vmatprep.subr.bf16.mxu0 %v13565_v19  ;;  %v13619_v19 = vcombine.high %v3802_v9, %v3806_v10  ;;  %v3855_v2 = vld [vmem:[%s19952_s5 + $0x5b8] sm:$0xff]  ;;  %v3862_v9 = vld [vmem:[%s19952_s5 + $0x5f0] sm:$0xff] }
 0x4f2   : > { %v3859_v10 = vld [vmem:[%s19952_s5 + $0x5d8] sm:$0xff] }
 0x4f3   : > { %5433 = vmatpush1.bf16.msra.mxu1 %v13562_v23  ;;  %v3811_v23 = vld [vmem:[%s19952_s5 + $0x458] sm:$0xff] }
 0x4f4   : > { %5515 = vmatpush1.bf16.msra.mxu0 %v13564_v24  ;;  %5434 = vmatprep.subr.bf16.mxu1 %v13571_v26  ;;  %v3815_v24 = vld [vmem:[%s19952_s5 + $0x478] sm:$0xff]  ;;  %v13620_v26 = vcombine.low %v3803_v11, %v3807_v14 }
 0x4f5   : > { %5516 = vmatprep.subr.bf16.mxu0 %v13573_v27  ;;  %v13627_v27 = vcombine.high %v3810_v21, %v3814_v40  ;;  %v13629_v32 = vcombine.high %v3811_v23, %v3815_v24  ;;  %v3863_v11 = vld [vmem:[%s19952_s5 + $0x5f8] sm:$0xff] }
 0x4f7   : > { %5435 = vmatpush1.bf16.msra.mxu1 %v13570_v34  ;;  %v3823_v34 = vld [vmem:[%s19952_s5 + $0x4b8] sm:$0xff] }
 0x4f8   : > { %5517 = vmatpush1.bf16.msra.mxu0 %v13572_v35  ;;  %5436 = vmatprep.subr.bf16.mxu1 %v13579_v36  ;;  %v13626_v35 = vcombine.low %v3810_v21, %v3814_v40  ;;  %v13628_v36 = vcombine.low %v3811_v23, %v3815_v24  ;;  %v13637_v38 = vcombine.high %v3819_v33, %v3823_v34  ;;  %v3870_v21 = vld [vmem:[%s19952_s5 + $0x630] sm:$0xff]  ;;  %v3867_v40 = vld [vmem:[%s19952_s5 + $0x618] sm:$0xff] }
 0x4f9   : > { %5518 = vmatprep.subr.bf16.mxu0 %v13581_v37  ;;  %v13635_v37 = vcombine.high %v3818_v29, %v3822_v30  ;;  %v13676_v24 = vcombine.low %v3859_v10, %v3863_v11 }
 0x4fb   : > { %5437 = vmatpush1.bf16.msra.mxu1 %v13578_v45  ;;  %v13636_v45 = vcombine.low %v3819_v33, %v3823_v34  ;;  %v3879_v33 = vld [vmem:[%s19952_s5 + $0x678] sm:$0xff] }
 0x4fc   : > { %5519 = vmatpush1.bf16.msra.mxu0 %v13580_v46  ;;  %5438 = vmatprep.subr.bf16.mxu1 %v13587_v47  ;;  %v13643_v46 = vcombine.high %v3826_v39, %v3830_v43  ;;  %v3886_v39 = vld [vmem:[%s19952_s5 + $0x6b0] sm:$0xff]  ;;  %v3883_v43 = vld [vmem:[%s19952_s5 + $0x698] sm:$0xff] }
 0x4fd   : > { %5520 = vmatprep.subr.bf16.mxu0 %v13589_v51  ;;  %v3834_v51 = vld [vmem:[%s19952_s5 + $0x510] sm:$0xff] }
 0x4fe   : > { %v13650_v54 = vcombine.low %v3834_v51, %v3838_v53 }
 0x4ff   : > { %5439 = vmatpush1.bf16.msra.mxu1 %v13586_v57 }
 0x500   : > { %5521 = vmatpush1.bf16.msra.mxu0 %v13588_v58  ;;  %5440 = vmatprep.subr.bf16.mxu1 %v13595_v59  ;;  %v13651_v58 = vcombine.high %v3834_v51, %v3838_v53  ;;  %v13653_v59 = vcombine.high %v3835_v41, %v3839_v25  ;;  %v3894_v51 = vld [vmem:[%s19952_s5 + $0x6f0] sm:$0xff]  ;;  %v3891_v53 = vld [vmem:[%s19952_s5 + $0x6d8] sm:$0xff] }
 0x501   : > { %5522 = vmatprep.subr.bf16.mxu0 %v13597_v48  ;;  %v3842_v48 = vld [vmem:[%s19952_s5 + $0x550] sm:$0xff] }
 0x502   : > { %v13658_v4 = vcombine.low %v3842_v48, %v3846_v49 }
 0x503   : > { %5441 = vmatpush1.bf16.msra.mxu1 %v13594_v55  ;;  %v13652_v55 = vcombine.low %v3835_v41, %v3839_v25  ;;  %v3895_v41 = vld [vmem:[%s19952_s5 + $0x6f8] sm:$0xff] }
 0x504   : > { %5523 = vmatpush1.bf16.msra.mxu0 %v13596_v60  ;;  %5442 = vmatprep.subr.bf16.mxu1 %v13603_v61  ;;  %v13659_v60 = vcombine.high %v3842_v48, %v3846_v49  ;;  %v13661_v61 = vcombine.high %v3843_v50, %v3847_v52  ;;  %v3902_v48 = vld [vmem:[%s19952_s5 + $0x730] sm:$0xff]  ;;  %v3899_v49 = vld [vmem:[%s19952_s5 + $0x718] sm:$0xff] }
 0x505   : > { %5524 = vmatprep.subr.bf16.mxu0 %v13605_v62  ;;  %v3850_v62 = vld [vmem:[%s19952_s5 + $0x590] sm:$0xff] }
 0x506   : > { %v13666_v14 = vcombine.low %v3850_v62, %v3854_v63 }
 0x507   : > { %5443 = vmatpush1.bf16.msra.mxu1 %v13602_v5  ;;  %v13660_v5 = vcombine.low %v3843_v50, %v3847_v52  ;;  %v3903_v50 = vld [vmem:[%s19952_s5 + $0x738] sm:$0xff] }
 0x508   : > { %5525 = vmatpush1.bf16.msra.mxu0 %v13604_v6  ;;  %5444 = vmatprep.subr.bf16.mxu1 %v13611_v7  ;;  %v13667_v6 = vcombine.high %v3850_v62, %v3854_v63  ;;  %v13669_v7 = vcombine.high %v3851_v0, %v3855_v2  ;;  %v3910_v62 = vld [vmem:[%s19952_s5 + $0x770] sm:$0xff]  ;;  %v3907_v63 = vld [vmem:[%s19952_s5 + $0x758] sm:$0xff] }
 0x509   : > { %5526 = vmatprep.subr.bf16.mxu0 %v13613_v8  ;;  %v3858_v8 = vld [vmem:[%s19952_s5 + $0x5d0] sm:$0xff] }
 0x50a   : > { %v13674_v23 = vcombine.low %v3858_v8, %v3862_v9 }
 0x50b   : > { %5445 = vmatpush1.bf16.msra.mxu1 %v13610_v17  ;;  %v13668_v17 = vcombine.low %v3851_v0, %v3855_v2  ;;  %v3911_v0 = vld [vmem:[%s19952_s5 + $0x778] sm:$0xff] }
 0x50c   : > { %5527 = vmatpush1.bf16.msra.mxu0 %v13612_v18  ;;  %5455 = vmatprep.subr.bf16.mxu1 %v13619_v19  ;;  %v13675_v18 = vcombine.high %v3858_v8, %v3862_v9  ;;  %v13677_v19 = vcombine.high %v3859_v10, %v3863_v11  ;;  %v3918_v8 = vld [vmem:[%s19952_s5 + $0x7b0] sm:$0xff]  ;;  %v3915_v9 = vld [vmem:[%s19952_s5 + $0x798] sm:$0xff] }
 0x50d   : > { %5537 = vmatprep.subr.bf16.mxu0 %v13621_v20  ;;  %v3866_v20 = vld [vmem:[%s19952_s5 + $0x610] sm:$0xff]  ;;  %v3919_v10 = vld [vmem:[%s19952_s5 + $0x7b8] sm:$0xff] }
 0x50e   : > { %5447 = vmatmul.mubr.bf16.vlgmr.msra.gmra.mrb[12].mxu1 %v18141_v42  ;;  %v13682_v34 = vcombine.low %v3866_v20, %v3870_v21 }
 0x50f   : > { %5529 = vmatmul.mubr.bf16.vlgmr.msra.gmra.mrb[8].mxu0 %v18141_v42  ;;  %5456 = vmatpush1.bf16.msra.mxu1 %v13618_v22  ;;  %v3827_v42 = vld [vmem:[%s19952_s5 + $0x4d8] sm:$0xff] }
 0x510   : > { %5487 = vmatprep.mubr.bf16.mxu1 %v18355_v1  ;;  %5538 = vmatpush1.bf16.msra.mxu0 %v13620_v26  ;;  %v13645_v47 = vcombine.high %v3827_v42, %v3831_v44  ;;  %v13644_v57 = vcombine.low %v3827_v42, %v3831_v44  ;;  %v3871_v22 = vld [vmem:[%s19952_s5 + $0x638] sm:$0xff]  ;;  %v13683_v26 = vcombine.high %v3866_v20, %v3870_v21  ;;  %v3926_v20 = vld [vmem:[%s19952_s5 + $0x7f0] sm:$0xff] }
 0x511   : > { %5569 = vmatprep.mubr.bf16.mxu0 %v18355_v1  ;;  %5457 = vmatprep.subr.bf16.mxu1 %v13627_v27  ;;  %v13634_v1 = vcombine.low %v3818_v29, %v3822_v30  ;;  %v13685_v27 = vcombine.high %v3867_v40, %v3871_v22  ;;  %v3874_v29 = vld [vmem:[%s19952_s5 + $0x650] sm:$0xff]  ;;  %v3887_v42 = vld [vmem:[%s19952_s5 + $0x6b8] sm:$0xff] }
 0x512   : > { %5539 = vmatprep.subr.bf16.mxu0 %v13629_v32  ;;  %v3878_v30 = vld [vmem:[%s19952_s5 + $0x670] sm:$0xff]  ;;  %v3875_v32 = vld [vmem:[%s19952_s5 + $0x658] sm:$0xff] }
 0x513   : > { %5458 = vmatpush1.bf16.msra.mxu1 %v13626_v35  ;;  %v13684_v35 = vcombine.low %v3867_v40, %v3871_v22  ;;  %v13690_v44 = vcombine.low %v3874_v29, %v3878_v30  ;;  %v3923_v21 = vld [vmem:[%s19952_s5 + $0x7d8] sm:$0xff] }
 0x514   : > { %5540 = vmatpush1.bf16.msra.mxu0 %v13628_v36  ;;  %5459 = vmatprep.subr.bf16.mxu1 %v13635_v37  ;;  %v13691_v36 = vcombine.high %v3874_v29, %v3878_v30  ;;  %v13693_v37 = vcombine.high %v3875_v32, %v3879_v33  ;;  %v3927_v40 = vld [vmem:[%s19952_s5 + $0x7f8] sm:$0xff]  ;;  %v5602_v29 = vld [vmem:[%s18730_s25 + $0x40] sm:$0xff]  ;;  %v5595_v30 = vld [vmem:[%s18730_s25 + $0x8] sm:$0xff] }
 0x515   : > { %5541 = vmatprep.subr.bf16.mxu0 %v13637_v38  ;;  %v3882_v38 = vld [vmem:[%s19952_s5 + $0x690] sm:$0xff] }
 0x516   : > { %v13698_v25 = vcombine.low %v3882_v38, %v3886_v39 }
 0x517   : > { %5460 = vmatpush1.bf16.msra.mxu1 %v13634_v1  ;;  %v13692_v1 = vcombine.low %v3875_v32, %v3879_v33  ;;  %v5603_v32 = vld [vmem:[%s18730_s25 + $0x48] sm:$0xff] }
 0x518   : > { %5542 = vmatpush1.bf16.msra.mxu0 %v13636_v45  ;;  %5461 = vmatprep.subr.bf16.mxu1 %v13643_v46  ;;  %v13699_v45 = vcombine.high %v3882_v38, %v3886_v39  ;;  %v13701_v46 = vcombine.high %v3883_v43, %v3887_v42  ;;  %v5618_v38 = vld [vmem:[%s18730_s25 + $0xc0] sm:$0xff]  ;;  %v5611_v39 = vld [vmem:[%s18730_s25 + $0x88] sm:$0xff] }
 0x519   : > { %5543 = vmatprep.subr.bf16.mxu0 %v13645_v47  ;;  %v3890_v47 = vld [vmem:[%s19952_s5 + $0x6d0] sm:$0xff] }
 0x51a   : > { %v13706_v52 = vcombine.low %v3890_v47, %v3894_v51 }
 0x51b   : > { %5462 = vmatpush1.bf16.msra.mxu1 %v13642_v56  ;;  %v13700_v56 = vcombine.low %v3883_v43, %v3887_v42  ;;  %v5619_v43 = vld [vmem:[%s18730_s25 + $0xc8] sm:$0xff] }
 0x51c   : > { %5544 = vmatpush1.bf16.msra.mxu0 %v13644_v57  ;;  %5463 = vmatprep.subr.bf16.mxu1 %v13651_v58  ;;  %v13707_v57 = vcombine.high %v3890_v47, %v3894_v51  ;;  %v13709_v58 = vcombine.high %v3891_v53, %v3895_v41  ;;  %v5634_v47 = vld [vmem:[%s18730_s25 + $0x140] sm:$0xff]  ;;  %v5627_v51 = vld [vmem:[%s18730_s25 + $0x108] sm:$0xff] }
 0x51d   : > { %5545 = vmatprep.subr.bf16.mxu0 %v13653_v59  ;;  %v3898_v59 = vld [vmem:[%s19952_s5 + $0x710] sm:$0xff] }
 0x51e   : > { %v13714_v2 = vcombine.low %v3898_v59, %v3902_v48 }
 0x51f   : > { %5464 = vmatpush1.bf16.msra.mxu1 %v13650_v54  ;;  %v13708_v54 = vcombine.low %v3891_v53, %v3895_v41  ;;  %v5635_v53 = vld [vmem:[%s18730_s25 + $0x148] sm:$0xff] }
 0x520   : > { %5546 = vmatpush1.bf16.msra.mxu0 %v13652_v55  ;;  %5465 = vmatprep.subr.bf16.mxu1 %v13659_v60  ;;  %v13715_v55 = vcombine.high %v3898_v59, %v3902_v48  ;;  %v13717_v60 = vcombine.high %v3899_v49, %v3903_v50  ;;  %v5650_v59 = vld [vmem:[%s18730_s25 + $0x1c0] sm:$0xff]  ;;  %v5643_v48 = vld [vmem:[%s18730_s25 + $0x188] sm:$0xff] }
 0x521   : > { %5547 = vmatprep.subr.bf16.mxu0 %v13661_v61  ;;  %v3906_v61 = vld [vmem:[%s19952_s5 + $0x750] sm:$0xff] }
 0x522   : > { %v13722_v11 = vcombine.low %v3906_v61, %v3910_v62 }
 0x523   : > { %5466 = vmatpush1.bf16.msra.mxu1 %v13658_v4  ;;  %v13716_v4 = vcombine.low %v3899_v49, %v3903_v50  ;;  %v5651_v49 = vld [vmem:[%s18730_s25 + $0x1c8] sm:$0xff] }
 0x524   : > { %5548 = vmatpush1.bf16.msra.mxu0 %v13660_v5  ;;  %5467 = vmatprep.subr.bf16.mxu1 %v13667_v6  ;;  %v13723_v5 = vcombine.high %v3906_v61, %v3910_v62  ;;  %v13725_v6 = vcombine.high %v3907_v63, %v3911_v0  ;;  %v5659_v61 = vld [vmem:[%s18730_s25 + $0x208] sm:$0xff] }
 0x525   : > { %5549 = vmatprep.subr.bf16.mxu0 %v13669_v7  ;;  %v3914_v7 = vld [vmem:[%s19952_s5 + $0x790] sm:$0xff]  ;;  %v5667_v62 = vld [vmem:[%s18730_s25 + $0x248] sm:$0xff] }
 0x526   : > { %v13730_v22 = vcombine.low %v3914_v7, %v3918_v8 }
 0x527   : > { %5468 = vmatpush1.bf16.msra.mxu1 %v13666_v14  ;;  %v13724_v14 = vcombine.low %v3907_v63, %v3911_v0  ;;  %v13792_v0 = vcombine.low %v5643_v48, %v5651_v49 }
 0x528   : > { %5550 = vmatpush1.bf16.msra.mxu0 %v13668_v17  ;;  %5469 = vmatprep.subr.bf16.mxu1 %v13675_v18  ;;  %v13731_v17 = vcombine.high %v3914_v7, %v3918_v8  ;;  %v13733_v18 = vcombine.high %v3915_v9, %v3919_v10  ;;  %v5675_v7 = vld [vmem:[%s18730_s25 + $0x288] sm:$0xff] }
 0x529   : > { %5551 = vmatprep.subr.bf16.mxu0 %v13677_v19  ;;  %v3922_v19 = vld [vmem:[%s19952_s5 + $0x7d0] sm:$0xff]  ;;  %v5683_v8 = vld [vmem:[%s18730_s25 + $0x2c8] sm:$0xff] }
 0x52a   : > { %v13738_v33 = vcombine.low %v3922_v19, %v3926_v20 }
 0x52b   : > { %5470 = vmatpush1.bf16.msra.mxu1 %v13674_v23  ;;  %v13732_v23 = vcombine.low %v3915_v9, %v3919_v10  ;;  %v13808_v10 = vcombine.low %v5659_v61, %v5667_v62 }
 0x52c   : > { %5552 = vmatpush1.bf16.msra.mxu0 %v13676_v24  ;;  %5471 = vmatprep.subr.bf16.mxu1 %v13683_v26  ;;  %v13739_v24 = vcombine.high %v3922_v19, %v3926_v20  ;;  %v13741_v26 = vcombine.high %v3923_v21, %v3927_v40  ;;  %v5691_v19 = vld [vmem:[%s18730_s25 + $0x308] sm:$0xff] }
 0x52d   : > { %5553 = vmatprep.subr.bf16.mxu0 %v13685_v27  ;;  %v5594_v27 = vld [vmem:[%s18730_s25] sm:$0xff]  ;;  %v5699_v20 = vld [vmem:[%s18730_s25 + $0x348] sm:$0xff] }
 0x52e   : > { %v13742_v42 = vcombine.low %v5594_v27, %v5602_v29 }
 0x52f   : > { %5472 = vmatpush1.bf16.msra.mxu1 %v13682_v34  ;;  %v13740_v34 = vcombine.low %v3923_v21, %v3927_v40  ;;  %v13824_v40 = vcombine.low %v5675_v7, %v5683_v8 }
 0x530   : > { %5554 = vmatpush1.bf16.msra.mxu0 %v13684_v35  ;;  %5473 = vmatprep.subr.bf16.mxu1 %v13691_v36  ;;  %v13743_v35 = vcombine.high %v5594_v27, %v5602_v29  ;;  %v13745_v36 = vcombine.high %v5595_v30, %v5603_v32  ;;  %v5707_v27 = vld [vmem:[%s18730_s25 + $0x388] sm:$0xff] }
 0x531   : > { %5555 = vmatprep.subr.bf16.mxu0 %v13693_v37  ;;  %v5610_v37 = vld [vmem:[%s18730_s25 + $0x80] sm:$0xff]  ;;  %v5715_v29 = vld [vmem:[%s18730_s25 + $0x3c8] sm:$0xff] }
 0x532   : > { %v13758_v41 = vcombine.low %v5610_v37, %v5618_v38 }
 0x533   : > { %5474 = vmatpush1.bf16.msra.mxu1 %v13690_v44  ;;  %v13744_v44 = vcombine.low %v5595_v30, %v5603_v32  ;;  %v13840_v32 = vcombine.low %v5691_v19, %v5699_v20 }
 0x534   : > { %5556 = vmatpush1.bf16.msra.mxu0 %v13692_v1  ;;  %5475 = vmatprep.subr.bf16.mxu1 %v13699_v45  ;;  %v13759_v1 = vcombine.high %v5610_v37, %v5618_v38  ;;  %v13761_v45 = vcombine.high %v5611_v39, %v5619_v43  ;;  %v5723_v37 = vld [vmem:[%s18730_s25 + $0x408] sm:$0xff] }
 0x535   : > { %5557 = vmatprep.subr.bf16.mxu0 %v13701_v46  ;;  %v5626_v46 = vld [vmem:[%s18730_s25 + $0x100] sm:$0xff]  ;;  %v5731_v38 = vld [vmem:[%s18730_s25 + $0x448] sm:$0xff] }
 0x536   : > { %v13774_v50 = vcombine.low %v5626_v46, %v5634_v47 }
 0x537   : > { %5476 = vmatpush1.bf16.msra.mxu1 %v13698_v25  ;;  %v13760_v25 = vcombine.low %v5611_v39, %v5619_v43  ;;  %v13856_v43 = vcombine.low %v5707_v27, %v5715_v29 }
 0x538   : > { %5558 = vmatpush1.bf16.msra.mxu0 %v13700_v56  ;;  %5477 = vmatprep.subr.bf16.mxu1 %v13707_v57  ;;  %v13775_v56 = vcombine.high %v5626_v46, %v5634_v47  ;;  %v13777_v57 = vcombine.high %v5627_v51, %v5635_v53  ;;  %v5739_v46 = vld [vmem:[%s18730_s25 + $0x488] sm:$0xff] }
 0x539   : > { %5559 = vmatprep.subr.bf16.mxu0 %v13709_v58  ;;  %v5642_v58 = vld [vmem:[%s18730_s25 + $0x180] sm:$0xff]  ;;  %v5747_v47 = vld [vmem:[%s18730_s25 + $0x4c8] sm:$0xff] }
 0x53a   : > { %v13790_v63 = vcombine.low %v5642_v58, %v5650_v59 }
 0x53b   : > { %5478 = vmatpush1.bf16.msra.mxu1 %v13706_v52  ;;  %v13791_v52 = vcombine.high %v5642_v58, %v5650_v59  ;;  %v5755_v58 = vld [vmem:[%s18730_s25 + $0x508] sm:$0xff] }
 0x53c   : > { %5560 = vmatpush1.bf16.msra.mxu0 %v13708_v54  ;;  %5479 = vmatprep.subr.bf16.mxu1 %v13715_v55  ;;  %v13793_v54 = vcombine.high %v5643_v48, %v5651_v49  ;;  %v5658_v55 = vld [vmem:[%s18730_s25 + $0x200] sm:$0xff]  ;;  %v5763_v59 = vld [vmem:[%s18730_s25 + $0x548] sm:$0xff]  ;;  %v13888_v49 = vcombine.low %v5739_v46, %v5747_v47 }
 0x53d   : > { %5561 = vmatprep.subr.bf16.mxu0 %v13717_v60  ;;  %v5666_v60 = vld [vmem:[%s18730_s25 + $0x240] sm:$0xff] }
 0x53e   : > { %v13806_v9 = vcombine.low %v5658_v55, %v5666_v60 }
 0x53f   : > { %5480 = vmatpush1.bf16.msra.mxu1 %v13714_v2  ;;  %v13807_v2 = vcombine.high %v5658_v55, %v5666_v60  ;;  %v5771_v55 = vld [vmem:[%s18730_s25 + $0x588] sm:$0xff] }
 0x540   : > { %5562 = vmatpush1.bf16.msra.mxu0 %v13716_v4  ;;  %5481 = vmatprep.subr.bf16.mxu1 %v13723_v5  ;;  %v13809_v4 = vcombine.high %v5659_v61, %v5667_v62  ;;  %v5674_v5 = vld [vmem:[%s18730_s25 + $0x280] sm:$0xff]  ;;  %v5779_v60 = vld [vmem:[%s18730_s25 + $0x5c8] sm:$0xff]  ;;  %v13904_v62 = vcombine.low %v5755_v58, %v5763_v59 }
 0x541   : > { %5563 = vmatprep.subr.bf16.mxu0 %v13725_v6  ;;  %v5682_v6 = vld [vmem:[%s18730_s25 + $0x2c0] sm:$0xff] }
 0x542   : > { %v13822_v21 = vcombine.low %v5674_v5, %v5682_v6 }
 0x543   : > { %5482 = vmatpush1.bf16.msra.mxu1 %v13722_v11  ;;  %v13823_v11 = vcombine.high %v5674_v5, %v5682_v6  ;;  %v5787_v5 = vld [vmem:[%s18730_s25 + $0x608] sm:$0xff] }
 0x544   : > { %5564 = vmatpush1.bf16.msra.mxu0 %v13724_v14  ;;  %5483 = vmatprep.subr.bf16.mxu1 %v13731_v17  ;;  %v13825_v14 = vcombine.high %v5675_v7, %v5683_v8  ;;  %v5690_v17 = vld [vmem:[%s18730_s25 + $0x300] sm:$0xff]  ;;  %v5795_v6 = vld [vmem:[%s18730_s25 + $0x648] sm:$0xff]  ;;  %v13920_v8 = vcombine.low %v5771_v55, %v5779_v60 }
 0x545   : > { %5565 = vmatprep.subr.bf16.mxu0 %v13733_v18  ;;  %v5698_v18 = vld [vmem:[%s18730_s25 + $0x340] sm:$0xff] }
 0x546   : > { %v13838_v30 = vcombine.low %v5690_v17, %v5698_v18 }
 0x547   : > { %5484 = vmatpush1.bf16.msra.mxu1 %v13730_v22  ;;  %v13839_v22 = vcombine.high %v5690_v17, %v5698_v18  ;;  %v5803_v17 = vld [vmem:[%s18730_s25 + $0x688] sm:$0xff] }
 0x548   : > { %5566 = vmatpush1.bf16.msra.mxu0 %v13732_v23  ;;  %5485 = vmatprep.subr.bf16.mxu1 %v13739_v24  ;;  %v13841_v23 = vcombine.high %v5691_v19, %v5699_v20  ;;  %v5706_v24 = vld [vmem:[%s18730_s25 + $0x380] sm:$0xff]  ;;  %v5811_v18 = vld [vmem:[%s18730_s25 + $0x6c8] sm:$0xff]  ;;  %v13936_v20 = vcombine.low %v5787_v5, %v5795_v6 }
 0x549   : > { %5567 = vmatprep.subr.bf16.mxu0 %v13741_v26  ;;  %v5714_v26 = vld [vmem:[%s18730_s25 + $0x3c0] sm:$0xff] }
 0x54a   : > { %v13854_v39 = vcombine.low %v5706_v24, %v5714_v26 }
 0x54b   : > { %5486 = vmatpush1.bf16.msra.mxu1 %v13738_v33  ;;  %v13855_v33 = vcombine.high %v5706_v24, %v5714_v26  ;;  %v5819_v24 = vld [vmem:[%s18730_s25 + $0x708] sm:$0xff] }
 0x54c   : > { %5568 = vmatpush1.bf16.msra.mxu0 %v13740_v34  ;;  %11822 = vmatprep.subr.bf16.mxu1 %v13743_v35  ;;  %v13857_v34 = vcombine.high %v5707_v27, %v5715_v29  ;;  %v5722_v35 = vld [vmem:[%s18730_s25 + $0x400] sm:$0xff]  ;;  %v5827_v26 = vld [vmem:[%s18730_s25 + $0x748] sm:$0xff]  ;;  %v13952_v29 = vcombine.low %v5803_v17, %v5811_v18 }
 0x54d   : > { %11986 = vmatprep.subr.bf16.mxu0 %v13745_v36  ;;  %v5730_v36 = vld [vmem:[%s18730_s25 + $0x440] sm:$0xff] }
 0x54e   : > { %5488 = vmatmul.mubr.bf16.vlgmr.msra.gmra.mrb[12].mxu1 %v18357_v3 }
 0x54f   : > { %5570 = vmatmul.mubr.bf16.vlgmr.msra.gmra.mrb[8].mxu0 %v18357_v3  ;;  %11823 = vmatpush1.bf16.msra.mxu1 %v13742_v42  ;;  %v13776_v3 = vcombine.low %v5627_v51, %v5635_v53  ;;  %v13871_v42 = vcombine.high %v5722_v35, %v5730_v36  ;;  %v13870_v51 = vcombine.low %v5722_v35, %v5730_v36  ;;  %v5835_v35 = vld [vmem:[%s18730_s25 + $0x788] sm:$0xff] }
 0x550   : > { %11987 = vmatpush1.bf16.msra.mxu0 %v13744_v44  ;;  %11824 = vmatprep.subr.bf16.mxu1 %v13759_v1  ;;  %v13873_v44 = vcombine.high %v5723_v37, %v5731_v38  ;;  %v5738_v1 = vld [vmem:[%s18730_s25 + $0x480] sm:$0xff]  ;;  %v13872_v53 = vcombine.low %v5723_v37, %v5731_v38  ;;  %v5843_v36 = vld [vmem:[%s18730_s25 + $0x7c8] sm:$0xff]  ;;  %v13968_v38 = vcombine.low %v5819_v24, %v5827_v26 }
 0x551   : > { %11988 = vmatprep.subr.bf16.mxu0 %v13761_v45  ;;  %v5746_v45 = vld [vmem:[%s18730_s25 + $0x4c0] sm:$0xff] }
 0x552   : > { %v13886_v48 = vcombine.low %v5738_v1, %v5746_v45 }
 0x553   : > { %11825 = vmatpush1.bf16.msra.mxu1 %v13758_v41  ;;  %v13887_v41 = vcombine.high %v5738_v1, %v5746_v45  ;;  %v5851_v1 = vld [vmem:[%s18730_s25 + $0x808] sm:$0xff] }
 0x554   : > { %11989 = vmatpush1.bf16.msra.mxu0 %v13760_v25  ;;  %11826 = vmatprep.subr.bf16.mxu1 %v13775_v56  ;;  %v13889_v25 = vcombine.high %v5739_v46, %v5747_v47  ;;  %v5754_v56 = vld [vmem:[%s18730_s25 + $0x500] sm:$0xff]  ;;  %v5859_v45 = vld [vmem:[%s18730_s25 + $0x848] sm:$0xff]  ;;  %v13984_v47 = vcombine.low %v5835_v35, %v5843_v36 }
 0x555   : > { %11990 = vmatprep.subr.bf16.mxu0 %v13777_v57  ;;  %v5762_v57 = vld [vmem:[%s18730_s25 + $0x540] sm:$0xff] }
 0x556   : > { %v13902_v61 = vcombine.low %v5754_v56, %v5762_v57 }
 0x557   : > { %11827 = vmatpush1.bf16.msra.mxu1 %v13774_v50  ;;  %v13903_v50 = vcombine.high %v5754_v56, %v5762_v57 }
 0x558   : > { %11991 = vmatpush1.bf16.msra.mxu0 %v13776_v3  ;;  %11828 = vmatprep.subr.bf16.mxu1 %v13791_v52  ;;  %v13905_v3 = vcombine.high %v5755_v58, %v5763_v59  ;;  %v5770_v52 = vld [vmem:[%s18730_s25 + $0x580] sm:$0xff] }
 0x559   : > { %11992 = vmatprep.subr.bf16.mxu0 %v13793_v54  ;;  %v5778_v54 = vld [vmem:[%s18730_s25 + $0x5c0] sm:$0xff] }
 0x55a   : > { %v13918_v7 = vcombine.low %v5770_v52, %v5778_v54 }
 0x55b   : > { %11829 = vmatpush1.bf16.msra.mxu1 %v13790_v63  ;;  %v13919_v63 = vcombine.high %v5770_v52, %v5778_v54 }
 0x55c   : > { %11993 = vmatpush1.bf16.msra.mxu0 %v13792_v0  ;;  %11830 = vmatprep.subr.bf16.mxu1 %v13807_v2  ;;  %v13921_v0 = vcombine.high %v5771_v55, %v5779_v60  ;;  %v5786_v2 = vld [vmem:[%s18730_s25 + $0x600] sm:$0xff] }
 0x55d   : > { %11994 = vmatprep.subr.bf16.mxu0 %v13809_v4  ;;  %v5794_v4 = vld [vmem:[%s18730_s25 + $0x640] sm:$0xff] }
 0x55e   : > { %v13934_v19 = vcombine.low %v5786_v2, %v5794_v4 }
 0x55f   : > { %11831 = vmatpush1.bf16.msra.mxu1 %v13806_v9  ;;  %v13935_v9 = vcombine.high %v5786_v2, %v5794_v4  ;;  %v5874_v4 = vld [vmem:[%s18730_s25 + $0x8c0] sm:$0xff] }
 0x560   : > { %11995 = vmatpush1.bf16.msra.mxu0 %v13808_v10  ;;  %11832 = vmatprep.subr.bf16.mxu1 %v13823_v11  ;;  %v13937_v10 = vcombine.high %v5787_v5, %v5795_v6  ;;  %v5802_v11 = vld [vmem:[%s18730_s25 + $0x680] sm:$0xff]  ;;  %v5867_v5 = vld [vmem:[%s18730_s25 + $0x888] sm:$0xff] }
 0x561   : > { %11996 = vmatprep.subr.bf16.mxu0 %v13825_v14  ;;  %v5810_v14 = vld [vmem:[%s18730_s25 + $0x6c0] sm:$0xff]  ;;  %v5875_v6 = vld [vmem:[%s18730_s25 + $0x8c8] sm:$0xff] }
 0x562   : > { %v13950_v27 = vcombine.low %v5802_v11, %v5810_v14 }
 0x563   : > { %11833 = vmatpush1.bf16.msra.mxu1 %v13822_v21  ;;  %v13951_v21 = vcombine.high %v5802_v11, %v5810_v14  ;;  %v5882_v11 = vld [vmem:[%s18730_s25 + $0x900] sm:$0xff] }
 0x564   : > { %11997 = vmatpush1.bf16.msra.mxu0 %v13824_v40  ;;  %11834 = vmatprep.subr.bf16.mxu1 %v13839_v22  ;;  %v13953_v40 = vcombine.high %v5803_v17, %v5811_v18  ;;  %v5818_v22 = vld [vmem:[%s18730_s25 + $0x700] sm:$0xff]  ;;  %v14017_v17 = vcombine.high %v5867_v5, %v5875_v6 }
 0x565   : > { %11998 = vmatprep.subr.bf16.mxu0 %v13841_v23  ;;  %v5826_v23 = vld [vmem:[%s18730_s25 + $0x740] sm:$0xff] }
 0x566   : > { %v13966_v37 = vcombine.low %v5818_v22, %v5826_v23  ;;  %v5890_v18 = vld [vmem:[%s18730_s25 + $0x940] sm:$0xff] }
 0x567   : > { %11835 = vmatpush1.bf16.msra.mxu1 %v13838_v30  ;;  %v13967_v30 = vcombine.high %v5818_v22, %v5826_v23  ;;  %v14016_v22 = vcombine.low %v5867_v5, %v5875_v6  ;;  %v14031_v23 = vcombine.high %v5882_v11, %v5890_v18  ;;  %v5978_v6 = vld [vmem:[%s18730_s25 + $0xc00] sm:$0xff] }
 0x568   : > { %11999 = vmatpush1.bf16.msra.mxu0 %v13840_v32  ;;  %11836 = vmatprep.subr.bf16.mxu1 %v13855_v33  ;;  %v13969_v32 = vcombine.high %v5819_v24, %v5827_v26  ;;  %v5834_v33 = vld [vmem:[%s18730_s25 + $0x780] sm:$0xff] }
 0x569   : > { %12000 = vmatprep.subr.bf16.mxu0 %v13857_v34  ;;  %v5842_v34 = vld [vmem:[%s18730_s25 + $0x7c0] sm:$0xff] }
 0x56a   : > { %v13982_v46 = vcombine.low %v5834_v33, %v5842_v34  ;;  %v5898_v26 = vld [vmem:[%s18730_s25 + $0x980] sm:$0xff] }
 0x56b   : > { %11837 = vmatpush1.bf16.msra.mxu1 %v13854_v39  ;;  %v13983_v39 = vcombine.high %v5834_v33, %v5842_v34 }
 0x56c   : > { %12001 = vmatpush1.bf16.msra.mxu0 %v13856_v43  ;;  %11838 = vmatprep.subr.bf16.mxu1 %v13871_v42  ;;  %v13985_v43 = vcombine.high %v5835_v35, %v5843_v36  ;;  %v5850_v42 = vld [vmem:[%s18730_s25 + $0x800] sm:$0xff] }
 0x56d   : > { %12002 = vmatprep.subr.bf16.mxu0 %v13873_v44  ;;  %v5858_v44 = vld [vmem:[%s18730_s25 + $0x840] sm:$0xff] }
 0x56e   : > { %v5914_v36 = vld [vmem:[%s18730_s25 + $0xa00] sm:$0xff] }
 0x56f   : > { %11839 = vmatpush1.bf16.msra.mxu1 %v13870_v51  ;;  %v13999_v51 = vcombine.high %v5850_v42, %v5858_v44 }
 0x570   : > { %12003 = vmatpush1.bf16.msra.mxu0 %v13872_v53  ;;  %11840 = vmatprep.subr.bf16.mxu1 %v13887_v41  ;;  %v14001_v53 = vcombine.high %v5851_v1, %v5859_v45  ;;  %v18805_v41 = vld [vmem:[%s19953_s6] sm:$0xff] }
 0x571   : > { %12004 = vmatprep.subr.bf16.mxu0 %v13889_v25  ;;  %v3933_v25 = vrot.slane %v18805_v41, %v17869_v12  ;;  %v3937_v56 = vrot.slane %v18805_v41, %v17875_v15  ;;  %v3945_v57 = vrot.slane %v18805_v41, %v18313_v31 }
 0x573   : > { %11841 = vmatpush1.bf16.msra.mxu1 %v13886_v48 }
 0x574   : > { %12005 = vmatpush1.bf16.msra.mxu0 %v13888_v49  ;;  %11842 = vmatprep.subr.bf16.mxu1 %v13903_v50 }
 0x575   : > { %12006 = vmatprep.subr.bf16.mxu0 %v13905_v3 }
 0x577   : > { %11843 = vmatpush1.bf16.msra.mxu1 %v13902_v61 }
 0x578   : > { %12007 = vmatpush1.bf16.msra.mxu0 %v13904_v62  ;;  %11844 = vmatprep.subr.bf16.mxu1 %v13919_v63 }
 0x579   : > { %12008 = vmatprep.subr.bf16.mxu0 %v13921_v0  ;;  %v5866_v0 = vld [vmem:[%s18730_s25 + $0x880] sm:$0xff] }
 0x57a   : > { %v14015_v14 = vcombine.high %v5866_v0, %v5874_v4 }
 0x57b   : > { %11845 = vmatpush1.bf16.msra.mxu1 %v13918_v7 }
 0x57c   : > { %12009 = vmatpush1.bf16.msra.mxu0 %v13920_v8  ;;  %11846 = vmatprep.subr.bf16.mxu1 %v13935_v9  ;;  %v13998_v8 = vcombine.low %v5850_v42, %v5858_v44  ;;  %v14000_v9 = vcombine.low %v5851_v1, %v5859_v45  ;;  %v5930_v45 = vld [vmem:[%s18730_s25 + $0xa80] sm:$0xff] }
 0x57d   : > { %12010 = vmatprep.subr.bf16.mxu0 %v13937_v10 }
 0x57f   : > { %11847 = vmatpush1.bf16.msra.mxu1 %v13934_v19  ;;  %v5883_v19 = vld [vmem:[%s18730_s25 + $0x908] sm:$0xff] }
 0x580   : > { %12011 = vmatpush1.bf16.msra.mxu0 %v13936_v20  ;;  %11848 = vmatprep.subr.bf16.mxu1 %v13951_v21  ;;  %v5891_v20 = vld [vmem:[%s18730_s25 + $0x948] sm:$0xff] }
 0x581   : > { %12012 = vmatprep.subr.bf16.mxu0 %v13953_v40  ;;  %v14014_v40 = vcombine.low %v5866_v0, %v5874_v4  ;;  %v14033_v24 = vcombine.high %v5883_v19, %v5891_v20  ;;  %v14032_v33 = vcombine.low %v5883_v19, %v5891_v20  ;;  %v5994_v20 = vld [vmem:[%s18730_s25 + $0xc80] sm:$0xff] }
 0x583   : > { %11849 = vmatpush1.bf16.msra.mxu1 %v13950_v27  ;;  %v5906_v27 = vld [vmem:[%s18730_s25 + $0x9c0] sm:$0xff] }
 0x584   : > { %12013 = vmatpush1.bf16.msra.mxu0 %v13952_v29  ;;  %11850 = vmatprep.subr.bf16.mxu1 %v13967_v30  ;;  %v5899_v29 = vld [vmem:[%s18730_s25 + $0x988] sm:$0xff]  ;;  %v14047_v34 = vcombine.high %v5898_v26, %v5906_v27 }
 0x585   : > { %12014 = vmatprep.subr.bf16.mxu0 %v13969_v32  ;;  %v5907_v30 = vld [vmem:[%s18730_s25 + $0x9c8] sm:$0xff]  ;;  %v14030_v32 = vcombine.low %v5882_v11, %v5890_v18 }
 0x586   : > { %v14049_v35 = vcombine.high %v5899_v29, %v5907_v30  ;;  %v14048_v42 = vcombine.low %v5899_v29, %v5907_v30  ;;  %v5987_v11 = vld [vmem:[%s18730_s25 + $0xc48] sm:$0xff]  ;;  %v6010_v30 = vld [vmem:[%s18730_s25 + $0xd00] sm:$0xff] }
 0x587   : > { %11851 = vmatpush1.bf16.msra.mxu1 %v13966_v37  ;;  %v5922_v37 = vld [vmem:[%s18730_s25 + $0xa40] sm:$0xff] }
 0x588   : > { %12015 = vmatpush1.bf16.msra.mxu0 %v13968_v38  ;;  %11852 = vmatprep.subr.bf16.mxu1 %v13983_v39  ;;  %v5915_v38 = vld [vmem:[%s18730_s25 + $0xa08] sm:$0xff]  ;;  %v14063_v44 = vcombine.high %v5914_v36, %v5922_v37 }
 0x589   : > { %12016 = vmatprep.subr.bf16.mxu0 %v13985_v43  ;;  %v5923_v39 = vld [vmem:[%s18730_s25 + $0xa48] sm:$0xff]  ;;  %v14046_v43 = vcombine.low %v5898_v26, %v5906_v27 }
 0x58a   : > { %v14065_v1 = vcombine.high %v5915_v38, %v5923_v39 }
 0x58b   : > { %11853 = vmatpush1.bf16.msra.mxu1 %v13982_v46  ;;  %v5938_v46 = vld [vmem:[%s18730_s25 + $0xac0] sm:$0xff] }
 0x58c   : > { %12017 = vmatpush1.bf16.msra.mxu0 %v13984_v47  ;;  %11863 = vmatprep.subr.bf16.mxu1 %v13999_v51  ;;  %v5931_v47 = vld [vmem:[%s18730_s25 + $0xa88] sm:$0xff] }
 0x58d   : > { %12027 = vmatprep.subr.bf16.mxu0 %v14001_v53  ;;  %v5939_v51 = vld [vmem:[%s18730_s25 + $0xac8] sm:$0xff]  ;;  %v14062_v53 = vcombine.low %v5914_v36, %v5922_v37 }
 0x5a1   : > { %v5325_v58 = vpop.f32.mrb[8].mxu1  ;;  %v18813_v59 = vpop.f32.mrb[4].mxu0 }
 0x5a2   : > { %v14771_v48 = vadd.f32 %v5325_v58, %v3933_v25  ;;  %v5327_v49 = vpop.f32.mrb[9].mxu1  ;;  %v5409_v50 = vpop.f32.mrb[5].mxu0  ;;  %v14064_v25 = vcombine.low %v5915_v38, %v5923_v39  ;;  %v5946_v58 = vld [vmem:[%s18730_s25 + $0xb00] sm:$0xff] }
 0x5a3   : > { %v14772_v3 = vadd.f32 %v5327_v49, %v3937_v56  ;;  %v14774_v52 = vadd.f32 %v5409_v50, %v3945_v57  ;;  %v5329_v54 = vpop.f32.mrb[10].mxu1  ;;  %v5411_v55 = vpop.f32.mrb[6].mxu0  ;;  %v14079_v56 = vcombine.high %v5930_v45, %v5938_v46  ;;  %v14081_v57 = vcombine.high %v5931_v47, %v5939_v51  ;;  %v5947_v49 = vld [vmem:[%s18730_s25 + $0xb08] sm:$0xff]  ;;  %v6026_v39 = vld [vmem:[%s18730_s25 + $0xd80] sm:$0xff] }
 0x5a4   : > { %v5578_v60 = vmax.f32 %v14771_v48, 0.0  ;;  %v5330_v61 = vpop.f32.mrb[11].mxu1  ;;  %v5412_v62 = vpop.f32.mrb[7].mxu0  ;;  %v5954_v48 = vld [vmem:[%s18730_s25 + $0xb40] sm:$0xff]  ;;  %v5955_v50 = vld [vmem:[%s18730_s25 + $0xb48] sm:$0xff] }
 0x5a5   : > { %v5579_v63 = vmax.f32 %v14772_v3, 0.0  ;;  %v5581_v2 = vmax.f32 %v14774_v52, 0.0  ;;  %v14078_v3 = vcombine.low %v5930_v45, %v5938_v46  ;;  %v14080_v52 = vcombine.low %v5931_v47, %v5939_v51  ;;  %v5970_v61 = vld [vmem:[%s18730_s25 + $0xbc0] sm:$0xff]  ;;  %v5963_v62 = vld [vmem:[%s18730_s25 + $0xb88] sm:$0xff] }
 0x5a6   : > { %v18821_v10 = vpack.c.bf16 %v5578_v60, %v5578_v60  ;;  %v14095_v54 = vcombine.high %v5946_v58, %v5954_v48  ;;  %v14097_v55 = vcombine.high %v5947_v49, %v5955_v50  ;;  %v5962_v60 = vld [vmem:[%s18730_s25 + $0xb80] sm:$0xff]  ;;  %v14094_v0 = vcombine.low %v5946_v58, %v5954_v48 }
 0x5a7   : > { %v18819_v7 = vpack.c.bf16 %v5579_v63, %v5579_v63  ;;  %v18829_v21 = vpack.c.bf16 %v5581_v2, %v5581_v2  ;;  %v5971_v63 = vld [vmem:[%s18730_s25 + $0xbc8] sm:$0xff]  ;;  %v14096_v2 = vcombine.low %v5947_v49, %v5955_v50  ;;  %v14111_v4 = vcombine.high %v5962_v60, %v5970_v61  ;;  %v6042_v51 = vld [vmem:[%s18730_s25 + $0xe00] sm:$0xff] }
 0x5a8   : > { %v14113_v5 = vcombine.high %v5963_v62, %v5971_v63  ;;  %v6058_v50 = vld [vmem:[%s18730_s25 + $0xe80] sm:$0xff] }
 0x5a9   : > { %11854 = vmatprep.mubr.bf16.mxu1 %v18819_v7  ;;  %12018 = vmatprep.mubr.bf16.mxu0 %v18819_v7 }
 0x5aa   : > { %11855 = vmatmul.mubr.bf16.vlgmr.msra.gmra.mrb[16].mxu1 %v18821_v10  ;;  %12019 = vmatmul.mubr.bf16.vlgmr.msra.gmra.mrb[12].mxu0 %v18821_v10 }
 0x5ab   : > { %11864 = vmatpush1.bf16.msra.mxu1 %v13998_v8  ;;  %12028 = vmatpush1.bf16.msra.mxu0 %v14000_v9  ;;  %v5986_v8 = vld [vmem:[%s18730_s25 + $0xc40] sm:$0xff]  ;;  %v5979_v9 = vld [vmem:[%s18730_s25 + $0xc08] sm:$0xff] }
 0x5ac   : > { %11895 = vmatprep.mubr.bf16.mxu1 %v18829_v21  ;;  %12059 = vmatprep.mubr.bf16.mxu0 %v18829_v21  ;;  %v14127_v18 = vcombine.high %v5978_v6, %v5986_v8  ;;  %v14129_v19 = vcombine.high %v5979_v9, %v5987_v11  ;;  %v14128_v26 = vcombine.low %v5979_v9, %v5987_v11 }
 0x5ad   : > { %11865 = vmatprep.subr.bf16.mxu1 %v14015_v14  ;;  %12029 = vmatprep.subr.bf16.mxu0 %v14017_v17  ;;  %v14110_v14 = vcombine.low %v5962_v60, %v5970_v61  ;;  %v14112_v17 = vcombine.low %v5963_v62, %v5971_v63  ;;  %v6074_v63 = vld [vmem:[%s18730_s25 + $0xf00] sm:$0xff] }
 0x5af   : > { %11866 = vmatpush1.bf16.msra.mxu1 %v14014_v40  ;;  %12030 = vmatpush1.bf16.msra.mxu0 %v14016_v22  ;;  %v6002_v40 = vld [vmem:[%s18730_s25 + $0xcc0] sm:$0xff]  ;;  %v5995_v22 = vld [vmem:[%s18730_s25 + $0xc88] sm:$0xff] }
 0x5b0   : > { %11867 = vmatprep.subr.bf16.mxu1 %v14031_v23  ;;  %12031 = vmatprep.subr.bf16.mxu0 %v14033_v24  ;;  %v6003_v23 = vld [vmem:[%s18730_s25 + $0xcc8] sm:$0xff]  ;;  %v14126_v24 = vcombine.low %v5978_v6, %v5986_v8  ;;  %v14143_v27 = vcombine.high %v5994_v20, %v6002_v40  ;;  %v3941_v8 = vrot.slane %v18805_v41, %v18310_v28 }
 0x5b1   : > { %v14145_v29 = vcombine.high %v5995_v22, %v6003_v23  ;;  %v14144_v36 = vcombine.low %v5995_v22, %v6003_v23 }
 0x5b2   : > { %v14773_v22 = vadd.f32 %v18813_v59, %v3941_v8  ;;  %v6186_v8 = vld [vmem:[%s18730_s25 + $0x1280] sm:$0xff] }
 0x5b3   : > { %11868 = vmatpush1.bf16.msra.mxu1 %v14030_v32  ;;  %12032 = vmatpush1.bf16.msra.mxu0 %v14032_v33  ;;  %v6018_v32 = vld [vmem:[%s18730_s25 + $0xd40] sm:$0xff]  ;;  %v6011_v33 = vld [vmem:[%s18730_s25 + $0xd08] sm:$0xff] }
 0x5b4   : > { %11869 = vmatprep.subr.bf16.mxu1 %v14047_v34  ;;  %12033 = vmatprep.subr.bf16.mxu0 %v14049_v35  ;;  %v6019_v34 = vld [vmem:[%s18730_s25 + $0xd48] sm:$0xff]  ;;  %v14142_v35 = vcombine.low %v5994_v20, %v6002_v40  ;;  %v14159_v37 = vcombine.high %v6010_v30, %v6018_v32 }
 0x5b5   : > { %v14161_v38 = vcombine.high %v6011_v33, %v6019_v34  ;;  %v14160_v45 = vcombine.low %v6011_v33, %v6019_v34  ;;  %v5580_v34 = vmax.f32 %v14773_v22, 0.0  ;;  %v6210_v22 = vld [vmem:[%s18730_s25 + $0x1340] sm:$0xff] }
 0x5b7   : > { %11870 = vmatpush1.bf16.msra.mxu1 %v14046_v43  ;;  %12034 = vmatpush1.bf16.msra.mxu0 %v14048_v42  ;;  %v6034_v43 = vld [vmem:[%s18730_s25 + $0xdc0] sm:$0xff]  ;;  %v6027_v42 = vld [vmem:[%s18730_s25 + $0xd88] sm:$0xff] }
 0x5b8   : > { %11871 = vmatprep.subr.bf16.mxu1 %v14063_v44  ;;  %12035 = vmatprep.subr.bf16.mxu0 %v14065_v1  ;;  %v6035_v44 = vld [vmem:[%s18730_s25 + $0xdc8] sm:$0xff]  ;;  %v14158_v1 = vcombine.low %v6010_v30, %v6018_v32  ;;  %v14175_v46 = vcombine.high %v6026_v39, %v6034_v43 }
 0x5b9   : > { %v14177_v47 = vcombine.high %v6027_v42, %v6035_v44  ;;  %v14176_v58 = vcombine.low %v6027_v42, %v6035_v44  ;;  %v6115_v30 = vld [vmem:[%s18730_s25 + $0x1048] sm:$0xff]  ;;  %v18898_v44 = vpack.c.bf16 %v5580_v34, %v5580_v34 }
 0x5ba   : > { %v6219_v34 = vld [vmem:[%s18730_s25 + $0x1388] sm:$0xff] }
 0x5bb   : > { %11872 = vmatpush1.bf16.msra.mxu1 %v14062_v53  ;;  %12036 = vmatpush1.bf16.msra.mxu0 %v14064_v25  ;;  %v6050_v53 = vld [vmem:[%s18730_s25 + $0xe40] sm:$0xff]  ;;  %v6043_v25 = vld [vmem:[%s18730_s25 + $0xe08] sm:$0xff] }
 0x5bc   : > { %11873 = vmatprep.subr.bf16.mxu1 %v14079_v56  ;;  %12037 = vmatprep.subr.bf16.mxu0 %v14081_v57  ;;  %v6051_v56 = vld [vmem:[%s18730_s25 + $0xe48] sm:$0xff]  ;;  %v14174_v57 = vcombine.low %v6026_v39, %v6034_v43  ;;  %v14191_v48 = vcombine.high %v6042_v51, %v6050_v53 }
 0x5bd   : > { %v14193_v49 = vcombine.high %v6043_v25, %v6051_v56  ;;  %v14192_v60 = vcombine.low %v6043_v25, %v6051_v56  ;;  %v6131_v39 = vld [vmem:[%s18730_s25 + $0x10c8] sm:$0xff] }
 0x5bf   : > { %11874 = vmatpush1.bf16.msra.mxu1 %v14078_v3  ;;  %12038 = vmatpush1.bf16.msra.mxu0 %v14080_v52  ;;  %v6066_v3 = vld [vmem:[%s18730_s25 + $0xec0] sm:$0xff]  ;;  %v6059_v52 = vld [vmem:[%s18730_s25 + $0xe88] sm:$0xff] }
 0x5c0   : > { %11875 = vmatprep.subr.bf16.mxu1 %v14095_v54  ;;  %12039 = vmatprep.subr.bf16.mxu0 %v14097_v55  ;;  %v6067_v54 = vld [vmem:[%s18730_s25 + $0xec8] sm:$0xff]  ;;  %v14190_v55 = vcombine.low %v6042_v51, %v6050_v53  ;;  %v14207_v61 = vcombine.high %v6058_v50, %v6066_v3 }
 0x5c1   : > { %v14209_v62 = vcombine.high %v6059_v52, %v6067_v54  ;;  %v14208_v6 = vcombine.low %v6059_v52, %v6067_v54  ;;  %v6139_v51 = vld [vmem:[%s18730_s25 + $0x1108] sm:$0xff] }
 0x5c2   : > { %v6147_v53 = vld [vmem:[%s18730_s25 + $0x1148] sm:$0xff] }
 0x5c3   : > { %11876 = vmatpush1.bf16.msra.mxu1 %v14094_v0  ;;  %12040 = vmatpush1.bf16.msra.mxu0 %v14096_v2  ;;  %v6082_v0 = vld [vmem:[%s18730_s25 + $0xf40] sm:$0xff]  ;;  %v6075_v2 = vld [vmem:[%s18730_s25 + $0xf08] sm:$0xff]  ;;  %v14288_v54 = vcombine.low %v6139_v51, %v6147_v53 }
 0x5c4   : > { %11877 = vmatprep.subr.bf16.mxu1 %v14111_v4  ;;  %12041 = vmatprep.subr.bf16.mxu0 %v14113_v5  ;;  %v6083_v4 = vld [vmem:[%s18730_s25 + $0xf48] sm:$0xff]  ;;  %v14206_v5 = vcombine.low %v6058_v50, %v6066_v3  ;;  %v14223_v9 = vcombine.high %v6074_v63, %v6082_v0  ;;  %v14222_v20 = vcombine.low %v6074_v63, %v6082_v0 }
 0x5c5   : > { %v14225_v11 = vcombine.high %v6075_v2, %v6083_v4  ;;  %v14224_v40 = vcombine.low %v6075_v2, %v6083_v4  ;;  %v6155_v50 = vld [vmem:[%s18730_s25 + $0x1188] sm:$0xff] }
 0x5c6   : > { %v6163_v3 = vld [vmem:[%s18730_s25 + $0x11c8] sm:$0xff] }
 0x5c7   : > { %11878 = vmatpush1.bf16.msra.mxu1 %v14110_v14  ;;  %12042 = vmatpush1.bf16.msra.mxu0 %v14112_v17  ;;  %v6090_v14 = vld [vmem:[%s18730_s25 + $0xf80] sm:$0xff]  ;;  %v6171_v63 = vld [vmem:[%s18730_s25 + $0x1208] sm:$0xff]  ;;  %v14304_v4 = vcombine.low %v6155_v50, %v6163_v3 }
 0x5c8   : > { %11879 = vmatprep.subr.bf16.mxu1 %v14127_v18  ;;  %12043 = vmatprep.subr.bf16.mxu0 %v14129_v19  ;;  %v6098_v17 = vld [vmem:[%s18730_s25 + $0xfc0] sm:$0xff]  ;;  %v6091_v18 = vld [vmem:[%s18730_s25 + $0xf88] sm:$0xff] }
 0x5c9   : > { %v6099_v19 = vld [vmem:[%s18730_s25 + $0xfc8] sm:$0xff]  ;;  %v14239_v23 = vcombine.high %v6090_v14, %v6098_v17  ;;  %v14238_v32 = vcombine.low %v6090_v14, %v6098_v17 }
 0x5ca   : > { %v14240_v33 = vcombine.low %v6091_v18, %v6099_v19  ;;  %v6179_v0 = vld [vmem:[%s18730_s25 + $0x1248] sm:$0xff] }
 0x5cb   : > { %11880 = vmatpush1.bf16.msra.mxu1 %v14126_v24  ;;  %12044 = vmatpush1.bf16.msra.mxu0 %v14128_v26  ;;  %v14241_v24 = vcombine.high %v6091_v18, %v6099_v19  ;;  %v6106_v26 = vld [vmem:[%s18730_s25 + $0x1000] sm:$0xff]  ;;  %v6195_v14 = vld [vmem:[%s18730_s25 + $0x12c8] sm:$0xff]  ;;  %v14320_v18 = vcombine.low %v6171_v63, %v6179_v0 }
 0x5cc   : > { %11881 = vmatprep.subr.bf16.mxu1 %v14143_v27  ;;  %12045 = vmatprep.subr.bf16.mxu0 %v14145_v29  ;;  %v6114_v27 = vld [vmem:[%s18730_s25 + $0x1040] sm:$0xff]  ;;  %v6107_v29 = vld [vmem:[%s18730_s25 + $0x1008] sm:$0xff] }
 0x5cd   : > { %v14255_v59 = vcombine.high %v6106_v26, %v6114_v27  ;;  %v14254_v43 = vcombine.low %v6106_v26, %v6114_v27  ;;  %v14256_v42 = vcombine.low %v6107_v29, %v6115_v30 }
 0x5cf   : > { %11882 = vmatpush1.bf16.msra.mxu1 %v14142_v35  ;;  %12046 = vmatpush1.bf16.msra.mxu0 %v14144_v36  ;;  %v14257_v35 = vcombine.high %v6107_v29, %v6115_v30  ;;  %v6122_v36 = vld [vmem:[%s18730_s25 + $0x1080] sm:$0xff] }
 0x5d0   : > { %11883 = vmatprep.subr.bf16.mxu1 %v14159_v37  ;;  %12047 = vmatprep.subr.bf16.mxu0 %v14161_v38  ;;  %v6130_v37 = vld [vmem:[%s18730_s25 + $0x10c0] sm:$0xff]  ;;  %v6123_v38 = vld [vmem:[%s18730_s25 + $0x1088] sm:$0xff] }
 0x5d1   : > { %v14270_v25 = vcombine.low %v6122_v36, %v6130_v37  ;;  %v14272_v56 = vcombine.low %v6123_v38, %v6131_v39 }
 0x5d3   : > { %11884 = vmatpush1.bf16.msra.mxu1 %v14158_v1  ;;  %12048 = vmatpush1.bf16.msra.mxu0 %v14160_v45  ;;  %v14271_v1 = vcombine.high %v6122_v36, %v6130_v37  ;;  %v14273_v45 = vcombine.high %v6123_v38, %v6131_v39  ;;  %v6234_v39 = vld [vmem:[%s18730_s25 + $0x1400] sm:$0xff] }
 0x5d4   : > { %11885 = vmatprep.subr.bf16.mxu1 %v14175_v46  ;;  %12049 = vmatprep.subr.bf16.mxu0 %v14177_v47  ;;  %v6138_v46 = vld [vmem:[%s18730_s25 + $0x1100] sm:$0xff] }
 0x5d5   : > { %v6146_v47 = vld [vmem:[%s18730_s25 + $0x1140] sm:$0xff] }
 0x5d6   : > { %v14286_v52 = vcombine.low %v6138_v46, %v6146_v47 }
 0x5d7   : > { %11886 = vmatpush1.bf16.msra.mxu1 %v14174_v57  ;;  %12050 = vmatpush1.bf16.msra.mxu0 %v14176_v58  ;;  %v14287_v57 = vcombine.high %v6138_v46, %v6146_v47  ;;  %v14289_v58 = vcombine.high %v6139_v51, %v6147_v53  ;;  %v6250_v53 = vld [vmem:[%s18730_s25 + $0x1480] sm:$0xff] }
 0x5d8   : > { %11887 = vmatprep.subr.bf16.mxu1 %v14191_v48  ;;  %12051 = vmatprep.subr.bf16.mxu0 %v14193_v49  ;;  %v6154_v48 = vld [vmem:[%s18730_s25 + $0x1180] sm:$0xff] }
 0x5d9   : > { %v6162_v49 = vld [vmem:[%s18730_s25 + $0x11c0] sm:$0xff] }
 0x5da   : > { %v14302_v2 = vcombine.low %v6154_v48, %v6162_v49 }
 0x5db   : > { %11888 = vmatpush1.bf16.msra.mxu1 %v14190_v55  ;;  %12052 = vmatpush1.bf16.msra.mxu0 %v14192_v60  ;;  %v14303_v55 = vcombine.high %v6154_v48, %v6162_v49  ;;  %v14305_v60 = vcombine.high %v6155_v50, %v6163_v3  ;;  %v6266_v3 = vld [vmem:[%s18730_s25 + $0x1500] sm:$0xff] }
 0x5dc   : > { %11889 = vmatprep.subr.bf16.mxu1 %v14207_v61  ;;  %12053 = vmatprep.subr.bf16.mxu0 %v14209_v62  ;;  %v6170_v61 = vld [vmem:[%s18730_s25 + $0x1200] sm:$0xff] }
 0x5dd   : > { %v6178_v62 = vld [vmem:[%s18730_s25 + $0x1240] sm:$0xff] }
 0x5de   : > { %v14318_v17 = vcombine.low %v6170_v61, %v6178_v62 }
 0x5df   : > { %11890 = vmatpush1.bf16.msra.mxu1 %v14206_v5  ;;  %12054 = vmatpush1.bf16.msra.mxu0 %v14208_v6  ;;  %v14319_v5 = vcombine.high %v6170_v61, %v6178_v62  ;;  %v14321_v6 = vcombine.high %v6171_v63, %v6179_v0  ;;  %v6282_v0 = vld [vmem:[%s18730_s25 + $0x1580] sm:$0xff] }
 0x5e0   : > { %11891 = vmatprep.subr.bf16.mxu1 %v14223_v9  ;;  %12055 = vmatprep.subr.bf16.mxu0 %v14225_v11  ;;  %v6194_v9 = vld [vmem:[%s18730_s25 + $0x12c0] sm:$0xff]  ;;  %v6187_v11 = vld [vmem:[%s18730_s25 + $0x1288] sm:$0xff] }
 0x5e1   : > { %v14335_v19 = vcombine.high %v6186_v8, %v6194_v9  ;;  %v14334_v26 = vcombine.low %v6186_v8, %v6194_v9  ;;  %v14336_v27 = vcombine.low %v6187_v11, %v6195_v14 }
 0x5e3   : > { %11892 = vmatpush1.bf16.msra.mxu1 %v14222_v20  ;;  %12056 = vmatpush1.bf16.msra.mxu0 %v14224_v40  ;;  %v14337_v20 = vcombine.high %v6187_v11, %v6195_v14  ;;  %v6202_v40 = vld [vmem:[%s18730_s25 + $0x1300] sm:$0xff] }
 0x5e4   : > { %11893 = vmatprep.subr.bf16.mxu1 %v14239_v23  ;;  %12057 = vmatprep.subr.bf16.mxu0 %v14241_v24  ;;  %v6203_v23 = vld [vmem:[%s18730_s25 + $0x1308] sm:$0xff]  ;;  %v14351_v29 = vcombine.high %v6202_v40, %v6210_v22  ;;  %v6298_v14 = vld [vmem:[%s18730_s25 + $0x1600] sm:$0xff] }
 0x5e5   : > { %v6211_v24 = vld [vmem:[%s18730_s25 + $0x1348] sm:$0xff] }
 0x5e6   : > { %v14353_v30 = vcombine.high %v6203_v23, %v6211_v24  ;;  %v14352_v36 = vcombine.low %v6203_v23, %v6211_v24  ;;  %v6314_v24 = vld [vmem:[%s18730_s25 + $0x1680] sm:$0xff] }
 0x5e7   : > { %11894 = vmatpush1.bf16.msra.mxu1 %v14238_v32  ;;  %12058 = vmatpush1.bf16.msra.mxu0 %v14240_v33  ;;  %v6218_v32 = vld [vmem:[%s18730_s25 + $0x1380] sm:$0xff] }
 0x5e8   : > { %11904 = vmatprep.subr.bf16.mxu1 %v14255_v59  ;;  %12068 = vmatprep.subr.bf16.mxu0 %v14257_v35  ;;  %v6226_v33 = vld [vmem:[%s18730_s25 + $0x13c0] sm:$0xff]  ;;  %v6227_v59 = vld [vmem:[%s18730_s25 + $0x13c8] sm:$0xff]  ;;  %v14350_v35 = vcombine.low %v6202_v40, %v6210_v22 }
 0x5e9   : > { %v14367_v37 = vcombine.high %v6218_v32, %v6226_v33  ;;  %v14369_v38 = vcombine.high %v6219_v34, %v6227_v59  ;;  %v14368_v46 = vcombine.low %v6219_v34, %v6227_v59  ;;  %v6330_v59 = vld [vmem:[%s18730_s25 + $0x1700] sm:$0xff] }
 0x5ea   : > { %11896 = vmatmul.mubr.bf16.vlgmr.msra.gmra.mrb[16].mxu1 %v18898_v44  ;;  %12060 = vmatmul.mubr.bf16.vlgmr.msra.gmra.mrb[12].mxu0 %v18898_v44 }
 0x5eb   : > { %11905 = vmatpush1.bf16.msra.mxu1 %v14254_v43  ;;  %12069 = vmatpush1.bf16.msra.mxu0 %v14256_v42  ;;  %v6242_v43 = vld [vmem:[%s18730_s25 + $0x1440] sm:$0xff]  ;;  %v6235_v42 = vld [vmem:[%s18730_s25 + $0x1408] sm:$0xff] }
 0x5ec   : > { %11906 = vmatprep.subr.bf16.mxu1 %v14271_v1  ;;  %12070 = vmatprep.subr.bf16.mxu0 %v14273_v45  ;;  %v6243_v1 = vld [vmem:[%s18730_s25 + $0x1448] sm:$0xff]  ;;  %v14366_v45 = vcombine.low %v6218_v32, %v6226_v33  ;;  %v14383_v47 = vcombine.high %v6234_v39, %v6242_v43 }
 0x5ed   : > { %v14385_v51 = vcombine.high %v6235_v42, %v6243_v1  ;;  %v14384_v48 = vcombine.low %v6235_v42, %v6243_v1  ;;  %v18958_v42 = vsub.s32 5, %v17405_v13 }
 0x5ef   : > { %11907 = vmatpush1.bf16.msra.mxu1 %v14270_v25  ;;  %12071 = vmatpush1.bf16.msra.mxu0 %v14272_v56  ;;  %v6258_v25 = vld [vmem:[%s18730_s25 + $0x14c0] sm:$0xff]  ;;  %v6251_v56 = vld [vmem:[%s18730_s25 + $0x1488] sm:$0xff] }
 0x5f0   : > { %11908 = vmatprep.subr.bf16.mxu1 %v14287_v57  ;;  %12072 = vmatprep.subr.bf16.mxu0 %v14289_v58  ;;  %v6259_v57 = vld [vmem:[%s18730_s25 + $0x14c8] sm:$0xff]  ;;  %v14382_v58 = vcombine.low %v6234_v39, %v6242_v43  ;;  %v14399_v49 = vcombine.high %v6250_v53, %v6258_v25 }
 0x5f1   : > { %v14401_v50 = vcombine.high %v6251_v56, %v6259_v57  ;;  %v14400_v61 = vcombine.low %v6251_v56, %v6259_v57 }
 0x5f3   : > { %11909 = vmatpush1.bf16.msra.mxu1 %v14286_v52  ;;  %12073 = vmatpush1.bf16.msra.mxu0 %v14288_v54  ;;  %v6274_v52 = vld [vmem:[%s18730_s25 + $0x1540] sm:$0xff]  ;;  %v6267_v54 = vld [vmem:[%s18730_s25 + $0x1508] sm:$0xff] }
 0x5f4   : > { %11910 = vmatprep.subr.bf16.mxu1 %v14303_v55  ;;  %12074 = vmatprep.subr.bf16.mxu0 %v14305_v60  ;;  %v6275_v55 = vld [vmem:[%s18730_s25 + $0x1548] sm:$0xff]  ;;  %v14398_v60 = vcombine.low %v6250_v53, %v6258_v25  ;;  %v14415_v62 = vcombine.high %v6266_v3, %v6274_v52 }
 0x5f5   : > { %v14417_v63 = vcombine.high %v6267_v54, %v6275_v55  ;;  %v14416_v8 = vcombine.low %v6267_v54, %v6275_v55  ;;  %v6347_v53 = vld [vmem:[%s18730_s25 + $0x1788] sm:$0xff]  ;;  %v6370_v55 = vld [vmem:[%s18730_s25 + $0x1840] sm:$0xff] }
 0x5f6   : > { %v6355_v25 = vld [vmem:[%s18730_s25 + $0x17c8] sm:$0xff] }
 0x5f7   : > { %11911 = vmatpush1.bf16.msra.mxu1 %v14302_v2  ;;  %12075 = vmatpush1.bf16.msra.mxu0 %v14304_v4  ;;  %v6290_v2 = vld [vmem:[%s18730_s25 + $0x15c0] sm:$0xff]  ;;  %v6283_v4 = vld [vmem:[%s18730_s25 + $0x1588] sm:$0xff] }
 0x5f8   : > { %11912 = vmatprep.subr.bf16.mxu1 %v14319_v5  ;;  %12076 = vmatprep.subr.bf16.mxu0 %v14321_v6  ;;  %v6291_v5 = vld [vmem:[%s18730_s25 + $0x15c8] sm:$0xff]  ;;  %v14414_v6 = vcombine.low %v6266_v3, %v6274_v52  ;;  %v14431_v9 = vcombine.high %v6282_v0, %v6290_v2  ;;  %v14497_v3 = vcombine.high %v6347_v53, %v6355_v25  ;;  %v6362_v52 = vld [vmem:[%s18730_s25 + $0x1800] sm:$0xff] }
 0x5f9   : > { %v14433_v11 = vcombine.high %v6283_v4, %v6291_v5  ;;  %v14432_v40 = vcombine.low %v6283_v4, %v6291_v5 }
 0x5fb   : > { %11913 = vmatpush1.bf16.msra.mxu1 %v14318_v17  ;;  %12077 = vmatpush1.bf16.msra.mxu0 %v14320_v18  ;;  %v6306_v17 = vld [vmem:[%s18730_s25 + $0x1640] sm:$0xff]  ;;  %v6299_v18 = vld [vmem:[%s18730_s25 + $0x1608] sm:$0xff] }
 0x5fc   : > { %11914 = vmatprep.subr.bf16.mxu1 %v14335_v19  ;;  %12078 = vmatprep.subr.bf16.mxu0 %v14337_v20  ;;  %v6307_v19 = vld [vmem:[%s18730_s25 + $0x1648] sm:$0xff]  ;;  %v14430_v20 = vcombine.low %v6282_v0, %v6290_v2  ;;  %v14447_v22 = vcombine.high %v6298_v14, %v6306_v17 }
 0x5fd   : > { %v14449_v23 = vcombine.high %v6299_v18, %v6307_v19  ;;  %v14448_v32 = vcombine.low %v6299_v18, %v6307_v19 }
 0x5ff   : > { %11915 = vmatpush1.bf16.msra.mxu1 %v14334_v26  ;;  %12079 = vmatpush1.bf16.msra.mxu0 %v14336_v27  ;;  %v6322_v26 = vld [vmem:[%s18730_s25 + $0x16c0] sm:$0xff]  ;;  %v6315_v27 = vld [vmem:[%s18730_s25 + $0x1688] sm:$0xff] }
 0x600   : > { %11916 = vmatprep.subr.bf16.mxu1 %v14351_v29  ;;  %12080 = vmatprep.subr.bf16.mxu0 %v14353_v30  ;;  %v6323_v29 = vld [vmem:[%s18730_s25 + $0x16c8] sm:$0xff]  ;;  %v14446_v30 = vcombine.low %v6298_v14, %v6306_v17  ;;  %v14463_v33 = vcombine.high %v6314_v24, %v6322_v26  ;;  %v14462_v39 = vcombine.low %v6314_v24, %v6322_v26 }
 0x601   : > { %v14465_v34 = vcombine.high %v6315_v27, %v6323_v29  ;;  %v14464_v43 = vcombine.low %v6315_v27, %v6323_v29  ;;  %v14511_v17 = vcombine.high %v6362_v52, %v6370_v55  ;;  %v6379_v24 = vld [vmem:[%s18730_s25 + $0x1888] sm:$0xff]  ;;  %v14510_v29 = vcombine.low %v6362_v52, %v6370_v55 }
 0x602   : > { %v6387_v26 = vld [vmem:[%s18730_s25 + $0x18c8] sm:$0xff] }
 0x603   : > { %11917 = vmatpush1.bf16.msra.mxu1 %v14350_v35  ;;  %12081 = vmatpush1.bf16.msra.mxu0 %v14352_v36  ;;  %v6338_v35 = vld [vmem:[%s18730_s25 + $0x1740] sm:$0xff]  ;;  %v6331_v36 = vld [vmem:[%s18730_s25 + $0x1708] sm:$0xff] }
 0x604   : > { %11918 = vmatprep.subr.bf16.mxu1 %v14367_v37  ;;  %12082 = vmatprep.subr.bf16.mxu0 %v14369_v38  ;;  %v6339_v37 = vld [vmem:[%s18730_s25 + $0x1748] sm:$0xff]  ;;  %v18955_v38 = vsub.s32 4, %v17405_v13  ;;  %v14479_v1 = vcombine.high %v6330_v59, %v6338_v35  ;;  %v14478_v57 = vcombine.low %v6330_v59, %v6338_v35  ;;  %v14529_v59 = vcombine.high %v6379_v24, %v6387_v26  ;;  %v6402_v35 = vld [vmem:[%s18730_s25 + $0x1940] sm:$0xff] }
 0x605   : > { %v6427_v52 = vld [vmem:[%s18730_s25 + $0x1a08] sm:$0xff] }
 0x606   : > { %v3949_v56 = vrot.slane %v18805_v41, %v18955_v38 }
 0x607   : > { %11919 = vmatpush1.bf16.msra.mxu1 %v14366_v45  ;;  %12083 = vmatpush1.bf16.msra.mxu0 %v14368_v46  ;;  %v14481_v45 = vcombine.high %v6331_v36, %v6339_v37  ;;  %v18961_v46 = vsub.s32 7, %v17405_v13 }
 0x608   : > { %11920 = vmatprep.subr.bf16.mxu1 %v14383_v47  ;;  %12084 = vmatprep.subr.bf16.mxu0 %v14385_v51  ;;  %v6346_v47 = vld [vmem:[%s18730_s25 + $0x1780] sm:$0xff] }
 0x609   : > { %v6354_v51 = vld [vmem:[%s18730_s25 + $0x17c0] sm:$0xff] }
 0x60b   : > { %11921 = vmatpush1.bf16.msra.mxu1 %v14382_v58  ;;  %12085 = vmatpush1.bf16.msra.mxu0 %v14384_v48  ;;  %v14480_v58 = vcombine.low %v6331_v36, %v6339_v37  ;;  %v3953_v48 = vrot.slane %v18805_v41, %v18958_v42  ;;  %v6395_v36 = vld [vmem:[%s18730_s25 + $0x1908] sm:$0xff] }
 0x60c   : > { %11922 = vmatprep.subr.bf16.mxu1 %v14399_v49  ;;  %12086 = vmatprep.subr.bf16.mxu0 %v14401_v50  ;;  %v3961_v49 = vrot.slane %v18805_v41, %v18961_v46  ;;  %v14495_v50 = vcombine.high %v6346_v47, %v6354_v51  ;;  %v14494_v41 = vcombine.low %v6346_v47, %v6354_v51  ;;  %v6403_v37 = vld [vmem:[%s18730_s25 + $0x1948] sm:$0xff]  ;;  %v6410_v51 = vld [vmem:[%s18730_s25 + $0x1980] sm:$0xff] }
 0x60d   : > { %v14545_v47 = vcombine.high %v6395_v36, %v6403_v37 }
 0x60f   : > { %11923 = vmatpush1.bf16.msra.mxu1 %v14398_v60  ;;  %12087 = vmatpush1.bf16.msra.mxu0 %v14400_v61  ;;  %v6363_v60 = vld [vmem:[%s18730_s25 + $0x1808] sm:$0xff] }
 0x610   : > { %11924 = vmatprep.subr.bf16.mxu1 %v14415_v62  ;;  %12088 = vmatprep.subr.bf16.mxu0 %v14417_v63  ;;  %v6371_v61 = vld [vmem:[%s18730_s25 + $0x1848] sm:$0xff] }
 0x611   : > { %v14513_v18 = vcombine.high %v6363_v60, %v6371_v61 }
 0x613   : > { %11925 = vmatpush1.bf16.msra.mxu1 %v14414_v6  ;;  %12089 = vmatpush1.bf16.msra.mxu0 %v14416_v8  ;;  %v14496_v6 = vcombine.low %v6347_v53, %v6355_v25  ;;  %v6418_v53 = vld [vmem:[%s18730_s25 + $0x19c0] sm:$0xff]  ;;  %v6411_v25 = vld [vmem:[%s18730_s25 + $0x1988] sm:$0xff] }
 0x614   : > { %11926 = vmatprep.subr.bf16.mxu1 %v14431_v9  ;;  %12090 = vmatprep.subr.bf16.mxu0 %v14433_v11  ;;  %v14558_v55 = vcombine.low %v6410_v51, %v6418_v53 }
 0x617   : > { %11927 = vmatpush1.bf16.msra.mxu1 %v14430_v20  ;;  %12091 = vmatpush1.bf16.msra.mxu0 %v14432_v40  ;;  %v6378_v40 = vld [vmem:[%s18730_s25 + $0x1880] sm:$0xff] }
 0x618   : > { %11928 = vmatprep.subr.bf16.mxu1 %v14447_v22  ;;  %12092 = vmatprep.subr.bf16.mxu0 %v14449_v23  ;;  %v6386_v23 = vld [vmem:[%s18730_s25 + $0x18c0] sm:$0xff] }
 0x61b   : > { %11929 = vmatpush1.bf16.msra.mxu1 %v14446_v30  ;;  %12093 = vmatpush1.bf16.msra.mxu0 %v14448_v32  ;;  %v14512_v30 = vcombine.low %v6363_v60, %v6371_v61 }
 0x61c   : > { %11930 = vmatprep.subr.bf16.mxu1 %v14463_v33  ;;  %12094 = vmatprep.subr.bf16.mxu0 %v14465_v34  ;;  %v6394_v33 = vld [vmem:[%s18730_s25 + $0x1900] sm:$0xff]  ;;  %v14527_v34 = vcombine.high %v6378_v40, %v6386_v23 }
 0x61f   : > { %11931 = vmatpush1.bf16.msra.mxu1 %v14462_v39  ;;  %12095 = vmatpush1.bf16.msra.mxu0 %v14464_v43  ;;  %v14526_v43 = vcombine.low %v6378_v40, %v6386_v23  ;;  %v6474_v23 = vld [vmem:[%s18730_s25 + $0x1b80] sm:$0xff] }
 0x620   : > { %11932 = vmatprep.subr.bf16.mxu1 %v14479_v1  ;;  %12096 = vmatprep.subr.bf16.mxu0 %v14481_v45  ;;  %v14528_v1 = vcombine.low %v6379_v24, %v6387_v26  ;;  %v14543_v45 = vcombine.high %v6394_v33, %v6402_v35  ;;  %v6482_v24 = vld [vmem:[%s18730_s25 + $0x1bc0] sm:$0xff]  ;;  %v6475_v26 = vld [vmem:[%s18730_s25 + $0x1b88] sm:$0xff] }
 0x621   : > { %v5489_v54 = vpop.f32.mrb[12].mxu1 }
 0x622   : > { %v14775_v62 = vadd.f32 %v5489_v54, %v3949_v56  ;;  %v18977_v63 = vpop.f32.mrb[8].mxu0  ;;  %v5491_v0 = vpop.f32.mrb[13].mxu1  ;;  %v6419_v56 = vld [vmem:[%s18730_s25 + $0x19c8] sm:$0xff] }
 0x623   : > { %v14776_v2 = vadd.f32 %v5491_v0, %v3953_v48  ;;  %v5573_v4 = vpop.f32.mrb[9].mxu0  ;;  %11933 = vmatpush1.bf16.msra.mxu1 %v14478_v57  ;;  %12097 = vmatpush1.bf16.msra.mxu0 %v14480_v58  ;;  %v5493_v5 = vpop.f32.mrb[14].mxu1  ;;  %v14542_v57 = vcombine.low %v6394_v33, %v6402_v35  ;;  %v14544_v58 = vcombine.low %v6395_v36, %v6403_v37  ;;  %v6435_v54 = vld [vmem:[%s18730_s25 + $0x1a48] sm:$0xff]  ;;  %v6442_v0 = vld [vmem:[%s18730_s25 + $0x1a80] sm:$0xff] }
 0x624   : > { %v5582_v8 = vmax.f32 %v14775_v62, 0.0  ;;  %v14778_v9 = vadd.f32 %v5573_v4, %v3961_v49  ;;  %v5575_v11 = vpop.f32.mrb[10].mxu0  ;;  %v5494_v14 = vpop.f32.mrb[15].mxu1  ;;  %11934 = vmatprep.subr.bf16.mxu1 %v14495_v50  ;;  %12098 = vmatprep.subr.bf16.mxu0 %v14497_v3  ;;  %v14559_v48 = vcombine.high %v6410_v51, %v6418_v53  ;;  %v14561_v49 = vcombine.high %v6411_v25, %v6419_v56  ;;  %v6426_v50 = vld [vmem:[%s18730_s25 + $0x1a00] sm:$0xff]  ;;  %v6443_v4 = vld [vmem:[%s18730_s25 + $0x1a88] sm:$0xff] }
 0x625   : > { %v5583_v19 = vmax.f32 %v14776_v2, 0.0  ;;  %v5576_v20 = vpop.f32.mrb[11].mxu0  ;;  %v6434_v3 = vld [vmem:[%s18730_s25 + $0x1a40] sm:$0xff]  ;;  %v14560_v60 = vcombine.low %v6411_v25, %v6419_v56  ;;  %v14577_v62 = vcombine.high %v6427_v52, %v6435_v54  ;;  %v6451_v5 = vld [vmem:[%s18730_s25 + $0x1ac8] sm:$0xff] }
 0x626   : > { %v5585_v22 = vmax.f32 %v14778_v9, 0.0  ;;  %v18985_v32 = vpack.c.bf16 %v5582_v8, %v5582_v8  ;;  %v14575_v61 = vcombine.high %v6426_v50, %v6434_v3  ;;  %v6450_v2 = vld [vmem:[%s18730_s25 + $0x1ac0] sm:$0xff]  ;;  %v14593_v9 = vcombine.high %v6443_v4, %v6451_v5  ;;  %v6491_v37 = vld [vmem:[%s18730_s25 + $0x1c08] sm:$0xff] }
 0x627   : > { %v18983_v27 = vpack.c.bf16 %v5583_v19, %v5583_v19  ;;  %11935 = vmatpush1.bf16.msra.mxu1 %v14494_v41  ;;  %12099 = vmatpush1.bf16.msra.mxu0 %v14496_v6  ;;  %v14574_v41 = vcombine.low %v6426_v50, %v6434_v3  ;;  %v14576_v6 = vcombine.low %v6427_v52, %v6435_v54  ;;  %v6458_v11 = vld [vmem:[%s18730_s25 + $0x1b00] sm:$0xff]  ;;  %v6507_v56 = vld [vmem:[%s18730_s25 + $0x1c88] sm:$0xff] }
 0x628   : > { %11945 = vmatprep.subr.bf16.mxu1 %v14511_v17  ;;  %12109 = vmatprep.subr.bf16.mxu0 %v14513_v18  ;;  %v18993_v39 = vpack.c.bf16 %v5585_v22, %v5585_v22  ;;  %v14591_v8 = vcombine.high %v6442_v0, %v6450_v2  ;;  %v6466_v14 = vld [vmem:[%s18730_s25 + $0x1b40] sm:$0xff]  ;;  %v6459_v17 = vld [vmem:[%s18730_s25 + $0x1b08] sm:$0xff]  ;;  %v14590_v19 = vcombine.low %v6442_v0, %v6450_v2 }
 0x629   : > { %11936 = vmatprep.mubr.bf16.mxu1 %v18983_v27  ;;  %12100 = vmatprep.mubr.bf16.mxu0 %v18983_v27  ;;  %v6467_v18 = vld [vmem:[%s18730_s25 + $0x1b48] sm:$0xff]  ;;  %v14592_v20 = vcombine.low %v6443_v4, %v6451_v5  ;;  %v14607_v40 = vcombine.high %v6458_v11, %v6466_v14  ;;  %v6490_v35 = vld [vmem:[%s18730_s25 + $0x1c00] sm:$0xff] }
 0x62a   : > { %11937 = vmatmul.mubr.bf16.vlgmr.msra.gmra.mrb[16].mxu1 %v18985_v32  ;;  %12101 = vmatmul.mubr.bf16.vlgmr.msra.gmra.mrb[12].mxu0 %v18985_v32  ;;  %v14609_v22 = vcombine.high %v6459_v17, %v6467_v18  ;;  %v14608_v33 = vcombine.low %v6459_v17, %v6467_v18  ;;  %v6498_v36 = vld [vmem:[%s18730_s25 + $0x1c40] sm:$0xff]  ;;  %v6523_v54 = vld [vmem:[%s18730_s25 + $0x1d08] sm:$0xff] }
 0x62b   : > { %11946 = vmatpush1.bf16.msra.mxu1 %v14510_v29  ;;  %12110 = vmatpush1.bf16.msra.mxu0 %v14512_v30  ;;  %v6483_v29 = vld [vmem:[%s18730_s25 + $0x1bc8] sm:$0xff]  ;;  %v14606_v30 = vcombine.low %v6458_v11, %v6466_v14  ;;  %v6506_v53 = vld [vmem:[%s18730_s25 + $0x1c80] sm:$0xff] }
 0x62c   : > { %11977 = vmatprep.mubr.bf16.mxu1 %v18993_v39  ;;  %12141 = vmatprep.mubr.bf16.mxu0 %v18993_v39  ;;  %v6514_v25 = vld [vmem:[%s18730_s25 + $0x1cc0] sm:$0xff]  ;;  %v6539_v5 = vld [vmem:[%s18730_s25 + $0x1d88] sm:$0xff] }
 0x62d   : > { %11947 = vmatprep.subr.bf16.mxu1 %v14527_v34  ;;  %12111 = vmatprep.subr.bf16.mxu0 %v14529_v59  ;;  %v14623_v34 = vcombine.high %v6474_v23, %v6482_v24  ;;  %v14625_v59 = vcombine.high %v6475_v26, %v6483_v29  ;;  %v6522_v3 = vld [vmem:[%s18730_s25 + $0x1d00] sm:$0xff]  ;;  %v6555_v18 = vld [vmem:[%s18730_s25 + $0x1e08] sm:$0xff] }
 0x62e   : > { %v6530_v52 = vld [vmem:[%s18730_s25 + $0x1d40] sm:$0xff] }
 0x62f   : > { %11948 = vmatpush1.bf16.msra.mxu1 %v14526_v43  ;;  %12112 = vmatpush1.bf16.msra.mxu0 %v14528_v1  ;;  %v6499_v43 = vld [vmem:[%s18730_s25 + $0x1c48] sm:$0xff]  ;;  %v14622_v1 = vcombine.low %v6474_v23, %v6482_v24  ;;  %v6538_v2 = vld [vmem:[%s18730_s25 + $0x1d80] sm:$0xff] }
 0x630   : > { %11949 = vmatprep.subr.bf16.mxu1 %v14543_v45  ;;  %12113 = vmatprep.subr.bf16.mxu0 %v14545_v47  ;;  %v14624_v45 = vcombine.low %v6475_v26, %v6483_v29  ;;  %v14639_v47 = vcombine.high %v6490_v35, %v6498_v36  ;;  %v14641_v51 = vcombine.high %v6491_v37, %v6499_v43  ;;  %v6546_v4 = vld [vmem:[%s18730_s25 + $0x1dc0] sm:$0xff]  ;;  %v6571_v29 = vld [vmem:[%s18730_s25 + $0x1e88] sm:$0xff] }
 0x631   : > { %v6554_v14 = vld [vmem:[%s18730_s25 + $0x1e00] sm:$0xff] }
 0x632   : > { %v6562_v17 = vld [vmem:[%s18730_s25 + $0x1e40] sm:$0xff] }
 0x633   : > { %11950 = vmatpush1.bf16.msra.mxu1 %v14542_v57  ;;  %12114 = vmatpush1.bf16.msra.mxu0 %v14544_v58  ;;  %v6515_v57 = vld [vmem:[%s18730_s25 + $0x1cc8] sm:$0xff]  ;;  %v14638_v58 = vcombine.low %v6490_v35, %v6498_v36  ;;  %v6570_v24 = vld [vmem:[%s18730_s25 + $0x1e80] sm:$0xff] }
 0x634   : > { %11951 = vmatprep.subr.bf16.mxu1 %v14559_v48  ;;  %12115 = vmatprep.subr.bf16.mxu0 %v14561_v49  ;;  %v14640_v48 = vcombine.low %v6491_v37, %v6499_v43  ;;  %v14655_v49 = vcombine.high %v6506_v53, %v6514_v25  ;;  %v14657_v50 = vcombine.high %v6507_v56, %v6515_v57  ;;  %v6578_v26 = vld [vmem:[%s18730_s25 + $0x1ec0] sm:$0xff] }
 0x635   : > { %v14719_v35 = vcombine.high %v6570_v24, %v6578_v26  ;;  %v6586_v37 = vld [vmem:[%s18730_s25 + $0x1f00] sm:$0xff] }
 0x636   : > { %v6594_v43 = vld [vmem:[%s18730_s25 + $0x1f40] sm:$0xff] }
 0x637   : > { %11952 = vmatpush1.bf16.msra.mxu1 %v14558_v55  ;;  %12116 = vmatpush1.bf16.msra.mxu0 %v14560_v60  ;;  %v6531_v55 = vld [vmem:[%s18730_s25 + $0x1d48] sm:$0xff]  ;;  %v14654_v60 = vcombine.low %v6506_v53, %v6514_v25  ;;  %v14735_v25 = vcombine.high %v6586_v37, %v6594_v43 }
 0x638   : > { %11953 = vmatprep.subr.bf16.mxu1 %v14575_v61  ;;  %12117 = vmatprep.subr.bf16.mxu0 %v14577_v62  ;;  %v14656_v61 = vcombine.low %v6507_v56, %v6515_v57  ;;  %v14671_v62 = vcombine.high %v6522_v3, %v6530_v52  ;;  %v14673_v0 = vcombine.high %v6523_v54, %v6531_v55  ;;  %v6602_v57 = vld [vmem:[%s18730_s25 + $0x1f80] sm:$0xff] }
 0x63b   : > { %11954 = vmatpush1.bf16.msra.mxu1 %v14574_v41  ;;  %12118 = vmatpush1.bf16.msra.mxu0 %v14576_v6  ;;  %v6547_v41 = vld [vmem:[%s18730_s25 + $0x1dc8] sm:$0xff]  ;;  %v14670_v6 = vcombine.low %v6522_v3, %v6530_v52 }
 0x63c   : > { %11955 = vmatprep.subr.bf16.mxu1 %v14591_v8  ;;  %12119 = vmatprep.subr.bf16.mxu0 %v14593_v9  ;;  %v14672_v8 = vcombine.low %v6523_v54, %v6531_v55  ;;  %v14687_v9 = vcombine.high %v6538_v2, %v6546_v4  ;;  %v14689_v11 = vcombine.high %v6539_v5, %v6547_v41 }
 0x63f   : > { %11956 = vmatpush1.bf16.msra.mxu1 %v14590_v19  ;;  %12120 = vmatpush1.bf16.msra.mxu0 %v14592_v20  ;;  %v6563_v19 = vld [vmem:[%s18730_s25 + $0x1e48] sm:$0xff]  ;;  %v14686_v20 = vcombine.low %v6538_v2, %v6546_v4 }
 0x640   : > { %11957 = vmatprep.subr.bf16.mxu1 %v14607_v40  ;;  %12121 = vmatprep.subr.bf16.mxu0 %v14609_v22  ;;  %v14688_v40 = vcombine.low %v6539_v5, %v6547_v41  ;;  %v14703_v22 = vcombine.high %v6554_v14, %v6562_v17  ;;  %v14705_v23 = vcombine.high %v6555_v18, %v6563_v19 }
 0x643   : > { %11958 = vmatpush1.bf16.msra.mxu1 %v14606_v30  ;;  %12122 = vmatpush1.bf16.msra.mxu0 %v14608_v33  ;;  %v6579_v30 = vld [vmem:[%s18730_s25 + $0x1ec8] sm:$0xff]  ;;  %v14702_v33 = vcombine.low %v6554_v14, %v6562_v17 }
 0x644   : > { %11959 = vmatprep.subr.bf16.mxu1 %v14623_v34  ;;  %12123 = vmatprep.subr.bf16.mxu0 %v14625_v59  ;;  %v14704_v34 = vcombine.low %v6555_v18, %v6563_v19  ;;  %v19044_v59 = vsub.s32 6, %v17405_v13  ;;  %v14721_v36 = vcombine.high %v6571_v29, %v6579_v30  ;;  %v15213_v13 = vld [vmem:[%s19953_s6] sm:$0xff] }
 0x646   : > { %v3957_v53 = vrot.slane %v15213_v13, %v19044_v59  ;;  %v5668_v13 = vld [vmem:[%s18730_s25 + $0x250] sm:$0xff] }
 0x647   : > { %11960 = vmatpush1.bf16.msra.mxu1 %v14622_v1  ;;  %12124 = vmatpush1.bf16.msra.mxu0 %v14624_v45  ;;  %v6587_v1 = vld [vmem:[%s18730_s25 + $0x1f08] sm:$0xff] }
 0x648   : > { %11961 = vmatprep.subr.bf16.mxu1 %v14639_v47  ;;  %12125 = vmatprep.subr.bf16.mxu0 %v14641_v51  ;;  %v6595_v45 = vld [vmem:[%s18730_s25 + $0x1f48] sm:$0xff]  ;;  %v14718_v47 = vcombine.low %v6570_v24, %v6578_v26  ;;  %v14720_v51 = vcombine.low %v6571_v29, %v6579_v30  ;;  %v14777_v52 = vadd.f32 %v18977_v63, %v3957_v53  ;;  %v5637_v24 = vld [vmem:[%s18730_s25 + $0x158] sm:$0xff] }
 0x649   : > { %v14737_v56 = vcombine.high %v6587_v1, %v6595_v45  ;;  %v14736_v3 = vcombine.low %v6587_v1, %v6595_v45  ;;  %v5661_v53 = vld [vmem:[%s18730_s25 + $0x218] sm:$0xff] }
 0x64a   : > { %v5584_v5 = vmax.f32 %v14777_v52, 0.0  ;;  %v5685_v52 = vld [vmem:[%s18730_s25 + $0x2d8] sm:$0xff] }
 0x64b   : > { %11962 = vmatpush1.bf16.msra.mxu1 %v14638_v58  ;;  %12126 = vmatpush1.bf16.msra.mxu0 %v14640_v48  ;;  %v6610_v58 = vld [vmem:[%s18730_s25 + $0x1fc0] sm:$0xff]  ;;  %v6603_v48 = vld [vmem:[%s18730_s25 + $0x1f88] sm:$0xff] }
 0x64c   : > { %11963 = vmatprep.subr.bf16.mxu1 %v14655_v49  ;;  %12127 = vmatprep.subr.bf16.mxu0 %v14657_v50  ;;  %v6611_v49 = vld [vmem:[%s18730_s25 + $0x1fc8] sm:$0xff]  ;;  %v14734_v50 = vcombine.low %v6586_v37, %v6594_v43  ;;  %v14751_v54 = vcombine.high %v6602_v57, %v6610_v58  ;;  %v14750_v2 = vcombine.low %v6602_v57, %v6610_v58  ;;  %v5653_v37 = vld [vmem:[%s18730_s25 + $0x1d8] sm:$0xff] }
 0x64d   : > { %v14753_v55 = vcombine.high %v6603_v48, %v6611_v49  ;;  %v14752_v4 = vcombine.low %v6603_v48, %v6611_v49  ;;  %v19067_v17 = vpack.c.bf16 %v5584_v5, %v5584_v5  ;;  %v5676_v49 = vld [vmem:[%s18730_s25 + $0x290] sm:$0xff] }
 0x64f   : > { %11964 = vmatpush1.bf16.msra.mxu1 %v14654_v60  ;;  %12128 = vmatpush1.bf16.msra.mxu0 %v14656_v61  ;;  %v5596_v60 = vld [vmem:[%s18730_s25 + $0x10] sm:$0xff] }
 0x650   : > { %11965 = vmatprep.subr.bf16.mxu1 %v14671_v62  ;;  %12129 = vmatprep.subr.bf16.mxu0 %v14673_v0  ;;  %v5604_v61 = vld [vmem:[%s18730_s25 + $0x50] sm:$0xff]  ;;  %v5597_v62 = vld [vmem:[%s18730_s25 + $0x18] sm:$0xff] }
 0x651   : > { %v5605_v0 = vld [vmem:[%s18730_s25 + $0x58] sm:$0xff]  ;;  %v13747_v63 = vcombine.high %v5596_v60, %v5604_v61  ;;  %v13746_v14 = vcombine.low %v5596_v60, %v5604_v61 }
 0x652   : > { %v13749_v41 = vcombine.high %v5597_v62, %v5605_v0  ;;  %v13748_v18 = vcombine.low %v5597_v62, %v5605_v0  ;;  %v5692_v62 = vld [vmem:[%s18730_s25 + $0x310] sm:$0xff] }
 0x653   : > { %11966 = vmatpush1.bf16.msra.mxu1 %v14670_v6  ;;  %12130 = vmatpush1.bf16.msra.mxu0 %v14672_v8  ;;  %v5612_v6 = vld [vmem:[%s18730_s25 + $0x90] sm:$0xff] }
 0x654   : > { %11967 = vmatprep.subr.bf16.mxu1 %v14687_v9  ;;  %12131 = vmatprep.subr.bf16.mxu0 %v14689_v11  ;;  %v5620_v8 = vld [vmem:[%s18730_s25 + $0xd0] sm:$0xff]  ;;  %v5613_v9 = vld [vmem:[%s18730_s25 + $0x98] sm:$0xff] }
 0x655   : > { %v5621_v11 = vld [vmem:[%s18730_s25 + $0xd8] sm:$0xff]  ;;  %v13763_v19 = vcombine.high %v5612_v6, %v5620_v8  ;;  %v13762_v26 = vcombine.low %v5612_v6, %v5620_v8  ;;  %v5700_v0 = vld [vmem:[%s18730_s25 + $0x350] sm:$0xff] }
 0x656   : > { %v13764_v29 = vcombine.low %v5613_v9, %v5621_v11  ;;  %v5708_v8 = vld [vmem:[%s18730_s25 + $0x390] sm:$0xff] }
 0x657   : > { %11968 = vmatpush1.bf16.msra.mxu1 %v14686_v20  ;;  %12132 = vmatpush1.bf16.msra.mxu0 %v14688_v40  ;;  %v13765_v20 = vcombine.high %v5613_v9, %v5621_v11  ;;  %v5628_v40 = vld [vmem:[%s18730_s25 + $0x110] sm:$0xff]  ;;  %v5709_v11 = vld [vmem:[%s18730_s25 + $0x398] sm:$0xff] }
 0x658   : > { %11969 = vmatprep.subr.bf16.mxu1 %v14703_v22  ;;  %12133 = vmatprep.subr.bf16.mxu0 %v14705_v23  ;;  %v5636_v22 = vld [vmem:[%s18730_s25 + $0x150] sm:$0xff]  ;;  %v5629_v23 = vld [vmem:[%s18730_s25 + $0x118] sm:$0xff] }
 0x659   : > { %v13779_v30 = vcombine.high %v5628_v40, %v5636_v22  ;;  %v13778_v43 = vcombine.low %v5628_v40, %v5636_v22  ;;  %v13780_v1 = vcombine.low %v5629_v23, %v5637_v24  ;;  %v5716_v9 = vld [vmem:[%s18730_s25 + $0x3d0] sm:$0xff] }
 0x65a   : > { %v5724_v22 = vld [vmem:[%s18730_s25 + $0x410] sm:$0xff] }
 0x65b   : > { %11970 = vmatpush1.bf16.msra.mxu1 %v14702_v33  ;;  %12134 = vmatpush1.bf16.msra.mxu0 %v14704_v34  ;;  %v13781_v33 = vcombine.high %v5629_v23, %v5637_v24  ;;  %v5644_v34 = vld [vmem:[%s18730_s25 + $0x190] sm:$0xff]  ;;  %v5725_v24 = vld [vmem:[%s18730_s25 + $0x418] sm:$0xff] }
 0x65c   : > { %11971 = vmatprep.subr.bf16.mxu1 %v14719_v35  ;;  %12135 = vmatprep.subr.bf16.mxu0 %v14721_v36  ;;  %v5652_v35 = vld [vmem:[%s18730_s25 + $0x1d0] sm:$0xff]  ;;  %v5645_v36 = vld [vmem:[%s18730_s25 + $0x198] sm:$0xff] }
 0x65d   : > { %v13795_v45 = vcombine.high %v5644_v34, %v5652_v35  ;;  %v13796_v57 = vcombine.low %v5645_v36, %v5653_v37  ;;  %v5732_v23 = vld [vmem:[%s18730_s25 + $0x450] sm:$0xff] }
 0x65f   : > { %11972 = vmatpush1.bf16.msra.mxu1 %v14718_v47  ;;  %12136 = vmatpush1.bf16.msra.mxu0 %v14720_v51  ;;  %v13797_v47 = vcombine.high %v5645_v36, %v5653_v37  ;;  %v5660_v51 = vld [vmem:[%s18730_s25 + $0x210] sm:$0xff]  ;;  %v5741_v37 = vld [vmem:[%s18730_s25 + $0x498] sm:$0xff] }
 0x660   : > { %11973 = vmatprep.subr.bf16.mxu1 %v14735_v25  ;;  %12137 = vmatprep.subr.bf16.mxu0 %v14737_v56  ;;  %v5669_v25 = vld [vmem:[%s18730_s25 + $0x258] sm:$0xff]  ;;  %v13794_v56 = vcombine.low %v5644_v34, %v5652_v35  ;;  %v13811_v58 = vcombine.high %v5660_v51, %v5668_v13  ;;  %v5740_v35 = vld [vmem:[%s18730_s25 + $0x490] sm:$0xff] }
 0x661   : > { %v13813_v48 = vcombine.high %v5661_v53, %v5669_v25  ;;  %v5748_v36 = vld [vmem:[%s18730_s25 + $0x4d0] sm:$0xff] }
 0x663   : > { %11974 = vmatpush1.bf16.msra.mxu1 %v14734_v50  ;;  %12138 = vmatpush1.bf16.msra.mxu0 %v14736_v3  ;;  %v5684_v50 = vld [vmem:[%s18730_s25 + $0x2d0] sm:$0xff]  ;;  %v5677_v3 = vld [vmem:[%s18730_s25 + $0x298] sm:$0xff] }
 0x664   : > { %11975 = vmatprep.subr.bf16.mxu1 %v14751_v54  ;;  %12139 = vmatprep.subr.bf16.mxu0 %v14753_v55  ;;  %v13810_v54 = vcombine.low %v5660_v51, %v5668_v13  ;;  %v13812_v55 = vcombine.low %v5661_v53, %v5669_v25  ;;  %v13827_v60 = vcombine.high %v5676_v49, %v5684_v50  ;;  %v5756_v13 = vld [vmem:[%s18730_s25 + $0x510] sm:$0xff]  ;;  %v5757_v25 = vld [vmem:[%s18730_s25 + $0x518] sm:$0xff] }
 0x665   : > { %v13829_v61 = vcombine.high %v5677_v3, %v5685_v52  ;;  %v13826_v5 = vcombine.low %v5676_v49, %v5684_v50  ;;  %v5764_v53 = vld [vmem:[%s18730_s25 + $0x550] sm:$0xff] }
 0x666   : > { %v5772_v50 = vld [vmem:[%s18730_s25 + $0x590] sm:$0xff] }
 0x667   : > { %11976 = vmatpush1.bf16.msra.mxu1 %v14750_v2  ;;  %12140 = vmatpush1.bf16.msra.mxu0 %v14752_v4  ;;  %v5693_v2 = vld [vmem:[%s18730_s25 + $0x318] sm:$0xff] }
 0x668   : > { %12150 = vmatprep.subr.bf16.mxu1 %v13747_v63  ;;  %12314 = vmatprep.subr.bf16.mxu0 %v13749_v41  ;;  %v5701_v4 = vld [vmem:[%s18730_s25 + $0x358] sm:$0xff]  ;;  %v13828_v63 = vcombine.low %v5677_v3, %v5685_v52  ;;  %v13843_v41 = vcombine.high %v5692_v62, %v5700_v0  ;;  %v5780_v3 = vld [vmem:[%s18730_s25 + $0x5d0] sm:$0xff] }
 0x669   : > { %v13845_v6 = vcombine.high %v5693_v2, %v5701_v4  ;;  %v5773_v52 = vld [vmem:[%s18730_s25 + $0x598] sm:$0xff] }
 0x66a   : > { %11978 = vmatmul.mubr.bf16.vlgmr.msra.gmra.mrb[16].mxu1 %v19067_v17  ;;  %12142 = vmatmul.mubr.bf16.vlgmr.msra.gmra.mrb[12].mxu0 %v19067_v17 }
 0x66b   : > { %12151 = vmatpush1.bf16.msra.mxu1 %v13746_v14  ;;  %12182 = vmatprep.mubr.bf16.mxu1 %v18819_v7  ;;  %v5717_v14 = vld [vmem:[%s18730_s25 + $0x3d8] sm:$0xff] }
 0x66c   : > { %12315 = vmatpush1.bf16.msra.mxu0 %v13748_v18  ;;  %12346 = vmatprep.mubr.bf16.mxu0 %v18819_v7  ;;  %v13842_v18 = vcombine.low %v5692_v62, %v5700_v0  ;;  %v13861_v40 = vcombine.high %v5709_v11, %v5717_v14  ;;  %v5788_v0 = vld [vmem:[%s18730_s25 + $0x610] sm:$0xff] }
 0x66d   : > { %12152 = vmatprep.subr.bf16.mxu1 %v13763_v19  ;;  %12316 = vmatprep.subr.bf16.mxu0 %v13765_v20  ;;  %v13844_v19 = vcombine.low %v5693_v2, %v5701_v4  ;;  %v13859_v20 = vcombine.high %v5708_v8, %v5716_v9  ;;  %v5796_v2 = vld [vmem:[%s18730_s25 + $0x650] sm:$0xff]  ;;  %v5789_v4 = vld [vmem:[%s18730_s25 + $0x618] sm:$0xff] }
 0x66f   : > { %12153 = vmatpush1.bf16.msra.mxu1 %v13762_v26  ;;  %v5733_v26 = vld [vmem:[%s18730_s25 + $0x458] sm:$0xff] }
 0x670   : > { %12317 = vmatpush1.bf16.msra.mxu0 %v13764_v29  ;;  %12154 = vmatprep.subr.bf16.mxu1 %v13779_v30  ;;  %v13858_v29 = vcombine.low %v5708_v8, %v5716_v9  ;;  %v13860_v30 = vcombine.low %v5709_v11, %v5717_v14  ;;  %v13877_v34 = vcombine.high %v5725_v24, %v5733_v26  ;;  %v5804_v9 = vld [vmem:[%s18730_s25 + $0x690] sm:$0xff]  ;;  %v5805_v14 = vld [vmem:[%s18730_s25 + $0x698] sm:$0xff] }
 0x671   : > { %12318 = vmatprep.subr.bf16.mxu0 %v13781_v33  ;;  %v13875_v33 = vcombine.high %v5724_v22, %v5732_v23  ;;  %v5812_v11 = vld [vmem:[%s18730_s25 + $0x6d0] sm:$0xff] }
 0x673   : > { %12155 = vmatpush1.bf16.msra.mxu1 %v13778_v43  ;;  %v5749_v43 = vld [vmem:[%s18730_s25 + $0x4d8] sm:$0xff] }
 0x674   : > { %12319 = vmatpush1.bf16.msra.mxu0 %v13780_v1  ;;  %12156 = vmatprep.subr.bf16.mxu1 %v13795_v45  ;;  %v13874_v1 = vcombine.low %v5724_v22, %v5732_v23  ;;  %v13876_v45 = vcombine.low %v5725_v24, %v5733_v26  ;;  %v13893_v51 = vcombine.high %v5741_v37, %v5749_v43  ;;  %v5820_v23 = vld [vmem:[%s18730_s25 + $0x710] sm:$0xff]  ;;  %v5821_v26 = vld [vmem:[%s18730_s25 + $0x718] sm:$0xff] }
 0x675   : > { %12320 = vmatprep.subr.bf16.mxu0 %v13797_v47  ;;  %v13891_v47 = vcombine.high %v5740_v35, %v5748_v36  ;;  %v5828_v24 = vld [vmem:[%s18730_s25 + $0x750] sm:$0xff] }
 0x677   : > { %12157 = vmatpush1.bf16.msra.mxu1 %v13794_v56  ;;  %v5765_v56 = vld [vmem:[%s18730_s25 + $0x558] sm:$0xff] }
 0x678   : > { %12321 = vmatpush1.bf16.msra.mxu0 %v13796_v57  ;;  %12158 = vmatprep.subr.bf16.mxu1 %v13811_v58  ;;  %v13890_v57 = vcombine.low %v5740_v35, %v5748_v36  ;;  %v13892_v58 = vcombine.low %v5741_v37, %v5749_v43  ;;  %v13909_v49 = vcombine.high %v5757_v25, %v5765_v56  ;;  %v5836_v36 = vld [vmem:[%s18730_s25 + $0x790] sm:$0xff]  ;;  %v5837_v43 = vld [vmem:[%s18730_s25 + $0x798] sm:$0xff] }
 0x679   : > { %12322 = vmatprep.subr.bf16.mxu0 %v13813_v48  ;;  %v13907_v48 = vcombine.high %v5756_v13, %v5764_v53  ;;  %v5844_v37 = vld [vmem:[%s18730_s25 + $0x7d0] sm:$0xff] }
 0x67b   : > { %12159 = vmatpush1.bf16.msra.mxu1 %v13810_v54  ;;  %v5781_v54 = vld [vmem:[%s18730_s25 + $0x5d8] sm:$0xff] }
 0x67c   : > { %12323 = vmatpush1.bf16.msra.mxu0 %v13812_v55  ;;  %12160 = vmatprep.subr.bf16.mxu1 %v13827_v60  ;;  %v13906_v55 = vcombine.low %v5756_v13, %v5764_v53  ;;  %v13908_v60 = vcombine.low %v5757_v25, %v5765_v56  ;;  %v13925_v62 = vcombine.high %v5773_v52, %v5781_v54  ;;  %v5852_v53 = vld [vmem:[%s18730_s25 + $0x810] sm:$0xff]  ;;  %v5853_v56 = vld [vmem:[%s18730_s25 + $0x818] sm:$0xff] }
 0x67d   : > { %12324 = vmatprep.subr.bf16.mxu0 %v13829_v61  ;;  %v13923_v61 = vcombine.high %v5772_v50, %v5780_v3  ;;  %v5860_v25 = vld [vmem:[%s18730_s25 + $0x850] sm:$0xff] }
 0x67f   : > { %12161 = vmatpush1.bf16.msra.mxu1 %v13826_v5  ;;  %v5797_v5 = vld [vmem:[%s18730_s25 + $0x658] sm:$0xff] }
 0x680   : > { %12325 = vmatpush1.bf16.msra.mxu0 %v13828_v63  ;;  %12162 = vmatprep.subr.bf16.mxu1 %v13843_v41  ;;  %v13922_v63 = vcombine.low %v5772_v50, %v5780_v3  ;;  %v13924_v41 = vcombine.low %v5773_v52, %v5781_v54  ;;  %v13941_v8 = vcombine.high %v5789_v4, %v5797_v5  ;;  %v5868_v3 = vld [vmem:[%s18730_s25 + $0x890] sm:$0xff] }
 0x681   : > { %12326 = vmatprep.subr.bf16.mxu0 %v13845_v6  ;;  %v13939_v6 = vcombine.high %v5788_v0, %v5796_v2  ;;  %v5876_v52 = vld [vmem:[%s18730_s25 + $0x8d0] sm:$0xff]  ;;  %v14002_v54 = vcombine.low %v5852_v53, %v5860_v25 }
 0x683   : > { %12163 = vmatpush1.bf16.msra.mxu1 %v13842_v18  ;;  %v5813_v18 = vld [vmem:[%s18730_s25 + $0x6d8] sm:$0xff] }
 0x684   : > { %12327 = vmatpush1.bf16.msra.mxu0 %v13844_v19  ;;  %12164 = vmatprep.subr.bf16.mxu1 %v13859_v20  ;;  %v13938_v19 = vcombine.low %v5788_v0, %v5796_v2  ;;  %v13940_v20 = vcombine.low %v5789_v4, %v5797_v5  ;;  %v13957_v22 = vcombine.high %v5805_v14, %v5813_v18  ;;  %v5884_v0 = vld [vmem:[%s18730_s25 + $0x910] sm:$0xff]  ;;  %v5885_v5 = vld [vmem:[%s18730_s25 + $0x918] sm:$0xff] }
 0x685   : > { %12328 = vmatprep.subr.bf16.mxu0 %v13861_v40  ;;  %v13955_v40 = vcombine.high %v5804_v9, %v5812_v11  ;;  %v5892_v2 = vld [vmem:[%s18730_s25 + $0x950] sm:$0xff] }
 0x687   : > { %12165 = vmatpush1.bf16.msra.mxu1 %v13858_v29  ;;  %v5829_v29 = vld [vmem:[%s18730_s25 + $0x758] sm:$0xff] }
 0x688   : > { %12329 = vmatpush1.bf16.msra.mxu0 %v13860_v30  ;;  %12166 = vmatprep.subr.bf16.mxu1 %v13875_v33  ;;  %v13954_v30 = vcombine.low %v5804_v9, %v5812_v11  ;;  %v13956_v33 = vcombine.low %v5805_v14, %v5813_v18  ;;  %v13973_v35 = vcombine.high %v5821_v26, %v5829_v29  ;;  %v5900_v11 = vld [vmem:[%s18730_s25 + $0x990] sm:$0xff]  ;;  %v5901_v18 = vld [vmem:[%s18730_s25 + $0x998] sm:$0xff] }
 0x689   : > { %12330 = vmatprep.subr.bf16.mxu0 %v13877_v34  ;;  %v13971_v34 = vcombine.high %v5820_v23, %v5828_v24  ;;  %v5908_v14 = vld [vmem:[%s18730_s25 + $0x9d0] sm:$0xff] }
 0x68b   : > { %12167 = vmatpush1.bf16.msra.mxu1 %v13874_v1  ;;  %v5845_v1 = vld [vmem:[%s18730_s25 + $0x7d8] sm:$0xff] }
 0x68c   : > { %12331 = vmatpush1.bf16.msra.mxu0 %v13876_v45  ;;  %12168 = vmatprep.subr.bf16.mxu1 %v13891_v47  ;;  %v13970_v45 = vcombine.low %v5820_v23, %v5828_v24  ;;  %v13972_v47 = vcombine.low %v5821_v26, %v5829_v29  ;;  %v13989_v13 = vcombine.high %v5837_v43, %v5845_v1  ;;  %v5916_v24 = vld [vmem:[%s18730_s25 + $0xa10] sm:$0xff]  ;;  %v5917_v29 = vld [vmem:[%s18730_s25 + $0xa18] sm:$0xff] }
 0x68d   : > { %12332 = vmatprep.subr.bf16.mxu0 %v13893_v51  ;;  %v13987_v51 = vcombine.high %v5836_v36, %v5844_v37  ;;  %v5924_v26 = vld [vmem:[%s18730_s25 + $0xa50] sm:$0xff] }
 0x68f   : > { %12169 = vmatpush1.bf16.msra.mxu1 %v13890_v57  ;;  %v5861_v57 = vld [vmem:[%s18730_s25 + $0x858] sm:$0xff] }
 0x690   : > { %12333 = vmatpush1.bf16.msra.mxu0 %v13892_v58  ;;  %12170 = vmatprep.subr.bf16.mxu1 %v13907_v48  ;;  %v13986_v58 = vcombine.low %v5836_v36, %v5844_v37  ;;  %v13988_v48 = vcombine.low %v5837_v43, %v5845_v1  ;;  %v14005_v50 = vcombine.high %v5853_v56, %v5861_v57  ;;  %v5932_v37 = vld [vmem:[%s18730_s25 + $0xa90] sm:$0xff]  ;;  %v5933_v1 = vld [vmem:[%s18730_s25 + $0xa98] sm:$0xff] }
 0x691   : > { %12334 = vmatprep.subr.bf16.mxu0 %v13909_v49  ;;  %v14003_v49 = vcombine.high %v5852_v53, %v5860_v25  ;;  %v5940_v43 = vld [vmem:[%s18730_s25 + $0xad0] sm:$0xff] }
 0x692   : > { %v5948_v25 = vld [vmem:[%s18730_s25 + $0xb10] sm:$0xff] }
 0x693   : > { %12171 = vmatpush1.bf16.msra.mxu1 %v13906_v55  ;;  %v5869_v55 = vld [vmem:[%s18730_s25 + $0x898] sm:$0xff] }
 0x694   : > { %12335 = vmatpush1.bf16.msra.mxu0 %v13908_v60  ;;  %12172 = vmatprep.subr.bf16.mxu1 %v13923_v61  ;;  %v5877_v60 = vld [vmem:[%s18730_s25 + $0x8d8] sm:$0xff]  ;;  %v14004_v61 = vcombine.low %v5853_v56, %v5861_v57  ;;  %v5956_v56 = vld [vmem:[%s18730_s25 + $0xb50] sm:$0xff] }
 0x695   : > { %12336 = vmatprep.subr.bf16.mxu0 %v13925_v62  ;;  %v14019_v62 = vcombine.high %v5868_v3, %v5876_v52  ;;  %v14021_v4 = vcombine.high %v5869_v55, %v5877_v60  ;;  %v5949_v57 = vld [vmem:[%s18730_s25 + $0xb18] sm:$0xff] }
 0x697   : > { %12173 = vmatpush1.bf16.msra.mxu1 %v13922_v63  ;;  %v5893_v63 = vld [vmem:[%s18730_s25 + $0x958] sm:$0xff] }
 0x698   : > { %12337 = vmatpush1.bf16.msra.mxu0 %v13924_v41  ;;  %12174 = vmatprep.subr.bf16.mxu1 %v13939_v6  ;;  %v14018_v41 = vcombine.low %v5868_v3, %v5876_v52  ;;  %v14020_v6 = vcombine.low %v5869_v55, %v5877_v60  ;;  %v14037_v9 = vcombine.high %v5885_v5, %v5893_v63  ;;  %v5964_v52 = vld [vmem:[%s18730_s25 + $0xb90] sm:$0xff]  ;;  %v5965_v55 = vld [vmem:[%s18730_s25 + $0xb98] sm:$0xff] }
 0x699   : > { %12338 = vmatprep.subr.bf16.mxu0 %v13941_v8  ;;  %v14035_v8 = vcombine.high %v5884_v0, %v5892_v2  ;;  %v5973_v60 = vld [vmem:[%s18730_s25 + $0xbd8] sm:$0xff] }
 0x69b   : > { %12175 = vmatpush1.bf16.msra.mxu1 %v13938_v19  ;;  %v5909_v19 = vld [vmem:[%s18730_s25 + $0x9d8] sm:$0xff] }
 0x69c   : > { %12339 = vmatpush1.bf16.msra.mxu0 %v13940_v20  ;;  %12176 = vmatprep.subr.bf16.mxu1 %v13955_v40  ;;  %v14034_v20 = vcombine.low %v5884_v0, %v5892_v2  ;;  %v14036_v40 = vcombine.low %v5885_v5, %v5893_v63  ;;  %v14053_v23 = vcombine.high %v5901_v18, %v5909_v19  ;;  %v5988_v5 = vld [vmem:[%s18730_s25 + $0xc50] sm:$0xff]  ;;  %v5981_v63 = vld [vmem:[%s18730_s25 + $0xc18] sm:$0xff] }
 0x69d   : > { %12340 = vmatprep.subr.bf16.mxu0 %v13957_v22  ;;  %v14051_v22 = vcombine.high %v5900_v11, %v5908_v14  ;;  %v14117_v2 = vcombine.high %v5965_v55, %v5973_v60 }
 0x69f   : > { %12177 = vmatpush1.bf16.msra.mxu1 %v13954_v30  ;;  %v5925_v30 = vld [vmem:[%s18730_s25 + $0xa58] sm:$0xff] }
 0x6a0   : > { %12341 = vmatpush1.bf16.msra.mxu0 %v13956_v33  ;;  %12178 = vmatprep.subr.bf16.mxu1 %v13971_v34  ;;  %v14050_v33 = vcombine.low %v5900_v11, %v5908_v14  ;;  %v14052_v34 = vcombine.low %v5901_v18, %v5909_v19  ;;  %v14069_v36 = vcombine.high %v5917_v29, %v5925_v30  ;;  %v5996_v14 = vld [vmem:[%s18730_s25 + $0xc90] sm:$0xff]  ;;  %v5997_v19 = vld [vmem:[%s18730_s25 + $0xc98] sm:$0xff] }
 0x6a1   : > { %12342 = vmatprep.subr.bf16.mxu0 %v13973_v35  ;;  %v14067_v35 = vcombine.high %v5916_v24, %v5924_v26  ;;  %v6004_v18 = vld [vmem:[%s18730_s25 + $0xcd0] sm:$0xff] }
 0x6a3   : > { %12179 = vmatpush1.bf16.msra.mxu1 %v13970_v45  ;;  %v5941_v45 = vld [vmem:[%s18730_s25 + $0xad8] sm:$0xff] }
 0x6a4   : > { %12343 = vmatpush1.bf16.msra.mxu0 %v13972_v47  ;;  %12180 = vmatprep.subr.bf16.mxu1 %v13987_v51  ;;  %v14066_v47 = vcombine.low %v5916_v24, %v5924_v26  ;;  %v14068_v51 = vcombine.low %v5917_v29, %v5925_v30  ;;  %v14085_v53 = vcombine.high %v5933_v1, %v5941_v45  ;;  %v6012_v26 = vld [vmem:[%s18730_s25 + $0xd10] sm:$0xff]  ;;  %v6013_v30 = vld [vmem:[%s18730_s25 + $0xd18] sm:$0xff] }
 0x6a5   : > { %12344 = vmatprep.subr.bf16.mxu0 %v13989_v13  ;;  %v14083_v13 = vcombine.high %v5932_v37, %v5940_v43  ;;  %v6020_v29 = vld [vmem:[%s18730_s25 + $0xd50] sm:$0xff] }
 0x6a7   : > { %12181 = vmatpush1.bf16.msra.mxu1 %v13986_v58  ;;  %v5957_v58 = vld [vmem:[%s18730_s25 + $0xb58] sm:$0xff] }
 0x6a8   : > { %12345 = vmatpush1.bf16.msra.mxu0 %v13988_v48  ;;  %12191 = vmatprep.subr.bf16.mxu1 %v14003_v49  ;;  %v14082_v48 = vcombine.low %v5932_v37, %v5940_v43  ;;  %v14084_v49 = vcombine.low %v5933_v1, %v5941_v45  ;;  %v14101_v3 = vcombine.high %v5949_v57, %v5957_v58  ;;  %v6028_v43 = vld [vmem:[%s18730_s25 + $0xd90] sm:$0xff]  ;;  %v6029_v45 = vld [vmem:[%s18730_s25 + $0xd98] sm:$0xff] }
 0x6a9   : > { %12355 = vmatprep.subr.bf16.mxu0 %v14005_v50  ;;  %v14099_v50 = vcombine.high %v5948_v25, %v5956_v56  ;;  %v6036_v1 = vld [vmem:[%s18730_s25 + $0xdd0] sm:$0xff] }
 0x6aa   : > { %12183 = vmatmul.mubr.bf16.vlgmr.msra.gmra.mrb[20].mxu1 %v18821_v10 }
 0x6ab   : > { %12347 = vmatmul.mubr.bf16.vlgmr.msra.gmra.mrb[16].mxu0 %v18821_v10  ;;  %12192 = vmatpush1.bf16.msra.mxu1 %v14002_v54  ;;  %v5972_v54 = vld [vmem:[%s18730_s25 + $0xbd0] sm:$0xff] }
 0x6ac   : > { %12223 = vmatprep.mubr.bf16.mxu1 %v18829_v21  ;;  %12356 = vmatpush1.bf16.msra.mxu0 %v14004_v61  ;;  %v14098_v61 = vcombine.low %v5948_v25, %v5956_v56  ;;  %v14115_v0 = vcombine.high %v5964_v52, %v5972_v54  ;;  %v6044_v56 = vld [vmem:[%s18730_s25 + $0xe10] sm:$0xff] }
 0x6ad   : > { %12387 = vmatprep.mubr.bf16.mxu0 %v18829_v21  ;;  %12193 = vmatprep.subr.bf16.mxu1 %v14019_v62  ;;  %v14100_v62 = vcombine.low %v5949_v57, %v5957_v58  ;;  %v6052_v57 = vld [vmem:[%s18730_s25 + $0xe50] sm:$0xff]  ;;  %v6045_v58 = vld [vmem:[%s18730_s25 + $0xe18] sm:$0xff] }
 0x6ae   : > { %12357 = vmatprep.subr.bf16.mxu0 %v14021_v4  ;;  %v5980_v4 = vld [vmem:[%s18730_s25 + $0xc10] sm:$0xff] }
 0x6af   : > { %12194 = vmatpush1.bf16.msra.mxu1 %v14018_v41  ;;  %v5989_v41 = vld [vmem:[%s18730_s25 + $0xc58] sm:$0xff] }
 0x6b0   : > { %12358 = vmatpush1.bf16.msra.mxu0 %v14020_v6  ;;  %12195 = vmatprep.subr.bf16.mxu1 %v14035_v8  ;;  %v14114_v6 = vcombine.low %v5964_v52, %v5972_v54  ;;  %v14116_v8 = vcombine.low %v5965_v55, %v5973_v60  ;;  %v14133_v11 = vcombine.high %v5981_v63, %v5989_v41  ;;  %v6060_v54 = vld [vmem:[%s18730_s25 + $0xe90] sm:$0xff]  ;;  %v6061_v60 = vld [vmem:[%s18730_s25 + $0xe98] sm:$0xff] }
 0x6b1   : > { %12359 = vmatprep.subr.bf16.mxu0 %v14037_v9  ;;  %v14131_v9 = vcombine.high %v5980_v4, %v5988_v5  ;;  %v6068_v55 = vld [vmem:[%s18730_s25 + $0xed0] sm:$0xff] }
 0x6b3   : > { %12196 = vmatpush1.bf16.msra.mxu1 %v14034_v20  ;;  %v6005_v20 = vld [vmem:[%s18730_s25 + $0xcd8] sm:$0xff] }
 0x6b4   : > { %12360 = vmatpush1.bf16.msra.mxu0 %v14036_v40  ;;  %12197 = vmatprep.subr.bf16.mxu1 %v14051_v22  ;;  %v14130_v40 = vcombine.low %v5980_v4, %v5988_v5  ;;  %v14132_v22 = vcombine.low %v5981_v63, %v5989_v41  ;;  %v14149_v24 = vcombine.high %v5997_v19, %v6005_v20  ;;  %v6076_v5 = vld [vmem:[%s18730_s25 + $0xf10] sm:$0xff]  ;;  %v6077_v41 = vld [vmem:[%s18730_s25 + $0xf18] sm:$0xff] }
 0x6b5   : > { %12361 = vmatprep.subr.bf16.mxu0 %v14053_v23  ;;  %v14147_v23 = vcombine.high %v5996_v14, %v6004_v18  ;;  %v6084_v63 = vld [vmem:[%s18730_s25 + $0xf50] sm:$0xff] }
 0x6b7   : > { %12198 = vmatpush1.bf16.msra.mxu1 %v14050_v33  ;;  %v6021_v33 = vld [vmem:[%s18730_s25 + $0xd58] sm:$0xff] }
 0x6b8   : > { %12362 = vmatpush1.bf16.msra.mxu0 %v14052_v34  ;;  %12199 = vmatprep.subr.bf16.mxu1 %v14067_v35  ;;  %v14146_v34 = vcombine.low %v5996_v14, %v6004_v18  ;;  %v14148_v35 = vcombine.low %v5997_v19, %v6005_v20  ;;  %v14165_v37 = vcombine.high %v6013_v30, %v6021_v33  ;;  %v6092_v18 = vld [vmem:[%s18730_s25 + $0xf90] sm:$0xff]  ;;  %v6093_v20 = vld [vmem:[%s18730_s25 + $0xf98] sm:$0xff] }
 0x6b9   : > { %12363 = vmatprep.subr.bf16.mxu0 %v14069_v36  ;;  %v14163_v36 = vcombine.high %v6012_v26, %v6020_v29  ;;  %v6100_v19 = vld [vmem:[%s18730_s25 + $0xfd0] sm:$0xff] }
 0x6bb   : > { %12200 = vmatpush1.bf16.msra.mxu1 %v14066_v47  ;;  %v6037_v47 = vld [vmem:[%s18730_s25 + $0xdd8] sm:$0xff] }
 0x6bc   : > { %12364 = vmatpush1.bf16.msra.mxu0 %v14068_v51  ;;  %12201 = vmatprep.subr.bf16.mxu1 %v14083_v13  ;;  %v14162_v51 = vcombine.low %v6012_v26, %v6020_v29  ;;  %v14164_v13 = vcombine.low %v6013_v30, %v6021_v33  ;;  %v14181_v25 = vcombine.high %v6029_v45, %v6037_v47  ;;  %v6108_v29 = vld [vmem:[%s18730_s25 + $0x1010] sm:$0xff]  ;;  %v6109_v33 = vld [vmem:[%s18730_s25 + $0x1018] sm:$0xff] }
 0x6bd   : > { %12365 = vmatprep.subr.bf16.mxu0 %v14085_v53  ;;  %v14179_v53 = vcombine.high %v6028_v43, %v6036_v1  ;;  %v6116_v30 = vld [vmem:[%s18730_s25 + $0x1050] sm:$0xff] }
 0x6bf   : > { %12202 = vmatpush1.bf16.msra.mxu1 %v14082_v48  ;;  %v6053_v48 = vld [vmem:[%s18730_s25 + $0xe58] sm:$0xff] }
 0x6c0   : > { %12366 = vmatpush1.bf16.msra.mxu0 %v14084_v49  ;;  %12203 = vmatprep.subr.bf16.mxu1 %v14099_v50  ;;  %v14178_v49 = vcombine.low %v6028_v43, %v6036_v1  ;;  %v14180_v50 = vcombine.low %v6029_v45, %v6037_v47  ;;  %v14197_v52 = vcombine.high %v6045_v58, %v6053_v48  ;;  %v6124_v1 = vld [vmem:[%s18730_s25 + $0x1090] sm:$0xff] }
 0x6c1   : > { %12367 = vmatprep.subr.bf16.mxu0 %v14101_v3  ;;  %v14195_v3 = vcombine.high %v6044_v56, %v6052_v57  ;;  %v6132_v45 = vld [vmem:[%s18730_s25 + $0x10d0] sm:$0xff]  ;;  %v14258_v47 = vcombine.low %v6108_v29, %v6116_v30 }
 0x6c3   : > { %12204 = vmatpush1.bf16.msra.mxu1 %v14098_v61  ;;  %v6069_v61 = vld [vmem:[%s18730_s25 + $0xed8] sm:$0xff] }
 0x6c4   : > { %12368 = vmatpush1.bf16.msra.mxu0 %v14100_v62  ;;  %12205 = vmatprep.subr.bf16.mxu1 %v14115_v0  ;;  %v14194_v62 = vcombine.low %v6044_v56, %v6052_v57  ;;  %v14196_v0 = vcombine.low %v6045_v58, %v6053_v48  ;;  %v14213_v4 = vcombine.high %v6061_v60, %v6069_v61  ;;  %v6140_v56 = vld [vmem:[%s18730_s25 + $0x1110] sm:$0xff]  ;;  %v6141_v48 = vld [vmem:[%s18730_s25 + $0x1118] sm:$0xff] }
 0x6c5   : > { %12369 = vmatprep.subr.bf16.mxu0 %v14117_v2  ;;  %v14211_v2 = vcombine.high %v6060_v54, %v6068_v55  ;;  %v6148_v57 = vld [vmem:[%s18730_s25 + $0x1150] sm:$0xff] }
 0x6c7   : > { %12206 = vmatpush1.bf16.msra.mxu1 %v14114_v6  ;;  %v6085_v6 = vld [vmem:[%s18730_s25 + $0xf58] sm:$0xff] }
 0x6c8   : > { %12370 = vmatpush1.bf16.msra.mxu0 %v14116_v8  ;;  %12207 = vmatprep.subr.bf16.mxu1 %v14131_v9  ;;  %v14210_v8 = vcombine.low %v6060_v54, %v6068_v55  ;;  %v14212_v9 = vcombine.low %v6061_v60, %v6069_v61  ;;  %v14229_v14 = vcombine.high %v6077_v41, %v6085_v6  ;;  %v6156_v55 = vld [vmem:[%s18730_s25 + $0x1190] sm:$0xff]  ;;  %v6157_v61 = vld [vmem:[%s18730_s25 + $0x1198] sm:$0xff] }
 0x6c9   : > { %12371 = vmatprep.subr.bf16.mxu0 %v14133_v11  ;;  %v14227_v11 = vcombine.high %v6076_v5, %v6084_v63  ;;  %v6164_v60 = vld [vmem:[%s18730_s25 + $0x11d0] sm:$0xff] }
 0x6cb   : > { %12208 = vmatpush1.bf16.msra.mxu1 %v14130_v40  ;;  %v6101_v40 = vld [vmem:[%s18730_s25 + $0xfd8] sm:$0xff] }
 0x6cc   : > { %12372 = vmatpush1.bf16.msra.mxu0 %v14132_v22  ;;  %12209 = vmatprep.subr.bf16.mxu1 %v14147_v23  ;;  %v14226_v22 = vcombine.low %v6076_v5, %v6084_v63  ;;  %v14228_v23 = vcombine.low %v6077_v41, %v6085_v6  ;;  %v14245_v26 = vcombine.high %v6093_v20, %v6101_v40  ;;  %v6172_v63 = vld [vmem:[%s18730_s25 + $0x1210] sm:$0xff]  ;;  %v6173_v6 = vld [vmem:[%s18730_s25 + $0x1218] sm:$0xff] }
 0x6cd   : > { %12373 = vmatprep.subr.bf16.mxu0 %v14149_v24  ;;  %v14243_v24 = vcombine.high %v6092_v18, %v6100_v19  ;;  %v6180_v41 = vld [vmem:[%s18730_s25 + $0x1250] sm:$0xff] }
 0x6cf   : > { %12210 = vmatpush1.bf16.msra.mxu1 %v14146_v34  ;;  %v6117_v34 = vld [vmem:[%s18730_s25 + $0x1058] sm:$0xff] }
 0x6d0   : > { %12374 = vmatpush1.bf16.msra.mxu0 %v14148_v35  ;;  %12211 = vmatprep.subr.bf16.mxu1 %v14163_v36  ;;  %v14242_v35 = vcombine.low %v6092_v18, %v6100_v19  ;;  %v14244_v36 = vcombine.low %v6093_v20, %v6101_v40  ;;  %v14261_v43 = vcombine.high %v6109_v33, %v6117_v34  ;;  %v6188_v19 = vld [vmem:[%s18730_s25 + $0x1290] sm:$0xff]  ;;  %v6189_v40 = vld [vmem:[%s18730_s25 + $0x1298] sm:$0xff] }
 0x6d1   : > { %12375 = vmatprep.subr.bf16.mxu0 %v14165_v37  ;;  %v14259_v37 = vcombine.high %v6108_v29, %v6116_v30  ;;  %v6196_v20 = vld [vmem:[%s18730_s25 + $0x12d0] sm:$0xff] }
 0x6d2   : > { %v6204_v30 = vld [vmem:[%s18730_s25 + $0x1310] sm:$0xff] }
 0x6d3   : > { %12212 = vmatpush1.bf16.msra.mxu1 %v14162_v51  ;;  %v6125_v51 = vld [vmem:[%s18730_s25 + $0x1098] sm:$0xff] }
 0x6d4   : > { %12376 = vmatpush1.bf16.msra.mxu0 %v14164_v13  ;;  %12213 = vmatprep.subr.bf16.mxu1 %v14179_v53  ;;  %v6133_v13 = vld [vmem:[%s18730_s25 + $0x10d8] sm:$0xff]  ;;  %v14260_v53 = vcombine.low %v6109_v33, %v6117_v34  ;;  %v6212_v33 = vld [vmem:[%s18730_s25 + $0x1350] sm:$0xff] }
 0x6d5   : > { %12377 = vmatprep.subr.bf16.mxu0 %v14181_v25  ;;  %v14275_v25 = vcombine.high %v6124_v1, %v6132_v45  ;;  %v14277_v58 = vcombine.high %v6125_v51, %v6133_v13  ;;  %v6205_v34 = vld [vmem:[%s18730_s25 + $0x1318] sm:$0xff] }
 0x6d7   : > { %12214 = vmatpush1.bf16.msra.mxu1 %v14178_v49  ;;  %v6149_v49 = vld [vmem:[%s18730_s25 + $0x1158] sm:$0xff] }
 0x6d8   : > { %12378 = vmatpush1.bf16.msra.mxu0 %v14180_v50  ;;  %12215 = vmatprep.subr.bf16.mxu1 %v14195_v3  ;;  %v14274_v50 = vcombine.low %v6124_v1, %v6132_v45  ;;  %v14276_v3 = vcombine.low %v6125_v51, %v6133_v13  ;;  %v14293_v54 = vcombine.high %v6141_v48, %v6149_v49  ;;  %v6220_v45 = vld [vmem:[%s18730_s25 + $0x1390] sm:$0xff]  ;;  %v6221_v51 = vld [vmem:[%s18730_s25 + $0x1398] sm:$0xff] }
 0x6d9   : > { %12379 = vmatprep.subr.bf16.mxu0 %v14197_v52  ;;  %v14291_v52 = vcombine.high %v6140_v56, %v6148_v57  ;;  %v6229_v13 = vld [vmem:[%s18730_s25 + $0x13d8] sm:$0xff] }
 0x6db   : > { %12216 = vmatpush1.bf16.msra.mxu1 %v14194_v62  ;;  %v6165_v62 = vld [vmem:[%s18730_s25 + $0x11d8] sm:$0xff] }
 0x6dc   : > { %12380 = vmatpush1.bf16.msra.mxu0 %v14196_v0  ;;  %12217 = vmatprep.subr.bf16.mxu1 %v14211_v2  ;;  %v14290_v0 = vcombine.low %v6140_v56, %v6148_v57  ;;  %v14292_v2 = vcombine.low %v6141_v48, %v6149_v49  ;;  %v14309_v5 = vcombine.high %v6157_v61, %v6165_v62  ;;  %v6244_v48 = vld [vmem:[%s18730_s25 + $0x1450] sm:$0xff]  ;;  %v6237_v49 = vld [vmem:[%s18730_s25 + $0x1418] sm:$0xff] }
 0x6dd   : > { %12381 = vmatprep.subr.bf16.mxu0 %v14213_v4  ;;  %v14307_v4 = vcombine.high %v6156_v55, %v6164_v60  ;;  %v14373_v57 = vcombine.high %v6221_v51, %v6229_v13 }
 0x6df   : > { %12218 = vmatpush1.bf16.msra.mxu1 %v14210_v8  ;;  %v6181_v8 = vld [vmem:[%s18730_s25 + $0x1258] sm:$0xff] }
 0x6e0   : > { %12382 = vmatpush1.bf16.msra.mxu0 %v14212_v9  ;;  %12219 = vmatprep.subr.bf16.mxu1 %v14227_v11  ;;  %v14306_v9 = vcombine.low %v6156_v55, %v6164_v60  ;;  %v14308_v11 = vcombine.low %v6157_v61, %v6165_v62  ;;  %v14325_v18 = vcombine.high %v6173_v6, %v6181_v8  ;;  %v6252_v60 = vld [vmem:[%s18730_s25 + $0x1490] sm:$0xff]  ;;  %v6253_v62 = vld [vmem:[%s18730_s25 + $0x1498] sm:$0xff] }
 0x6e1   : > { %12383 = vmatprep.subr.bf16.mxu0 %v14229_v14  ;;  %v14323_v14 = vcombine.high %v6172_v63, %v6180_v41  ;;  %v6260_v61 = vld [vmem:[%s18730_s25 + $0x14d0] sm:$0xff] }
 0x6e3   : > { %12220 = vmatpush1.bf16.msra.mxu1 %v14226_v22  ;;  %v6197_v22 = vld [vmem:[%s18730_s25 + $0x12d8] sm:$0xff] }
 0x6e4   : > { %12384 = vmatpush1.bf16.msra.mxu0 %v14228_v23  ;;  %12221 = vmatprep.subr.bf16.mxu1 %v14243_v24  ;;  %v14322_v23 = vcombine.low %v6172_v63, %v6180_v41  ;;  %v14324_v24 = vcombine.low %v6173_v6, %v6181_v8  ;;  %v14341_v29 = vcombine.high %v6189_v40, %v6197_v22  ;;  %v6268_v41 = vld [vmem:[%s18730_s25 + $0x1510] sm:$0xff]  ;;  %v6269_v8 = vld [vmem:[%s18730_s25 + $0x1518] sm:$0xff] }
 0x6e5   : > { %12385 = vmatprep.subr.bf16.mxu0 %v14245_v26  ;;  %v14339_v26 = vcombine.high %v6188_v19, %v6196_v20  ;;  %v6276_v6 = vld [vmem:[%s18730_s25 + $0x1550] sm:$0xff] }
 0x6e7   : > { %12222 = vmatpush1.bf16.msra.mxu1 %v14242_v35  ;;  %v6213_v35 = vld [vmem:[%s18730_s25 + $0x1358] sm:$0xff] }
 0x6e8   : > { %12386 = vmatpush1.bf16.msra.mxu0 %v14244_v36  ;;  %12232 = vmatprep.subr.bf16.mxu1 %v14259_v37  ;;  %v14338_v36 = vcombine.low %v6188_v19, %v6196_v20  ;;  %v14340_v37 = vcombine.low %v6189_v40, %v6197_v22  ;;  %v14357_v1 = vcombine.high %v6205_v34, %v6213_v35  ;;  %v6284_v20 = vld [vmem:[%s18730_s25 + $0x1590] sm:$0xff]  ;;  %v6285_v22 = vld [vmem:[%s18730_s25 + $0x1598] sm:$0xff] }
 0x6e9   : > { %12396 = vmatprep.subr.bf16.mxu0 %v14261_v43  ;;  %v14355_v43 = vcombine.high %v6204_v30, %v6212_v33  ;;  %v6292_v40 = vld [vmem:[%s18730_s25 + $0x15d0] sm:$0xff] }
 0x6ea   : > { %12224 = vmatmul.mubr.bf16.vlgmr.msra.gmra.mrb[20].mxu1 %v18898_v44 }
 0x6eb   : > { %12388 = vmatmul.mubr.bf16.vlgmr.msra.gmra.mrb[16].mxu0 %v18898_v44  ;;  %12233 = vmatpush1.bf16.msra.mxu1 %v14258_v47  ;;  %v6228_v47 = vld [vmem:[%s18730_s25 + $0x13d0] sm:$0xff] }
 0x6ec   : > { %12264 = vmatprep.mubr.bf16.mxu1 %v18983_v27  ;;  %12397 = vmatpush1.bf16.msra.mxu0 %v14260_v53  ;;  %v14354_v53 = vcombine.low %v6204_v30, %v6212_v33  ;;  %v14371_v56 = vcombine.high %v6220_v45, %v6228_v47  ;;  %v6300_v33 = vld [vmem:[%s18730_s25 + $0x1610] sm:$0xff] }
 0x6ed   : > { %12428 = vmatprep.mubr.bf16.mxu0 %v18983_v27  ;;  %12234 = vmatprep.subr.bf16.mxu1 %v14275_v25  ;;  %v14356_v25 = vcombine.low %v6205_v34, %v6213_v35  ;;  %v6308_v34 = vld [vmem:[%s18730_s25 + $0x1650] sm:$0xff]  ;;  %v6301_v35 = vld [vmem:[%s18730_s25 + $0x1618] sm:$0xff] }
 0x6ee   : > { %12398 = vmatprep.subr.bf16.mxu0 %v14277_v58  ;;  %v6236_v58 = vld [vmem:[%s18730_s25 + $0x1410] sm:$0xff] }
 0x6ef   : > { %12235 = vmatpush1.bf16.msra.mxu1 %v14274_v50  ;;  %v6245_v50 = vld [vmem:[%s18730_s25 + $0x1458] sm:$0xff] }
 0x6f0   : > { %12399 = vmatpush1.bf16.msra.mxu0 %v14276_v3  ;;  %12236 = vmatprep.subr.bf16.mxu1 %v14291_v52  ;;  %v14370_v3 = vcombine.low %v6220_v45, %v6228_v47  ;;  %v14372_v52 = vcombine.low %v6221_v51, %v6229_v13  ;;  %v14389_v55 = vcombine.high %v6237_v49, %v6245_v50  ;;  %v6316_v47 = vld [vmem:[%s18730_s25 + $0x1690] sm:$0xff]  ;;  %v6317_v13 = vld [vmem:[%s18730_s25 + $0x1698] sm:$0xff] }
 0x6f1   : > { %12400 = vmatprep.subr.bf16.mxu0 %v14293_v54  ;;  %v14387_v54 = vcombine.high %v6236_v58, %v6244_v48  ;;  %v6324_v51 = vld [vmem:[%s18730_s25 + $0x16d0] sm:$0xff] }
 0x6f3   : > { %12237 = vmatpush1.bf16.msra.mxu1 %v14290_v0  ;;  %v6261_v0 = vld [vmem:[%s18730_s25 + $0x14d8] sm:$0xff] }
 0x6f4   : > { %12401 = vmatpush1.bf16.msra.mxu0 %v14292_v2  ;;  %12238 = vmatprep.subr.bf16.mxu1 %v14307_v4  ;;  %v14386_v2 = vcombine.low %v6236_v58, %v6244_v48  ;;  %v14388_v4 = vcombine.low %v6237_v49, %v6245_v50  ;;  %v14405_v63 = vcombine.high %v6253_v62, %v6261_v0  ;;  %v6332_v48 = vld [vmem:[%s18730_s25 + $0x1710] sm:$0xff]  ;;  %v6333_v50 = vld [vmem:[%s18730_s25 + $0x1718] sm:$0xff] }
 0x6f5   : > { %12402 = vmatprep.subr.bf16.mxu0 %v14309_v5  ;;  %v14403_v5 = vcombine.high %v6252_v60, %v6260_v61  ;;  %v6340_v49 = vld [vmem:[%s18730_s25 + $0x1750] sm:$0xff] }
 0x6f7   : > { %12239 = vmatpush1.bf16.msra.mxu1 %v14306_v9  ;;  %v6277_v9 = vld [vmem:[%s18730_s25 + $0x1558] sm:$0xff] }
 0x6f8   : > { %12403 = vmatpush1.bf16.msra.mxu0 %v14308_v11  ;;  %12240 = vmatprep.subr.bf16.mxu1 %v14323_v14  ;;  %v14402_v11 = vcombine.low %v6252_v60, %v6260_v61  ;;  %v14404_v14 = vcombine.low %v6253_v62, %v6261_v0  ;;  %v14421_v19 = vcombine.high %v6269_v8, %v6277_v9  ;;  %v6348_v61 = vld [vmem:[%s18730_s25 + $0x1790] sm:$0xff]  ;;  %v6349_v0 = vld [vmem:[%s18730_s25 + $0x1798] sm:$0xff] }
 0x6f9   : > { %12404 = vmatprep.subr.bf16.mxu0 %v14325_v18  ;;  %v14419_v18 = vcombine.high %v6268_v41, %v6276_v6  ;;  %v6356_v62 = vld [vmem:[%s18730_s25 + $0x17d0] sm:$0xff] }
 0x6fb   : > { %12241 = vmatpush1.bf16.msra.mxu1 %v14322_v23  ;;  %v6293_v23 = vld [vmem:[%s18730_s25 + $0x15d8] sm:$0xff] }
 0x6fc   : > { %12405 = vmatpush1.bf16.msra.mxu0 %v14324_v24  ;;  %12242 = vmatprep.subr.bf16.mxu1 %v14339_v26  ;;  %v14418_v24 = vcombine.low %v6268_v41, %v6276_v6  ;;  %v14420_v26 = vcombine.low %v6269_v8, %v6277_v9  ;;  %v14437_v30 = vcombine.high %v6285_v22, %v6293_v23  ;;  %v6364_v6 = vld [vmem:[%s18730_s25 + $0x1810] sm:$0xff]  ;;  %v6365_v9 = vld [vmem:[%s18730_s25 + $0x1818] sm:$0xff] }
 0x6fd   : > { %12406 = vmatprep.subr.bf16.mxu0 %v14341_v29  ;;  %v14435_v29 = vcombine.high %v6284_v20, %v6292_v40  ;;  %v6372_v8 = vld [vmem:[%s18730_s25 + $0x1850] sm:$0xff] }
 0x6ff   : > { %12243 = vmatpush1.bf16.msra.mxu1 %v14338_v36  ;;  %v6309_v36 = vld [vmem:[%s18730_s25 + $0x1658] sm:$0xff] }
 0x700   : > { %12407 = vmatpush1.bf16.msra.mxu0 %v14340_v37  ;;  %12244 = vmatprep.subr.bf16.mxu1 %v14355_v43  ;;  %v14434_v37 = vcombine.low %v6284_v20, %v6292_v40  ;;  %v14436_v43 = vcombine.low %v6285_v22, %v6293_v23  ;;  %v14453_v45 = vcombine.high %v6301_v35, %v6309_v36  ;;  %v6380_v40 = vld [vmem:[%s18730_s25 + $0x1890] sm:$0xff] }
 0x701   : > { %12408 = vmatprep.subr.bf16.mxu0 %v14357_v1  ;;  %v14451_v1 = vcombine.high %v6300_v33, %v6308_v34  ;;  %v6388_v22 = vld [vmem:[%s18730_s25 + $0x18d0] sm:$0xff]  ;;  %v14514_v23 = vcombine.low %v6364_v6, %v6372_v8 }
 0x703   : > { %12245 = vmatpush1.bf16.msra.mxu1 %v14354_v53  ;;  %v6325_v53 = vld [vmem:[%s18730_s25 + $0x16d8] sm:$0xff] }
 0x704   : > { %12409 = vmatpush1.bf16.msra.mxu0 %v14356_v25  ;;  %12246 = vmatprep.subr.bf16.mxu1 %v14371_v56  ;;  %v14450_v25 = vcombine.low %v6300_v33, %v6308_v34  ;;  %v14452_v56 = vcombine.low %v6301_v35, %v6309_v36  ;;  %v14469_v58 = vcombine.high %v6317_v13, %v6325_v53  ;;  %v6396_v33 = vld [vmem:[%s18730_s25 + $0x1910] sm:$0xff]  ;;  %v6397_v36 = vld [vmem:[%s18730_s25 + $0x1918] sm:$0xff] }
 0x705   : > { %12410 = vmatprep.subr.bf16.mxu0 %v14373_v57  ;;  %v14467_v57 = vcombine.high %v6316_v47, %v6324_v51  ;;  %v6404_v34 = vld [vmem:[%s18730_s25 + $0x1950] sm:$0xff] }
 0x707   : > { %12247 = vmatpush1.bf16.msra.mxu1 %v14370_v3  ;;  %v6341_v3 = vld [vmem:[%s18730_s25 + $0x1758] sm:$0xff] }
 0x708   : > { %12411 = vmatpush1.bf16.msra.mxu0 %v14372_v52  ;;  %12248 = vmatprep.subr.bf16.mxu1 %v14387_v54  ;;  %v14466_v52 = vcombine.low %v6316_v47, %v6324_v51  ;;  %v14468_v54 = vcombine.low %v6317_v13, %v6325_v53  ;;  %v14485_v60 = vcombine.high %v6333_v50, %v6341_v3  ;;  %v6412_v51 = vld [vmem:[%s18730_s25 + $0x1990] sm:$0xff]  ;;  %v6413_v53 = vld [vmem:[%s18730_s25 + $0x1998] sm:$0xff] }
 0x709   : > { %12412 = vmatprep.subr.bf16.mxu0 %v14389_v55  ;;  %v14483_v55 = vcombine.high %v6332_v48, %v6340_v49  ;;  %v6420_v13 = vld [vmem:[%s18730_s25 + $0x19d0] sm:$0xff] }
 0x70b   : > { %12249 = vmatpush1.bf16.msra.mxu1 %v14386_v2  ;;  %v6357_v2 = vld [vmem:[%s18730_s25 + $0x17d8] sm:$0xff] }
 0x70c   : > { %12413 = vmatpush1.bf16.msra.mxu0 %v14388_v4  ;;  %12250 = vmatprep.subr.bf16.mxu1 %v14403_v5  ;;  %v14482_v4 = vcombine.low %v6332_v48, %v6340_v49  ;;  %v14484_v5 = vcombine.low %v6333_v50, %v6341_v3  ;;  %v14501_v41 = vcombine.high %v6349_v0, %v6357_v2  ;;  %v6428_v49 = vld [vmem:[%s18730_s25 + $0x1a10] sm:$0xff]  ;;  %v6429_v3 = vld [vmem:[%s18730_s25 + $0x1a18] sm:$0xff] }
 0x70d   : > { %12414 = vmatprep.subr.bf16.mxu0 %v14405_v63  ;;  %v14499_v63 = vcombine.high %v6348_v61, %v6356_v62  ;;  %v6436_v50 = vld [vmem:[%s18730_s25 + $0x1a50] sm:$0xff] }
 0x70f   : > { %12251 = vmatpush1.bf16.msra.mxu1 %v14402_v11  ;;  %v6373_v11 = vld [vmem:[%s18730_s25 + $0x1858] sm:$0xff] }
 0x710   : > { %12415 = vmatpush1.bf16.msra.mxu0 %v14404_v14  ;;  %12252 = vmatprep.subr.bf16.mxu1 %v14419_v18  ;;  %v14498_v14 = vcombine.low %v6348_v61, %v6356_v62  ;;  %v14500_v18 = vcombine.low %v6349_v0, %v6357_v2  ;;  %v14517_v20 = vcombine.high %v6365_v9, %v6373_v11  ;;  %v6444_v62 = vld [vmem:[%s18730_s25 + $0x1a90] sm:$0xff]  ;;  %v6445_v2 = vld [vmem:[%s18730_s25 + $0x1a98] sm:$0xff] }
 0x711   : > { %12416 = vmatprep.subr.bf16.mxu0 %v14421_v19  ;;  %v14515_v19 = vcombine.high %v6364_v6, %v6372_v8  ;;  %v6452_v0 = vld [vmem:[%s18730_s25 + $0x1ad0] sm:$0xff] }
 0x712   : > { %v14595_v6 = vcombine.high %v6444_v62, %v6452_v0 }
 0x713   : > { %12253 = vmatpush1.bf16.msra.mxu1 %v14418_v24  ;;  %v6381_v24 = vld [vmem:[%s18730_s25 + $0x1898] sm:$0xff] }
 0x714   : > { %12417 = vmatpush1.bf16.msra.mxu0 %v14420_v26  ;;  %12254 = vmatprep.subr.bf16.mxu1 %v14435_v29  ;;  %v6389_v26 = vld [vmem:[%s18730_s25 + $0x18d8] sm:$0xff]  ;;  %v14516_v29 = vcombine.low %v6365_v9, %v6373_v11  ;;  %v6460_v9 = vld [vmem:[%s18730_s25 + $0x1b10] sm:$0xff] }
 0x715   : > { %12418 = vmatprep.subr.bf16.mxu0 %v14437_v30  ;;  %v14531_v30 = vcombine.high %v6380_v40, %v6388_v22  ;;  %v14533_v35 = vcombine.high %v6381_v24, %v6389_v26  ;;  %v6468_v11 = vld [vmem:[%s18730_s25 + $0x1b50] sm:$0xff] }
 0x717   : > { %12255 = vmatpush1.bf16.msra.mxu1 %v14434_v37  ;;  %v6405_v37 = vld [vmem:[%s18730_s25 + $0x1958] sm:$0xff] }
 0x718   : > { %12419 = vmatpush1.bf16.msra.mxu0 %v14436_v43  ;;  %12256 = vmatprep.subr.bf16.mxu1 %v14451_v1  ;;  %v14530_v43 = vcombine.low %v6380_v40, %v6388_v22  ;;  %v14532_v1 = vcombine.low %v6381_v24, %v6389_v26  ;;  %v14549_v47 = vcombine.high %v6397_v36, %v6405_v37 }
 0x719   : > { %12420 = vmatprep.subr.bf16.mxu0 %v14453_v45  ;;  %v14547_v45 = vcombine.high %v6396_v33, %v6404_v34  ;;  %v14611_v26 = vcombine.high %v6460_v9, %v6468_v11 }
 0x71b   : > { %12257 = vmatpush1.bf16.msra.mxu1 %v14450_v25  ;;  %v6421_v25 = vld [vmem:[%s18730_s25 + $0x19d8] sm:$0xff] }
 0x71c   : > { %12421 = vmatpush1.bf16.msra.mxu0 %v14452_v56  ;;  %12258 = vmatprep.subr.bf16.mxu1 %v14467_v57  ;;  %v14546_v56 = vcombine.low %v6396_v33, %v6404_v34  ;;  %v14548_v57 = vcombine.low %v6397_v36, %v6405_v37  ;;  %v14565_v48 = vcombine.high %v6413_v53, %v6421_v25  ;;  %v6476_v34 = vld [vmem:[%s18730_s25 + $0x1b90] sm:$0xff] }
 0x71d   : > { %12422 = vmatprep.subr.bf16.mxu0 %v14469_v58  ;;  %v14563_v58 = vcombine.high %v6412_v51, %v6420_v13 }
 0x71f   : > { %12259 = vmatpush1.bf16.msra.mxu1 %v14466_v52  ;;  %v6437_v52 = vld [vmem:[%s18730_s25 + $0x1a58] sm:$0xff] }
 0x720   : > { %12423 = vmatpush1.bf16.msra.mxu0 %v14468_v54  ;;  %12260 = vmatprep.subr.bf16.mxu1 %v14483_v55  ;;  %v14562_v54 = vcombine.low %v6412_v51, %v6420_v13  ;;  %v14564_v55 = vcombine.low %v6413_v53, %v6421_v25  ;;  %v14581_v61 = vcombine.high %v6429_v3, %v6437_v52 }
 0x721   : > { %12424 = vmatprep.subr.bf16.mxu0 %v14485_v60  ;;  %v14579_v60 = vcombine.high %v6428_v49, %v6436_v50 }
 0x723   : > { %12261 = vmatpush1.bf16.msra.mxu1 %v14482_v4  ;;  %v6453_v4 = vld [vmem:[%s18730_s25 + $0x1ad8] sm:$0xff] }
 0x724   : > { %12425 = vmatpush1.bf16.msra.mxu0 %v14484_v5  ;;  %12262 = vmatprep.subr.bf16.mxu1 %v14499_v63  ;;  %v14578_v5 = vcombine.low %v6428_v49, %v6436_v50  ;;  %v6618_v63 = vld [vmem:[%s19298_s15] sm:$0xff]  ;;  %v14597_v8 = vcombine.high %v6445_v2, %v6453_v4  ;;  %v14596_v24 = vcombine.low %v6445_v2, %v6453_v4  ;;  %v6508_v2 = vld [vmem:[%s18730_s25 + $0x1c90] sm:$0xff] }
 0x725   : > { %12426 = vmatprep.subr.bf16.mxu0 %v14501_v41  ;;  %v14580_v41 = vcombine.low %v6429_v3, %v6437_v52  ;;  %v6629_v40 = vrot.slane %v6618_v63, %v17875_v15  ;;  %v6637_v22 = vrot.slane %v6618_v63, %v18313_v31  ;;  %v6492_v3 = vld [vmem:[%s18730_s25 + $0x1c10] sm:$0xff] }
 0x726   : > { %v6500_v52 = vld [vmem:[%s18730_s25 + $0x1c50] sm:$0xff] }
 0x727   : > { %12263 = vmatpush1.bf16.msra.mxu1 %v14498_v14  ;;  %v6625_v14 = vrot.slane %v6618_v63, %v17869_v12  ;;  %v6516_v4 = vld [vmem:[%s18730_s25 + $0x1cd0] sm:$0xff] }
 0x728   : > { %12427 = vmatpush1.bf16.msra.mxu0 %v14500_v18  ;;  %12273 = vmatprep.subr.bf16.mxu1 %v14515_v19  ;;  %v6633_v18 = vrot.slane %v6618_v63, %v18310_v28  ;;  %v6461_v19 = vld [vmem:[%s18730_s25 + $0x1b18] sm:$0xff] }
 0x729   : > { %12437 = vmatprep.subr.bf16.mxu0 %v14517_v20  ;;  %v6469_v20 = vld [vmem:[%s18730_s25 + $0x1b58] sm:$0xff] }
 0x72a   : > { %12265 = vmatmul.mubr.bf16.vlgmr.msra.gmra.mrb[20].mxu1 %v18985_v32  ;;  %v14613_v33 = vcombine.high %v6461_v19, %v6469_v20  ;;  %v6517_v63 = vld [vmem:[%s18730_s25 + $0x1cd8] sm:$0xff] }
 0x72b   : > { %12429 = vmatmul.mubr.bf16.vlgmr.msra.gmra.mrb[16].mxu0 %v18985_v32  ;;  %12274 = vmatpush1.bf16.msra.mxu1 %v14514_v23  ;;  %v14594_v23 = vcombine.low %v6444_v62, %v6452_v0  ;;  %v14643_v62 = vcombine.high %v6492_v3, %v6500_v52 }
 0x72c   : > { %12305 = vmatprep.mubr.bf16.mxu1 %v18993_v39  ;;  %12438 = vmatpush1.bf16.msra.mxu0 %v14516_v29 }
 0x72d   : > { %12469 = vmatprep.mubr.bf16.mxu0 %v18993_v39  ;;  %12275 = vmatprep.subr.bf16.mxu1 %v14531_v30 }
 0x72e   : > { %12439 = vmatprep.subr.bf16.mxu0 %v14533_v35  ;;  %v6484_v35 = vld [vmem:[%s18730_s25 + $0x1bd0] sm:$0xff] }
 0x72f   : > { %12276 = vmatpush1.bf16.msra.mxu1 %v14530_v43  ;;  %v14627_v49 = vcombine.high %v6476_v34, %v6484_v35 }
 0x730   : > { %12440 = vmatpush1.bf16.msra.mxu0 %v14532_v1  ;;  %12277 = vmatprep.subr.bf16.mxu1 %v14547_v45  ;;  %v6477_v45 = vld [vmem:[%s18730_s25 + $0x1b98] sm:$0xff] }
 0x731   : > { %12441 = vmatprep.subr.bf16.mxu0 %v14549_v47  ;;  %v6485_v47 = vld [vmem:[%s18730_s25 + $0x1bd8] sm:$0xff] }
 0x732   : > { %v14629_v50 = vcombine.high %v6477_v45, %v6485_v47 }
 0x733   : > { %12278 = vmatpush1.bf16.msra.mxu1 %v14546_v56  ;;  %v14610_v56 = vcombine.low %v6460_v9, %v6468_v11  ;;  %v6524_v11 = vld [vmem:[%s18730_s25 + $0x1d10] sm:$0xff] }
 0x734   : > { %12442 = vmatpush1.bf16.msra.mxu0 %v14548_v57  ;;  %12279 = vmatprep.subr.bf16.mxu1 %v14563_v58 }
 0x735   : > { %12443 = vmatprep.subr.bf16.mxu0 %v14565_v48  ;;  %v14612_v48 = vcombine.low %v6461_v19, %v6469_v20  ;;  %v6525_v19 = vld [vmem:[%s18730_s25 + $0x1d18] sm:$0xff] }
 0x736   : > { %v6533_v20 = vld [vmem:[%s18730_s25 + $0x1d58] sm:$0xff] }
 0x737   : > { %12280 = vmatpush1.bf16.msra.mxu1 %v14562_v54  ;;  %v6493_v54 = vld [vmem:[%s18730_s25 + $0x1c18] sm:$0xff] }
 0x738   : > { %12444 = vmatpush1.bf16.msra.mxu0 %v14564_v55  ;;  %12281 = vmatprep.subr.bf16.mxu1 %v14579_v60  ;;  %v6501_v55 = vld [vmem:[%s18730_s25 + $0x1c58] sm:$0xff]  ;;  %v14626_v60 = vcombine.low %v6476_v34, %v6484_v35  ;;  %v6540_v34 = vld [vmem:[%s18730_s25 + $0x1d90] sm:$0xff] }
 0x739   : > { %12445 = vmatprep.subr.bf16.mxu0 %v14581_v61  ;;  %v14628_v61 = vcombine.low %v6477_v45, %v6485_v47  ;;  %v14645_v0 = vcombine.high %v6493_v54, %v6501_v55  ;;  %v6548_v35 = vld [vmem:[%s18730_s25 + $0x1dd0] sm:$0xff] }
 0x73b   : > { %12282 = vmatpush1.bf16.msra.mxu1 %v14578_v5  ;;  %v6509_v5 = vld [vmem:[%s18730_s25 + $0x1c98] sm:$0xff] }
 0x73c   : > { %12446 = vmatpush1.bf16.msra.mxu0 %v14580_v41  ;;  %12283 = vmatprep.subr.bf16.mxu1 %v14595_v6  ;;  %v14642_v41 = vcombine.low %v6492_v3, %v6500_v52  ;;  %v14644_v6 = vcombine.low %v6493_v54, %v6501_v55  ;;  %v14661_v9 = vcombine.high %v6509_v5, %v6517_v63  ;;  %v6572_v54 = vld [vmem:[%s18730_s25 + $0x1e90] sm:$0xff] }
 0x73d   : > { %v11979_v29 = vpop.f32.mrb[16].mxu1  ;;  %v12143_v30 = vpop.f32.mrb[12].mxu0  ;;  %12447 = vmatprep.subr.bf16.mxu0 %v14597_v8  ;;  %v14659_v8 = vcombine.high %v6508_v2, %v6516_v4  ;;  %v6580_v55 = vld [vmem:[%s18730_s25 + $0x1ed0] sm:$0xff] }
 0x73e   : > { %v14779_v36 = vadd.f32 %v11979_v29, %v6625_v14  ;;  %v14781_v37 = vadd.f32 %v12143_v30, %v6633_v18  ;;  %v11981_v43 = vpop.f32.mrb[17].mxu1  ;;  %v12145_v1 = vpop.f32.mrb[13].mxu0  ;;  %v6532_v14 = vld [vmem:[%s18730_s25 + $0x1d50] sm:$0xff] }
 0x73f   : > { %v14780_v51 = vadd.f32 %v11981_v43, %v6629_v40  ;;  %v14782_v13 = vadd.f32 %v12145_v1, %v6637_v22  ;;  %v11983_v53 = vpop.f32.mrb[18].mxu1  ;;  %v12147_v25 = vpop.f32.mrb[14].mxu0  ;;  %12284 = vmatpush1.bf16.msra.mxu1 %v14594_v23  ;;  %v14658_v22 = vcombine.low %v6508_v2, %v6516_v4  ;;  %v6549_v43 = vld [vmem:[%s18730_s25 + $0x1dd8] sm:$0xff]  ;;  %v14674_v45 = vcombine.low %v6524_v11, %v6532_v14 }
 0x740   : > { %15181 = vtanh.f32 %v14779_v36  ;;  %12448 = vmatpush1.bf16.msra.mxu0 %v14596_v24  ;;  %v11984_v57 = vpop.f32.mrb[19].mxu1  ;;  %v12148_v58 = vpop.f32.mrb[15].mxu0  ;;  %12285 = vmatprep.subr.bf16.mxu1 %v14611_v26  ;;  %v14660_v24 = vcombine.low %v6509_v5, %v6517_v63  ;;  %v14675_v26 = vcombine.high %v6524_v11, %v6532_v14  ;;  %v6556_v25 = vld [vmem:[%s18730_s25 + $0x1e10] sm:$0xff]  ;;  %v14723_v2 = vcombine.high %v6572_v54, %v6580_v55 }
 0x741   : > { %15183 = vtanh.f32 %v14781_v37  ;;  %12449 = vmatprep.subr.bf16.mxu0 %v14613_v33  ;;  %v14677_v33 = vcombine.high %v6525_v19, %v6533_v20  ;;  %v6541_v37 = vld [vmem:[%s18730_s25 + $0x1d98] sm:$0xff]  ;;  %v6588_v5 = vld [vmem:[%s18730_s25 + $0x1f10] sm:$0xff] }
 0x742   : > { %15185 = vtanh.f32 %v14780_v51  ;;  %v14676_v51 = vcombine.low %v6525_v19, %v6533_v20  ;;  %v14693_v53 = vcombine.high %v6541_v37, %v6549_v43  ;;  %v6557_v58 = vld [vmem:[%s18730_s25 + $0x1e18] sm:$0xff]  ;;  %v6596_v63 = vld [vmem:[%s18730_s25 + $0x1f50] sm:$0xff] }
 0x743   : > { %15187 = vtanh.f32 %v14782_v13  ;;  %12286 = vmatpush1.bf16.msra.mxu1 %v14610_v56  ;;  %v14691_v13 = vcombine.high %v6540_v34, %v6548_v35  ;;  %v6564_v56 = vld [vmem:[%s18730_s25 + $0x1e50] sm:$0xff]  ;;  %v14739_v11 = vcombine.high %v6588_v5, %v6596_v63  ;;  %v6605_v20 = vld [vmem:[%s18730_s25 + $0x1f98] sm:$0xff] }
 0x744   : > { %12450 = vmatpush1.bf16.msra.mxu0 %v14612_v48  ;;  %12287 = vmatprep.subr.bf16.mxu1 %v14627_v49  ;;  %v6565_v48 = vld [vmem:[%s18730_s25 + $0x1e58] sm:$0xff]  ;;  %v14690_v49 = vcombine.low %v6540_v34, %v6548_v35  ;;  %v14707_v3 = vcombine.high %v6556_v25, %v6564_v56  ;;  %v6612_v19 = vld [vmem:[%s18730_s25 + $0x1fd0] sm:$0xff]  ;;  %v5607_v34 = vld [vmem:[%s18730_s25 + $0x68] sm:$0xff] }
 0x745   : > { %12451 = vmatprep.subr.bf16.mxu0 %v14629_v50  ;;  %v14692_v50 = vcombine.low %v6541_v37, %v6549_v43  ;;  %v14709_v52 = vcombine.high %v6557_v58, %v6565_v48 }
 0x747   : > { %12288 = vmatpush1.bf16.msra.mxu1 %v14626_v60  ;;  %v6573_v60 = vld [vmem:[%s18730_s25 + $0x1e98] sm:$0xff] }
 0x748   : > { %12452 = vmatpush1.bf16.msra.mxu0 %v14628_v61  ;;  %12289 = vmatprep.subr.bf16.mxu1 %v14643_v62  ;;  %v6581_v61 = vld [vmem:[%s18730_s25 + $0x1ed8] sm:$0xff]  ;;  %v14706_v62 = vcombine.low %v6556_v25, %v6564_v56  ;;  %v5630_v56 = vld [vmem:[%s18730_s25 + $0x120] sm:$0xff] }
 0x749   : > { %12453 = vmatprep.subr.bf16.mxu0 %v14645_v0  ;;  %v14708_v0 = vcombine.low %v6557_v58, %v6565_v48  ;;  %v14725_v4 = vcombine.high %v6573_v60, %v6581_v61  ;;  %v5631_v48 = vld [vmem:[%s18730_s25 + $0x128] sm:$0xff] }
 0x74a   : > { %v15182_v18 = vpop.eup %15181 }
 0x74b   : > { %v15184_v40 = vpop.eup %15183  ;;  %12290 = vmatpush1.bf16.msra.mxu1 %v14642_v41  ;;  %v6589_v41 = vld [vmem:[%s18730_s25 + $0x1f18] sm:$0xff] }
 0x74c   : > { %v15186_v23 = vpop.eup %15185  ;;  %12454 = vmatpush1.bf16.msra.mxu0 %v14644_v6  ;;  %12291 = vmatprep.subr.bf16.mxu1 %v14659_v8  ;;  %v6597_v6 = vld [vmem:[%s18730_s25 + $0x1f58] sm:$0xff]  ;;  %v14722_v8 = vcombine.low %v6572_v54, %v6580_v55  ;;  %v5646_v55 = vld [vmem:[%s18730_s25 + $0x1a0] sm:$0xff] }
 0x74d   : > { %v15188_v29 = vpop.eup %15187  ;;  %v13166_v30 = vcombine.low %v15182_v18, %v15186_v23  ;;  %12455 = vmatprep.subr.bf16.mxu0 %v14661_v9  ;;  %v14724_v9 = vcombine.low %v6573_v60, %v6581_v61  ;;  %v14741_v14 = vcombine.high %v6589_v41, %v6597_v6  ;;  %v6604_v18 = vld [vmem:[%s18730_s25 + $0x1f90] sm:$0xff]  ;;  %v14740_v23 = vcombine.low %v6589_v41, %v6597_v6  ;;  %v5654_v60 = vld [vmem:[%s18730_s25 + $0x1e0] sm:$0xff]  ;;  %v5647_v61 = vld [vmem:[%s18730_s25 + $0x1a8] sm:$0xff] }
 0x74e   : > { %v13167_v36 = vcombine.low %v15184_v40, %v15188_v29  ;;  %v6613_v40 = vld [vmem:[%s18730_s25 + $0x1fd8] sm:$0xff]  ;;  %v5598_v29 = vld [vmem:[%s18730_s25 + $0x20] sm:$0xff]  ;;  %v14754_v35 = vcombine.low %v6604_v18, %v6612_v19  ;;  %v5663_v6 = vld [vmem:[%s18730_s25 + $0x228] sm:$0xff] }
 0x74f   : > { %v13174_v1 = vrot.slane %v13166_v30, %v17414_v16  ;;  %12292 = vmatpush1.bf16.msra.mxu1 %v14658_v22  ;;  %v14738_v22 = vcombine.low %v6588_v5, %v6596_v63  ;;  %v5606_v30 = vld [vmem:[%s18730_s25 + $0x60] sm:$0xff] }
 0x750   : > { %v13181_v47 = vrot.slane %v13167_v36, %v17414_v16  ;;  %12456 = vmatpush1.bf16.msra.mxu0 %v14660_v24  ;;  %12293 = vmatprep.subr.bf16.mxu1 %v14675_v26  ;;  %v14755_v24 = vcombine.high %v6604_v18, %v6612_v19  ;;  %v14757_v26 = vcombine.high %v6605_v20, %v6613_v40  ;;  %v5662_v63 = vld [vmem:[%s18730_s25 + $0x220] sm:$0xff] }
 0x751   : > { %12457 = vmatprep.subr.bf16.mxu0 %v14677_v33  ;;  %v5599_v33 = vld [vmem:[%s18730_s25 + $0x28] sm:$0xff]  ;;  %v14756_v36 = vcombine.low %v6605_v20, %v6613_v40  ;;  %v13751_v37 = vcombine.high %v5598_v29, %v5606_v30  ;;  %v5670_v41 = vld [vmem:[%s18730_s25 + $0x260] sm:$0xff] }
 0x752   : > { %v13182_v57 = vcombine.low %v13174_v1, %v13181_v47  ;;  %v13753_v43 = vcombine.high %v5599_v33, %v5607_v34  ;;  %v5614_v1 = vld [vmem:[%s18730_s25 + $0xa0] sm:$0xff]  ;;  %v13750_v47 = vcombine.low %v5598_v29, %v5606_v30  ;;  %v5679_v40 = vld [vmem:[%s18730_s25 + $0x2a8] sm:$0xff] }
 0x753   : > { %12294 = vmatpush1.bf16.msra.mxu1 %v14674_v45  ;;  %v5622_v45 = vld [vmem:[%s18730_s25 + $0xe0] sm:$0xff] }
 0x754   : > { %13238 = vst [vmem:[%s19339_s19] sm:$0xff] %v13182_v57  ;;  %12458 = vmatpush1.bf16.msra.mxu0 %v14676_v51  ;;  %12295 = vmatprep.subr.bf16.mxu1 %v14691_v13  ;;  %v5615_v51 = vld [vmem:[%s18730_s25 + $0xa8] sm:$0xff]  ;;  %v13767_v25 = vcombine.high %v5614_v1, %v5622_v45  ;;  %v5638_v57 = vld [vmem:[%s18730_s25 + $0x160] sm:$0xff] }
 0x755   : > { %12459 = vmatprep.subr.bf16.mxu0 %v14693_v53  ;;  %v5623_v13 = vld [vmem:[%s18730_s25 + $0xe8] sm:$0xff]  ;;  %v13752_v53 = vcombine.low %v5599_v33, %v5607_v34  ;;  %v5678_v19 = vld [vmem:[%s18730_s25 + $0x2a0] sm:$0xff] }
 0x756   : > { %v13769_v58 = vcombine.high %v5615_v51, %v5623_v13  ;;  %v5686_v20 = vld [vmem:[%s18730_s25 + $0x2e0] sm:$0xff]  ;;  %v5695_v34 = vld [vmem:[%s18730_s25 + $0x328] sm:$0xff] }
 0x757   : > { %12296 = vmatpush1.bf16.msra.mxu1 %v14690_v49  ;;  %v5639_v49 = vld [vmem:[%s18730_s25 + $0x168] sm:$0xff]  ;;  %v5694_v30 = vld [vmem:[%s18730_s25 + $0x320] sm:$0xff] }
 0x758   : > { %12460 = vmatpush1.bf16.msra.mxu0 %v14692_v50  ;;  %12297 = vmatprep.subr.bf16.mxu1 %v14707_v3  ;;  %v13766_v50 = vcombine.low %v5614_v1, %v5622_v45  ;;  %v13768_v3 = vcombine.low %v5615_v51, %v5623_v13  ;;  %v13785_v54 = vcombine.high %v5631_v48, %v5639_v49  ;;  %v5702_v33 = vld [vmem:[%s18730_s25 + $0x360] sm:$0xff]  ;;  %v5711_v51 = vld [vmem:[%s18730_s25 + $0x3a8] sm:$0xff] }
 0x759   : > { %12461 = vmatprep.subr.bf16.mxu0 %v14709_v52  ;;  %v13783_v52 = vcombine.high %v5630_v56, %v5638_v57  ;;  %v5710_v45 = vld [vmem:[%s18730_s25 + $0x3a0] sm:$0xff]  ;;  %v5719_v13 = vld [vmem:[%s18730_s25 + $0x3e8] sm:$0xff] }
 0x75b   : > { %12298 = vmatpush1.bf16.msra.mxu1 %v14706_v62  ;;  %v5655_v62 = vld [vmem:[%s18730_s25 + $0x1e8] sm:$0xff] }
 0x75c   : > { %12462 = vmatpush1.bf16.msra.mxu0 %v14708_v0  ;;  %12299 = vmatprep.subr.bf16.mxu1 %v14723_v2  ;;  %v13782_v0 = vcombine.low %v5630_v56, %v5638_v57  ;;  %v13784_v2 = vcombine.low %v5631_v48, %v5639_v49  ;;  %v13801_v5 = vcombine.high %v5647_v61, %v5655_v62  ;;  %v5734_v48 = vld [vmem:[%s18730_s25 + $0x460] sm:$0xff]  ;;  %v5727_v49 = vld [vmem:[%s18730_s25 + $0x428] sm:$0xff] }
 0x75d   : > { %12463 = vmatprep.subr.bf16.mxu0 %v14725_v4  ;;  %v13799_v4 = vcombine.high %v5646_v55, %v5654_v60  ;;  %v13865_v57 = vcombine.high %v5711_v51, %v5719_v13 }
 0x75f   : > { %12300 = vmatpush1.bf16.msra.mxu1 %v14722_v8  ;;  %v5671_v8 = vld [vmem:[%s18730_s25 + $0x268] sm:$0xff] }
 0x760   : > { %12464 = vmatpush1.bf16.msra.mxu0 %v14724_v9  ;;  %12301 = vmatprep.subr.bf16.mxu1 %v14739_v11  ;;  %v13798_v9 = vcombine.low %v5646_v55, %v5654_v60  ;;  %v13800_v11 = vcombine.low %v5647_v61, %v5655_v62  ;;  %v13817_v18 = vcombine.high %v5663_v6, %v5671_v8  ;;  %v5742_v60 = vld [vmem:[%s18730_s25 + $0x4a0] sm:$0xff]  ;;  %v5743_v62 = vld [vmem:[%s18730_s25 + $0x4a8] sm:$0xff] }
 0x761   : > { %12465 = vmatprep.subr.bf16.mxu0 %v14741_v14  ;;  %v13815_v14 = vcombine.high %v5662_v63, %v5670_v41  ;;  %v5750_v61 = vld [vmem:[%s18730_s25 + $0x4e0] sm:$0xff] }
 0x763   : > { %12302 = vmatpush1.bf16.msra.mxu1 %v14738_v22  ;;  %v5687_v22 = vld [vmem:[%s18730_s25 + $0x2e8] sm:$0xff] }
 0x764   : > { %12466 = vmatpush1.bf16.msra.mxu0 %v14740_v23  ;;  %12303 = vmatprep.subr.bf16.mxu1 %v14755_v24  ;;  %v13814_v23 = vcombine.low %v5662_v63, %v5670_v41  ;;  %v13816_v24 = vcombine.low %v5663_v6, %v5671_v8  ;;  %v13833_v29 = vcombine.high %v5679_v40, %v5687_v22  ;;  %v5758_v41 = vld [vmem:[%s18730_s25 + $0x520] sm:$0xff]  ;;  %v5759_v8 = vld [vmem:[%s18730_s25 + $0x528] sm:$0xff] }
 0x765   : > { %12467 = vmatprep.subr.bf16.mxu0 %v14757_v26  ;;  %v13831_v26 = vcombine.high %v5678_v19, %v5686_v20  ;;  %v5766_v6 = vld [vmem:[%s18730_s25 + $0x560] sm:$0xff] }
 0x767   : > { %12304 = vmatpush1.bf16.msra.mxu1 %v14754_v35  ;;  %v5703_v35 = vld [vmem:[%s18730_s25 + $0x368] sm:$0xff] }
 0x768   : > { %12468 = vmatpush1.bf16.msra.mxu0 %v14756_v36  ;;  %12478 = vmatprep.subr.bf16.mxu1 %v13751_v37  ;;  %v13830_v36 = vcombine.low %v5678_v19, %v5686_v20  ;;  %v13832_v37 = vcombine.low %v5679_v40, %v5687_v22  ;;  %v13849_v1 = vcombine.high %v5695_v34, %v5703_v35  ;;  %v5774_v20 = vld [vmem:[%s18730_s25 + $0x5a0] sm:$0xff]  ;;  %v5775_v22 = vld [vmem:[%s18730_s25 + $0x5a8] sm:$0xff] }
 0x769   : > { %12642 = vmatprep.subr.bf16.mxu0 %v13753_v43  ;;  %v13847_v43 = vcombine.high %v5694_v30, %v5702_v33  ;;  %v5782_v40 = vld [vmem:[%s18730_s25 + $0x5e0] sm:$0xff] }
 0x76a   : > { %12306 = vmatmul.mubr.bf16.vlgmr.msra.gmra.mrb[20].mxu1 %v19067_v17 }
 0x76b   : > { %12470 = vmatmul.mubr.bf16.vlgmr.msra.gmra.mrb[16].mxu0 %v19067_v17  ;;  %12479 = vmatpush1.bf16.msra.mxu1 %v13750_v47  ;;  %v5718_v47 = vld [vmem:[%s18730_s25 + $0x3e0] sm:$0xff] }
 0x76c   : > { %12510 = vmatprep.mubr.bf16.mxu1 %v18819_v7  ;;  %12643 = vmatpush1.bf16.msra.mxu0 %v13752_v53  ;;  %v13846_v53 = vcombine.low %v5694_v30, %v5702_v33  ;;  %v13863_v56 = vcombine.high %v5710_v45, %v5718_v47  ;;  %v5790_v33 = vld [vmem:[%s18730_s25 + $0x620] sm:$0xff] }
 0x76d   : > { %12674 = vmatprep.mubr.bf16.mxu0 %v18819_v7  ;;  %12480 = vmatprep.subr.bf16.mxu1 %v13767_v25  ;;  %v13848_v25 = vcombine.low %v5695_v34, %v5703_v35  ;;  %v5798_v34 = vld [vmem:[%s18730_s25 + $0x660] sm:$0xff]  ;;  %v5791_v35 = vld [vmem:[%s18730_s25 + $0x628] sm:$0xff] }
 0x76e   : > { %12644 = vmatprep.subr.bf16.mxu0 %v13769_v58  ;;  %v5726_v58 = vld [vmem:[%s18730_s25 + $0x420] sm:$0xff] }
 0x76f   : > { %12481 = vmatpush1.bf16.msra.mxu1 %v13766_v50  ;;  %v5735_v50 = vld [vmem:[%s18730_s25 + $0x468] sm:$0xff] }
 0x770   : > { %12645 = vmatpush1.bf16.msra.mxu0 %v13768_v3  ;;  %12482 = vmatprep.subr.bf16.mxu1 %v13783_v52  ;;  %v13862_v3 = vcombine.low %v5710_v45, %v5718_v47  ;;  %v13864_v52 = vcombine.low %v5711_v51, %v5719_v13  ;;  %v13881_v55 = vcombine.high %v5727_v49, %v5735_v50  ;;  %v5806_v47 = vld [vmem:[%s18730_s25 + $0x6a0] sm:$0xff]  ;;  %v5807_v13 = vld [vmem:[%s18730_s25 + $0x6a8] sm:$0xff] }
 0x771   : > { %12646 = vmatprep.subr.bf16.mxu0 %v13785_v54  ;;  %v13879_v54 = vcombine.high %v5726_v58, %v5734_v48  ;;  %v5814_v51 = vld [vmem:[%s18730_s25 + $0x6e0] sm:$0xff] }
 0x773   : > { %12483 = vmatpush1.bf16.msra.mxu1 %v13782_v0  ;;  %v5751_v0 = vld [vmem:[%s18730_s25 + $0x4e8] sm:$0xff] }
 0x774   : > { %12647 = vmatpush1.bf16.msra.mxu0 %v13784_v2  ;;  %12484 = vmatprep.subr.bf16.mxu1 %v13799_v4  ;;  %v13878_v2 = vcombine.low %v5726_v58, %v5734_v48  ;;  %v13880_v4 = vcombine.low %v5727_v49, %v5735_v50  ;;  %v13897_v63 = vcombine.high %v5743_v62, %v5751_v0  ;;  %v5822_v48 = vld [vmem:[%s18730_s25 + $0x720] sm:$0xff]  ;;  %v5823_v50 = vld [vmem:[%s18730_s25 + $0x728] sm:$0xff] }
 0x775   : > { %12648 = vmatprep.subr.bf16.mxu0 %v13801_v5  ;;  %v13895_v5 = vcombine.high %v5742_v60, %v5750_v61  ;;  %v5830_v49 = vld [vmem:[%s18730_s25 + $0x760] sm:$0xff] }
 0x777   : > { %12485 = vmatpush1.bf16.msra.mxu1 %v13798_v9  ;;  %v5767_v9 = vld [vmem:[%s18730_s25 + $0x568] sm:$0xff] }
 0x778   : > { %12649 = vmatpush1.bf16.msra.mxu0 %v13800_v11  ;;  %12486 = vmatprep.subr.bf16.mxu1 %v13815_v14  ;;  %v13894_v11 = vcombine.low %v5742_v60, %v5750_v61  ;;  %v13896_v14 = vcombine.low %v5743_v62, %v5751_v0  ;;  %v13913_v19 = vcombine.high %v5759_v8, %v5767_v9  ;;  %v5838_v61 = vld [vmem:[%s18730_s25 + $0x7a0] sm:$0xff]  ;;  %v5839_v0 = vld [vmem:[%s18730_s25 + $0x7a8] sm:$0xff] }
 0x779   : > { %12650 = vmatprep.subr.bf16.mxu0 %v13817_v18  ;;  %v13911_v18 = vcombine.high %v5758_v41, %v5766_v6  ;;  %v5846_v62 = vld [vmem:[%s18730_s25 + $0x7e0] sm:$0xff] }
 0x77b   : > { %12487 = vmatpush1.bf16.msra.mxu1 %v13814_v23  ;;  %v5783_v23 = vld [vmem:[%s18730_s25 + $0x5e8] sm:$0xff] }
 0x77c   : > { %12651 = vmatpush1.bf16.msra.mxu0 %v13816_v24  ;;  %12488 = vmatprep.subr.bf16.mxu1 %v13831_v26  ;;  %v13910_v24 = vcombine.low %v5758_v41, %v5766_v6  ;;  %v13912_v26 = vcombine.low %v5759_v8, %v5767_v9  ;;  %v13929_v30 = vcombine.high %v5775_v22, %v5783_v23  ;;  %v5854_v6 = vld [vmem:[%s18730_s25 + $0x820] sm:$0xff]  ;;  %v5855_v9 = vld [vmem:[%s18730_s25 + $0x828] sm:$0xff] }
 0x77d   : > { %12652 = vmatprep.subr.bf16.mxu0 %v13833_v29  ;;  %v13927_v29 = vcombine.high %v5774_v20, %v5782_v40  ;;  %v5862_v8 = vld [vmem:[%s18730_s25 + $0x860] sm:$0xff] }
 0x77f   : > { %12489 = vmatpush1.bf16.msra.mxu1 %v13830_v36  ;;  %v5799_v36 = vld [vmem:[%s18730_s25 + $0x668] sm:$0xff] }
 0x780   : > { %12653 = vmatpush1.bf16.msra.mxu0 %v13832_v37  ;;  %12490 = vmatprep.subr.bf16.mxu1 %v13847_v43  ;;  %v13926_v37 = vcombine.low %v5774_v20, %v5782_v40  ;;  %v13928_v43 = vcombine.low %v5775_v22, %v5783_v23  ;;  %v13945_v45 = vcombine.high %v5791_v35, %v5799_v36  ;;  %v5870_v40 = vld [vmem:[%s18730_s25 + $0x8a0] sm:$0xff] }
 0x781   : > { %12654 = vmatprep.subr.bf16.mxu0 %v13849_v1  ;;  %v13943_v1 = vcombine.high %v5790_v33, %v5798_v34  ;;  %v5878_v22 = vld [vmem:[%s18730_s25 + $0x8e0] sm:$0xff]  ;;  %v14006_v23 = vcombine.low %v5854_v6, %v5862_v8 }
 0x783   : > { %12491 = vmatpush1.bf16.msra.mxu1 %v13846_v53  ;;  %v5815_v53 = vld [vmem:[%s18730_s25 + $0x6e8] sm:$0xff] }
 0x784   : > { %12655 = vmatpush1.bf16.msra.mxu0 %v13848_v25  ;;  %12492 = vmatprep.subr.bf16.mxu1 %v13863_v56  ;;  %v13942_v25 = vcombine.low %v5790_v33, %v5798_v34  ;;  %v13944_v56 = vcombine.low %v5791_v35, %v5799_v36  ;;  %v13961_v58 = vcombine.high %v5807_v13, %v5815_v53  ;;  %v5886_v33 = vld [vmem:[%s18730_s25 + $0x920] sm:$0xff]  ;;  %v5887_v36 = vld [vmem:[%s18730_s25 + $0x928] sm:$0xff] }
 0x785   : > { %12656 = vmatprep.subr.bf16.mxu0 %v13865_v57  ;;  %v13959_v57 = vcombine.high %v5806_v47, %v5814_v51  ;;  %v5894_v34 = vld [vmem:[%s18730_s25 + $0x960] sm:$0xff] }
 0x787   : > { %12493 = vmatpush1.bf16.msra.mxu1 %v13862_v3  ;;  %v5831_v3 = vld [vmem:[%s18730_s25 + $0x768] sm:$0xff] }
 0x788   : > { %12657 = vmatpush1.bf16.msra.mxu0 %v13864_v52  ;;  %12494 = vmatprep.subr.bf16.mxu1 %v13879_v54  ;;  %v13958_v52 = vcombine.low %v5806_v47, %v5814_v51  ;;  %v13960_v54 = vcombine.low %v5807_v13, %v5815_v53  ;;  %v13977_v60 = vcombine.high %v5823_v50, %v5831_v3  ;;  %v5902_v51 = vld [vmem:[%s18730_s25 + $0x9a0] sm:$0xff]  ;;  %v5903_v53 = vld [vmem:[%s18730_s25 + $0x9a8] sm:$0xff] }
 0x789   : > { %12658 = vmatprep.subr.bf16.mxu0 %v13881_v55  ;;  %v13975_v55 = vcombine.high %v5822_v48, %v5830_v49  ;;  %v5910_v13 = vld [vmem:[%s18730_s25 + $0x9e0] sm:$0xff] }
 0x78b   : > { %12495 = vmatpush1.bf16.msra.mxu1 %v13878_v2  ;;  %v5847_v2 = vld [vmem:[%s18730_s25 + $0x7e8] sm:$0xff] }
 0x78c   : > { %12659 = vmatpush1.bf16.msra.mxu0 %v13880_v4  ;;  %12496 = vmatprep.subr.bf16.mxu1 %v13895_v5  ;;  %v13974_v4 = vcombine.low %v5822_v48, %v5830_v49  ;;  %v13976_v5 = vcombine.low %v5823_v50, %v5831_v3  ;;  %v13993_v41 = vcombine.high %v5839_v0, %v5847_v2  ;;  %v5918_v49 = vld [vmem:[%s18730_s25 + $0xa20] sm:$0xff]  ;;  %v5919_v3 = vld [vmem:[%s18730_s25 + $0xa28] sm:$0xff] }
 0x78d   : > { %12660 = vmatprep.subr.bf16.mxu0 %v13897_v63  ;;  %v13991_v63 = vcombine.high %v5838_v61, %v5846_v62  ;;  %v5926_v50 = vld [vmem:[%s18730_s25 + $0xa60] sm:$0xff] }
 0x78f   : > { %12497 = vmatpush1.bf16.msra.mxu1 %v13894_v11  ;;  %v5863_v11 = vld [vmem:[%s18730_s25 + $0x868] sm:$0xff] }
 0x790   : > { %12661 = vmatpush1.bf16.msra.mxu0 %v13896_v14  ;;  %12498 = vmatprep.subr.bf16.mxu1 %v13911_v18  ;;  %v13990_v14 = vcombine.low %v5838_v61, %v5846_v62  ;;  %v13992_v18 = vcombine.low %v5839_v0, %v5847_v2  ;;  %v14009_v20 = vcombine.high %v5855_v9, %v5863_v11  ;;  %v5934_v62 = vld [vmem:[%s18730_s25 + $0xaa0] sm:$0xff]  ;;  %v5935_v2 = vld [vmem:[%s18730_s25 + $0xaa8] sm:$0xff] }
 0x791   : > { %12662 = vmatprep.subr.bf16.mxu0 %v13913_v19  ;;  %v14007_v19 = vcombine.high %v5854_v6, %v5862_v8  ;;  %v5942_v0 = vld [vmem:[%s18730_s25 + $0xae0] sm:$0xff] }
 0x792   : > { %v5950_v8 = vld [vmem:[%s18730_s25 + $0xb20] sm:$0xff] }
 0x793   : > { %12499 = vmatpush1.bf16.msra.mxu1 %v13910_v24  ;;  %v5871_v24 = vld [vmem:[%s18730_s25 + $0x8a8] sm:$0xff] }
 0x794   : > { %12663 = vmatpush1.bf16.msra.mxu0 %v13912_v26  ;;  %12500 = vmatprep.subr.bf16.mxu1 %v13927_v29  ;;  %v5879_v26 = vld [vmem:[%s18730_s25 + $0x8e8] sm:$0xff]  ;;  %v14008_v29 = vcombine.low %v5855_v9, %v5863_v11  ;;  %v5958_v9 = vld [vmem:[%s18730_s25 + $0xb60] sm:$0xff] }
 0x795   : > { %12664 = vmatprep.subr.bf16.mxu0 %v13929_v30  ;;  %v14023_v30 = vcombine.high %v5870_v40, %v5878_v22  ;;  %v14025_v35 = vcombine.high %v5871_v24, %v5879_v26  ;;  %v5951_v11 = vld [vmem:[%s18730_s25 + $0xb28] sm:$0xff] }
 0x797   : > { %12501 = vmatpush1.bf16.msra.mxu1 %v13926_v37  ;;  %v5895_v37 = vld [vmem:[%s18730_s25 + $0x968] sm:$0xff] }
 0x798   : > { %12665 = vmatpush1.bf16.msra.mxu0 %v13928_v43  ;;  %12502 = vmatprep.subr.bf16.mxu1 %v13943_v1  ;;  %v14022_v43 = vcombine.low %v5870_v40, %v5878_v22  ;;  %v14024_v1 = vcombine.low %v5871_v24, %v5879_v26  ;;  %v14041_v47 = vcombine.high %v5887_v36, %v5895_v37  ;;  %v5966_v22 = vld [vmem:[%s18730_s25 + $0xba0] sm:$0xff]  ;;  %v5967_v24 = vld [vmem:[%s18730_s25 + $0xba8] sm:$0xff] }
 0x799   : > { %12666 = vmatprep.subr.bf16.mxu0 %v13945_v45  ;;  %v14039_v45 = vcombine.high %v5886_v33, %v5894_v34  ;;  %v5975_v26 = vld [vmem:[%s18730_s25 + $0xbe8] sm:$0xff] }
 0x79b   : > { %12503 = vmatpush1.bf16.msra.mxu1 %v13942_v25  ;;  %v5911_v25 = vld [vmem:[%s18730_s25 + $0x9e8] sm:$0xff] }
 0x79c   : > { %12667 = vmatpush1.bf16.msra.mxu0 %v13944_v56  ;;  %12504 = vmatprep.subr.bf16.mxu1 %v13959_v57  ;;  %v14038_v56 = vcombine.low %v5886_v33, %v5894_v34  ;;  %v14040_v57 = vcombine.low %v5887_v36, %v5895_v37  ;;  %v14057_v48 = vcombine.high %v5903_v53, %v5911_v25  ;;  %v5990_v36 = vld [vmem:[%s18730_s25 + $0xc60] sm:$0xff]  ;;  %v5983_v37 = vld [vmem:[%s18730_s25 + $0xc28] sm:$0xff] }
 0x79d   : > { %12668 = vmatprep.subr.bf16.mxu0 %v13961_v58  ;;  %v14055_v58 = vcombine.high %v5902_v51, %v5910_v13  ;;  %v14121_v34 = vcombine.high %v5967_v24, %v5975_v26 }
 0x79f   : > { %12505 = vmatpush1.bf16.msra.mxu1 %v13958_v52  ;;  %v5927_v52 = vld [vmem:[%s18730_s25 + $0xa68] sm:$0xff] }
 0x7a0   : > { %12669 = vmatpush1.bf16.msra.mxu0 %v13960_v54  ;;  %12506 = vmatprep.subr.bf16.mxu1 %v13975_v55  ;;  %v14054_v54 = vcombine.low %v5902_v51, %v5910_v13  ;;  %v14056_v55 = vcombine.low %v5903_v53, %v5911_v25  ;;  %v14073_v61 = vcombine.high %v5919_v3, %v5927_v52  ;;  %v5998_v13 = vld [vmem:[%s18730_s25 + $0xca0] sm:$0xff]  ;;  %v5999_v25 = vld [vmem:[%s18730_s25 + $0xca8] sm:$0xff] }
 0x7a1   : > { %12670 = vmatprep.subr.bf16.mxu0 %v13977_v60  ;;  %v14071_v60 = vcombine.high %v5918_v49, %v5926_v50  ;;  %v6006_v53 = vld [vmem:[%s18730_s25 + $0xce0] sm:$0xff] }
 0x7a3   : > { %12507 = vmatpush1.bf16.msra.mxu1 %v13974_v4  ;;  %v5943_v4 = vld [vmem:[%s18730_s25 + $0xae8] sm:$0xff] }
 0x7a4   : > { %12671 = vmatpush1.bf16.msra.mxu0 %v13976_v5  ;;  %12508 = vmatprep.subr.bf16.mxu1 %v13991_v63  ;;  %v14070_v5 = vcombine.low %v5918_v49, %v5926_v50  ;;  %v14072_v63 = vcombine.low %v5919_v3, %v5927_v52  ;;  %v14089_v6 = vcombine.high %v5935_v2, %v5943_v4  ;;  %v6014_v50 = vld [vmem:[%s18730_s25 + $0xd20] sm:$0xff]  ;;  %v6015_v52 = vld [vmem:[%s18730_s25 + $0xd28] sm:$0xff] }
 0x7a5   : > { %12672 = vmatprep.subr.bf16.mxu0 %v13993_v41  ;;  %v14087_v41 = vcombine.high %v5934_v62, %v5942_v0  ;;  %v6022_v3 = vld [vmem:[%s18730_s25 + $0xd60] sm:$0xff] }
 0x7a7   : > { %12509 = vmatpush1.bf16.msra.mxu1 %v13990_v14  ;;  %v5959_v14 = vld [vmem:[%s18730_s25 + $0xb68] sm:$0xff] }
 0x7a8   : > { %12673 = vmatpush1.bf16.msra.mxu0 %v13992_v18  ;;  %12519 = vmatprep.subr.bf16.mxu1 %v14007_v19  ;;  %v14086_v18 = vcombine.low %v5934_v62, %v5942_v0  ;;  %v14088_v19 = vcombine.low %v5935_v2, %v5943_v4  ;;  %v14105_v40 = vcombine.high %v5951_v11, %v5959_v14  ;;  %v6030_v0 = vld [vmem:[%s18730_s25 + $0xda0] sm:$0xff]  ;;  %v6031_v4 = vld [vmem:[%s18730_s25 + $0xda8] sm:$0xff] }
 0x7a9   : > { %12683 = vmatprep.subr.bf16.mxu0 %v14009_v20  ;;  %v14103_v20 = vcombine.high %v5950_v8, %v5958_v9  ;;  %v6038_v2 = vld [vmem:[%s18730_s25 + $0xde0] sm:$0xff] }
 0x7aa   : > { %12511 = vmatmul.mubr.bf16.vlgmr.msra.gmra.mrb[24].mxu1 %v18821_v10 }
 0x7ab   : > { %12675 = vmatmul.mubr.bf16.vlgmr.msra.gmra.mrb[20].mxu0 %v18821_v10  ;;  %12520 = vmatpush1.bf16.msra.mxu1 %v14006_v23  ;;  %v5974_v23 = vld [vmem:[%s18730_s25 + $0xbe0] sm:$0xff] }
 0x7ac   : > { %12551 = vmatprep.mubr.bf16.mxu1 %v18829_v21  ;;  %12684 = vmatpush1.bf16.msra.mxu0 %v14008_v29  ;;  %v14102_v29 = vcombine.low %v5950_v8, %v5958_v9  ;;  %v14119_v33 = vcombine.high %v5966_v22, %v5974_v23  ;;  %v6046_v9 = vld [vmem:[%s18730_s25 + $0xe20] sm:$0xff] }
 0x7ad   : > { %12715 = vmatprep.mubr.bf16.mxu0 %v18829_v21  ;;  %12521 = vmatprep.subr.bf16.mxu1 %v14023_v30  ;;  %v14104_v30 = vcombine.low %v5951_v11, %v5959_v14  ;;  %v6054_v11 = vld [vmem:[%s18730_s25 + $0xe60] sm:$0xff]  ;;  %v6047_v14 = vld [vmem:[%s18730_s25 + $0xe28] sm:$0xff] }
 0x7ae   : > { %12685 = vmatprep.subr.bf16.mxu0 %v14025_v35  ;;  %v5982_v35 = vld [vmem:[%s18730_s25 + $0xc20] sm:$0xff] }
 0x7af   : > { %12522 = vmatpush1.bf16.msra.mxu1 %v14022_v43  ;;  %v5991_v43 = vld [vmem:[%s18730_s25 + $0xc68] sm:$0xff] }
 0x7b0   : > { %12686 = vmatpush1.bf16.msra.mxu0 %v14024_v1  ;;  %12523 = vmatprep.subr.bf16.mxu1 %v14039_v45  ;;  %v14118_v1 = vcombine.low %v5966_v22, %v5974_v23  ;;  %v14120_v45 = vcombine.low %v5967_v24, %v5975_v26  ;;  %v14137_v51 = vcombine.high %v5983_v37, %v5991_v43  ;;  %v6062_v23 = vld [vmem:[%s18730_s25 + $0xea0] sm:$0xff]  ;;  %v6063_v26 = vld [vmem:[%s18730_s25 + $0xea8] sm:$0xff] }
 0x7b1   : > { %12687 = vmatprep.subr.bf16.mxu0 %v14041_v47  ;;  %v14135_v47 = vcombine.high %v5982_v35, %v5990_v36  ;;  %v6070_v24 = vld [vmem:[%s18730_s25 + $0xee0] sm:$0xff] }
 0x7b3   : > { %12524 = vmatpush1.bf16.msra.mxu1 %v14038_v56  ;;  %v6007_v56 = vld [vmem:[%s18730_s25 + $0xce8] sm:$0xff] }
 0x7b4   : > { %12688 = vmatpush1.bf16.msra.mxu0 %v14040_v57  ;;  %12525 = vmatprep.subr.bf16.mxu1 %v14055_v58  ;;  %v14134_v57 = vcombine.low %v5982_v35, %v5990_v36  ;;  %v14136_v58 = vcombine.low %v5983_v37, %v5991_v43  ;;  %v14153_v49 = vcombine.high %v5999_v25, %v6007_v56  ;;  %v6078_v36 = vld [vmem:[%s18730_s25 + $0xf20] sm:$0xff]  ;;  %v6079_v43 = vld [vmem:[%s18730_s25 + $0xf28] sm:$0xff] }
 0x7b5   : > { %12689 = vmatprep.subr.bf16.mxu0 %v14057_v48  ;;  %v14151_v48 = vcombine.high %v5998_v13, %v6006_v53  ;;  %v6086_v37 = vld [vmem:[%s18730_s25 + $0xf60] sm:$0xff] }
 0x7b7   : > { %12526 = vmatpush1.bf16.msra.mxu1 %v14054_v54  ;;  %v6023_v54 = vld [vmem:[%s18730_s25 + $0xd68] sm:$0xff] }
 0x7b8   : > { %12690 = vmatpush1.bf16.msra.mxu0 %v14056_v55  ;;  %12527 = vmatprep.subr.bf16.mxu1 %v14071_v60  ;;  %v14150_v55 = vcombine.low %v5998_v13, %v6006_v53  ;;  %v14152_v60 = vcombine.low %v5999_v25, %v6007_v56  ;;  %v14169_v62 = vcombine.high %v6015_v52, %v6023_v54  ;;  %v6094_v53 = vld [vmem:[%s18730_s25 + $0xfa0] sm:$0xff]  ;;  %v6095_v56 = vld [vmem:[%s18730_s25 + $0xfa8] sm:$0xff] }
 0x7b9   : > { %12691 = vmatprep.subr.bf16.mxu0 %v14073_v61  ;;  %v14167_v61 = vcombine.high %v6014_v50, %v6022_v3  ;;  %v6102_v25 = vld [vmem:[%s18730_s25 + $0xfe0] sm:$0xff] }
 0x7bb   : > { %12528 = vmatpush1.bf16.msra.mxu1 %v14070_v5  ;;  %v6039_v5 = vld [vmem:[%s18730_s25 + $0xde8] sm:$0xff] }
 0x7bc   : > { %12692 = vmatpush1.bf16.msra.mxu0 %v14072_v63  ;;  %12529 = vmatprep.subr.bf16.mxu1 %v14087_v41  ;;  %v14166_v63 = vcombine.low %v6014_v50, %v6022_v3  ;;  %v14168_v41 = vcombine.low %v6015_v52, %v6023_v54  ;;  %v14185_v8 = vcombine.high %v6031_v4, %v6039_v5  ;;  %v6110_v3 = vld [vmem:[%s18730_s25 + $0x1020] sm:$0xff]  ;;  %v6111_v54 = vld [vmem:[%s18730_s25 + $0x1028] sm:$0xff] }
 0x7bd   : > { %12693 = vmatprep.subr.bf16.mxu0 %v14089_v6  ;;  %v14183_v6 = vcombine.high %v6030_v0, %v6038_v2  ;;  %v6118_v52 = vld [vmem:[%s18730_s25 + $0x1060] sm:$0xff] }
 0x7bf   : > { %12530 = vmatpush1.bf16.msra.mxu1 %v14086_v18  ;;  %v6055_v18 = vld [vmem:[%s18730_s25 + $0xe68] sm:$0xff] }
 0x7c0   : > { %12694 = vmatpush1.bf16.msra.mxu0 %v14088_v19  ;;  %12531 = vmatprep.subr.bf16.mxu1 %v14103_v20  ;;  %v14182_v19 = vcombine.low %v6030_v0, %v6038_v2  ;;  %v14184_v20 = vcombine.low %v6031_v4, %v6039_v5  ;;  %v14201_v22 = vcombine.high %v6047_v14, %v6055_v18  ;;  %v6126_v2 = vld [vmem:[%s18730_s25 + $0x10a0] sm:$0xff] }
 0x7c1   : > { %12695 = vmatprep.subr.bf16.mxu0 %v14105_v40  ;;  %v14199_v40 = vcombine.high %v6046_v9, %v6054_v11  ;;  %v6134_v4 = vld [vmem:[%s18730_s25 + $0x10e0] sm:$0xff]  ;;  %v14262_v5 = vcombine.low %v6110_v3, %v6118_v52 }
 0x7c3   : > { %12532 = vmatpush1.bf16.msra.mxu1 %v14102_v29  ;;  %v6071_v29 = vld [vmem:[%s18730_s25 + $0xee8] sm:$0xff] }
 0x7c4   : > { %12696 = vmatpush1.bf16.msra.mxu0 %v14104_v30  ;;  %12533 = vmatprep.subr.bf16.mxu1 %v14119_v33  ;;  %v14198_v30 = vcombine.low %v6046_v9, %v6054_v11  ;;  %v14200_v33 = vcombine.low %v6047_v14, %v6055_v18  ;;  %v14217_v35 = vcombine.high %v6063_v26, %v6071_v29  ;;  %v6142_v9 = vld [vmem:[%s18730_s25 + $0x1120] sm:$0xff]  ;;  %v6143_v18 = vld [vmem:[%s18730_s25 + $0x1128] sm:$0xff] }
 0x7c5   : > { %12697 = vmatprep.subr.bf16.mxu0 %v14121_v34  ;;  %v14215_v34 = vcombine.high %v6062_v23, %v6070_v24  ;;  %v6150_v11 = vld [vmem:[%s18730_s25 + $0x1160] sm:$0xff] }
 0x7c7   : > { %12534 = vmatpush1.bf16.msra.mxu1 %v14118_v1  ;;  %v6087_v1 = vld [vmem:[%s18730_s25 + $0xf68] sm:$0xff] }
 0x7c8   : > { %12698 = vmatpush1.bf16.msra.mxu0 %v14120_v45  ;;  %12535 = vmatprep.subr.bf16.mxu1 %v14135_v47  ;;  %v14214_v45 = vcombine.low %v6062_v23, %v6070_v24  ;;  %v14216_v47 = vcombine.low %v6063_v26, %v6071_v29  ;;  %v14233_v13 = vcombine.high %v6079_v43, %v6087_v1  ;;  %v6158_v24 = vld [vmem:[%s18730_s25 + $0x11a0] sm:$0xff]  ;;  %v6159_v29 = vld [vmem:[%s18730_s25 + $0x11a8] sm:$0xff] }
 0x7c9   : > { %12699 = vmatprep.subr.bf16.mxu0 %v14137_v51  ;;  %v14231_v51 = vcombine.high %v6078_v36, %v6086_v37  ;;  %v6166_v26 = vld [vmem:[%s18730_s25 + $0x11e0] sm:$0xff] }
 0x7cb   : > { %12536 = vmatpush1.bf16.msra.mxu1 %v14134_v57  ;;  %v6103_v57 = vld [vmem:[%s18730_s25 + $0xfe8] sm:$0xff] }
 0x7cc   : > { %12700 = vmatpush1.bf16.msra.mxu0 %v14136_v58  ;;  %12537 = vmatprep.subr.bf16.mxu1 %v14151_v48  ;;  %v14230_v58 = vcombine.low %v6078_v36, %v6086_v37  ;;  %v14232_v48 = vcombine.low %v6079_v43, %v6087_v1  ;;  %v14249_v50 = vcombine.high %v6095_v56, %v6103_v57  ;;  %v6174_v37 = vld [vmem:[%s18730_s25 + $0x1220] sm:$0xff]  ;;  %v6175_v1 = vld [vmem:[%s18730_s25 + $0x1228] sm:$0xff] }
 0x7cd   : > { %12701 = vmatprep.subr.bf16.mxu0 %v14153_v49  ;;  %v14247_v49 = vcombine.high %v6094_v53, %v6102_v25  ;;  %v6182_v43 = vld [vmem:[%s18730_s25 + $0x1260] sm:$0xff] }
 0x7cf   : > { %12538 = vmatpush1.bf16.msra.mxu1 %v14150_v55  ;;  %v6119_v55 = vld [vmem:[%s18730_s25 + $0x1068] sm:$0xff] }
 0x7d0   : > { %12702 = vmatpush1.bf16.msra.mxu0 %v14152_v60  ;;  %12539 = vmatprep.subr.bf16.mxu1 %v14167_v61  ;;  %v14246_v60 = vcombine.low %v6094_v53, %v6102_v25  ;;  %v14248_v61 = vcombine.low %v6095_v56, %v6103_v57  ;;  %v14265_v0 = vcombine.high %v6111_v54, %v6119_v55  ;;  %v6190_v25 = vld [vmem:[%s18730_s25 + $0x12a0] sm:$0xff]  ;;  %v6191_v57 = vld [vmem:[%s18730_s25 + $0x12a8] sm:$0xff] }
 0x7d1   : > { %12703 = vmatprep.subr.bf16.mxu0 %v14169_v62  ;;  %v14263_v62 = vcombine.high %v6110_v3, %v6118_v52  ;;  %v6198_v56 = vld [vmem:[%s18730_s25 + $0x12e0] sm:$0xff] }
 0x7d2   : > { %v6206_v52 = vld [vmem:[%s18730_s25 + $0x1320] sm:$0xff] }
 0x7d3   : > { %12540 = vmatpush1.bf16.msra.mxu1 %v14166_v63  ;;  %v6127_v63 = vld [vmem:[%s18730_s25 + $0x10a8] sm:$0xff] }
 0x7d4   : > { %12704 = vmatpush1.bf16.msra.mxu0 %v14168_v41  ;;  %12541 = vmatprep.subr.bf16.mxu1 %v14183_v6  ;;  %v6135_v41 = vld [vmem:[%s18730_s25 + $0x10e8] sm:$0xff]  ;;  %v14264_v6 = vcombine.low %v6111_v54, %v6119_v55  ;;  %v6214_v54 = vld [vmem:[%s18730_s25 + $0x1360] sm:$0xff] }
 0x7d5   : > { %12705 = vmatprep.subr.bf16.mxu0 %v14185_v8  ;;  %v14279_v8 = vcombine.high %v6126_v2, %v6134_v4  ;;  %v14281_v14 = vcombine.high %v6127_v63, %v6135_v41  ;;  %v6207_v55 = vld [vmem:[%s18730_s25 + $0x1328] sm:$0xff] }
 0x7d7   : > { %12542 = vmatpush1.bf16.msra.mxu1 %v14182_v19  ;;  %v6151_v19 = vld [vmem:[%s18730_s25 + $0x1168] sm:$0xff] }
 0x7d8   : > { %12706 = vmatpush1.bf16.msra.mxu0 %v14184_v20  ;;  %12543 = vmatprep.subr.bf16.mxu1 %v14199_v40  ;;  %v14278_v20 = vcombine.low %v6126_v2, %v6134_v4  ;;  %v14280_v40 = vcombine.low %v6127_v63, %v6135_v41  ;;  %v14297_v23 = vcombine.high %v6143_v18, %v6151_v19  ;;  %v6222_v4 = vld [vmem:[%s18730_s25 + $0x13a0] sm:$0xff]  ;;  %v6223_v63 = vld [vmem:[%s18730_s25 + $0x13a8] sm:$0xff] }
 0x7d9   : > { %12707 = vmatprep.subr.bf16.mxu0 %v14201_v22  ;;  %v14295_v22 = vcombine.high %v6142_v9, %v6150_v11  ;;  %v6231_v41 = vld [vmem:[%s18730_s25 + $0x13e8] sm:$0xff] }
 0x7db   : > { %12544 = vmatpush1.bf16.msra.mxu1 %v14198_v30  ;;  %v6167_v30 = vld [vmem:[%s18730_s25 + $0x11e8] sm:$0xff] }
 0x7dc   : > { %12708 = vmatpush1.bf16.msra.mxu0 %v14200_v33  ;;  %12545 = vmatprep.subr.bf16.mxu1 %v14215_v34  ;;  %v14294_v33 = vcombine.low %v6142_v9, %v6150_v11  ;;  %v14296_v34 = vcombine.low %v6143_v18, %v6151_v19  ;;  %v14313_v36 = vcombine.high %v6159_v29, %v6167_v30  ;;  %v6246_v18 = vld [vmem:[%s18730_s25 + $0x1460] sm:$0xff]  ;;  %v6239_v19 = vld [vmem:[%s18730_s25 + $0x1428] sm:$0xff] }
 0x7dd   : > { %12709 = vmatprep.subr.bf16.mxu0 %v14217_v35  ;;  %v14311_v35 = vcombine.high %v6158_v24, %v6166_v26  ;;  %v14377_v11 = vcombine.high %v6223_v63, %v6231_v41 }
 0x7df   : > { %12546 = vmatpush1.bf16.msra.mxu1 %v14214_v45  ;;  %v6183_v45 = vld [vmem:[%s18730_s25 + $0x1268] sm:$0xff] }
 0x7e0   : > { %12710 = vmatpush1.bf16.msra.mxu0 %v14216_v47  ;;  %12547 = vmatprep.subr.bf16.mxu1 %v14231_v51  ;;  %v14310_v47 = vcombine.low %v6158_v24, %v6166_v26  ;;  %v14312_v51 = vcombine.low %v6159_v29, %v6167_v30  ;;  %v14329_v53 = vcombine.high %v6175_v1, %v6183_v45  ;;  %v6254_v26 = vld [vmem:[%s18730_s25 + $0x14a0] sm:$0xff]  ;;  %v6255_v30 = vld [vmem:[%s18730_s25 + $0x14a8] sm:$0xff] }
 0x7e1   : > { %12711 = vmatprep.subr.bf16.mxu0 %v14233_v13  ;;  %v14327_v13 = vcombine.high %v6174_v37, %v6182_v43  ;;  %v6262_v29 = vld [vmem:[%s18730_s25 + $0x14e0] sm:$0xff] }
 0x7e3   : > { %12548 = vmatpush1.bf16.msra.mxu1 %v14230_v58  ;;  %v6199_v58 = vld [vmem:[%s18730_s25 + $0x12e8] sm:$0xff] }
 0x7e4   : > { %12712 = vmatpush1.bf16.msra.mxu0 %v14232_v48  ;;  %12549 = vmatprep.subr.bf16.mxu1 %v14247_v49  ;;  %v14326_v48 = vcombine.low %v6174_v37, %v6182_v43  ;;  %v14328_v49 = vcombine.low %v6175_v1, %v6183_v45  ;;  %v14345_v3 = vcombine.high %v6191_v57, %v6199_v58  ;;  %v6270_v43 = vld [vmem:[%s18730_s25 + $0x1520] sm:$0xff]  ;;  %v6271_v45 = vld [vmem:[%s18730_s25 + $0x1528] sm:$0xff] }
 0x7e5   : > { %12713 = vmatprep.subr.bf16.mxu0 %v14249_v50  ;;  %v14343_v50 = vcombine.high %v6190_v25, %v6198_v56  ;;  %v6278_v1 = vld [vmem:[%s18730_s25 + $0x1560] sm:$0xff] }
 0x7e7   : > { %12550 = vmatpush1.bf16.msra.mxu1 %v14246_v60  ;;  %v6215_v60 = vld [vmem:[%s18730_s25 + $0x1368] sm:$0xff] }
 0x7e8   : > { %12714 = vmatpush1.bf16.msra.mxu0 %v14248_v61  ;;  %12560 = vmatprep.subr.bf16.mxu1 %v14263_v62  ;;  %v14342_v61 = vcombine.low %v6190_v25, %v6198_v56  ;;  %v14344_v62 = vcombine.low %v6191_v57, %v6199_v58  ;;  %v14361_v2 = vcombine.high %v6207_v55, %v6215_v60  ;;  %v6286_v56 = vld [vmem:[%s18730_s25 + $0x15a0] sm:$0xff]  ;;  %v6287_v58 = vld [vmem:[%s18730_s25 + $0x15a8] sm:$0xff] }
 0x7e9   : > { %12724 = vmatprep.subr.bf16.mxu0 %v14265_v0  ;;  %v14359_v0 = vcombine.high %v6206_v52, %v6214_v54  ;;  %v6294_v57 = vld [vmem:[%s18730_s25 + $0x15e0] sm:$0xff] }
 0x7ea   : > { %12552 = vmatmul.mubr.bf16.vlgmr.msra.gmra.mrb[24].mxu1 %v18898_v44 }
 0x7eb   : > { %12716 = vmatmul.mubr.bf16.vlgmr.msra.gmra.mrb[20].mxu0 %v18898_v44  ;;  %12561 = vmatpush1.bf16.msra.mxu1 %v14262_v5  ;;  %v6230_v5 = vld [vmem:[%s18730_s25 + $0x13e0] sm:$0xff] }
 0x7ec   : > { %12592 = vmatprep.mubr.bf16.mxu1 %v18983_v27  ;;  %12725 = vmatpush1.bf16.msra.mxu0 %v14264_v6  ;;  %v14358_v6 = vcombine.low %v6206_v52, %v6214_v54  ;;  %v14375_v9 = vcombine.high %v6222_v4, %v6230_v5  ;;  %v6302_v54 = vld [vmem:[%s18730_s25 + $0x1620] sm:$0xff] }
 0x7ed   : > { %12756 = vmatprep.mubr.bf16.mxu0 %v18983_v27  ;;  %12562 = vmatprep.subr.bf16.mxu1 %v14279_v8  ;;  %v14360_v8 = vcombine.low %v6207_v55, %v6215_v60  ;;  %v6310_v55 = vld [vmem:[%s18730_s25 + $0x1660] sm:$0xff]  ;;  %v6303_v60 = vld [vmem:[%s18730_s25 + $0x1628] sm:$0xff] }
 0x7ee   : > { %12726 = vmatprep.subr.bf16.mxu0 %v14281_v14  ;;  %v6238_v14 = vld [vmem:[%s18730_s25 + $0x1420] sm:$0xff] }
 0x7ef   : > { %12563 = vmatpush1.bf16.msra.mxu1 %v14278_v20  ;;  %v6247_v20 = vld [vmem:[%s18730_s25 + $0x1468] sm:$0xff] }
 0x7f0   : > { %12727 = vmatpush1.bf16.msra.mxu0 %v14280_v40  ;;  %12564 = vmatprep.subr.bf16.mxu1 %v14295_v22  ;;  %v14374_v40 = vcombine.low %v6222_v4, %v6230_v5  ;;  %v14376_v22 = vcombine.low %v6223_v63, %v6231_v41  ;;  %v14393_v24 = vcombine.high %v6239_v19, %v6247_v20  ;;  %v6318_v5 = vld [vmem:[%s18730_s25 + $0x16a0] sm:$0xff]  ;;  %v6319_v41 = vld [vmem:[%s18730_s25 + $0x16a8] sm:$0xff] }
 0x7f1   : > { %12728 = vmatprep.subr.bf16.mxu0 %v14297_v23  ;;  %v14391_v23 = vcombine.high %v6238_v14, %v6246_v18  ;;  %v6326_v63 = vld [vmem:[%s18730_s25 + $0x16e0] sm:$0xff] }
 0x7f3   : > { %12565 = vmatpush1.bf16.msra.mxu1 %v14294_v33  ;;  %v6263_v33 = vld [vmem:[%s18730_s25 + $0x14e8] sm:$0xff] }
 0x7f4   : > { %12729 = vmatpush1.bf16.msra.mxu0 %v14296_v34  ;;  %12566 = vmatprep.subr.bf16.mxu1 %v14311_v35  ;;  %v14390_v34 = vcombine.low %v6238_v14, %v6246_v18  ;;  %v14392_v35 = vcombine.low %v6239_v19, %v6247_v20  ;;  %v14409_v37 = vcombine.high %v6255_v30, %v6263_v33  ;;  %v6334_v18 = vld [vmem:[%s18730_s25 + $0x1720] sm:$0xff]  ;;  %v6335_v20 = vld [vmem:[%s18730_s25 + $0x1728] sm:$0xff] }
 0x7f5   : > { %12730 = vmatprep.subr.bf16.mxu0 %v14313_v36  ;;  %v14407_v36 = vcombine.high %v6254_v26, %v6262_v29  ;;  %v6342_v19 = vld [vmem:[%s18730_s25 + $0x1760] sm:$0xff] }
 0x7f7   : > { %12567 = vmatpush1.bf16.msra.mxu1 %v14310_v47  ;;  %v6279_v47 = vld [vmem:[%s18730_s25 + $0x1568] sm:$0xff] }
 0x7f8   : > { %12731 = vmatpush1.bf16.msra.mxu0 %v14312_v51  ;;  %12568 = vmatprep.subr.bf16.mxu1 %v14327_v13  ;;  %v14406_v51 = vcombine.low %v6254_v26, %v6262_v29  ;;  %v14408_v13 = vcombine.low %v6255_v30, %v6263_v33  ;;  %v14425_v25 = vcombine.high %v6271_v45, %v6279_v47  ;;  %v6350_v29 = vld [vmem:[%s18730_s25 + $0x17a0] sm:$0xff]  ;;  %v6351_v33 = vld [vmem:[%s18730_s25 + $0x17a8] sm:$0xff] }
 0x7f9   : > { %12732 = vmatprep.subr.bf16.mxu0 %v14329_v53  ;;  %v14423_v53 = vcombine.high %v6270_v43, %v6278_v1  ;;  %v6358_v30 = vld [vmem:[%s18730_s25 + $0x17e0] sm:$0xff] }
 0x7fb   : > { %12569 = vmatpush1.bf16.msra.mxu1 %v14326_v48  ;;  %v6295_v48 = vld [vmem:[%s18730_s25 + $0x15e8] sm:$0xff] }
 0x7fc   : > { %12733 = vmatpush1.bf16.msra.mxu0 %v14328_v49  ;;  %12570 = vmatprep.subr.bf16.mxu1 %v14343_v50  ;;  %v14422_v49 = vcombine.low %v6270_v43, %v6278_v1  ;;  %v14424_v50 = vcombine.low %v6271_v45, %v6279_v47  ;;  %v14441_v52 = vcombine.high %v6287_v58, %v6295_v48  ;;  %v6366_v1 = vld [vmem:[%s18730_s25 + $0x1820] sm:$0xff]  ;;  %v6367_v47 = vld [vmem:[%s18730_s25 + $0x1828] sm:$0xff] }
 0x7fd   : > { %12734 = vmatprep.subr.bf16.mxu0 %v14345_v3  ;;  %v14439_v3 = vcombine.high %v6286_v56, %v6294_v57  ;;  %v6374_v45 = vld [vmem:[%s18730_s25 + $0x1860] sm:$0xff] }
 0x7ff   : > { %12571 = vmatpush1.bf16.msra.mxu1 %v14342_v61  ;;  %v6311_v61 = vld [vmem:[%s18730_s25 + $0x1668] sm:$0xff] }
 0x800   : > { %12735 = vmatpush1.bf16.msra.mxu0 %v14344_v62  ;;  %12572 = vmatprep.subr.bf16.mxu1 %v14359_v0  ;;  %v14438_v62 = vcombine.low %v6286_v56, %v6294_v57  ;;  %v14440_v0 = vcombine.low %v6287_v58, %v6295_v48  ;;  %v14457_v4 = vcombine.high %v6303_v60, %v6311_v61  ;;  %v6382_v57 = vld [vmem:[%s18730_s25 + $0x18a0] sm:$0xff] }
 0x801   : > { %12736 = vmatprep.subr.bf16.mxu0 %v14361_v2  ;;  %v14455_v2 = vcombine.high %v6302_v54, %v6310_v55  ;;  %v6390_v58 = vld [vmem:[%s18730_s25 + $0x18e0] sm:$0xff]  ;;  %v14518_v48 = vcombine.low %v6366_v1, %v6374_v45 }
 0x803   : > { %12573 = vmatpush1.bf16.msra.mxu1 %v14358_v6  ;;  %v6327_v6 = vld [vmem:[%s18730_s25 + $0x16e8] sm:$0xff] }
 0x804   : > { %12737 = vmatpush1.bf16.msra.mxu0 %v14360_v8  ;;  %12574 = vmatprep.subr.bf16.mxu1 %v14375_v9  ;;  %v14454_v8 = vcombine.low %v6302_v54, %v6310_v55  ;;  %v14456_v9 = vcombine.low %v6303_v60, %v6311_v61  ;;  %v14473_v14 = vcombine.high %v6319_v41, %v6327_v6  ;;  %v6398_v54 = vld [vmem:[%s18730_s25 + $0x1920] sm:$0xff]  ;;  %v6399_v61 = vld [vmem:[%s18730_s25 + $0x1928] sm:$0xff] }
 0x805   : > { %12738 = vmatprep.subr.bf16.mxu0 %v14377_v11  ;;  %v14471_v11 = vcombine.high %v6318_v5, %v6326_v63  ;;  %v6406_v55 = vld [vmem:[%s18730_s25 + $0x1960] sm:$0xff] }
 0x807   : > { %12575 = vmatpush1.bf16.msra.mxu1 %v14374_v40  ;;  %v6343_v40 = vld [vmem:[%s18730_s25 + $0x1768] sm:$0xff] }
 0x808   : > { %12739 = vmatpush1.bf16.msra.mxu0 %v14376_v22  ;;  %12576 = vmatprep.subr.bf16.mxu1 %v14391_v23  ;;  %v14470_v22 = vcombine.low %v6318_v5, %v6326_v63  ;;  %v14472_v23 = vcombine.low %v6319_v41, %v6327_v6  ;;  %v14489_v26 = vcombine.high %v6335_v20, %v6343_v40  ;;  %v6414_v63 = vld [vmem:[%s18730_s25 + $0x19a0] sm:$0xff]  ;;  %v6415_v6 = vld [vmem:[%s18730_s25 + $0x19a8] sm:$0xff] }
 0x809   : > { %12740 = vmatprep.subr.bf16.mxu0 %v14393_v24  ;;  %v14487_v24 = vcombine.high %v6334_v18, %v6342_v19  ;;  %v6422_v41 = vld [vmem:[%s18730_s25 + $0x19e0] sm:$0xff] }
 0x80b   : > { %12577 = vmatpush1.bf16.msra.mxu1 %v14390_v34  ;;  %v6359_v34 = vld [vmem:[%s18730_s25 + $0x17e8] sm:$0xff] }
 0x80c   : > { %12741 = vmatpush1.bf16.msra.mxu0 %v14392_v35  ;;  %12578 = vmatprep.subr.bf16.mxu1 %v14407_v36  ;;  %v14486_v35 = vcombine.low %v6334_v18, %v6342_v19  ;;  %v14488_v36 = vcombine.low %v6335_v20, %v6343_v40  ;;  %v14505_v43 = vcombine.high %v6351_v33, %v6359_v34  ;;  %v6430_v19 = vld [vmem:[%s18730_s25 + $0x1a20] sm:$0xff]  ;;  %v6431_v40 = vld [vmem:[%s18730_s25 + $0x1a28] sm:$0xff] }
 0x80d   : > { %12742 = vmatprep.subr.bf16.mxu0 %v14409_v37  ;;  %v14503_v37 = vcombine.high %v6350_v29, %v6358_v30  ;;  %v6438_v20 = vld [vmem:[%s18730_s25 + $0x1a60] sm:$0xff] }
 0x80f   : > { %12579 = vmatpush1.bf16.msra.mxu1 %v14406_v51  ;;  %v6375_v51 = vld [vmem:[%s18730_s25 + $0x1868] sm:$0xff] }
 0x810   : > { %12743 = vmatpush1.bf16.msra.mxu0 %v14408_v13  ;;  %12580 = vmatprep.subr.bf16.mxu1 %v14423_v53  ;;  %v14502_v13 = vcombine.low %v6350_v29, %v6358_v30  ;;  %v14504_v53 = vcombine.low %v6351_v33, %v6359_v34  ;;  %v14521_v56 = vcombine.high %v6367_v47, %v6375_v51  ;;  %v6446_v30 = vld [vmem:[%s18730_s25 + $0x1aa0] sm:$0xff]  ;;  %v6447_v34 = vld [vmem:[%s18730_s25 + $0x1aa8] sm:$0xff] }
 0x811   : > { %12744 = vmatprep.subr.bf16.mxu0 %v14425_v25  ;;  %v14519_v25 = vcombine.high %v6366_v1, %v6374_v45  ;;  %v6454_v33 = vld [vmem:[%s18730_s25 + $0x1ae0] sm:$0xff] }
 0x812   : > { %v6462_v45 = vld [vmem:[%s18730_s25 + $0x1b20] sm:$0xff] }
 0x813   : > { %12581 = vmatpush1.bf16.msra.mxu1 %v14422_v49  ;;  %v6383_v49 = vld [vmem:[%s18730_s25 + $0x18a8] sm:$0xff] }
 0x814   : > { %12745 = vmatpush1.bf16.msra.mxu0 %v14424_v50  ;;  %12582 = vmatprep.subr.bf16.mxu1 %v14439_v3  ;;  %v6391_v50 = vld [vmem:[%s18730_s25 + $0x18e8] sm:$0xff]  ;;  %v14520_v3 = vcombine.low %v6367_v47, %v6375_v51  ;;  %v6470_v47 = vld [vmem:[%s18730_s25 + $0x1b60] sm:$0xff] }
 0x815   : > { %12746 = vmatprep.subr.bf16.mxu0 %v14441_v52  ;;  %v14535_v52 = vcombine.high %v6382_v57, %v6390_v58  ;;  %v14537_v60 = vcombine.high %v6383_v49, %v6391_v50  ;;  %v15214_v51 = vld [vmem:[%s19298_s15] sm:$0xff] }
 0x817   : > { %12583 = vmatpush1.bf16.msra.mxu1 %v14438_v62  ;;  %v6407_v62 = vld [vmem:[%s18730_s25 + $0x1968] sm:$0xff] }
 0x818   : > { %12747 = vmatpush1.bf16.msra.mxu0 %v14440_v0  ;;  %12584 = vmatprep.subr.bf16.mxu1 %v14455_v2  ;;  %v14534_v0 = vcombine.low %v6382_v57, %v6390_v58  ;;  %v14536_v2 = vcombine.low %v6383_v49, %v6391_v50  ;;  %v14553_v5 = vcombine.high %v6399_v61, %v6407_v62 }
 0x819   : > { %12748 = vmatprep.subr.bf16.mxu0 %v14457_v4  ;;  %v14551_v4 = vcombine.high %v6398_v54, %v6406_v55  ;;  %v6645_v57 = vrot.slane %v15214_v51, %v18958_v42  ;;  %v14598_v58 = vcombine.low %v6446_v30, %v6454_v33  ;;  %v14615_v50 = vcombine.high %v6462_v45, %v6470_v47 }
 0x81b   : > { %12585 = vmatpush1.bf16.msra.mxu1 %v14454_v8  ;;  %v6423_v8 = vld [vmem:[%s18730_s25 + $0x19e8] sm:$0xff] }
 0x81c   : > { %12749 = vmatpush1.bf16.msra.mxu0 %v14456_v9  ;;  %12586 = vmatprep.subr.bf16.mxu1 %v14471_v11  ;;  %v14550_v9 = vcombine.low %v6398_v54, %v6406_v55  ;;  %v14552_v11 = vcombine.low %v6399_v61, %v6407_v62  ;;  %v14569_v18 = vcombine.high %v6415_v6, %v6423_v8  ;;  %v6478_v54 = vld [vmem:[%s18730_s25 + $0x1ba0] sm:$0xff] }
 0x81d   : > { %12750 = vmatprep.subr.bf16.mxu0 %v14473_v14  ;;  %v14567_v14 = vcombine.high %v6414_v63, %v6422_v41  ;;  %v6486_v55 = vld [vmem:[%s18730_s25 + $0x1be0] sm:$0xff] }
 0x81f   : > { %12587 = vmatpush1.bf16.msra.mxu1 %v14470_v22  ;;  %v6439_v22 = vld [vmem:[%s18730_s25 + $0x1a68] sm:$0xff] }
 0x820   : > { %12751 = vmatpush1.bf16.msra.mxu0 %v14472_v23  ;;  %12588 = vmatprep.subr.bf16.mxu1 %v14487_v24  ;;  %v14566_v23 = vcombine.low %v6414_v63, %v6422_v41  ;;  %v14568_v24 = vcombine.low %v6415_v6, %v6423_v8  ;;  %v14585_v29 = vcombine.high %v6431_v40, %v6439_v22 }
 0x821   : > { %12752 = vmatprep.subr.bf16.mxu0 %v14489_v26  ;;  %v14583_v26 = vcombine.high %v6430_v19, %v6438_v20  ;;  %v14614_v6 = vcombine.low %v6462_v45, %v6470_v47 }
 0x823   : > { %12589 = vmatpush1.bf16.msra.mxu1 %v14486_v35  ;;  %v6455_v35 = vld [vmem:[%s18730_s25 + $0x1ae8] sm:$0xff] }
 0x824   : > { %12753 = vmatpush1.bf16.msra.mxu0 %v14488_v36  ;;  %12590 = vmatprep.subr.bf16.mxu1 %v14503_v37  ;;  %v14582_v36 = vcombine.low %v6430_v19, %v6438_v20  ;;  %v14584_v37 = vcombine.low %v6431_v40, %v6439_v22  ;;  %v14601_v1 = vcombine.high %v6447_v34, %v6455_v35  ;;  %v6494_v40 = vld [vmem:[%s18730_s25 + $0x1c20] sm:$0xff] }
 0x825   : > { %12754 = vmatprep.subr.bf16.mxu0 %v14505_v43  ;;  %v14599_v43 = vcombine.high %v6446_v30, %v6454_v33  ;;  %v14600_v49 = vcombine.low %v6447_v34, %v6455_v35  ;;  %v6502_v22 = vld [vmem:[%s18730_s25 + $0x1c60] sm:$0xff] }
 0x826   : > { %v14647_v30 = vcombine.high %v6494_v40, %v6502_v22  ;;  %v6510_v34 = vld [vmem:[%s18730_s25 + $0x1ca0] sm:$0xff] }
 0x827   : > { %12591 = vmatpush1.bf16.msra.mxu1 %v14502_v13  ;;  %v6641_v13 = vrot.slane %v15214_v51, %v18955_v38  ;;  %v6518_v35 = vld [vmem:[%s18730_s25 + $0x1ce0] sm:$0xff] }
 0x828   : > { %12755 = vmatpush1.bf16.msra.mxu0 %v14504_v53  ;;  %12601 = vmatprep.subr.bf16.mxu1 %v14519_v25  ;;  %v6463_v53 = vld [vmem:[%s18730_s25 + $0x1b28] sm:$0xff]  ;;  %v14663_v45 = vcombine.high %v6510_v34, %v6518_v35 }
 0x829   : > { %12765 = vmatprep.subr.bf16.mxu0 %v14521_v56  ;;  %v6471_v25 = vld [vmem:[%s18730_s25 + $0x1b68] sm:$0xff]  ;;  %v6649_v56 = vrot.slane %v15214_v51, %v19044_v59 }
 0x82a   : > { %12593 = vmatmul.mubr.bf16.vlgmr.msra.gmra.mrb[24].mxu1 %v18985_v32 }
 0x82b   : > { %12757 = vmatmul.mubr.bf16.vlgmr.msra.gmra.mrb[20].mxu0 %v18985_v32  ;;  %12602 = vmatpush1.bf16.msra.mxu1 %v14518_v48  ;;  %v6653_v48 = vrot.slane %v15214_v51, %v18961_v46  ;;  %v6526_v51 = vld [vmem:[%s18730_s25 + $0x1d20] sm:$0xff] }
 0x82c   : > { %12633 = vmatprep.mubr.bf16.mxu1 %v18993_v39  ;;  %12766 = vmatpush1.bf16.msra.mxu0 %v14520_v3 }
 0x82d   : > { %12797 = vmatprep.mubr.bf16.mxu0 %v18993_v39  ;;  %12603 = vmatprep.subr.bf16.mxu1 %v14535_v52  ;;  %v14617_v52 = vcombine.high %v6463_v53, %v6471_v25 }
 0x82e   : > { %12767 = vmatprep.subr.bf16.mxu0 %v14537_v60 }
 0x82f   : > { %12604 = vmatpush1.bf16.msra.mxu1 %v14534_v0  ;;  %v6479_v0 = vld [vmem:[%s18730_s25 + $0x1ba8] sm:$0xff] }
 0x830   : > { %12768 = vmatpush1.bf16.msra.mxu0 %v14536_v2  ;;  %12605 = vmatprep.subr.bf16.mxu1 %v14551_v4  ;;  %v6487_v2 = vld [vmem:[%s18730_s25 + $0x1be8] sm:$0xff] }
 0x831   : > { %12769 = vmatprep.subr.bf16.mxu0 %v14553_v5  ;;  %v14633_v20 = vcombine.high %v6479_v0, %v6487_v2 }
 0x833   : > { %12606 = vmatpush1.bf16.msra.mxu1 %v14550_v9 }
 0x834   : > { %12770 = vmatpush1.bf16.msra.mxu0 %v14552_v11  ;;  %12607 = vmatprep.subr.bf16.mxu1 %v14567_v14  ;;  %v14616_v14 = vcombine.low %v6463_v53, %v6471_v25  ;;  %v6527_v25 = vld [vmem:[%s18730_s25 + $0x1d28] sm:$0xff] }
 0x835   : > { %12771 = vmatprep.subr.bf16.mxu0 %v14569_v18  ;;  %v14631_v18 = vcombine.high %v6478_v54, %v6486_v55 }
 0x837   : > { %12608 = vmatpush1.bf16.msra.mxu1 %v14566_v23  ;;  %v6495_v23 = vld [vmem:[%s18730_s25 + $0x1c28] sm:$0xff] }
 0x838   : > { %12772 = vmatpush1.bf16.msra.mxu0 %v14568_v24  ;;  %12609 = vmatprep.subr.bf16.mxu1 %v14583_v26  ;;  %v6503_v24 = vld [vmem:[%s18730_s25 + $0x1c68] sm:$0xff]  ;;  %v14630_v26 = vcombine.low %v6478_v54, %v6486_v55  ;;  %v6542_v55 = vld [vmem:[%s18730_s25 + $0x1da0] sm:$0xff] }
 0x839   : > { %12773 = vmatprep.subr.bf16.mxu0 %v14585_v29  ;;  %v14632_v29 = vcombine.low %v6479_v0, %v6487_v2  ;;  %v14649_v33 = vcombine.high %v6495_v23, %v6503_v24  ;;  %v6551_v0 = vld [vmem:[%s18730_s25 + $0x1de8] sm:$0xff] }
 0x83b   : > { %12610 = vmatpush1.bf16.msra.mxu1 %v14582_v36  ;;  %v6511_v36 = vld [vmem:[%s18730_s25 + $0x1ca8] sm:$0xff] }
 0x83c   : > { %12774 = vmatpush1.bf16.msra.mxu0 %v14584_v37  ;;  %12611 = vmatprep.subr.bf16.mxu1 %v14599_v43  ;;  %v6519_v37 = vld [vmem:[%s18730_s25 + $0x1ce8] sm:$0xff]  ;;  %v14646_v43 = vcombine.low %v6494_v40, %v6502_v22 }
 0x83d   : > { %v12307_v3 = vpop.f32.mrb[20].mxu1  ;;  %12775 = vmatprep.subr.bf16.mxu0 %v14601_v1  ;;  %v14648_v1 = vcombine.low %v6495_v23, %v6503_v24  ;;  %v14665_v47 = vcombine.high %v6511_v36, %v6519_v37  ;;  %v6574_v23 = vld [vmem:[%s18730_s25 + $0x1ea0] sm:$0xff] }
 0x83e   : > { %v14783_v60 = vadd.f32 %v12307_v3, %v6641_v13  ;;  %v12471_v61 = vpop.f32.mrb[16].mxu0  ;;  %v12309_v62 = vpop.f32.mrb[21].mxu1  ;;  %v6534_v13 = vld [vmem:[%s18730_s25 + $0x1d60] sm:$0xff] }
 0x83f   : > { %v14785_v4 = vadd.f32 %v12471_v61, %v6649_v56  ;;  %v14784_v5 = vadd.f32 %v12309_v62, %v6645_v57  ;;  %v12473_v63 = vpop.f32.mrb[17].mxu0  ;;  %v12311_v41 = vpop.f32.mrb[22].mxu1  ;;  %12612 = vmatpush1.bf16.msra.mxu1 %v14598_v58  ;;  %v6535_v56 = vld [vmem:[%s18730_s25 + $0x1d68] sm:$0xff]  ;;  %v14662_v58 = vcombine.low %v6510_v34, %v6518_v35  ;;  %v6582_v24 = vld [vmem:[%s18730_s25 + $0x1ee0] sm:$0xff] }
 0x840   : > { %15189 = vtanh.f32 %v14783_v60  ;;  %v14786_v8 = vadd.f32 %v12473_v63, %v6653_v48  ;;  %v12475_v9 = vpop.f32.mrb[18].mxu0  ;;  %12776 = vmatpush1.bf16.msra.mxu0 %v14600_v49  ;;  %v12312_v11 = vpop.f32.mrb[23].mxu1  ;;  %12613 = vmatprep.subr.bf16.mxu1 %v14615_v50  ;;  %v14664_v49 = vcombine.low %v6511_v36, %v6519_v37  ;;  %v14679_v50 = vcombine.high %v6526_v51, %v6534_v13  ;;  %v6550_v60 = vld [vmem:[%s18730_s25 + $0x1de0] sm:$0xff]  ;;  %v6543_v62 = vld [vmem:[%s18730_s25 + $0x1da8] sm:$0xff] }
 0x841   : > { %15191 = vtanh.f32 %v14785_v4  ;;  %v12476_v19 = vpop.f32.mrb[19].mxu0  ;;  %12777 = vmatprep.subr.bf16.mxu0 %v14617_v52  ;;  %v14681_v54 = vcombine.high %v6527_v25, %v6535_v56  ;;  %v14678_v4 = vcombine.low %v6526_v51, %v6534_v13  ;;  %v14680_v63 = vcombine.low %v6527_v25, %v6535_v56  ;;  %v6566_v9 = vld [vmem:[%s18730_s25 + $0x1e60] sm:$0xff]  ;;  %v6607_v56 = vld [vmem:[%s18730_s25 + $0x1fa8] sm:$0xff] }
 0x842   : > { %15193 = vtanh.f32 %v14784_v5  ;;  %v14695_v41 = vcombine.high %v6542_v55, %v6550_v60  ;;  %v14694_v19 = vcombine.low %v6542_v55, %v6550_v60  ;;  %v14727_v34 = vcombine.high %v6574_v23, %v6582_v24  ;;  %v6590_v36 = vld [vmem:[%s18730_s25 + $0x1f20] sm:$0xff]  ;;  %v5609_v55 = vld [vmem:[%s18730_s25 + $0x78] sm:$0xff] }
 0x843   : > { %15195 = vtanh.f32 %v14786_v8  ;;  %12614 = vmatpush1.bf16.msra.mxu1 %v14614_v6  ;;  %v14697_v6 = vcombine.high %v6543_v62, %v6551_v0  ;;  %v6558_v8 = vld [vmem:[%s18730_s25 + $0x1e20] sm:$0xff] }
 0x844   : > { %12778 = vmatpush1.bf16.msra.mxu0 %v14616_v14  ;;  %12615 = vmatprep.subr.bf16.mxu1 %v14631_v18  ;;  %v6559_v14 = vld [vmem:[%s18730_s25 + $0x1e28] sm:$0xff]  ;;  %v14711_v40 = vcombine.high %v6558_v8, %v6566_v9  ;;  %v6598_v37 = vld [vmem:[%s18730_s25 + $0x1f60] sm:$0xff] }
 0x845   : > { %12779 = vmatprep.subr.bf16.mxu0 %v14633_v20  ;;  %v6567_v18 = vld [vmem:[%s18730_s25 + $0x1e68] sm:$0xff]  ;;  %v14696_v20 = vcombine.low %v6543_v62, %v6551_v0  ;;  %v14743_v51 = vcombine.high %v6590_v36, %v6598_v37  ;;  %v6614_v25 = vld [vmem:[%s18730_s25 + $0x1fe0] sm:$0xff] }
 0x846   : > { %v14713_v22 = vcombine.high %v6559_v14, %v6567_v18 }
 0x847   : > { %12616 = vmatpush1.bf16.msra.mxu1 %v14630_v26  ;;  %v6575_v26 = vld [vmem:[%s18730_s25 + $0x1ea8] sm:$0xff] }
 0x848   : > { %12780 = vmatpush1.bf16.msra.mxu0 %v14632_v29  ;;  %12617 = vmatprep.subr.bf16.mxu1 %v14647_v30  ;;  %v6583_v29 = vld [vmem:[%s18730_s25 + $0x1ee8] sm:$0xff]  ;;  %v14710_v30 = vcombine.low %v6558_v8, %v6566_v9  ;;  %v5632_v9 = vld [vmem:[%s18730_s25 + $0x130] sm:$0xff] }
 0x849   : > { %12781 = vmatprep.subr.bf16.mxu0 %v14649_v33  ;;  %v14712_v33 = vcombine.low %v6559_v14, %v6567_v18  ;;  %v14729_v35 = vcombine.high %v6575_v26, %v6583_v29  ;;  %v5633_v18 = vld [vmem:[%s18730_s25 + $0x138] sm:$0xff] }
 0x84a   : > { %v15190_v53 = vpop.eup %15189 }
 0x84b   : > { %v15192_v57 = vpop.eup %15191  ;;  %12618 = vmatpush1.bf16.msra.mxu1 %v14646_v43  ;;  %v6591_v43 = vld [vmem:[%s18730_s25 + $0x1f28] sm:$0xff] }
 0x84c   : > { %v15194_v48 = vpop.eup %15193  ;;  %12782 = vmatpush1.bf16.msra.mxu0 %v14648_v1  ;;  %12619 = vmatprep.subr.bf16.mxu1 %v14663_v45  ;;  %v6599_v1 = vld [vmem:[%s18730_s25 + $0x1f68] sm:$0xff]  ;;  %v14726_v45 = vcombine.low %v6574_v23, %v6582_v24  ;;  %v5648_v24 = vld [vmem:[%s18730_s25 + $0x1b0] sm:$0xff] }
 0x84d   : > { %v15196_v3 = vpop.eup %15195  ;;  %v13183_v52 = vcombine.low %v15190_v53, %v15194_v48  ;;  %12783 = vmatprep.subr.bf16.mxu0 %v14665_v47  ;;  %v14728_v47 = vcombine.low %v6575_v26, %v6583_v29  ;;  %v14745_v13 = vcombine.high %v6591_v43, %v6599_v1  ;;  %v6606_v53 = vld [vmem:[%s18730_s25 + $0x1fa0] sm:$0xff]  ;;  %v14744_v48 = vcombine.low %v6591_v43, %v6599_v1  ;;  %v5656_v26 = vld [vmem:[%s18730_s25 + $0x1f0] sm:$0xff]  ;;  %v5649_v29 = vld [vmem:[%s18730_s25 + $0x1b8] sm:$0xff] }
 0x84e   : > { %v13184_v61 = vcombine.low %v15192_v57, %v15196_v3  ;;  %v6615_v57 = vld [vmem:[%s18730_s25 + $0x1fe8] sm:$0xff]  ;;  %v5600_v3 = vld [vmem:[%s18730_s25 + $0x30] sm:$0xff]  ;;  %v14758_v60 = vcombine.low %v6606_v53, %v6614_v25  ;;  %v5665_v43 = vld [vmem:[%s18730_s25 + $0x238] sm:$0xff] }
 0x84f   : > { %v13191_v2 = vrot.slane %v13183_v52, %v17414_v16  ;;  %12620 = vmatpush1.bf16.msra.mxu1 %v14662_v58  ;;  %v14742_v58 = vcombine.low %v6590_v36, %v6598_v37  ;;  %v5608_v52 = vld [vmem:[%s18730_s25 + $0x70] sm:$0xff]  ;;  %v5673_v1 = vld [vmem:[%s18730_s25 + $0x278] sm:$0xff] }
 0x850   : > { %v13198_v5 = vrot.slane %v13184_v61, %v17414_v16  ;;  %12784 = vmatpush1.bf16.msra.mxu0 %v14664_v49  ;;  %12621 = vmatprep.subr.bf16.mxu1 %v14679_v50  ;;  %v14759_v49 = vcombine.high %v6606_v53, %v6614_v25  ;;  %v14761_v50 = vcombine.high %v6607_v56, %v6615_v57  ;;  %v5664_v36 = vld [vmem:[%s18730_s25 + $0x230] sm:$0xff] }
 0x851   : > { %12785 = vmatprep.subr.bf16.mxu0 %v14681_v54  ;;  %v5601_v54 = vld [vmem:[%s18730_s25 + $0x38] sm:$0xff]  ;;  %v14760_v61 = vcombine.low %v6607_v56, %v6615_v57  ;;  %v13755_v62 = vcombine.high %v5600_v3, %v5608_v52  ;;  %v5672_v37 = vld [vmem:[%s18730_s25 + $0x270] sm:$0xff] }
 0x852   : > { %v13199_v11 = vcombine.low %v13191_v2, %v13198_v5  ;;  %v13757_v0 = vcombine.high %v5601_v54, %v5609_v55  ;;  %v5616_v2 = vld [vmem:[%s18730_s25 + $0xb0] sm:$0xff]  ;;  %v13754_v5 = vcombine.low %v5600_v3, %v5608_v52  ;;  %v5681_v56 = vld [vmem:[%s18730_s25 + $0x2b8] sm:$0xff] }
 0x853   : > { %12622 = vmatpush1.bf16.msra.mxu1 %v14678_v4  ;;  %v5624_v4 = vld [vmem:[%s18730_s25 + $0xf0] sm:$0xff]  ;;  %v5689_v57 = vld [vmem:[%s18730_s25 + $0x2f8] sm:$0xff] }
 0x854   : > { %13239 = vst [vmem:[%s19339_s19 + $0x8] sm:$0xff] %v13199_v11  ;;  %12786 = vmatpush1.bf16.msra.mxu0 %v14680_v63  ;;  %12623 = vmatprep.subr.bf16.mxu1 %v14695_v41  ;;  %v5617_v63 = vld [vmem:[%s18730_s25 + $0xb8] sm:$0xff]  ;;  %v13771_v8 = vcombine.high %v5616_v2, %v5624_v4  ;;  %v5640_v11 = vld [vmem:[%s18730_s25 + $0x170] sm:$0xff] }
 0x855   : > { %12787 = vmatprep.subr.bf16.mxu0 %v14697_v6  ;;  %v5625_v41 = vld [vmem:[%s18730_s25 + $0xf8] sm:$0xff]  ;;  %v13756_v6 = vcombine.low %v5601_v54, %v5609_v55  ;;  %v5680_v53 = vld [vmem:[%s18730_s25 + $0x2b0] sm:$0xff] }
 0x856   : > { %v13773_v14 = vcombine.high %v5617_v63, %v5625_v41  ;;  %v5688_v25 = vld [vmem:[%s18730_s25 + $0x2f0] sm:$0xff]  ;;  %v5697_v54 = vld [vmem:[%s18730_s25 + $0x338] sm:$0xff] }
 0x857   : > { %12624 = vmatpush1.bf16.msra.mxu1 %v14694_v19  ;;  %v5641_v19 = vld [vmem:[%s18730_s25 + $0x178] sm:$0xff]  ;;  %v5696_v3 = vld [vmem:[%s18730_s25 + $0x330] sm:$0xff] }
 0x858   : > { %12788 = vmatpush1.bf16.msra.mxu0 %v14696_v20  ;;  %12625 = vmatprep.subr.bf16.mxu1 %v14711_v40  ;;  %v13770_v20 = vcombine.low %v5616_v2, %v5624_v4  ;;  %v13772_v40 = vcombine.low %v5617_v63, %v5625_v41  ;;  %v13789_v23 = vcombine.high %v5633_v18, %v5641_v19  ;;  %v5704_v52 = vld [vmem:[%s18730_s25 + $0x370] sm:$0xff]  ;;  %v5705_v55 = vld [vmem:[%s18730_s25 + $0x378] sm:$0xff] }
 0x859   : > { %12789 = vmatprep.subr.bf16.mxu0 %v14713_v22  ;;  %v13787_v22 = vcombine.high %v5632_v9, %v5640_v11  ;;  %v5712_v2 = vld [vmem:[%s18730_s25 + $0x3b0] sm:$0xff]  ;;  %v5721_v63 = vld [vmem:[%s18730_s25 + $0x3f8] sm:$0xff]  ;;  %v13850_v41 = vcombine.low %v5696_v3, %v5704_v52 }
 0x85a   : > { %v5720_v4 = vld [vmem:[%s18730_s25 + $0x3f0] sm:$0xff] }
 0x85b   : > { %12626 = vmatpush1.bf16.msra.mxu1 %v14710_v30  ;;  %v5657_v30 = vld [vmem:[%s18730_s25 + $0x1f8] sm:$0xff] }
 0x85c   : > { %12790 = vmatpush1.bf16.msra.mxu0 %v14712_v33  ;;  %12627 = vmatprep.subr.bf16.mxu1 %v14727_v34  ;;  %v13786_v33 = vcombine.low %v5632_v9, %v5640_v11  ;;  %v13788_v34 = vcombine.low %v5633_v18, %v5641_v19  ;;  %v5728_v11 = vld [vmem:[%s18730_s25 + $0x430] sm:$0xff]  ;;  %v5729_v18 = vld [vmem:[%s18730_s25 + $0x438] sm:$0xff] }
 0x85d   : > { %12791 = vmatprep.subr.bf16.mxu0 %v14729_v35  ;;  %v13803_v35 = vcombine.high %v5648_v24, %v5656_v26  ;;  %v5737_v19 = vld [vmem:[%s18730_s25 + $0x478] sm:$0xff] }
 0x85f   : > { %12628 = vmatpush1.bf16.msra.mxu1 %v14726_v45  ;;  %v13802_v45 = vcombine.low %v5648_v24, %v5656_v26  ;;  %v5744_v24 = vld [vmem:[%s18730_s25 + $0x4b0] sm:$0xff] }
 0x860   : > { %12792 = vmatpush1.bf16.msra.mxu0 %v14728_v47  ;;  %12629 = vmatprep.subr.bf16.mxu1 %v14743_v51  ;;  %v13804_v47 = vcombine.low %v5649_v29, %v5657_v30  ;;  %v13819_v51 = vcombine.high %v5664_v36, %v5672_v37  ;;  %v5752_v26 = vld [vmem:[%s18730_s25 + $0x4f0] sm:$0xff] }
 0x861   : > { %12793 = vmatprep.subr.bf16.mxu0 %v14745_v13  ;;  %v13821_v13 = vcombine.high %v5665_v43, %v5673_v1 }
 0x863   : > { %12630 = vmatpush1.bf16.msra.mxu1 %v14742_v58  ;;  %v13818_v58 = vcombine.low %v5664_v36, %v5672_v37  ;;  %v5760_v36 = vld [vmem:[%s18730_s25 + $0x530] sm:$0xff] }
 0x864   : > { %12794 = vmatpush1.bf16.msra.mxu0 %v14744_v48  ;;  %12631 = vmatprep.subr.bf16.mxu1 %v14759_v49  ;;  %v13820_v48 = vcombine.low %v5665_v43, %v5673_v1  ;;  %v13835_v49 = vcombine.high %v5680_v53, %v5688_v25  ;;  %v5768_v37 = vld [vmem:[%s18730_s25 + $0x570] sm:$0xff]  ;;  %v5761_v43 = vld [vmem:[%s18730_s25 + $0x538] sm:$0xff] }
 0x865   : > { %12795 = vmatprep.subr.bf16.mxu0 %v14761_v50  ;;  %v13837_v50 = vcombine.high %v5681_v56, %v5689_v57  ;;  %v5769_v1 = vld [vmem:[%s18730_s25 + $0x578] sm:$0xff] }
 0x867   : > { %12632 = vmatpush1.bf16.msra.mxu1 %v14758_v60  ;;  %v13834_v60 = vcombine.low %v5680_v53, %v5688_v25  ;;  %v5776_v53 = vld [vmem:[%s18730_s25 + $0x5b0] sm:$0xff] }
 0x868   : > { %12796 = vmatpush1.bf16.msra.mxu0 %v14760_v61  ;;  %12806 = vmatprep.subr.bf16.mxu1 %v13755_v62  ;;  %v13836_v61 = vcombine.low %v5681_v56, %v5689_v57  ;;  %v13851_v62 = vcombine.high %v5696_v3, %v5704_v52  ;;  %v5784_v25 = vld [vmem:[%s18730_s25 + $0x5f0] sm:$0xff]  ;;  %v5777_v56 = vld [vmem:[%s18730_s25 + $0x5b8] sm:$0xff] }
 0x869   : > { %12970 = vmatprep.subr.bf16.mxu0 %v13757_v0  ;;  %v13853_v0 = vcombine.high %v5697_v54, %v5705_v55  ;;  %v5785_v57 = vld [vmem:[%s18730_s25 + $0x5f8] sm:$0xff]  ;;  %v5792_v3 = vld [vmem:[%s18730_s25 + $0x630] sm:$0xff] }
 0x86a   : > { %12634 = vmatmul.mubr.bf16.vlgmr.msra.gmra.mrb[24].mxu1 %v19067_v17  ;;  %v5800_v52 = vld [vmem:[%s18730_s25 + $0x670] sm:$0xff] }
 0x86b   : > { %12798 = vmatmul.mubr.bf16.vlgmr.msra.gmra.mrb[20].mxu0 %v19067_v17  ;;  %12807 = vmatpush1.bf16.msra.mxu1 %v13754_v5  ;;  %v5713_v5 = vld [vmem:[%s18730_s25 + $0x3b8] sm:$0xff] }
 0x86c   : > { %12838 = vmatprep.mubr.bf16.mxu1 %v18819_v7  ;;  %12971 = vmatpush1.bf16.msra.mxu0 %v13756_v6  ;;  %v13852_v6 = vcombine.low %v5697_v54, %v5705_v55  ;;  %v13869_v9 = vcombine.high %v5713_v5, %v5721_v63  ;;  %v5793_v54 = vld [vmem:[%s18730_s25 + $0x638] sm:$0xff] }
 0x86d   : > { %13002 = vmatprep.mubr.bf16.mxu0 %v18819_v7  ;;  %12808 = vmatprep.subr.bf16.mxu1 %v13771_v8  ;;  %v13805_v7 = vcombine.high %v5649_v29, %v5657_v30  ;;  %v13867_v8 = vcombine.high %v5712_v2, %v5720_v4  ;;  %v5745_v29 = vld [vmem:[%s18730_s25 + $0x4b8] sm:$0xff] }
 0x86e   : > { %12972 = vmatprep.subr.bf16.mxu0 %v13773_v14  ;;  %v5736_v14 = vld [vmem:[%s18730_s25 + $0x470] sm:$0xff]  ;;  %v5753_v30 = vld [vmem:[%s18730_s25 + $0x4f8] sm:$0xff] }
 0x86f   : > { %12809 = vmatpush1.bf16.msra.mxu1 %v13770_v20  ;;  %v13866_v20 = vcombine.low %v5712_v2, %v5720_v4  ;;  %v5801_v55 = vld [vmem:[%s18730_s25 + $0x678] sm:$0xff]  ;;  %v5808_v2 = vld [vmem:[%s18730_s25 + $0x6b0] sm:$0xff] }
 0x870   : > { %12973 = vmatpush1.bf16.msra.mxu0 %v13772_v40  ;;  %12810 = vmatprep.subr.bf16.mxu1 %v13787_v22  ;;  %v13868_v40 = vcombine.low %v5713_v5, %v5721_v63  ;;  %v13883_v22 = vcombine.high %v5728_v11, %v5736_v14  ;;  %v5816_v4 = vld [vmem:[%s18730_s25 + $0x6f0] sm:$0xff]  ;;  %v5809_v5 = vld [vmem:[%s18730_s25 + $0x6b8] sm:$0xff] }
 0x871   : > { %12974 = vmatprep.subr.bf16.mxu0 %v13789_v23  ;;  %v13885_v23 = vcombine.high %v5729_v18, %v5737_v19  ;;  %v5817_v63 = vld [vmem:[%s18730_s25 + $0x6f8] sm:$0xff] }
 0x873   : > { %12811 = vmatpush1.bf16.msra.mxu1 %v13786_v33  ;;  %v13882_v33 = vcombine.low %v5728_v11, %v5736_v14  ;;  %v5824_v11 = vld [vmem:[%s18730_s25 + $0x730] sm:$0xff] }
 0x874   : > { %12975 = vmatpush1.bf16.msra.mxu0 %v13788_v34  ;;  %12812 = vmatprep.subr.bf16.mxu1 %v13803_v35  ;;  %v13884_v34 = vcombine.low %v5729_v18, %v5737_v19  ;;  %v13899_v35 = vcombine.high %v5744_v24, %v5752_v26  ;;  %v5832_v14 = vld [vmem:[%s18730_s25 + $0x770] sm:$0xff]  ;;  %v5825_v18 = vld [vmem:[%s18730_s25 + $0x738] sm:$0xff] }
 0x875   : > { %12976 = vmatprep.subr.bf16.mxu0 %v13805_v7  ;;  %v13901_v7 = vcombine.high %v5745_v29, %v5753_v30  ;;  %v5833_v19 = vld [vmem:[%s18730_s25 + $0x778] sm:$0xff] }
 0x877   : > { %12813 = vmatpush1.bf16.msra.mxu1 %v13802_v45  ;;  %v13898_v45 = vcombine.low %v5744_v24, %v5752_v26  ;;  %v5840_v24 = vld [vmem:[%s18730_s25 + $0x7b0] sm:$0xff] }
 0x878   : > { %12977 = vmatpush1.bf16.msra.mxu0 %v13804_v47  ;;  %12814 = vmatprep.subr.bf16.mxu1 %v13819_v51  ;;  %v13900_v47 = vcombine.low %v5745_v29, %v5753_v30  ;;  %v13915_v51 = vcombine.high %v5760_v36, %v5768_v37  ;;  %v5848_v26 = vld [vmem:[%s18730_s25 + $0x7f0] sm:$0xff]  ;;  %v5841_v29 = vld [vmem:[%s18730_s25 + $0x7b8] sm:$0xff] }
 0x879   : > { %12978 = vmatprep.subr.bf16.mxu0 %v13821_v13  ;;  %v13917_v13 = vcombine.high %v5761_v43, %v5769_v1  ;;  %v5849_v30 = vld [vmem:[%s18730_s25 + $0x7f8] sm:$0xff] }
 0x87b   : > { %12815 = vmatpush1.bf16.msra.mxu1 %v13818_v58  ;;  %v13914_v58 = vcombine.low %v5760_v36, %v5768_v37  ;;  %v5856_v36 = vld [vmem:[%s18730_s25 + $0x830] sm:$0xff] }
 0x87c   : > { %12979 = vmatpush1.bf16.msra.mxu0 %v13820_v48  ;;  %12816 = vmatprep.subr.bf16.mxu1 %v13835_v49  ;;  %v13916_v48 = vcombine.low %v5761_v43, %v5769_v1  ;;  %v13931_v49 = vcombine.high %v5776_v53, %v5784_v25  ;;  %v5864_v37 = vld [vmem:[%s18730_s25 + $0x870] sm:$0xff]  ;;  %v5857_v43 = vld [vmem:[%s18730_s25 + $0x838] sm:$0xff] }
 0x87d   : > { %12980 = vmatprep.subr.bf16.mxu0 %v13837_v50  ;;  %v13933_v50 = vcombine.high %v5777_v56, %v5785_v57  ;;  %v5865_v1 = vld [vmem:[%s18730_s25 + $0x878] sm:$0xff] }
 0x87f   : > { %12817 = vmatpush1.bf16.msra.mxu1 %v13834_v60  ;;  %v13930_v60 = vcombine.low %v5776_v53, %v5784_v25  ;;  %v5872_v53 = vld [vmem:[%s18730_s25 + $0x8b0] sm:$0xff] }
 0x880   : > { %12981 = vmatpush1.bf16.msra.mxu0 %v13836_v61  ;;  %12818 = vmatprep.subr.bf16.mxu1 %v13851_v62  ;;  %v13932_v61 = vcombine.low %v5777_v56, %v5785_v57  ;;  %v13947_v62 = vcombine.high %v5792_v3, %v5800_v52  ;;  %v5880_v25 = vld [vmem:[%s18730_s25 + $0x8f0] sm:$0xff]  ;;  %v14010_v56 = vcombine.low %v5856_v36, %v5864_v37  ;;  %v5873_v57 = vld [vmem:[%s18730_s25 + $0x8b8] sm:$0xff] }
 0x881   : > { %12982 = vmatprep.subr.bf16.mxu0 %v13853_v0  ;;  %v13949_v0 = vcombine.high %v5793_v54, %v5801_v55 }
 0x883   : > { %12819 = vmatpush1.bf16.msra.mxu1 %v13850_v41  ;;  %v13946_v41 = vcombine.low %v5792_v3, %v5800_v52  ;;  %v5896_v3 = vld [vmem:[%s18730_s25 + $0x970] sm:$0xff] }
 0x884   : > { %12983 = vmatpush1.bf16.msra.mxu0 %v13852_v6  ;;  %12820 = vmatprep.subr.bf16.mxu1 %v13867_v8  ;;  %v13948_v6 = vcombine.low %v5793_v54, %v5801_v55  ;;  %v13963_v8 = vcombine.high %v5808_v2, %v5816_v4  ;;  %v5889_v54 = vld [vmem:[%s18730_s25 + $0x938] sm:$0xff] }
 0x885   : > { %12984 = vmatprep.subr.bf16.mxu0 %v13869_v9  ;;  %v13965_v9 = vcombine.high %v5809_v5, %v5817_v63  ;;  %v5897_v55 = vld [vmem:[%s18730_s25 + $0x978] sm:$0xff] }
 0x887   : > { %12821 = vmatpush1.bf16.msra.mxu1 %v13866_v20  ;;  %v13962_v20 = vcombine.low %v5808_v2, %v5816_v4  ;;  %v5904_v2 = vld [vmem:[%s18730_s25 + $0x9b0] sm:$0xff] }
 0x888   : > { %12985 = vmatpush1.bf16.msra.mxu0 %v13868_v40  ;;  %12822 = vmatprep.subr.bf16.mxu1 %v13883_v22  ;;  %v13964_v40 = vcombine.low %v5809_v5, %v5817_v63  ;;  %v13979_v22 = vcombine.high %v5824_v11, %v5832_v14  ;;  %v5912_v4 = vld [vmem:[%s18730_s25 + $0x9f0] sm:$0xff]  ;;  %v5905_v5 = vld [vmem:[%s18730_s25 + $0x9b8] sm:$0xff] }
 0x889   : > { %12986 = vmatprep.subr.bf16.mxu0 %v13885_v23  ;;  %v13981_v23 = vcombine.high %v5825_v18, %v5833_v19 }
 0x88b   : > { %12823 = vmatpush1.bf16.msra.mxu1 %v13882_v33  ;;  %v13978_v33 = vcombine.low %v5824_v11, %v5832_v14  ;;  %v5921_v11 = vld [vmem:[%s18730_s25 + $0xa38] sm:$0xff] }
 0x88c   : > { %12987 = vmatpush1.bf16.msra.mxu0 %v13884_v34  ;;  %12824 = vmatprep.subr.bf16.mxu1 %v13899_v35  ;;  %v13980_v34 = vcombine.low %v5825_v18, %v5833_v19  ;;  %v13995_v35 = vcombine.high %v5840_v24, %v5848_v26  ;;  %v5929_v14 = vld [vmem:[%s18730_s25 + $0xa78] sm:$0xff]  ;;  %v14058_v18 = vcombine.low %v5904_v2, %v5912_v4 }
 0x88d   : > { %12988 = vmatprep.subr.bf16.mxu0 %v13901_v7  ;;  %v13997_v7 = vcombine.high %v5841_v29, %v5849_v30 }
 0x88f   : > { %12825 = vmatpush1.bf16.msra.mxu1 %v13898_v45  ;;  %v13994_v45 = vcombine.low %v5840_v24, %v5848_v26  ;;  %v5937_v24 = vld [vmem:[%s18730_s25 + $0xab8] sm:$0xff] }
 0x890   : > { %12989 = vmatpush1.bf16.msra.mxu0 %v13900_v47  ;;  %12826 = vmatprep.subr.bf16.mxu1 %v13915_v51  ;;  %v13996_v47 = vcombine.low %v5841_v29, %v5849_v30  ;;  %v14011_v51 = vcombine.high %v5856_v36, %v5864_v37  ;;  %v5945_v26 = vld [vmem:[%s18730_s25 + $0xaf8] sm:$0xff]  ;;  %v14076_v30 = vcombine.low %v5921_v11, %v5929_v14 }
 0x891   : > { %12990 = vmatprep.subr.bf16.mxu0 %v13917_v13  ;;  %v14013_v13 = vcombine.high %v5857_v43, %v5865_v1  ;;  %v5953_v36 = vld [vmem:[%s18730_s25 + $0xb38] sm:$0xff] }
 0x892   : > { %v5961_v37 = vld [vmem:[%s18730_s25 + $0xb78] sm:$0xff] }
 0x893   : > { %12827 = vmatpush1.bf16.msra.mxu1 %v13914_v58  ;;  %v5881_v58 = vld [vmem:[%s18730_s25 + $0x8f8] sm:$0xff] }
 0x894   : > { %12991 = vmatpush1.bf16.msra.mxu0 %v13916_v48  ;;  %12828 = vmatprep.subr.bf16.mxu1 %v13931_v49  ;;  %v14012_v48 = vcombine.low %v5857_v43, %v5865_v1  ;;  %v14027_v49 = vcombine.high %v5872_v53, %v5880_v25  ;;  %v14029_v52 = vcombine.high %v5873_v57, %v5881_v58 }
 0x895   : > { %12992 = vmatprep.subr.bf16.mxu0 %v13933_v50  ;;  %v5888_v50 = vld [vmem:[%s18730_s25 + $0x930] sm:$0xff]  ;;  %v14092_v1 = vcombine.low %v5937_v24, %v5945_v26 }
 0x896   : > { %v14042_v63 = vcombine.low %v5888_v50, %v5896_v3 }
 0x897   : > { %12829 = vmatpush1.bf16.msra.mxu1 %v13930_v60  ;;  %v14026_v60 = vcombine.low %v5872_v53, %v5880_v25  ;;  %v5969_v53 = vld [vmem:[%s18730_s25 + $0xbb8] sm:$0xff] }
 0x898   : > { %12993 = vmatpush1.bf16.msra.mxu0 %v13932_v61  ;;  %12830 = vmatprep.subr.bf16.mxu1 %v13947_v62  ;;  %v14028_v61 = vcombine.low %v5873_v57, %v5881_v58  ;;  %v14043_v62 = vcombine.high %v5888_v50, %v5896_v3  ;;  %v5977_v25 = vld [vmem:[%s18730_s25 + $0xbf8] sm:$0xff]  ;;  %v14108_v57 = vcombine.low %v5953_v36, %v5961_v37  ;;  %v5992_v50 = vld [vmem:[%s18730_s25 + $0xc70] sm:$0xff] }
 0x899   : > { %12994 = vmatprep.subr.bf16.mxu0 %v13949_v0  ;;  %v14045_v0 = vcombine.high %v5889_v54, %v5897_v55  ;;  %v5985_v3 = vld [vmem:[%s18730_s25 + $0xc38] sm:$0xff] }
 0x89b   : > { %12831 = vmatpush1.bf16.msra.mxu1 %v13946_v41  ;;  %v14044_v41 = vcombine.low %v5889_v54, %v5897_v55  ;;  %v14124_v55 = vcombine.low %v5969_v53, %v5977_v25 }
 0x89c   : > { %12995 = vmatpush1.bf16.msra.mxu0 %v13948_v6  ;;  %12832 = vmatprep.subr.bf16.mxu1 %v13963_v8  ;;  %v14059_v6 = vcombine.high %v5904_v2, %v5912_v4  ;;  %v5920_v8 = vld [vmem:[%s18730_s25 + $0xa30] sm:$0xff]  ;;  %v6001_v2 = vld [vmem:[%s18730_s25 + $0xcb8] sm:$0xff] }
 0x89d   : > { %12996 = vmatprep.subr.bf16.mxu0 %v13965_v9  ;;  %v5928_v9 = vld [vmem:[%s18730_s25 + $0xa70] sm:$0xff]  ;;  %v6009_v4 = vld [vmem:[%s18730_s25 + $0xcf8] sm:$0xff] }
 0x89e   : > { %v14074_v29 = vcombine.low %v5920_v8, %v5928_v9 }
 0x89f   : > { %12833 = vmatpush1.bf16.msra.mxu1 %v13962_v20  ;;  %v14075_v20 = vcombine.high %v5920_v8, %v5928_v9  ;;  %v6017_v8 = vld [vmem:[%s18730_s25 + $0xd38] sm:$0xff] }
 0x8a0   : > { %12997 = vmatpush1.bf16.msra.mxu0 %v13964_v40  ;;  %12834 = vmatprep.subr.bf16.mxu1 %v13979_v22  ;;  %v14077_v40 = vcombine.high %v5921_v11, %v5929_v14  ;;  %v5936_v22 = vld [vmem:[%s18730_s25 + $0xab0] sm:$0xff]  ;;  %v6025_v9 = vld [vmem:[%s18730_s25 + $0xd78] sm:$0xff]  ;;  %v14156_v14 = vcombine.low %v6001_v2, %v6009_v4 }
 0x8a1   : > { %12998 = vmatprep.subr.bf16.mxu0 %v13981_v23  ;;  %v5944_v23 = vld [vmem:[%s18730_s25 + $0xaf0] sm:$0xff] }
 0x8a2   : > { %v14090_v43 = vcombine.low %v5936_v22, %v5944_v23 }
 0x8a3   : > { %12835 = vmatpush1.bf16.msra.mxu1 %v13978_v33  ;;  %v14091_v33 = vcombine.high %v5936_v22, %v5944_v23  ;;  %v6033_v22 = vld [vmem:[%s18730_s25 + $0xdb8] sm:$0xff] }
 0x8a4   : > { %12999 = vmatpush1.bf16.msra.mxu0 %v13980_v34  ;;  %12836 = vmatprep.subr.bf16.mxu1 %v13995_v35  ;;  %v14093_v34 = vcombine.high %v5937_v24, %v5945_v26  ;;  %v5952_v35 = vld [vmem:[%s18730_s25 + $0xb30] sm:$0xff]  ;;  %v6041_v23 = vld [vmem:[%s18730_s25 + $0xdf8] sm:$0xff]  ;;  %v14172_v26 = vcombine.low %v6017_v8, %v6025_v9 }
 0x8a5   : > { %13000 = vmatprep.subr.bf16.mxu0 %v13997_v7  ;;  %v5960_v7 = vld [vmem:[%s18730_s25 + $0xb70] sm:$0xff] }
 0x8a7   : > { %12837 = vmatpush1.bf16.msra.mxu1 %v13994_v45  ;;  %v14107_v45 = vcombine.high %v5952_v35, %v5960_v7 }
 0x8a8   : > { %13001 = vmatpush1.bf16.msra.mxu0 %v13996_v47  ;;  %12847 = vmatprep.subr.bf16.mxu1 %v14011_v51  ;;  %v14109_v47 = vcombine.high %v5953_v36, %v5961_v37  ;;  %v5968_v51 = vld [vmem:[%s18730_s25 + $0xbb0] sm:$0xff]  ;;  %v14188_v37 = vcombine.low %v6033_v22, %v6041_v23 }
 0x8a9   : > { %13011 = vmatprep.subr.bf16.mxu0 %v14013_v13  ;;  %v5976_v13 = vld [vmem:[%s18730_s25 + $0xbf0] sm:$0xff] }
 0x8aa   : > { %12839 = vmatmul.mubr.bf16.vlgmr.msra.gmra.mrb[28].mxu1 %v18821_v10  ;;  %v14123_v58 = vcombine.high %v5968_v51, %v5976_v13  ;;  %v14122_v54 = vcombine.low %v5968_v51, %v5976_v13  ;;  %v6065_v51 = vld [vmem:[%s18730_s25 + $0xeb8] sm:$0xff] }
 0x8ab   : > { %13003 = vmatmul.mubr.bf16.vlgmr.msra.gmra.mrb[24].mxu0 %v18821_v10  ;;  %12848 = vmatpush1.bf16.msra.mxu1 %v14010_v56  ;;  %v5913_v10 = vld [vmem:[%s18730_s25 + $0x9f8] sm:$0xff]  ;;  %v14106_v56 = vcombine.low %v5952_v35, %v5960_v7 }
 0x8ac   : > { %12879 = vmatprep.mubr.bf16.mxu1 %v18829_v21  ;;  %13012 = vmatpush1.bf16.msra.mxu0 %v14012_v48  ;;  %v14060_v19 = vcombine.low %v5905_v5, %v5913_v10  ;;  %v14125_v48 = vcombine.high %v5969_v53, %v5977_v25  ;;  %v6049_v35 = vld [vmem:[%s18730_s25 + $0xe38] sm:$0xff] }
 0x8ad   : > { %13043 = vmatprep.mubr.bf16.mxu0 %v18829_v21  ;;  %12849 = vmatprep.subr.bf16.mxu1 %v14027_v49  ;;  %v14061_v21 = vcombine.high %v5905_v5, %v5913_v10  ;;  %v5984_v49 = vld [vmem:[%s18730_s25 + $0xc30] sm:$0xff]  ;;  %v6057_v7 = vld [vmem:[%s18730_s25 + $0xe78] sm:$0xff] }
 0x8ae   : > { %13013 = vmatprep.subr.bf16.mxu0 %v14029_v52  ;;  %v5993_v52 = vld [vmem:[%s18730_s25 + $0xc78] sm:$0xff]  ;;  %v14138_v5 = vcombine.low %v5984_v49, %v5992_v50  ;;  %v14204_v25 = vcombine.low %v6049_v35, %v6057_v7 }
 0x8af   : > { %12850 = vmatpush1.bf16.msra.mxu1 %v14026_v60  ;;  %v14139_v60 = vcombine.high %v5984_v49, %v5992_v50  ;;  %v14140_v10 = vcombine.low %v5985_v3, %v5993_v52  ;;  %v6073_v13 = vld [vmem:[%s18730_s25 + $0xef8] sm:$0xff] }
 0x8b0   : > { %13014 = vmatpush1.bf16.msra.mxu0 %v14028_v61  ;;  %12851 = vmatprep.subr.bf16.mxu1 %v14043_v62  ;;  %v14141_v61 = vcombine.high %v5985_v3, %v5993_v52  ;;  %v6000_v62 = vld [vmem:[%s18730_s25 + $0xcb0] sm:$0xff]  ;;  %v6081_v49 = vld [vmem:[%s18730_s25 + $0xf38] sm:$0xff]  ;;  %v14220_v52 = vcombine.low %v6065_v51, %v6073_v13 }
 0x8b1   : > { %13015 = vmatprep.subr.bf16.mxu0 %v14045_v0  ;;  %v6008_v0 = vld [vmem:[%s18730_s25 + $0xcf0] sm:$0xff]  ;;  %v6089_v50 = vld [vmem:[%s18730_s25 + $0xf78] sm:$0xff] }
 0x8b2   : > { %v14154_v11 = vcombine.low %v6000_v62, %v6008_v0 }
 0x8b3   : > { %12852 = vmatpush1.bf16.msra.mxu1 %v14042_v63  ;;  %v14155_v63 = vcombine.high %v6000_v62, %v6008_v0  ;;  %v6097_v62 = vld [vmem:[%s18730_s25 + $0xfb8] sm:$0xff] }
 0x8b4   : > { %13016 = vmatpush1.bf16.msra.mxu0 %v14044_v41  ;;  %12853 = vmatprep.subr.bf16.mxu1 %v14059_v6  ;;  %v14157_v41 = vcombine.high %v6001_v2, %v6009_v4  ;;  %v6016_v6 = vld [vmem:[%s18730_s25 + $0xd30] sm:$0xff]  ;;  %v6105_v0 = vld [vmem:[%s18730_s25 + $0xff8] sm:$0xff]  ;;  %v14236_v4 = vcombine.low %v6081_v49, %v6089_v50 }
 0x8b5   : > { %13017 = vmatprep.subr.bf16.mxu0 %v14061_v21  ;;  %v6024_v21 = vld [vmem:[%s18730_s25 + $0xd70] sm:$0xff] }
 0x8b6   : > { %v14170_v24 = vcombine.low %v6016_v6, %v6024_v21 }
 0x8b7   : > { %12854 = vmatpush1.bf16.msra.mxu1 %v14058_v18  ;;  %v14171_v18 = vcombine.high %v6016_v6, %v6024_v21  ;;  %v6113_v6 = vld [vmem:[%s18730_s25 + $0x1038] sm:$0xff] }
 0x8b8   : > { %13018 = vmatpush1.bf16.msra.mxu0 %v14060_v19  ;;  %12855 = vmatprep.subr.bf16.mxu1 %v14075_v20  ;;  %v14173_v19 = vcombine.high %v6017_v8, %v6025_v9  ;;  %v6032_v20 = vld [vmem:[%s18730_s25 + $0xdb0] sm:$0xff]  ;;  %v6121_v21 = vld [vmem:[%s18730_s25 + $0x1078] sm:$0xff]  ;;  %v14252_v9 = vcombine.low %v6097_v62, %v6105_v0 }
 0x8b9   : > { %13019 = vmatprep.subr.bf16.mxu0 %v14077_v40  ;;  %v6040_v40 = vld [vmem:[%s18730_s25 + $0xdf0] sm:$0xff] }
 0x8ba   : > { %v14186_v36 = vcombine.low %v6032_v20, %v6040_v40 }
 0x8bb   : > { %12856 = vmatpush1.bf16.msra.mxu1 %v14074_v29  ;;  %v14187_v29 = vcombine.high %v6032_v20, %v6040_v40  ;;  %v6129_v40 = vld [vmem:[%s18730_s25 + $0x10b8] sm:$0xff] }
 0x8bc   : > { %13020 = vmatpush1.bf16.msra.mxu0 %v14076_v30  ;;  %12857 = vmatprep.subr.bf16.mxu1 %v14091_v33  ;;  %v14189_v30 = vcombine.high %v6033_v22, %v6041_v23  ;;  %v6048_v33 = vld [vmem:[%s18730_s25 + $0xe30] sm:$0xff]  ;;  %v6137_v22 = vld [vmem:[%s18730_s25 + $0x10f8] sm:$0xff]  ;;  %v14268_v23 = vcombine.low %v6113_v6, %v6121_v21 }
 0x8bd   : > { %13021 = vmatprep.subr.bf16.mxu0 %v14093_v34  ;;  %v6056_v34 = vld [vmem:[%s18730_s25 + $0xe70] sm:$0xff] }
 0x8be   : > { %v14202_v53 = vcombine.low %v6048_v33, %v6056_v34 }
 0x8bf   : > { %12858 = vmatpush1.bf16.msra.mxu1 %v14090_v43  ;;  %v14203_v43 = vcombine.high %v6048_v33, %v6056_v34  ;;  %v6145_v33 = vld [vmem:[%s18730_s25 + $0x1138] sm:$0xff] }
 0x8c0   : > { %13022 = vmatpush1.bf16.msra.mxu0 %v14092_v1  ;;  %12859 = vmatprep.subr.bf16.mxu1 %v14107_v45  ;;  %v14205_v1 = vcombine.high %v6049_v35, %v6057_v7  ;;  %v6064_v45 = vld [vmem:[%s18730_s25 + $0xeb0] sm:$0xff]  ;;  %v6153_v34 = vld [vmem:[%s18730_s25 + $0x1178] sm:$0xff]  ;;  %v14284_v7 = vcombine.low %v6129_v40, %v6137_v22 }
 0x8c1   : > { %13023 = vmatprep.subr.bf16.mxu0 %v14109_v47  ;;  %v6072_v47 = vld [vmem:[%s18730_s25 + $0xef0] sm:$0xff] }
 0x8c2   : > { %v14218_v3 = vcombine.low %v6064_v45, %v6072_v47 }
 0x8c3   : > { %12860 = vmatpush1.bf16.msra.mxu1 %v14106_v56  ;;  %v14219_v56 = vcombine.high %v6064_v45, %v6072_v47  ;;  %v6161_v45 = vld [vmem:[%s18730_s25 + $0x11b8] sm:$0xff] }
 0x8c4   : > { %13024 = vmatpush1.bf16.msra.mxu0 %v14108_v57  ;;  %12861 = vmatprep.subr.bf16.mxu1 %v14123_v58  ;;  %v14221_v57 = vcombine.high %v6065_v51, %v6073_v13  ;;  %v6080_v58 = vld [vmem:[%s18730_s25 + $0xf30] sm:$0xff]  ;;  %v14300_v51 = vcombine.low %v6145_v33, %v6153_v34 }
 0x8c5   : > { %13025 = vmatprep.subr.bf16.mxu0 %v14125_v48  ;;  %v6088_v48 = vld [vmem:[%s18730_s25 + $0xf70] sm:$0xff] }
 0x8c6   : > { %v14234_v2 = vcombine.low %v6080_v58, %v6088_v48 }
 0x8c7   : > { %12862 = vmatpush1.bf16.msra.mxu1 %v14122_v54  ;;  %v14235_v54 = vcombine.high %v6080_v58, %v6088_v48 }
 0x8c8   : > { %13026 = vmatpush1.bf16.msra.mxu0 %v14124_v55  ;;  %12863 = vmatprep.subr.bf16.mxu1 %v14139_v60  ;;  %v14237_v55 = vcombine.high %v6081_v49, %v6089_v50  ;;  %v6096_v60 = vld [vmem:[%s18730_s25 + $0xfb0] sm:$0xff] }
 0x8c9   : > { %13027 = vmatprep.subr.bf16.mxu0 %v14141_v61  ;;  %v6104_v61 = vld [vmem:[%s18730_s25 + $0xff0] sm:$0xff] }
 0x8ca   : > { %v14250_v8 = vcombine.low %v6096_v60, %v6104_v61 }
 0x8cb   : > { %12864 = vmatpush1.bf16.msra.mxu1 %v14138_v5  ;;  %v14251_v5 = vcombine.high %v6096_v60, %v6104_v61 }
 0x8cc   : > { %13028 = vmatpush1.bf16.msra.mxu0 %v14140_v10  ;;  %12865 = vmatprep.subr.bf16.mxu1 %v14155_v63  ;;  %v14253_v10 = vcombine.high %v6097_v62, %v6105_v0  ;;  %v6112_v63 = vld [vmem:[%s18730_s25 + $0x1030] sm:$0xff] }
 0x8cd   : > { %13029 = vmatprep.subr.bf16.mxu0 %v14157_v41  ;;  %v6120_v41 = vld [vmem:[%s18730_s25 + $0x1070] sm:$0xff] }
 0x8ce   : > { %v14266_v20 = vcombine.low %v6112_v63, %v6120_v41 }
 0x8cf   : > { %12866 = vmatpush1.bf16.msra.mxu1 %v14154_v11  ;;  %v14267_v11 = vcombine.high %v6112_v63, %v6120_v41 }
 0x8d0   : > { %13030 = vmatpush1.bf16.msra.mxu0 %v14156_v14  ;;  %12867 = vmatprep.subr.bf16.mxu1 %v14171_v18  ;;  %v14269_v14 = vcombine.high %v6113_v6, %v6121_v21  ;;  %v6128_v18 = vld [vmem:[%s18730_s25 + $0x10b0] sm:$0xff] }
 0x8d1   : > { %13031 = vmatprep.subr.bf16.mxu0 %v14173_v19  ;;  %v6136_v19 = vld [vmem:[%s18730_s25 + $0x10f0] sm:$0xff] }
 0x8d2   : > { %v14282_v35 = vcombine.low %v6128_v18, %v6136_v19 }
 0x8d3   : > { %12868 = vmatpush1.bf16.msra.mxu1 %v14170_v24  ;;  %v14283_v24 = vcombine.high %v6128_v18, %v6136_v19 }
 0x8d4   : > { %13032 = vmatpush1.bf16.msra.mxu0 %v14172_v26  ;;  %12869 = vmatprep.subr.bf16.mxu1 %v14187_v29  ;;  %v6144_v26 = vld [vmem:[%s18730_s25 + $0x1130] sm:$0xff] }
 0x8d5   : > { %13033 = vmatprep.subr.bf16.mxu0 %v14189_v30  ;;  %v6152_v29 = vld [vmem:[%s18730_s25 + $0x1170] sm:$0xff]  ;;  %v14285_v30 = vcombine.high %v6129_v40, %v6137_v22 }
 0x8d6   : > { %v14298_v47 = vcombine.low %v6144_v26, %v6152_v29  ;;  %v6240_v22 = vld [vmem:[%s18730_s25 + $0x1430] sm:$0xff] }
 0x8d7   : > { %12870 = vmatpush1.bf16.msra.mxu1 %v14186_v36  ;;  %v14299_v36 = vcombine.high %v6144_v26, %v6152_v29  ;;  %v6249_v26 = vld [vmem:[%s18730_s25 + $0x1478] sm:$0xff] }
 0x8d8   : > { %13034 = vmatpush1.bf16.msra.mxu0 %v14188_v37  ;;  %12871 = vmatprep.subr.bf16.mxu1 %v14203_v43  ;;  %v14301_v37 = vcombine.high %v6145_v33, %v6153_v34  ;;  %v6160_v43 = vld [vmem:[%s18730_s25 + $0x11b0] sm:$0xff] }
 0x8d9   : > { %13035 = vmatprep.subr.bf16.mxu0 %v14205_v1  ;;  %v6168_v1 = vld [vmem:[%s18730_s25 + $0x11f0] sm:$0xff] }
 0x8da   : > { %v14315_v13 = vcombine.high %v6160_v43, %v6168_v1  ;;  %v14314_v58 = vcombine.low %v6160_v43, %v6168_v1 }
 0x8db   : > { %12872 = vmatpush1.bf16.msra.mxu1 %v14202_v53  ;;  %v6176_v53 = vld [vmem:[%s18730_s25 + $0x1230] sm:$0xff] }
 0x8dc   : > { %13036 = vmatpush1.bf16.msra.mxu0 %v14204_v25  ;;  %12873 = vmatprep.subr.bf16.mxu1 %v14219_v56  ;;  %v6184_v25 = vld [vmem:[%s18730_s25 + $0x1270] sm:$0xff]  ;;  %v6177_v56 = vld [vmem:[%s18730_s25 + $0x1238] sm:$0xff] }
 0x8dd   : > { %13037 = vmatprep.subr.bf16.mxu0 %v14221_v57  ;;  %v6185_v57 = vld [vmem:[%s18730_s25 + $0x1278] sm:$0xff]  ;;  %v14331_v49 = vcombine.high %v6176_v53, %v6184_v25  ;;  %v14330_v60 = vcombine.low %v6176_v53, %v6184_v25 }
 0x8de   : > { %v14333_v50 = vcombine.high %v6177_v56, %v6185_v57  ;;  %v14332_v61 = vcombine.low %v6177_v56, %v6185_v57 }
 0x8df   : > { %12874 = vmatpush1.bf16.msra.mxu1 %v14218_v3  ;;  %v6192_v3 = vld [vmem:[%s18730_s25 + $0x12b0] sm:$0xff] }
 0x8e0   : > { %13038 = vmatpush1.bf16.msra.mxu0 %v14220_v52  ;;  %12875 = vmatprep.subr.bf16.mxu1 %v14235_v54  ;;  %v6200_v52 = vld [vmem:[%s18730_s25 + $0x12f0] sm:$0xff]  ;;  %v6193_v54 = vld [vmem:[%s18730_s25 + $0x12b8] sm:$0xff] }
 0x8e1   : > { %13039 = vmatprep.subr.bf16.mxu0 %v14237_v55  ;;  %v6201_v55 = vld [vmem:[%s18730_s25 + $0x12f8] sm:$0xff]  ;;  %v14347_v62 = vcombine.high %v6192_v3, %v6200_v52  ;;  %v14346_v63 = vcombine.low %v6192_v3, %v6200_v52 }
 0x8e2   : > { %v14349_v0 = vcombine.high %v6193_v54, %v6201_v55  ;;  %v14348_v41 = vcombine.low %v6193_v54, %v6201_v55 }
 0x8e3   : > { %12876 = vmatpush1.bf16.msra.mxu1 %v14234_v2  ;;  %v6208_v2 = vld [vmem:[%s18730_s25 + $0x1330] sm:$0xff] }
 0x8e4   : > { %13040 = vmatpush1.bf16.msra.mxu0 %v14236_v4  ;;  %12877 = vmatprep.subr.bf16.mxu1 %v14251_v5  ;;  %v6216_v4 = vld [vmem:[%s18730_s25 + $0x1370] sm:$0xff]  ;;  %v6209_v5 = vld [vmem:[%s18730_s25 + $0x1338] sm:$0xff] }
 0x8e5   : > { %13041 = vmatprep.subr.bf16.mxu0 %v14253_v10  ;;  %v6217_v10 = vld [vmem:[%s18730_s25 + $0x1378] sm:$0xff]  ;;  %v14363_v6 = vcombine.high %v6208_v2, %v6216_v4  ;;  %v14362_v18 = vcombine.low %v6208_v2, %v6216_v4 }
 0x8e6   : > { %v14365_v21 = vcombine.high %v6209_v5, %v6217_v10  ;;  %v14364_v19 = vcombine.low %v6209_v5, %v6217_v10 }
 0x8e7   : > { %12878 = vmatpush1.bf16.msra.mxu1 %v14250_v8  ;;  %v6224_v8 = vld [vmem:[%s18730_s25 + $0x13b0] sm:$0xff] }
 0x8e8   : > { %13042 = vmatpush1.bf16.msra.mxu0 %v14252_v9  ;;  %12888 = vmatprep.subr.bf16.mxu1 %v14267_v11  ;;  %v6232_v9 = vld [vmem:[%s18730_s25 + $0x13f0] sm:$0xff]  ;;  %v6225_v11 = vld [vmem:[%s18730_s25 + $0x13b8] sm:$0xff] }
 0x8e9   : > { %13052 = vmatprep.subr.bf16.mxu0 %v14269_v14  ;;  %v6233_v14 = vld [vmem:[%s18730_s25 + $0x13f8] sm:$0xff]  ;;  %v14378_v29 = vcombine.low %v6224_v8, %v6232_v9 }
 0x8ea   : > { %12880 = vmatmul.mubr.bf16.vlgmr.msra.gmra.mrb[28].mxu1 %v18898_v44  ;;  %v14381_v40 = vcombine.high %v6225_v11, %v6233_v14 }
 0x8eb   : > { %13044 = vmatmul.mubr.bf16.vlgmr.msra.gmra.mrb[24].mxu0 %v18898_v44  ;;  %12889 = vmatpush1.bf16.msra.mxu1 %v14266_v20  ;;  %v6169_v44 = vld [vmem:[%s18730_s25 + $0x11f8] sm:$0xff]  ;;  %v14379_v20 = vcombine.high %v6224_v8, %v6232_v9 }
 0x8ec   : > { %12920 = vmatprep.mubr.bf16.mxu1 %v18983_v27  ;;  %13053 = vmatpush1.bf16.msra.mxu0 %v14268_v23  ;;  %v14316_v48 = vcombine.low %v6161_v45, %v6169_v44  ;;  %v6248_v23 = vld [vmem:[%s18730_s25 + $0x1470] sm:$0xff] }
 0x8ed   : > { %13084 = vmatprep.mubr.bf16.mxu0 %v18983_v27  ;;  %12890 = vmatprep.subr.bf16.mxu1 %v14283_v24  ;;  %v14317_v27 = vcombine.high %v6161_v45, %v6169_v44  ;;  %v6241_v24 = vld [vmem:[%s18730_s25 + $0x1438] sm:$0xff]  ;;  %v14395_v33 = vcombine.high %v6240_v22, %v6248_v23  ;;  %v14394_v43 = vcombine.low %v6240_v22, %v6248_v23 }
 0x8ee   : > { %13054 = vmatprep.subr.bf16.mxu0 %v14285_v30  ;;  %v14380_v30 = vcombine.low %v6225_v11, %v6233_v14  ;;  %v14397_v34 = vcombine.high %v6241_v24, %v6249_v26  ;;  %v14396_v1 = vcombine.low %v6241_v24, %v6249_v26 }
 0x8ef   : > { %12891 = vmatpush1.bf16.msra.mxu1 %v14282_v35  ;;  %v6256_v35 = vld [vmem:[%s18730_s25 + $0x14b0] sm:$0xff] }
 0x8f0   : > { %13055 = vmatpush1.bf16.msra.mxu0 %v14284_v7  ;;  %12892 = vmatprep.subr.bf16.mxu1 %v14299_v36  ;;  %v6264_v7 = vld [vmem:[%s18730_s25 + $0x14f0] sm:$0xff]  ;;  %v6257_v36 = vld [vmem:[%s18730_s25 + $0x14b8] sm:$0xff] }
 0x8f1   : > { %13056 = vmatprep.subr.bf16.mxu0 %v14301_v37  ;;  %v6265_v37 = vld [vmem:[%s18730_s25 + $0x14f8] sm:$0xff]  ;;  %v14411_v45 = vcombine.high %v6256_v35, %v6264_v7  ;;  %v14410_v53 = vcombine.low %v6256_v35, %v6264_v7 }
 0x8f2   : > { %v14413_v44 = vcombine.high %v6257_v36, %v6265_v37  ;;  %v14412_v25 = vcombine.low %v6257_v36, %v6265_v37 }
 0x8f3   : > { %12893 = vmatpush1.bf16.msra.mxu1 %v14298_v47  ;;  %v6272_v47 = vld [vmem:[%s18730_s25 + $0x1530] sm:$0xff] }
 0x8f4   : > { %13057 = vmatpush1.bf16.msra.mxu0 %v14300_v51  ;;  %12894 = vmatprep.subr.bf16.mxu1 %v14315_v13  ;;  %v6280_v51 = vld [vmem:[%s18730_s25 + $0x1570] sm:$0xff]  ;;  %v6273_v13 = vld [vmem:[%s18730_s25 + $0x1538] sm:$0xff] }
 0x8f5   : > { %13058 = vmatprep.subr.bf16.mxu0 %v14317_v27  ;;  %v6281_v27 = vld [vmem:[%s18730_s25 + $0x1578] sm:$0xff]  ;;  %v14427_v56 = vcombine.high %v6272_v47, %v6280_v51  ;;  %v14426_v3 = vcombine.low %v6272_v47, %v6280_v51 }
 0x8f6   : > { %v14429_v57 = vcombine.high %v6273_v13, %v6281_v27  ;;  %v14428_v52 = vcombine.low %v6273_v13, %v6281_v27 }
 0x8f7   : > { %12895 = vmatpush1.bf16.msra.mxu1 %v14314_v58  ;;  %v6288_v58 = vld [vmem:[%s18730_s25 + $0x15b0] sm:$0xff] }
 0x8f8   : > { %13059 = vmatpush1.bf16.msra.mxu0 %v14316_v48  ;;  %12896 = vmatprep.subr.bf16.mxu1 %v14331_v49  ;;  %v6296_v48 = vld [vmem:[%s18730_s25 + $0x15f0] sm:$0xff]  ;;  %v6289_v49 = vld [vmem:[%s18730_s25 + $0x15b8] sm:$0xff] }
 0x8f9   : > { %13060 = vmatprep.subr.bf16.mxu0 %v14333_v50  ;;  %v6297_v50 = vld [vmem:[%s18730_s25 + $0x15f8] sm:$0xff]  ;;  %v14443_v54 = vcombine.high %v6288_v58, %v6296_v48  ;;  %v14442_v2 = vcombine.low %v6288_v58, %v6296_v48 }
 0x8fa   : > { %v14445_v55 = vcombine.high %v6289_v49, %v6297_v50  ;;  %v14444_v4 = vcombine.low %v6289_v49, %v6297_v50  ;;  %v6393_v58 = vld [vmem:[%s18730_s25 + $0x18f8] sm:$0xff]  ;;  %v6400_v50 = vld [vmem:[%s18730_s25 + $0x1930] sm:$0xff] }
 0x8fb   : > { %12897 = vmatpush1.bf16.msra.mxu1 %v14330_v60  ;;  %v6304_v60 = vld [vmem:[%s18730_s25 + $0x1630] sm:$0xff] }
 0x8fc   : > { %13061 = vmatpush1.bf16.msra.mxu0 %v14332_v61  ;;  %12898 = vmatprep.subr.bf16.mxu1 %v14347_v62  ;;  %v6312_v61 = vld [vmem:[%s18730_s25 + $0x1670] sm:$0xff]  ;;  %v6305_v62 = vld [vmem:[%s18730_s25 + $0x1638] sm:$0xff] }
 0x8fd   : > { %13062 = vmatprep.subr.bf16.mxu0 %v14349_v0  ;;  %v6313_v0 = vld [vmem:[%s18730_s25 + $0x1678] sm:$0xff]  ;;  %v14459_v5 = vcombine.high %v6304_v60, %v6312_v61  ;;  %v14458_v8 = vcombine.low %v6304_v60, %v6312_v61 }
 0x8fe   : > { %v14461_v10 = vcombine.high %v6305_v62, %v6313_v0  ;;  %v14460_v9 = vcombine.low %v6305_v62, %v6313_v0 }
 0x8ff   : > { %12899 = vmatpush1.bf16.msra.mxu1 %v14346_v63  ;;  %v6320_v63 = vld [vmem:[%s18730_s25 + $0x16b0] sm:$0xff] }
 0x900   : > { %13063 = vmatpush1.bf16.msra.mxu0 %v14348_v41  ;;  %12900 = vmatprep.subr.bf16.mxu1 %v14363_v6  ;;  %v6328_v41 = vld [vmem:[%s18730_s25 + $0x16f0] sm:$0xff]  ;;  %v6321_v6 = vld [vmem:[%s18730_s25 + $0x16b8] sm:$0xff] }
 0x901   : > { %13064 = vmatprep.subr.bf16.mxu0 %v14365_v21  ;;  %v6329_v21 = vld [vmem:[%s18730_s25 + $0x16f8] sm:$0xff]  ;;  %v14475_v11 = vcombine.high %v6320_v63, %v6328_v41  ;;  %v14474_v22 = vcombine.low %v6320_v63, %v6328_v41 }
 0x902   : > { %v14477_v14 = vcombine.high %v6321_v6, %v6329_v21  ;;  %v14476_v23 = vcombine.low %v6321_v6, %v6329_v21  ;;  %v6432_v6 = vld [vmem:[%s18730_s25 + $0x1a30] sm:$0xff] }
 0x903   : > { %12901 = vmatpush1.bf16.msra.mxu1 %v14362_v18  ;;  %v6336_v18 = vld [vmem:[%s18730_s25 + $0x1730] sm:$0xff] }
 0x904   : > { %13065 = vmatpush1.bf16.msra.mxu0 %v14364_v19  ;;  %12902 = vmatprep.subr.bf16.mxu1 %v14379_v20  ;;  %v6344_v19 = vld [vmem:[%s18730_s25 + $0x1770] sm:$0xff]  ;;  %v6337_v20 = vld [vmem:[%s18730_s25 + $0x1738] sm:$0xff] }
 0x905   : > { %13066 = vmatprep.subr.bf16.mxu0 %v14381_v40  ;;  %v6345_v40 = vld [vmem:[%s18730_s25 + $0x1778] sm:$0xff]  ;;  %v14491_v24 = vcombine.high %v6336_v18, %v6344_v19  ;;  %v14490_v35 = vcombine.low %v6336_v18, %v6344_v19  ;;  %v6440_v21 = vld [vmem:[%s18730_s25 + $0x1a70] sm:$0xff] }
 0x906   : > { %v14493_v26 = vcombine.high %v6337_v20, %v6345_v40  ;;  %v14492_v7 = vcombine.low %v6337_v20, %v6345_v40  ;;  %v14587_v18 = vcombine.high %v6432_v6, %v6440_v21  ;;  %v6448_v20 = vld [vmem:[%s18730_s25 + $0x1ab0] sm:$0xff] }
 0x907   : > { %12903 = vmatpush1.bf16.msra.mxu1 %v14378_v29  ;;  %v6352_v29 = vld [vmem:[%s18730_s25 + $0x17b0] sm:$0xff] }
 0x908   : > { %13067 = vmatpush1.bf16.msra.mxu0 %v14380_v30  ;;  %12904 = vmatprep.subr.bf16.mxu1 %v14395_v33  ;;  %v6360_v30 = vld [vmem:[%s18730_s25 + $0x17f0] sm:$0xff]  ;;  %v6353_v33 = vld [vmem:[%s18730_s25 + $0x17b8] sm:$0xff] }
 0x909   : > { %13068 = vmatprep.subr.bf16.mxu0 %v14397_v34  ;;  %v6361_v34 = vld [vmem:[%s18730_s25 + $0x17f8] sm:$0xff]  ;;  %v14507_v36 = vcombine.high %v6352_v29, %v6360_v30  ;;  %v14506_v47 = vcombine.low %v6352_v29, %v6360_v30  ;;  %v6456_v40 = vld [vmem:[%s18730_s25 + $0x1af0] sm:$0xff] }
 0x90a   : > { %v14509_v37 = vcombine.high %v6353_v33, %v6361_v34  ;;  %v14508_v51 = vcombine.low %v6353_v33, %v6361_v34  ;;  %v14603_v30 = vcombine.high %v6448_v20, %v6456_v40  ;;  %v6464_v34 = vld [vmem:[%s18730_s25 + $0x1b30] sm:$0xff] }
 0x90b   : > { %12905 = vmatpush1.bf16.msra.mxu1 %v14394_v43  ;;  %v6368_v43 = vld [vmem:[%s18730_s25 + $0x1830] sm:$0xff] }
 0x90c   : > { %13069 = vmatpush1.bf16.msra.mxu0 %v14396_v1  ;;  %12906 = vmatprep.subr.bf16.mxu1 %v14411_v45  ;;  %v6376_v1 = vld [vmem:[%s18730_s25 + $0x1870] sm:$0xff]  ;;  %v6369_v45 = vld [vmem:[%s18730_s25 + $0x1838] sm:$0xff] }
 0x90d   : > { %13070 = vmatprep.subr.bf16.mxu0 %v14413_v44  ;;  %v6377_v44 = vld [vmem:[%s18730_s25 + $0x1878] sm:$0xff]  ;;  %v14523_v13 = vcombine.high %v6368_v43, %v6376_v1 }
 0x90e   : > { %v14525_v27 = vcombine.high %v6369_v45, %v6377_v44  ;;  %v14524_v48 = vcombine.low %v6369_v45, %v6377_v44  ;;  %v14602_v45 = vcombine.low %v6448_v20, %v6456_v40  ;;  %v6536_v20 = vld [vmem:[%s18730_s25 + $0x1d70] sm:$0xff] }
 0x90f   : > { %12907 = vmatpush1.bf16.msra.mxu1 %v14410_v53  ;;  %v6384_v53 = vld [vmem:[%s18730_s25 + $0x18b0] sm:$0xff] }
 0x910   : > { %13071 = vmatpush1.bf16.msra.mxu0 %v14412_v25  ;;  %12908 = vmatprep.subr.bf16.mxu1 %v14427_v56  ;;  %v6392_v25 = vld [vmem:[%s18730_s25 + $0x18f0] sm:$0xff]  ;;  %v14522_v56 = vcombine.low %v6368_v43, %v6376_v1 }
 0x911   : > { %13072 = vmatprep.subr.bf16.mxu0 %v14429_v57  ;;  %v6385_v57 = vld [vmem:[%s18730_s25 + $0x18b8] sm:$0xff]  ;;  %v14539_v49 = vcombine.high %v6384_v53, %v6392_v25  ;;  %v14538_v60 = vcombine.low %v6384_v53, %v6392_v25  ;;  %v6488_v53 = vld [vmem:[%s18730_s25 + $0x1bf0] sm:$0xff] }
 0x912   : > { %v14540_v61 = vcombine.low %v6385_v57, %v6393_v58 }
 0x913   : > { %12909 = vmatpush1.bf16.msra.mxu1 %v14426_v3  ;;  %v6408_v3 = vld [vmem:[%s18730_s25 + $0x1970] sm:$0xff] }
 0x914   : > { %13073 = vmatpush1.bf16.msra.mxu0 %v14428_v52  ;;  %12910 = vmatprep.subr.bf16.mxu1 %v14443_v54  ;;  %v14541_v52 = vcombine.high %v6385_v57, %v6393_v58  ;;  %v6401_v54 = vld [vmem:[%s18730_s25 + $0x1938] sm:$0xff]  ;;  %v14555_v62 = vcombine.high %v6400_v50, %v6408_v3 }
 0x915   : > { %13074 = vmatprep.subr.bf16.mxu0 %v14445_v55  ;;  %v6409_v55 = vld [vmem:[%s18730_s25 + $0x1978] sm:$0xff] }
 0x916   : > { %v14557_v0 = vcombine.high %v6401_v54, %v6409_v55  ;;  %v14556_v63 = vcombine.low %v6401_v54, %v6409_v55  ;;  %v6481_v57 = vld [vmem:[%s18730_s25 + $0x1bb8] sm:$0xff] }
 0x917   : > { %12911 = vmatpush1.bf16.msra.mxu1 %v14442_v2  ;;  %v6416_v2 = vld [vmem:[%s18730_s25 + $0x19b0] sm:$0xff]  ;;  %v6489_v58 = vld [vmem:[%s18730_s25 + $0x1bf8] sm:$0xff] }
 0x918   : > { %13075 = vmatpush1.bf16.msra.mxu0 %v14444_v4  ;;  %12912 = vmatprep.subr.bf16.mxu1 %v14459_v5  ;;  %v6424_v4 = vld [vmem:[%s18730_s25 + $0x19f0] sm:$0xff]  ;;  %v6417_v5 = vld [vmem:[%s18730_s25 + $0x19b8] sm:$0xff] }
 0x919   : > { %13076 = vmatprep.subr.bf16.mxu0 %v14461_v10  ;;  %v14554_v10 = vcombine.low %v6400_v50, %v6408_v3  ;;  %v14571_v41 = vcombine.high %v6416_v2, %v6424_v4 }
 0x91b   : > { %12913 = vmatpush1.bf16.msra.mxu1 %v14458_v8  ;;  %v6433_v8 = vld [vmem:[%s18730_s25 + $0x1a38] sm:$0xff] }
 0x91c   : > { %13077 = vmatpush1.bf16.msra.mxu0 %v14460_v9  ;;  %12914 = vmatprep.subr.bf16.mxu1 %v14475_v11  ;;  %v6441_v9 = vld [vmem:[%s18730_s25 + $0x1a78] sm:$0xff]  ;;  %v14570_v11 = vcombine.low %v6416_v2, %v6424_v4  ;;  %v6504_v2 = vld [vmem:[%s18730_s25 + $0x1c70] sm:$0xff] }
 0x91d   : > { %13078 = vmatprep.subr.bf16.mxu0 %v14477_v14  ;;  %v14589_v19 = vcombine.high %v6433_v8, %v6441_v9  ;;  %v14588_v29 = vcombine.low %v6433_v8, %v6441_v9  ;;  %v6497_v4 = vld [vmem:[%s18730_s25 + $0x1c38] sm:$0xff] }
 0x91e   : > { %v6521_v8 = vld [vmem:[%s18730_s25 + $0x1cf8] sm:$0xff] }
 0x91f   : > { %12915 = vmatpush1.bf16.msra.mxu1 %v14474_v22  ;;  %v6449_v22 = vld [vmem:[%s18730_s25 + $0x1ab8] sm:$0xff] }
 0x920   : > { %13079 = vmatpush1.bf16.msra.mxu0 %v14476_v23  ;;  %12916 = vmatprep.subr.bf16.mxu1 %v14491_v24  ;;  %v6457_v23 = vld [vmem:[%s18730_s25 + $0x1af8] sm:$0xff]  ;;  %v14586_v24 = vcombine.low %v6432_v6, %v6440_v21  ;;  %v6520_v6 = vld [vmem:[%s18730_s25 + $0x1cf0] sm:$0xff] }
 0x921   : > { %13080 = vmatprep.subr.bf16.mxu0 %v14493_v26  ;;  %v19871_v26 = vld [vmem:[%s19298_s15 + $0x8] sm:$0xff]  ;;  %v14605_v33 = vcombine.high %v6449_v22, %v6457_v23  ;;  %v6513_v21 = vld [vmem:[%s18730_s25 + $0x1cb8] sm:$0xff] }
 0x922   : > { %v6665_v43 = vrot.slane %v19871_v26, %v18310_v28  ;;  %v6661_v1 = vrot.slane %v19871_v26, %v17875_v15  ;;  %v6669_v44 = vrot.slane %v19871_v26, %v18313_v31 }
 0x923   : > { %12917 = vmatpush1.bf16.msra.mxu1 %v14490_v35  ;;  %v6472_v35 = vld [vmem:[%s18730_s25 + $0x1b70] sm:$0xff] }
 0x924   : > { %13081 = vmatpush1.bf16.msra.mxu0 %v14492_v7  ;;  %12918 = vmatprep.subr.bf16.mxu1 %v14507_v36  ;;  %v6657_v7 = vrot.slane %v19871_v26, %v17869_v12  ;;  %v6465_v36 = vld [vmem:[%s18730_s25 + $0x1b38] sm:$0xff]  ;;  %v14619_v12 = vcombine.high %v6464_v34, %v6472_v35  ;;  %v14618_v31 = vcombine.low %v6464_v34, %v6472_v35 }
 0x925   : > { %13082 = vmatprep.subr.bf16.mxu0 %v14509_v37  ;;  %v6473_v37 = vld [vmem:[%s18730_s25 + $0x1b78] sm:$0xff] }
 0x926   : > { %v14620_v55 = vcombine.low %v6465_v36, %v6473_v37 }
 0x927   : > { %12919 = vmatpush1.bf16.msra.mxu1 %v14506_v47  ;;  %v14604_v47 = vcombine.low %v6449_v22, %v6457_v23  ;;  %v6529_v22 = vld [vmem:[%s18730_s25 + $0x1d38] sm:$0xff] }
 0x928   : > { %13083 = vmatpush1.bf16.msra.mxu0 %v14508_v51  ;;  %12929 = vmatprep.subr.bf16.mxu1 %v14523_v13  ;;  %v14621_v13 = vcombine.high %v6465_v36, %v6473_v37  ;;  %v6537_v23 = vld [vmem:[%s18730_s25 + $0x1d78] sm:$0xff]  ;;  %v6544_v37 = vld [vmem:[%s18730_s25 + $0x1db0] sm:$0xff] }
 0x929   : > { %13093 = vmatprep.subr.bf16.mxu0 %v14525_v27  ;;  %v6480_v27 = vld [vmem:[%s18730_s25 + $0x1bb0] sm:$0xff]  ;;  %v14685_v36 = vcombine.high %v6529_v22, %v6537_v23 }
 0x92a   : > { %12921 = vmatmul.mubr.bf16.vlgmr.msra.gmra.mrb[28].mxu1 %v18985_v32 }
 0x92b   : > { %13085 = vmatmul.mubr.bf16.vlgmr.msra.gmra.mrb[24].mxu0 %v18985_v32  ;;  %12930 = vmatpush1.bf16.msra.mxu1 %v14522_v56  ;;  %v6425_v32 = vld [vmem:[%s18730_s25 + $0x19f8] sm:$0xff] }
 0x92c   : > { %12961 = vmatprep.mubr.bf16.mxu1 %v18993_v39  ;;  %13094 = vmatpush1.bf16.msra.mxu0 %v14524_v48  ;;  %v14572_v14 = vcombine.low %v6417_v5, %v6425_v32 }
 0x92d   : > { %13125 = vmatprep.mubr.bf16.mxu0 %v18993_v39  ;;  %12931 = vmatprep.subr.bf16.mxu1 %v14539_v49  ;;  %v14573_v39 = vcombine.high %v6417_v5, %v6425_v32  ;;  %v6505_v5 = vld [vmem:[%s18730_s25 + $0x1c78] sm:$0xff]  ;;  %v14634_v32 = vcombine.low %v6480_v27, %v6488_v53 }
 0x92e   : > { %13095 = vmatprep.subr.bf16.mxu0 %v14541_v52 }
 0x92f   : > { %12932 = vmatpush1.bf16.msra.mxu1 %v14538_v60  ;;  %v14635_v60 = vcombine.high %v6480_v27, %v6488_v53 }
 0x930   : > { %13096 = vmatpush1.bf16.msra.mxu0 %v14540_v61  ;;  %12933 = vmatprep.subr.bf16.mxu1 %v14555_v62  ;;  %v14637_v62 = vcombine.high %v6481_v57, %v6489_v58 }
 0x931   : > { %13097 = vmatprep.subr.bf16.mxu0 %v14557_v0  ;;  %v6496_v0 = vld [vmem:[%s18730_s25 + $0x1c30] sm:$0xff] }
 0x932   : > { %v14650_v9 = vcombine.low %v6496_v0, %v6504_v2 }
 0x933   : > { %12934 = vmatpush1.bf16.msra.mxu1 %v14554_v10  ;;  %v14636_v10 = vcombine.low %v6481_v57, %v6489_v58  ;;  %v6561_v57 = vld [vmem:[%s18730_s25 + $0x1e38] sm:$0xff] }
 0x934   : > { %13098 = vmatpush1.bf16.msra.mxu0 %v14556_v63  ;;  %12935 = vmatprep.subr.bf16.mxu1 %v14571_v41  ;;  %v14651_v63 = vcombine.high %v6496_v0, %v6504_v2  ;;  %v14653_v41 = vcombine.high %v6497_v4, %v6505_v5  ;;  %v6569_v58 = vld [vmem:[%s18730_s25 + $0x1e78] sm:$0xff]  ;;  %v6592_v0 = vld [vmem:[%s18730_s25 + $0x1f30] sm:$0xff] }
 0x935   : > { %13099 = vmatprep.subr.bf16.mxu0 %v14573_v39  ;;  %v6512_v39 = vld [vmem:[%s18730_s25 + $0x1cb0] sm:$0xff] }
 0x936   : > { %v6600_v2 = vld [vmem:[%s18730_s25 + $0x1f70] sm:$0xff] }
 0x937   : > { %12936 = vmatpush1.bf16.msra.mxu1 %v14570_v11  ;;  %v14652_v11 = vcombine.low %v6497_v4, %v6505_v5  ;;  %v6593_v4 = vld [vmem:[%s18730_s25 + $0x1f38] sm:$0xff] }
 0x938   : > { %13100 = vmatpush1.bf16.msra.mxu0 %v14572_v14  ;;  %12937 = vmatprep.subr.bf16.mxu1 %v14587_v18  ;;  %v14667_v14 = vcombine.high %v6512_v39, %v6520_v6  ;;  %v14669_v18 = vcombine.high %v6513_v21, %v6521_v8  ;;  %v6601_v5 = vld [vmem:[%s18730_s25 + $0x1f78] sm:$0xff] }
 0x939   : > { %13101 = vmatprep.subr.bf16.mxu0 %v14589_v19  ;;  %v6528_v19 = vld [vmem:[%s18730_s25 + $0x1d30] sm:$0xff] }
 0x93a   : > { %v14683_v34 = vcombine.high %v6528_v19, %v6536_v20 }
 0x93b   : > { %12938 = vmatpush1.bf16.msra.mxu1 %v14586_v24 }
 0x93c   : > { %13102 = vmatpush1.bf16.msra.mxu0 %v14588_v29  ;;  %12939 = vmatprep.subr.bf16.mxu1 %v14603_v30  ;;  %v14666_v29 = vcombine.low %v6512_v39, %v6520_v6  ;;  %v6608_v39 = vld [vmem:[%s18730_s25 + $0x1fb0] sm:$0xff] }
 0x93d   : > { %v12635_v51 = vpop.f32.mrb[24].mxu1  ;;  %13103 = vmatprep.subr.bf16.mxu0 %v14605_v33  ;;  %v14668_v33 = vcombine.low %v6513_v21, %v6521_v8  ;;  %v6616_v6 = vld [vmem:[%s18730_s25 + $0x1ff0] sm:$0xff]  ;;  %v6609_v21 = vld [vmem:[%s18730_s25 + $0x1fb8] sm:$0xff] }
 0x93e   : > { %v14787_v25 = vadd.f32 %v12635_v51, %v6657_v7  ;;  %v12799_v28 = vpop.f32.mrb[20].mxu0  ;;  %v12637_v56 = vpop.f32.mrb[25].mxu1  ;;  %v6617_v8 = vld [vmem:[%s18730_s25 + $0x1ff8] sm:$0xff] }
 0x93f   : > { %v14789_v15 = vadd.f32 %v12799_v28, %v6665_v43  ;;  %v14788_v48 = vadd.f32 %v12637_v56, %v6661_v1  ;;  %v12801_v49 = vpop.f32.mrb[21].mxu0  ;;  %v12639_v50 = vpop.f32.mrb[26].mxu1  ;;  %12940 = vmatpush1.bf16.msra.mxu1 %v14602_v45  ;;  %v6552_v43 = vld [vmem:[%s18730_s25 + $0x1df0] sm:$0xff]  ;;  %v6545_v45 = vld [vmem:[%s18730_s25 + $0x1db8] sm:$0xff] }
 0x940   : > { %15197 = vtanh.f32 %v14787_v25  ;;  %v14790_v3 = vadd.f32 %v12801_v49, %v6669_v44  ;;  %v12803_v52 = vpop.f32.mrb[22].mxu0  ;;  %13104 = vmatpush1.bf16.msra.mxu0 %v14604_v47  ;;  %v12640_v54 = vpop.f32.mrb[27].mxu1  ;;  %12941 = vmatprep.subr.bf16.mxu1 %v14619_v12  ;;  %v6553_v44 = vld [vmem:[%s18730_s25 + $0x1df8] sm:$0xff]  ;;  %v14682_v12 = vcombine.low %v6528_v19, %v6536_v20  ;;  %v14699_v27 = vcombine.high %v6544_v37, %v6552_v43  ;;  %v6560_v25 = vld [vmem:[%s18730_s25 + $0x1e30] sm:$0xff] }
 0x941   : > { %15199 = vtanh.f32 %v14789_v15  ;;  %v12804_v61 = vpop.f32.mrb[23].mxu0  ;;  %13105 = vmatprep.subr.bf16.mxu0 %v14621_v13  ;;  %v14684_v13 = vcombine.low %v6529_v22, %v6537_v23  ;;  %v14701_v53 = vcombine.high %v6545_v45, %v6553_v44  ;;  %v6568_v28 = vld [vmem:[%s18730_s25 + $0x1e70] sm:$0xff]  ;;  %v14698_v15 = vcombine.low %v6544_v37, %v6552_v43  ;;  %v6577_v52 = vld [vmem:[%s18730_s25 + $0x1eb8] sm:$0xff] }
 0x942   : > { %15201 = vtanh.f32 %v14788_v48  ;;  %v14700_v48 = vcombine.low %v6545_v45, %v6553_v44  ;;  %v14715_v49 = vcombine.high %v6560_v25, %v6568_v28  ;;  %v14717_v50 = vcombine.high %v6561_v57, %v6569_v58  ;;  %v6585_v54 = vld [vmem:[%s18730_s25 + $0x1ef8] sm:$0xff] }
 0x943   : > { %15203 = vtanh.f32 %v14790_v3  ;;  %12942 = vmatpush1.bf16.msra.mxu1 %v14618_v31  ;;  %v6576_v31 = vld [vmem:[%s18730_s25 + $0x1eb0] sm:$0xff]  ;;  %v14762_v19 = vcombine.low %v6608_v39, %v6616_v6  ;;  %v14764_v20 = vcombine.low %v6609_v21, %v6617_v8  ;;  %v6681_v22 = vrot.slane %v19871_v26, %v19044_v59 }
 0x944   : > { %13106 = vmatpush1.bf16.msra.mxu0 %v14620_v55  ;;  %12943 = vmatprep.subr.bf16.mxu1 %v14635_v60  ;;  %v6584_v3 = vld [vmem:[%s18730_s25 + $0x1ef0] sm:$0xff]  ;;  %v14714_v55 = vcombine.low %v6560_v25, %v6568_v28  ;;  %v14716_v60 = vcombine.low %v6561_v57, %v6569_v58  ;;  %v6677_v23 = vrot.slane %v19871_v26, %v18958_v42 }
 0x945   : > { %13107 = vmatprep.subr.bf16.mxu0 %v14637_v62  ;;  %v14731_v61 = vcombine.high %v6576_v31, %v6584_v3  ;;  %v14733_v62 = vcombine.high %v6577_v52, %v6585_v54 }
 0x947   : > { %12944 = vmatpush1.bf16.msra.mxu1 %v14634_v32  ;;  %v14730_v32 = vcombine.low %v6576_v31, %v6584_v3 }
 0x948   : > { %13108 = vmatpush1.bf16.msra.mxu0 %v14636_v10  ;;  %12945 = vmatprep.subr.bf16.mxu1 %v14651_v63  ;;  %v14732_v10 = vcombine.low %v6577_v52, %v6585_v54  ;;  %v14747_v63 = vcombine.high %v6592_v0, %v6600_v2 }
 0x949   : > { %13109 = vmatprep.subr.bf16.mxu0 %v14653_v41  ;;  %v14749_v41 = vcombine.high %v6593_v4, %v6601_v5 }
 0x94a   : > { %v15198_v40 = vpop.eup %15197 }
 0x94b   : > { %v15200_v24 = vpop.eup %15199  ;;  %12946 = vmatpush1.bf16.msra.mxu1 %v14650_v9  ;;  %v14746_v9 = vcombine.low %v6592_v0, %v6600_v2 }
 0x94c   : > { %v15202_v30 = vpop.eup %15201  ;;  %13110 = vmatpush1.bf16.msra.mxu0 %v14652_v11  ;;  %12947 = vmatprep.subr.bf16.mxu1 %v14667_v14  ;;  %v14748_v11 = vcombine.low %v6593_v4, %v6601_v5  ;;  %v14763_v14 = vcombine.high %v6608_v39, %v6616_v6 }
 0x94d   : > { %v15204_v35 = vpop.eup %15203  ;;  %v13200_v7 = vcombine.low %v15198_v40, %v15202_v30  ;;  %13111 = vmatprep.subr.bf16.mxu0 %v14669_v18  ;;  %v14765_v18 = vcombine.high %v6609_v21, %v6617_v8  ;;  %v6673_v40 = vrot.slane %v19871_v26, %v18955_v38 }
 0x94e   : > { %v13201_v1 = vcombine.low %v15200_v24, %v15204_v35  ;;  %v6685_v24 = vrot.slane %v19871_v26, %v18961_v46 }
 0x94f   : > { %v13208_v47 = vrot.slane %v13200_v7, %v17414_v16  ;;  %12948 = vmatpush1.bf16.msra.mxu1 %v14666_v29 }
 0x950   : > { %v13215_v51 = vrot.slane %v13201_v1, %v17414_v16  ;;  %13112 = vmatpush1.bf16.msra.mxu0 %v14668_v33  ;;  %12949 = vmatprep.subr.bf16.mxu1 %v14683_v34 }
 0x951   : > { %13113 = vmatprep.subr.bf16.mxu0 %v14685_v36 }
 0x952   : > { %v13216_v56 = vcombine.low %v13208_v47, %v13215_v51 }
 0x953   : > { %12950 = vmatpush1.bf16.msra.mxu1 %v14682_v12 }
 0x954   : > { %13240 = vst [vmem:[%s19339_s19 + $0x10] sm:$0xff] %v13216_v56  ;;  %13114 = vmatpush1.bf16.msra.mxu0 %v14684_v13  ;;  %12951 = vmatprep.subr.bf16.mxu1 %v14699_v27 }
 0x955   : > { %13115 = vmatprep.subr.bf16.mxu0 %v14701_v53 }
 0x957   : > { %12952 = vmatpush1.bf16.msra.mxu1 %v14698_v15 }
 0x958   : > { %13116 = vmatpush1.bf16.msra.mxu0 %v14700_v48  ;;  %12953 = vmatprep.subr.bf16.mxu1 %v14715_v49 }
 0x959   : > { %13117 = vmatprep.subr.bf16.mxu0 %v14717_v50 }
 0x95b   : > { %12954 = vmatpush1.bf16.msra.mxu1 %v14714_v55 }
 0x95c   : > { %13118 = vmatpush1.bf16.msra.mxu0 %v14716_v60  ;;  %12955 = vmatprep.subr.bf16.mxu1 %v14731_v61 }
 0x95d   : > { %13119 = vmatprep.subr.bf16.mxu0 %v14733_v62 }
 0x95f   : > { %12956 = vmatpush1.bf16.msra.mxu1 %v14730_v32 }
 0x960   : > { %13120 = vmatpush1.bf16.msra.mxu0 %v14732_v10  ;;  %12957 = vmatprep.subr.bf16.mxu1 %v14747_v63 }
 0x961   : > { %13121 = vmatprep.subr.bf16.mxu0 %v14749_v41 }
 0x963   : > { %12958 = vmatpush1.bf16.msra.mxu1 %v14746_v9 }
 0x964   : > { %13122 = vmatpush1.bf16.msra.mxu0 %v14748_v11  ;;  %12959 = vmatprep.subr.bf16.mxu1 %v14763_v14 }
 0x965   : > { %13123 = vmatprep.subr.bf16.mxu0 %v14765_v18 }
 0x967   : > { %12960 = vmatpush1.bf16.msra.mxu1 %v14762_v19 }
 0x968   : > { %13124 = vmatpush1.bf16.msra.mxu0 %v14764_v20 }
 0x96a   : > { %12962 = vmatmul.mubr.bf16.vlgmr.msra.gmra.mrb[28].mxu1 %v19067_v17 }
 0x96b   : > { %13126 = vmatmul.mubr.bf16.vlgmr.msra.gmra.mrb[24].mxu0 %v19067_v17 }
 0xa3d   : > { %v12963_v29 = vpop.f32.mrb[28].mxu1 }
 0xa3e   : > { %v14791_v30 = vadd.f32 %v12963_v29, %v6673_v40  ;;  %v13127_v33 = vpop.f32.mrb[24].mxu0  ;;  %v12965_v34 = vpop.f32.mrb[29].mxu1 }
 0xa3f   : > { %v14793_v35 = vadd.f32 %v13127_v33, %v6681_v22  ;;  %v14792_v7 = vadd.f32 %v12965_v34, %v6677_v23  ;;  %v13129_v36 = vpop.f32.mrb[25].mxu0  ;;  %v12967_v17 = vpop.f32.mrb[30].mxu1 }
 0xa40   : > { %15205 = vtanh.f32 %v14791_v30  ;;  %v14794_v37 = vadd.f32 %v13129_v36, %v6685_v24  ;;  %v13131_v38 = vpop.f32.mrb[26].mxu0  ;;  %v12968_v43 = vpop.f32.mrb[31].mxu1 }
 0xa41   : > { %15207 = vtanh.f32 %v14793_v35  ;;  %v13132_v59 = vpop.f32.mrb[27].mxu0 }
 0xa42   : > { %15209 = vtanh.f32 %v14792_v7 }
 0xa43   : > { %15211 = vtanh.f32 %v14794_v37 }
 0xa4a   : > { %v15206_v42 = vpop.eup %15205 }
 0xa4b   : > { %v15208_v1 = vpop.eup %15207 }
 0xa4c   : > { %v15210_v46 = vpop.eup %15209 }
 0xa4d   : > { %v15212_v26 = vpop.eup %15211  ;;  %v13217_v45 = vcombine.low %v15206_v42, %v15210_v46 }
 0xa4e   : > { %v13218_v44 = vcombine.low %v15208_v1, %v15212_v26 }
 0xa4f   : > { %v13225_v47 = vrot.slane %v13217_v45, %v17414_v16 }
 0xa50   : > { %v13232_v12 = vrot.slane %v13218_v44, %v17414_v16 }
 0xa52   : > { %v13233_v51 = vcombine.low %v13225_v47, %v13232_v12 }
 0xa54   : > { %13241 = vst [vmem:[%s19339_s19 + $0x18] sm:$0xff] %v13233_v51 }
 0xa55 PF: > { %p16_p9 = scmp.ge.s32.totalorder %s15307_s13, 8   ;;  %s19957_s30 = smov %s15233_s10 }
 0xa56   : > { %s19958_s10 = smov %s15316_s16  ;;  %s19959_s11 = smov %s15307_s13 }
 0xa57   :  { %18 = sbr.rel (!%p16_p9) target bundleno = 2 (0x2), region = 117 }

</bundles_post_ra>
